<compile_context>
chip_gen: v7x
topology: tpu7x:2x2x1
jax: 0.10.0
libtpu: 0.0.40
codegen_flags: <defaults>
</compile_context>

<pallas_src>
import functools
import math

import jax
import jax.numpy as jnp
import numpy as np
from jax.experimental import pallas as pl
from jax.experimental.pallas import tpu as pltpu

# ---- hyper-parameters consistent with the module's __init__ ----
CONV_SEQ = [8, 6, 4]        # NodeConv channel_seq (first Conv2d has in_channels=1)
CONV_KERNEL = 3             # (1, k) conv, MaxPool2d((1, k), stride=(1, k))
DECONV_SEQ = [4, 6, 1]      # NodeDeConv channel_seq (starts at CONV_SEQ[-1])
DECONV_KERNEL = 3
DECONV_STRIDE = [2, 3]
OUTPUT_PADDING = 1          # hard-coded in NodeDeConv
BN_EPS = 1e-5
LEAKY_SLOPE = 0.1
BATCH_BLOCK = 128           # batch elements per grid step (lane axis width)


def _round8(n):
    return ((n + 7) // 8) * 8


# ----------------------------------------------------------------------------------
# Static parameter layout (pure function of the architecture constants)
# ----------------------------------------------------------------------------------
def _build_param_layout():
    layout = {"conv": [], "deconv": []}
    off = 0
    in_ch = 1
    n_conv = len(CONV_SEQ)
    for i, out_ch in enumerate(CONV_SEQ):
        post = i < n_conv - 1
        ent = {"c_in": in_ch, "c_out": out_ch, "post": post, "w": off}
        off += out_ch * in_ch * CONV_KERNEL          # (c_out, c_in, k) row-major
        ent["b"] = off
        off += out_ch
        if post:
            ent["scale"] = off
            off += out_ch
            ent["shift"] = off
            off += out_ch
        layout["conv"].append(ent)
        in_ch = out_ch

    n_dec = len(DECONV_SEQ)
    for i in range(1, n_dec):
        c_in, c_out = DECONV_SEQ[i - 1], DECONV_SEQ[i]
        post = i < n_dec - 1
        ent = {"c_in": c_in, "c_out": c_out, "post": post,
               "stride": DECONV_STRIDE[i - 1], "w": off}
        off += c_in * c_out * DECONV_KERNEL          # (c_in, c_out, k) row-major
        ent["b"] = off
        off += c_out
        if post:
            ent["scale"] = off
            off += c_out
            ent["shift"] = off
            off += c_out
        layout["deconv"].append(ent)
    return layout, off


_LAYOUT, _PARAM_COUNT = _build_param_layout()


def _build_plan(t_in):
    """Static per-layer plan: lengths + non-overlapping VMEM scratch row offsets."""
    plan = []
    rows = 0
    l = t_in
    for ent in _LAYOUT["conv"]:
        l_conv = l - CONV_KERNEL + 1
        d = dict(ent, kind="conv", l_in=l, l_conv=l_conv)
        if ent["post"]:
            d["lm"] = l_conv - CONV_KERNEL + 1       # running-max slab length
            d["lp"] = l_conv // CONV_KERNEL          # pooled length (floor, as PyTorch)
            d["buf_base"] = rows
            d["buf_stride"] = _round8(d["lm"])
            rows += ent["c_out"] * d["buf_stride"]
            l = d["lp"]
        else:
            l = l_conv
        plan.append(d)
    for ent in _LAYOUT["deconv"]:
        s = ent["stride"]
        l_out = (l - 1) * s + DECONV_KERNEL + OUTPUT_PADDING
        d = dict(ent, kind="deconv", l_in=l, l_out=l_out,
                 buf_base=rows, buf_stride=_round8(l_out))
        rows += ent["c_out"] * d["buf_stride"]
        l = l_out
        plan.append(d)
    return plan, rows, l                              # l == l_final


# ----------------------------------------------------------------------------------
# The fused SAE kernel (one grid step == BATCH_BLOCK batch elements on the lane axis)
# ----------------------------------------------------------------------------------
def _sae_kernel(params_ref, x_ref, o_ref, buf_ref, *, plan, b_blk):
    """params_ref: (P,) f32 in SMEM (packed weights / bias / folded BN)
       x_ref:      (T, B_blk)               input tile (time on sublanes, batch on lanes)
       o_ref:      (C_last, L_final, B_blk) output tile
       buf_ref:    (rows, B_blk)            VMEM scratch (per-layer non-overlapping regions)
    """
    k = CONV_KERNEL
    kd = DECONV_KERNEL
    n_layers = len(plan)

    def pget(off):                       # scalar read from SMEM (static offset)
        return params_ref[off]

    def leaky(v):                        # exact for slope in (0, 1)
        return jnp.maximum(v, LEAKY_SLOPE * v)

    xs = [x_ref[...].astype(jnp.float32)]          # per-channel (L, B_blk) slabs
    for li, d in enumerate(plan):
        c_in, c_out = d["c_in"], d["c_out"]

        if d["kind"] == "conv":
            # ---------- Conv2d(1,k) [-> MaxPool(1,k) -> LeakyReLU -> BN] ----------
            l_conv = d["l_conv"]
            accs = [None] * c_out
            for ci in range(c_in):
                # shifted slices hoisted out of the co loop (computed once per (ci, j))
                shifted = [xs[ci][j:j + l_conv, :] for j in range(k)]
                for co in range(c_out):
                    a = accs[co]
                    for j in range(k):               # VPU broadcast-FMA per tap
                        w = pget(d["w"] + (co * c_in + ci) * k + j)
                        t = w * shifted[j]
                        a = t if a is None else a + t
                    accs[co] = a

            if d["post"]:
                lm, lp = d["lm"], d["lp"]
                new_xs = []
                for co in range(c_out):
                    acc = accs[co] + pget(d["b"] + co)
                    # running max over k shifted slabs (full-slab VALU/XLU work)
                    m = acc[0:lm, :]
                    for j in range(1, k):
                        m = jnp.maximum(m, acc[j:j + lm, :])
                    base = d["buf_base"] + co * d["buf_stride"]
                    buf_ref[base:base + lm, :] = m              # one store per channel
                    p = buf_ref[pl.ds(base, lp, stride=k), :]   # one strided load per channel
                    new_xs.append(leaky(p) * pget(d["scale"] + co) + pget(d["shift"] + co))
                xs = new_xs
            else:
                xs = [accs[co] + pget(d["b"] + co) for co in range(c_out)]

        else:
            # ---------- ConvTranspose1d [-> LeakyReLU -> BN], polyphase slab form ----------
            s, l_in, l_out = d["stride"], d["l_in"], d["l_out"]
            last = li == n_layers - 1
            new_xs = []
            for co in range(c_out):
                base = d["buf_base"] + co * d["buf_stride"]
                bias = pget(d["b"] + co)
                # pre-init the whole channel slab with bias (output_padding / tail rows keep it)
                buf_ref[base:base + l_out, :] = jnp.zeros((l_out, b_blk), jnp.float32) + bias
                for j in range(kd):
                    contrib = None
                    for ci in range(c_in):           # full-slab scalar-broadcast FMA
                        w = pget(d["w"] + (ci * c_out + co) * kd + j)
                        t = w * xs[ci]
                        contrib = t if contrib is None else contrib + t
                    # scatter-accumulate the tap: out[l*s + j] += contrib[l]
                    idx = pl.ds(base + j, l_in, stride=s)
                    buf_ref[idx, :] = buf_ref[idx, :] + contrib
                full = buf_ref[base:base + l_out, :]
                if d["post"]:
                    full = leaky(full) * pget(d["scale"] + co) + pget(d["shift"] + co)
                if last:
                    o_ref[co, :, :] = full.astype(o_ref.dtype)   # one wide store per channel
                else:
                    new_xs.append(full)
            xs = new_xs


# ----------------------------------------------------------------------------------
# Wrapper: one fused pallas_call, grid over batch blocks (batch on lanes)
# ----------------------------------------------------------------------------------
@jax.jit
def sae_forward_pallas(x_nchw, packed_params):
    """x_nchw: (B, 1, 1, T) float.  Returns (B, DECONV_SEQ[-1], L_final).
    Note: NodeConv's trailing .squeeze() would also drop the batch dim when B == 1;
    we keep the batch dim (matches the common B > 1 case)."""
    batch = x_nchw.shape[0]
    t_in = x_nchw.shape[-1]
    b_blk = BATCH_BLOCK
    b_pad = ((batch + b_blk - 1) // b_blk) * b_blk
    plan, buf_rows, l_final = _build_plan(t_in)
    c_last = DECONV_SEQ[-1]

    # (B,1,1,T) -> (T, B_pad): time on sublanes, batch on (dense) lanes.
    # TODO(synk): fold these wrapper transposes into the kernel (in-kernel XLU transpose) if
    # the extra HBM pass ever matters for large B; kept outside for lowering robustness.
    xt = jnp.transpose(x_nchw[:, 0, 0, :].astype(jnp.float32), (1, 0))
    if b_pad != batch:
        xt = jnp.pad(xt, ((0, 0), (0, b_pad - batch)))

    # Advisory cost estimate so XLA schedules surrounding ops sensibly.
    macs = 0
    for d in plan:
        if d["kind"] == "conv":
            macs += d["c_out"] * d["c_in"] * CONV_KERNEL * d["l_conv"]
        else:
            macs += d["c_in"] * d["c_out"] * DECONV_KERNEL * d["l_in"]
    cost = pl.CostEstimate(flops=2 * macs * b_pad, transcendentals=0,
                           bytes_accessed=4 * b_pad * (t_in + c_last * l_final))

    kern = functools.partial(_sae_kernel, plan=plan, b_blk=b_blk)
    out = pl.pallas_call(
        kern,
        out_shape=jax.ShapeDtypeStruct((c_last, l_final, b_pad), jnp.float32),
        grid=(b_pad // b_blk,),
        in_specs=[
            pl.BlockSpec(memory_space=pltpu.MemorySpace.SMEM),   # packed params (scalars)
            pl.BlockSpec((t_in, b_blk), lambda b: (0, b)),       # input tile (T, B_blk)
        ],
        out_specs=pl.BlockSpec((c_last, l_final, b_blk), lambda b: (0, 0, b)),
        scratch_shapes=[pltpu.VMEM((buf_rows, b_blk), jnp.float32)],
        compiler_params=pltpu.CompilerParams(dimension_semantics=("parallel",)),
        cost_estimate=cost,
    )(packed_params, xt)

    return jnp.transpose(out, (2, 0, 1))[:batch]     # (B, C_last, L_final)


# ----------------------------------------------------------------------------------
# Parameters (deterministic, synthetic), one-time packing, and numpy reference
# ----------------------------------------------------------------------------------
def init_sae_params(key):
    def uniform(kk, shape, bound):
        return jax.random.uniform(kk, shape, jnp.float32, -bound, bound)

    params = {"conv": [], "deconv": []}
    in_ch = 1
    for i, out_ch in enumerate(CONV_SEQ):
        key, kw, kb, kg, kbt, km, kv = jax.random.split(key, 7)
        bound = 1.0 / math.sqrt(in_ch * CONV_KERNEL)
        layer = {"w": uniform(kw, (out_ch, in_ch, 1, CONV_KERNEL), bound),
                 "b": uniform(kb, (out_ch,), bound)}
        if i < len(CONV_SEQ) - 1:
            layer["bn_gamma"] = 1.0 + 0.1 * jax.random.normal(kg, (out_ch,), jnp.float32)
            layer["bn_beta"] = 0.1 * jax.random.normal(kbt, (out_ch,), jnp.float32)
            layer["bn_mean"] = 0.1 * jax.random.normal(km, (out_ch,), jnp.float32)
            layer["bn_var"] = 1.0 + 0.1 * jnp.abs(jax.random.normal(kv, (out_ch,), jnp.float32))
        params["conv"].append(layer)
        in_ch = out_ch

    for i in range(1, len(DECONV_SEQ)):
        c_in, c_out = DECONV_SEQ[i - 1], DECONV_SEQ[i]
        key, kw, kb, kg, kbt, km, kv = jax.random.split(key, 7)
        bound = 1.0 / math.sqrt(c_in * DECONV_KERNEL)
        layer = {"w": uniform(kw, (c_in, c_out, DECONV_KERNEL), bound),
                 "b": uniform(kb, (c_out,), bound)}
        if i < len(DECONV_SEQ) - 1:
            layer["bn_gamma"] = 1.0 + 0.1 * jax.random.normal(kg, (c_out,), jnp.float32)
            layer["bn_beta"] = 0.1 * jax.random.normal(kbt, (c_out,), jnp.float32)
            layer["bn_mean"] = 0.1 * jax.random.normal(km, (c_out,), jnp.float32)
            layer["bn_var"] = 1.0 + 0.1 * jnp.abs(jax.random.normal(kv, (c_out,), jnp.float32))
        params["deconv"].append(layer)
    return params


def _fold_bn_np(p):
    scale = np.asarray(p["bn_gamma"], np.float32) / np.sqrt(np.asarray(p["bn_var"], np.float32) + BN_EPS)
    shift = np.asarray(p["bn_beta"], np.float32) - np.asarray(p["bn_mean"], np.float32) * scale
    return scale, shift


def pack_sae_params(params):
    """One-time preprocessing: fold BN + flatten all weights/biases into a single f32 vector."""
    vec = np.zeros((_PARAM_COUNT,), np.float32)
    for ent, p in zip(_LAYOUT["conv"], params["conv"]):
        w = np.asarray(p["w"], np.float32)[:, :, 0, :]           # (c_out, c_in, k)
        vec[ent["w"]:ent["w"] + w.size] = w.reshape(-1)
        vec[ent["b"]:ent["b"] + ent["c_out"]] = np.asarray(p["b"], np.float32)
        if ent["post"]:
            scale, shift = _fold_bn_np(p)
            vec[ent["scale"]:ent["scale"] + ent["c_out"]] = scale
            vec[ent["shift"]:ent["shift"] + ent["c_out"]] = shift
    for ent, p in zip(_LAYOUT["deconv"], params["deconv"]):
        w = np.asarray(p["w"], np.float32)                       # (c_in, c_out, k)
        vec[ent["w"]:ent["w"] + w.size] = w.reshape(-1)
        vec[ent["b"]:ent["b"] + ent["c_out"]] = np.asarray(p["b"], np.float32)
        if ent["post"]:
            scale, shift = _fold_bn_np(p)
            vec[ent["scale"]:ent["scale"] + ent["c_out"]] = scale
            vec[ent["shift"]:ent["shift"] + ent["c_out"]] = shift
    return jnp.asarray(vec)


def sae_forward_reference(x_nchw, params):
    """Pure numpy reference with PyTorch eval-mode semantics."""
    x = np.asarray(x_nchw, np.float32)[:, :, 0, :]
    n_conv = len(params["conv"])
    for i, p in enumerate(params["conv"]):
        w = np.asarray(p["w"], np.float32)[:, :, 0, :]   # (C_out, C_in, k)
        b = np.asarray(p["b"], np.float32)
        c_out, _, k = w.shape
        batch, _, length = x.shape
        w_conv = length - k + 1
        out = np.zeros((batch, c_out, w_conv), np.float32)
        for j in range(k):
            out += np.einsum("bcl,oc->bol", x[:, :, j:j + w_conv], w[:, :, j])
        out += b[None, :, None]
        if i < n_conv - 1:
            lp = w_conv // k
            out = out[:, :, :lp * k].reshape(batch, c_out, lp, k).max(-1)
            out = np.where(out >= 0, out, LEAKY_SLOPE * out)
            scale = np.asarray(p["bn_gamma"]) / np.sqrt(np.asarray(p["bn_var"]) + BN_EPS)
            shift = np.asarray(p["bn_beta"]) - np.asarray(p["bn_mean"]) * scale
            out = out * scale[None, :, None] + shift[None, :, None]
        x = out
    n_dec = len(params["deconv"])
    for i, p in enumerate(params["deconv"]):
        w = np.asarray(p["w"], np.float32)                # (C_in, C_out, k)
        b = np.asarray(p["b"], np.float32)
        _, c_out, k = w.shape
        s = DECONV_STRIDE[i]
        batch, _, l_in = x.shape
        l_out = (l_in - 1) * s + k + OUTPUT_PADDING
        out = np.zeros((batch, c_out, l_out), np.float32)
        for l in range(l_in):
            for j in range(k):
                out[:, :, l * s + j] += x[:, :, l] @ w[:, :, j]
        out += b[None, :, None]
        if i < n_dec - 1:
            out = np.where(out >= 0, out, LEAKY_SLOPE * out)
            scale = np.asarray(p["bn_gamma"]) / np.sqrt(np.asarray(p["bn_var"]) + BN_EPS)
            shift = np.asarray(p["bn_beta"]) - np.asarray(p["bn_mean"]) * scale
            out = out * scale[None, :, None] + shift[None, :, None]
        x = out
    return x


# ----------------------------------------------------------------------------------
if __name__ == "__main__":
    key = jax.random.PRNGKey(0)
    pkey, xkey = jax.random.split(key)
    params = init_sae_params(pkey)
    packed = pack_sae_params(params)          # one-time weight/BN preprocessing

    B, T = 2, 50
    x = jax.random.normal(xkey, (B, 1, 1, T), jnp.float32)   # NCHW, H=1 node time series

    out = sae_forward_pallas(x, packed)
    out = jax.block_until_ready(out)

    ref = sae_forward_reference(x, params)
    l_final = _build_plan(T)[2]
    assert out.shape == ref.shape == (B, DECONV_SEQ[-1], l_final), (out.shape, ref.shape)
    np.testing.assert_allclose(np.asarray(out), ref, rtol=2e-4, atol=2e-4)
    print("KERNEL_OK")
</pallas_src>

<mosaic_0001>
module attributes {stable_mosaic.version = 11 : i64} {
  func.func @_sae_kernel(%arg0: i32, %arg1: memref<395xf32, #tpu.memory_space<smem>>, %arg2: memref<50x128xf32, #tpu.memory_space<vmem>>, %arg3: memref<1x19x128xf32, #tpu.memory_space<vmem>>, %arg4: memref<552x128xf32, #tpu.memory_space<vmem>>) attributes {dimension_semantics = [#tpu.dimension_semantics<parallel>], iteration_bounds = array<i64: 1>, scalar_prefetch = 0 : i64, scratch_operands = 1 : i64, tpu.core_type = #tpu.core_type<tc>, window_params = [{transform_indices = @transform_0, window_bounds = array<i64: 395>}, {transform_indices = @transform_1, window_bounds = array<i64: 50, 128>}, {transform_indices = @transform_2, window_bounds = array<i64: 1, 19, 128>}]} {
    %c0 = arith.constant 0 : index
    %c0_0 = arith.constant 0 : index
    %0 = vector.load %arg2[%c0, %c0_0] : memref<50x128xf32, #tpu.memory_space<vmem>>, vector<50x128xf32>
    %1 = vector.extract_strided_slice %0 {offsets = [0, 0], sizes = [48, 128], strides = [1, 1]} : vector<50x128xf32> to vector<48x128xf32>
    %2 = vector.extract_strided_slice %0 {offsets = [1, 0], sizes = [48, 128], strides = [1, 1]} : vector<50x128xf32> to vector<48x128xf32>
    %3 = vector.extract_strided_slice %0 {offsets = [2, 0], sizes = [48, 128], strides = [1, 1]} : vector<50x128xf32> to vector<48x128xf32>
    %c0_1 = arith.constant 0 : index
    %4 = memref.load %arg1[%c0_1] : memref<395xf32, #tpu.memory_space<smem>>
    %5 = vector.broadcast %4 : f32 to vector<48x128xf32>
    %6 = arith.mulf %5, %1 : vector<48x128xf32>
    %c1 = arith.constant 1 : index
    %7 = memref.load %arg1[%c1] : memref<395xf32, #tpu.memory_space<smem>>
    %8 = vector.broadcast %7 : f32 to vector<48x128xf32>
    %9 = arith.mulf %8, %2 : vector<48x128xf32>
    %10 = arith.addf %6, %9 : vector<48x128xf32>
    %c2 = arith.constant 2 : index
    %11 = memref.load %arg1[%c2] : memref<395xf32, #tpu.memory_space<smem>>
    %12 = vector.broadcast %11 : f32 to vector<48x128xf32>
    %13 = arith.mulf %12, %3 : vector<48x128xf32>
    %14 = arith.addf %10, %13 : vector<48x128xf32>
    %c3 = arith.constant 3 : index
    %15 = memref.load %arg1[%c3] : memref<395xf32, #tpu.memory_space<smem>>
    %16 = vector.broadcast %15 : f32 to vector<48x128xf32>
    %17 = arith.mulf %16, %1 : vector<48x128xf32>
    %c4 = arith.constant 4 : index
    %18 = memref.load %arg1[%c4] : memref<395xf32, #tpu.memory_space<smem>>
    %19 = vector.broadcast %18 : f32 to vector<48x128xf32>
    %20 = arith.mulf %19, %2 : vector<48x128xf32>
    %21 = arith.addf %17, %20 : vector<48x128xf32>
    %c5 = arith.constant 5 : index
    %22 = memref.load %arg1[%c5] : memref<395xf32, #tpu.memory_space<smem>>
    %23 = vector.broadcast %22 : f32 to vector<48x128xf32>
    %24 = arith.mulf %23, %3 : vector<48x128xf32>
    %25 = arith.addf %21, %24 : vector<48x128xf32>
    %c6 = arith.constant 6 : index
    %26 = memref.load %arg1[%c6] : memref<395xf32, #tpu.memory_space<smem>>
    %27 = vector.broadcast %26 : f32 to vector<48x128xf32>
    %28 = arith.mulf %27, %1 : vector<48x128xf32>
    %c7 = arith.constant 7 : index
    %29 = memref.load %arg1[%c7] : memref<395xf32, #tpu.memory_space<smem>>
    %30 = vector.broadcast %29 : f32 to vector<48x128xf32>
    %31 = arith.mulf %30, %2 : vector<48x128xf32>
    %32 = arith.addf %28, %31 : vector<48x128xf32>
    %c8 = arith.constant 8 : index
    %33 = memref.load %arg1[%c8] : memref<395xf32, #tpu.memory_space<smem>>
    %34 = vector.broadcast %33 : f32 to vector<48x128xf32>
    %35 = arith.mulf %34, %3 : vector<48x128xf32>
    %36 = arith.addf %32, %35 : vector<48x128xf32>
    %c9 = arith.constant 9 : index
    %37 = memref.load %arg1[%c9] : memref<395xf32, #tpu.memory_space<smem>>
    %38 = vector.broadcast %37 : f32 to vector<48x128xf32>
    %39 = arith.mulf %38, %1 : vector<48x128xf32>
    %c10 = arith.constant 10 : index
    %40 = memref.load %arg1[%c10] : memref<395xf32, #tpu.memory_space<smem>>
    %41 = vector.broadcast %40 : f32 to vector<48x128xf32>
    %42 = arith.mulf %41, %2 : vector<48x128xf32>
    %43 = arith.addf %39, %42 : vector<48x128xf32>
    %c11 = arith.constant 11 : index
    %44 = memref.load %arg1[%c11] : memref<395xf32, #tpu.memory_space<smem>>
    %45 = vector.broadcast %44 : f32 to vector<48x128xf32>
    %46 = arith.mulf %45, %3 : vector<48x128xf32>
    %47 = arith.addf %43, %46 : vector<48x128xf32>
    %c12 = arith.constant 12 : index
    %48 = memref.load %arg1[%c12] : memref<395xf32, #tpu.memory_space<smem>>
    %49 = vector.broadcast %48 : f32 to vector<48x128xf32>
    %50 = arith.mulf %49, %1 : vector<48x128xf32>
    %c13 = arith.constant 13 : index
    %51 = memref.load %arg1[%c13] : memref<395xf32, #tpu.memory_space<smem>>
    %52 = vector.broadcast %51 : f32 to vector<48x128xf32>
    %53 = arith.mulf %52, %2 : vector<48x128xf32>
    %54 = arith.addf %50, %53 : vector<48x128xf32>
    %c14 = arith.constant 14 : index
    %55 = memref.load %arg1[%c14] : memref<395xf32, #tpu.memory_space<smem>>
    %56 = vector.broadcast %55 : f32 to vector<48x128xf32>
    %57 = arith.mulf %56, %3 : vector<48x128xf32>
    %58 = arith.addf %54, %57 : vector<48x128xf32>
    %c15 = arith.constant 15 : index
    %59 = memref.load %arg1[%c15] : memref<395xf32, #tpu.memory_space<smem>>
    %60 = vector.broadcast %59 : f32 to vector<48x128xf32>
    %61 = arith.mulf %60, %1 : vector<48x128xf32>
    %c16 = arith.constant 16 : index
    %62 = memref.load %arg1[%c16] : memref<395xf32, #tpu.memory_space<smem>>
    %63 = vector.broadcast %62 : f32 to vector<48x128xf32>
    %64 = arith.mulf %63, %2 : vector<48x128xf32>
    %65 = arith.addf %61, %64 : vector<48x128xf32>
    %c17 = arith.constant 17 : index
    %66 = memref.load %arg1[%c17] : memref<395xf32, #tpu.memory_space<smem>>
    %67 = vector.broadcast %66 : f32 to vector<48x128xf32>
    %68 = arith.mulf %67, %3 : vector<48x128xf32>
    %69 = arith.addf %65, %68 : vector<48x128xf32>
    %c18 = arith.constant 18 : index
    %70 = memref.load %arg1[%c18] : memref<395xf32, #tpu.memory_space<smem>>
    %71 = vector.broadcast %70 : f32 to vector<48x128xf32>
    %72 = arith.mulf %71, %1 : vector<48x128xf32>
    %c19 = arith.constant 19 : index
    %73 = memref.load %arg1[%c19] : memref<395xf32, #tpu.memory_space<smem>>
    %74 = vector.broadcast %73 : f32 to vector<48x128xf32>
    %75 = arith.mulf %74, %2 : vector<48x128xf32>
    %76 = arith.addf %72, %75 : vector<48x128xf32>
    %c20 = arith.constant 20 : index
    %77 = memref.load %arg1[%c20] : memref<395xf32, #tpu.memory_space<smem>>
    %78 = vector.broadcast %77 : f32 to vector<48x128xf32>
    %79 = arith.mulf %78, %3 : vector<48x128xf32>
    %80 = arith.addf %76, %79 : vector<48x128xf32>
    %c21 = arith.constant 21 : index
    %81 = memref.load %arg1[%c21] : memref<395xf32, #tpu.memory_space<smem>>
    %82 = vector.broadcast %81 : f32 to vector<48x128xf32>
    %83 = arith.mulf %82, %1 : vector<48x128xf32>
    %c22 = arith.constant 22 : index
    %84 = memref.load %arg1[%c22] : memref<395xf32, #tpu.memory_space<smem>>
    %85 = vector.broadcast %84 : f32 to vector<48x128xf32>
    %86 = arith.mulf %85, %2 : vector<48x128xf32>
    %87 = arith.addf %83, %86 : vector<48x128xf32>
    %c23 = arith.constant 23 : index
    %88 = memref.load %arg1[%c23] : memref<395xf32, #tpu.memory_space<smem>>
    %89 = vector.broadcast %88 : f32 to vector<48x128xf32>
    %90 = arith.mulf %89, %3 : vector<48x128xf32>
    %91 = arith.addf %87, %90 : vector<48x128xf32>
    %c24 = arith.constant 24 : index
    %92 = memref.load %arg1[%c24] : memref<395xf32, #tpu.memory_space<smem>>
    %93 = vector.broadcast %92 : f32 to vector<48x128xf32>
    %94 = arith.addf %14, %93 : vector<48x128xf32>
    %95 = vector.extract_strided_slice %94 {offsets = [0, 0], sizes = [46, 128], strides = [1, 1]} : vector<48x128xf32> to vector<46x128xf32>
    %96 = vector.extract_strided_slice %94 {offsets = [1, 0], sizes = [46, 128], strides = [1, 1]} : vector<48x128xf32> to vector<46x128xf32>
    %97 = arith.maximumf %95, %96 : vector<46x128xf32>
    %98 = vector.extract_strided_slice %94 {offsets = [2, 0], sizes = [46, 128], strides = [1, 1]} : vector<48x128xf32> to vector<46x128xf32>
    %99 = arith.maximumf %97, %98 : vector<46x128xf32>
    %c0_2 = arith.constant 0 : index
    %c0_3 = arith.constant 0 : index
    %100 = vector.load %arg4[%c0_2, %c0_3] : memref<552x128xf32, #tpu.memory_space<vmem>>, vector<46x128xf32>
    tpu.vector_store %arg4[%c0_2, %c0_3], %99 {strides = array<i32>} : memref<552x128xf32, #tpu.memory_space<vmem>>, vector<46x128xf32>,
    %c0_4 = arith.constant 0 : index
    %c0_5 = arith.constant 0 : index
    %101 = tpu.strided_load %arg4[%c0_4, %c0_5] {strides = array<i32: 3, 1>} : memref<552x128xf32, #tpu.memory_space<vmem>>, vector<16x128xf32>
    %cst = arith.constant 1.000000e-01 : f32
    %102 = vector.broadcast %cst : f32 to vector<16x128xf32>
    %103 = arith.mulf %102, %101 : vector<16x128xf32>
    %104 = arith.maximumf %101, %103 : vector<16x128xf32>
    %c32 = arith.constant 32 : index
    %105 = memref.load %arg1[%c32] : memref<395xf32, #tpu.memory_space<smem>>
    %106 = vector.broadcast %105 : f32 to vector<16x128xf32>
    %107 = arith.mulf %104, %106 : vector<16x128xf32>
    %c40 = arith.constant 40 : index
    %108 = memref.load %arg1[%c40] : memref<395xf32, #tpu.memory_space<smem>>
    %109 = vector.broadcast %108 : f32 to vector<16x128xf32>
    %110 = arith.addf %107, %109 : vector<16x128xf32>
    %c25 = arith.constant 25 : index
    %111 = memref.load %arg1[%c25] : memref<395xf32, #tpu.memory_space<smem>>
    %112 = vector.broadcast %111 : f32 to vector<48x128xf32>
    %113 = arith.addf %25, %112 : vector<48x128xf32>
    %114 = vector.extract_strided_slice %113 {offsets = [0, 0], sizes = [46, 128], strides = [1, 1]} : vector<48x128xf32> to vector<46x128xf32>
    %115 = vector.extract_strided_slice %113 {offsets = [1, 0], sizes = [46, 128], strides = [1, 1]} : vector<48x128xf32> to vector<46x128xf32>
    %116 = arith.maximumf %114, %115 : vector<46x128xf32>
    %117 = vector.extract_strided_slice %113 {offsets = [2, 0], sizes = [46, 128], strides = [1, 1]} : vector<48x128xf32> to vector<46x128xf32>
    %118 = arith.maximumf %116, %117 : vector<46x128xf32>
    %c48 = arith.constant 48 : index
    %c0_6 = arith.constant 0 : index
    %119 = vector.load %arg4[%c48, %c0_6] : memref<552x128xf32, #tpu.memory_space<vmem>>, vector<46x128xf32>
    tpu.vector_store %arg4[%c48, %c0_6], %118 {strides = array<i32>} : memref<552x128xf32, #tpu.memory_space<vmem>>, vector<46x128xf32>,
    %c48_7 = arith.constant 48 : index
    %c0_8 = arith.constant 0 : index
    %120 = tpu.strided_load %arg4[%c48_7, %c0_8] {strides = array<i32: 3, 1>} : memref<552x128xf32, #tpu.memory_space<vmem>>, vector<16x128xf32>
    %cst_9 = arith.constant 1.000000e-01 : f32
    %121 = vector.broadcast %cst_9 : f32 to vector<16x128xf32>
    %122 = arith.mulf %121, %120 : vector<16x128xf32>
    %123 = arith.maximumf %120, %122 : vector<16x128xf32>
    %c33 = arith.constant 33 : index
    %124 = memref.load %arg1[%c33] : memref<395xf32, #tpu.memory_space<smem>>
    %125 = vector.broadcast %124 : f32 to vector<16x128xf32>
    %126 = arith.mulf %123, %125 : vector<16x128xf32>
    %c41 = arith.constant 41 : index
    %127 = memref.load %arg1[%c41] : memref<395xf32, #tpu.memory_space<smem>>
    %128 = vector.broadcast %127 : f32 to vector<16x128xf32>
    %129 = arith.addf %126, %128 : vector<16x128xf32>
    %c26 = arith.constant 26 : index
    %130 = memref.load %arg1[%c26] : memref<395xf32, #tpu.memory_space<smem>>
    %131 = vector.broadcast %130 : f32 to vector<48x128xf32>
    %132 = arith.addf %36, %131 : vector<48x128xf32>
    %133 = vector.extract_strided_slice %132 {offsets = [0, 0], sizes = [46, 128], strides = [1, 1]} : vector<48x128xf32> to vector<46x128xf32>
    %134 = vector.extract_strided_slice %132 {offsets = [1, 0], sizes = [46, 128], strides = [1, 1]} : vector<48x128xf32> to vector<46x128xf32>
    %135 = arith.maximumf %133, %134 : vector<46x128xf32>
    %136 = vector.extract_strided_slice %132 {offsets = [2, 0], sizes = [46, 128], strides = [1, 1]} : vector<48x128xf32> to vector<46x128xf32>
    %137 = arith.maximumf %135, %136 : vector<46x128xf32>
    %c96 = arith.constant 96 : index
    %c0_10 = arith.constant 0 : index
    %138 = vector.load %arg4[%c96, %c0_10] : memref<552x128xf32, #tpu.memory_space<vmem>>, vector<46x128xf32>
    tpu.vector_store %arg4[%c96, %c0_10], %137 {strides = array<i32>} : memref<552x128xf32, #tpu.memory_space<vmem>>, vector<46x128xf32>,
    %c96_11 = arith.constant 96 : index
    %c0_12 = arith.constant 0 : index
    %139 = tpu.strided_load %arg4[%c96_11, %c0_12] {strides = array<i32: 3, 1>} : memref<552x128xf32, #tpu.memory_space<vmem>>, vector<16x128xf32>
    %cst_13 = arith.constant 1.000000e-01 : f32
    %140 = vector.broadcast %cst_13 : f32 to vector<16x128xf32>
    %141 = arith.mulf %140, %139 : vector<16x128xf32>
    %142 = arith.maximumf %139, %141 : vector<16x128xf32>
    %c34 = arith.constant 34 : index
    %143 = memref.load %arg1[%c34] : memref<395xf32, #tpu.memory_space<smem>>
    %144 = vector.broadcast %143 : f32 to vector<16x128xf32>
    %145 = arith.mulf %142, %144 : vector<16x128xf32>
    %c42 = arith.constant 42 : index
    %146 = memref.load %arg1[%c42] : memref<395xf32, #tpu.memory_space<smem>>
    %147 = vector.broadcast %146 : f32 to vector<16x128xf32>
    %148 = arith.addf %145, %147 : vector<16x128xf32>
    %c27 = arith.constant 27 : index
    %149 = memref.load %arg1[%c27] : memref<395xf32, #tpu.memory_space<smem>>
    %150 = vector.broadcast %149 : f32 to vector<48x128xf32>
    %151 = arith.addf %47, %150 : vector<48x128xf32>
    %152 = vector.extract_strided_slice %151 {offsets = [0, 0], sizes = [46, 128], strides = [1, 1]} : vector<48x128xf32> to vector<46x128xf32>
    %153 = vector.extract_strided_slice %151 {offsets = [1, 0], sizes = [46, 128], strides = [1, 1]} : vector<48x128xf32> to vector<46x128xf32>
    %154 = arith.maximumf %152, %153 : vector<46x128xf32>
    %155 = vector.extract_strided_slice %151 {offsets = [2, 0], sizes = [46, 128], strides = [1, 1]} : vector<48x128xf32> to vector<46x128xf32>
    %156 = arith.maximumf %154, %155 : vector<46x128xf32>
    %c144 = arith.constant 144 : index
    %c0_14 = arith.constant 0 : index
    %157 = vector.load %arg4[%c144, %c0_14] : memref<552x128xf32, #tpu.memory_space<vmem>>, vector<46x128xf32>
    tpu.vector_store %arg4[%c144, %c0_14], %156 {strides = array<i32>} : memref<552x128xf32, #tpu.memory_space<vmem>>, vector<46x128xf32>,
    %c144_15 = arith.constant 144 : index
    %c0_16 = arith.constant 0 : index
    %158 = tpu.strided_load %arg4[%c144_15, %c0_16] {strides = array<i32: 3, 1>} : memref<552x128xf32, #tpu.memory_space<vmem>>, vector<16x128xf32>
    %cst_17 = arith.constant 1.000000e-01 : f32
    %159 = vector.broadcast %cst_17 : f32 to vector<16x128xf32>
    %160 = arith.mulf %159, %158 : vector<16x128xf32>
    %161 = arith.maximumf %158, %160 : vector<16x128xf32>
    %c35 = arith.constant 35 : index
    %162 = memref.load %arg1[%c35] : memref<395xf32, #tpu.memory_space<smem>>
    %163 = vector.broadcast %162 : f32 to vector<16x128xf32>
    %164 = arith.mulf %161, %163 : vector<16x128xf32>
    %c43 = arith.constant 43 : index
    %165 = memref.load %arg1[%c43] : memref<395xf32, #tpu.memory_space<smem>>
    %166 = vector.broadcast %165 : f32 to vector<16x128xf32>
    %167 = arith.addf %164, %166 : vector<16x128xf32>
    %c28 = arith.constant 28 : index
    %168 = memref.load %arg1[%c28] : memref<395xf32, #tpu.memory_space<smem>>
    %169 = vector.broadcast %168 : f32 to vector<48x128xf32>
    %170 = arith.addf %58, %169 : vector<48x128xf32>
    %171 = vector.extract_strided_slice %170 {offsets = [0, 0], sizes = [46, 128], strides = [1, 1]} : vector<48x128xf32> to vector<46x128xf32>
    %172 = vector.extract_strided_slice %170 {offsets = [1, 0], sizes = [46, 128], strides = [1, 1]} : vector<48x128xf32> to vector<46x128xf32>
    %173 = arith.maximumf %171, %172 : vector<46x128xf32>
    %174 = vector.extract_strided_slice %170 {offsets = [2, 0], sizes = [46, 128], strides = [1, 1]} : vector<48x128xf32> to vector<46x128xf32>
    %175 = arith.maximumf %173, %174 : vector<46x128xf32>
    %c192 = arith.constant 192 : index
    %c0_18 = arith.constant 0 : index
    %176 = vector.load %arg4[%c192, %c0_18] : memref<552x128xf32, #tpu.memory_space<vmem>>, vector<46x128xf32>
    tpu.vector_store %arg4[%c192, %c0_18], %175 {strides = array<i32>} : memref<552x128xf32, #tpu.memory_space<vmem>>, vector<46x128xf32>,
    %c192_19 = arith.constant 192 : index
    %c0_20 = arith.constant 0 : index
    %177 = tpu.strided_load %arg4[%c192_19, %c0_20] {strides = array<i32: 3, 1>} : memref<552x128xf32, #tpu.memory_space<vmem>>, vector<16x128xf32>
    %cst_21 = arith.constant 1.000000e-01 : f32
    %178 = vector.broadcast %cst_21 : f32 to vector<16x128xf32>
    %179 = arith.mulf %178, %177 : vector<16x128xf32>
    %180 = arith.maximumf %177, %179 : vector<16x128xf32>
    %c36 = arith.constant 36 : index
    %181 = memref.load %arg1[%c36] : memref<395xf32, #tpu.memory_space<smem>>
    %182 = vector.broadcast %181 : f32 to vector<16x128xf32>
    %183 = arith.mulf %180, %182 : vector<16x128xf32>
    %c44 = arith.constant 44 : index
    %184 = memref.load %arg1[%c44] : memref<395xf32, #tpu.memory_space<smem>>
    %185 = vector.broadcast %184 : f32 to vector<16x128xf32>
    %186 = arith.addf %183, %185 : vector<16x128xf32>
    %c29 = arith.constant 29 : index
    %187 = memref.load %arg1[%c29] : memref<395xf32, #tpu.memory_space<smem>>
    %188 = vector.broadcast %187 : f32 to vector<48x128xf32>
    %189 = arith.addf %69, %188 : vector<48x128xf32>
    %190 = vector.extract_strided_slice %189 {offsets = [0, 0], sizes = [46, 128], strides = [1, 1]} : vector<48x128xf32> to vector<46x128xf32>
    %191 = vector.extract_strided_slice %189 {offsets = [1, 0], sizes = [46, 128], strides = [1, 1]} : vector<48x128xf32> to vector<46x128xf32>
    %192 = arith.maximumf %190, %191 : vector<46x128xf32>
    %193 = vector.extract_strided_slice %189 {offsets = [2, 0], sizes = [46, 128], strides = [1, 1]} : vector<48x128xf32> to vector<46x128xf32>
    %194 = arith.maximumf %192, %193 : vector<46x128xf32>
    %c240 = arith.constant 240 : index
    %c0_22 = arith.constant 0 : index
    %195 = vector.load %arg4[%c240, %c0_22] : memref<552x128xf32, #tpu.memory_space<vmem>>, vector<46x128xf32>
    tpu.vector_store %arg4[%c240, %c0_22], %194 {strides = array<i32>} : memref<552x128xf32, #tpu.memory_space<vmem>>, vector<46x128xf32>,
    %c240_23 = arith.constant 240 : index
    %c0_24 = arith.constant 0 : index
    %196 = tpu.strided_load %arg4[%c240_23, %c0_24] {strides = array<i32: 3, 1>} : memref<552x128xf32, #tpu.memory_space<vmem>>, vector<16x128xf32>
    %cst_25 = arith.constant 1.000000e-01 : f32
    %197 = vector.broadcast %cst_25 : f32 to vector<16x128xf32>
    %198 = arith.mulf %197, %196 : vector<16x128xf32>
    %199 = arith.maximumf %196, %198 : vector<16x128xf32>
    %c37 = arith.constant 37 : index
    %200 = memref.load %arg1[%c37] : memref<395xf32, #tpu.memory_space<smem>>
    %201 = vector.broadcast %200 : f32 to vector<16x128xf32>
    %202 = arith.mulf %199, %201 : vector<16x128xf32>
    %c45 = arith.constant 45 : index
    %203 = memref.load %arg1[%c45] : memref<395xf32, #tpu.memory_space<smem>>
    %204 = vector.broadcast %203 : f32 to vector<16x128xf32>
    %205 = arith.addf %202, %204 : vector<16x128xf32>
    %c30 = arith.constant 30 : index
    %206 = memref.load %arg1[%c30] : memref<395xf32, #tpu.memory_space<smem>>
    %207 = vector.broadcast %206 : f32 to vector<48x128xf32>
    %208 = arith.addf %80, %207 : vector<48x128xf32>
    %209 = vector.extract_strided_slice %208 {offsets = [0, 0], sizes = [46, 128], strides = [1, 1]} : vector<48x128xf32> to vector<46x128xf32>
    %210 = vector.extract_strided_slice %208 {offsets = [1, 0], sizes = [46, 128], strides = [1, 1]} : vector<48x128xf32> to vector<46x128xf32>
    %211 = arith.maximumf %209, %210 : vector<46x128xf32>
    %212 = vector.extract_strided_slice %208 {offsets = [2, 0], sizes = [46, 128], strides = [1, 1]} : vector<48x128xf32> to vector<46x128xf32>
    %213 = arith.maximumf %211, %212 : vector<46x128xf32>
    %c288 = arith.constant 288 : index
    %c0_26 = arith.constant 0 : index
    %214 = vector.load %arg4[%c288, %c0_26] : memref<552x128xf32, #tpu.memory_space<vmem>>, vector<46x128xf32>
    tpu.vector_store %arg4[%c288, %c0_26], %213 {strides = array<i32>} : memref<552x128xf32, #tpu.memory_space<vmem>>, vector<46x128xf32>,
    %c288_27 = arith.constant 288 : index
    %c0_28 = arith.constant 0 : index
    %215 = tpu.strided_load %arg4[%c288_27, %c0_28] {strides = array<i32: 3, 1>} : memref<552x128xf32, #tpu.memory_space<vmem>>, vector<16x128xf32>
    %cst_29 = arith.constant 1.000000e-01 : f32
    %216 = vector.broadcast %cst_29 : f32 to vector<16x128xf32>
    %217 = arith.mulf %216, %215 : vector<16x128xf32>
    %218 = arith.maximumf %215, %217 : vector<16x128xf32>
    %c38 = arith.constant 38 : index
    %219 = memref.load %arg1[%c38] : memref<395xf32, #tpu.memory_space<smem>>
    %220 = vector.broadcast %219 : f32 to vector<16x128xf32>
    %221 = arith.mulf %218, %220 : vector<16x128xf32>
    %c46 = arith.constant 46 : index
    %222 = memref.load %arg1[%c46] : memref<395xf32, #tpu.memory_space<smem>>
    %223 = vector.broadcast %222 : f32 to vector<16x128xf32>
    %224 = arith.addf %221, %223 : vector<16x128xf32>
    %c31 = arith.constant 31 : index
    %225 = memref.load %arg1[%c31] : memref<395xf32, #tpu.memory_space<smem>>
    %226 = vector.broadcast %225 : f32 to vector<48x128xf32>
    %227 = arith.addf %91, %226 : vector<48x128xf32>
    %228 = vector.extract_strided_slice %227 {offsets = [0, 0], sizes = [46, 128], strides = [1, 1]} : vector<48x128xf32> to vector<46x128xf32>
    %229 = vector.extract_strided_slice %227 {offsets = [1, 0], sizes = [46, 128], strides = [1, 1]} : vector<48x128xf32> to vector<46x128xf32>
    %230 = arith.maximumf %228, %229 : vector<46x128xf32>
    %231 = vector.extract_strided_slice %227 {offsets = [2, 0], sizes = [46, 128], strides = [1, 1]} : vector<48x128xf32> to vector<46x128xf32>
    %232 = arith.maximumf %230, %231 : vector<46x128xf32>
    %c336 = arith.constant 336 : index
    %c0_30 = arith.constant 0 : index
    %233 = vector.load %arg4[%c336, %c0_30] : memref<552x128xf32, #tpu.memory_space<vmem>>, vector<46x128xf32>
    tpu.vector_store %arg4[%c336, %c0_30], %232 {strides = array<i32>} : memref<552x128xf32, #tpu.memory_space<vmem>>, vector<46x128xf32>,
    %c336_31 = arith.constant 336 : index
    %c0_32 = arith.constant 0 : index
    %234 = tpu.strided_load %arg4[%c336_31, %c0_32] {strides = array<i32: 3, 1>} : memref<552x128xf32, #tpu.memory_space<vmem>>, vector<16x128xf32>
    %cst_33 = arith.constant 1.000000e-01 : f32
    %235 = vector.broadcast %cst_33 : f32 to vector<16x128xf32>
    %236 = arith.mulf %235, %234 : vector<16x128xf32>
    %237 = arith.maximumf %234, %236 : vector<16x128xf32>
    %c39 = arith.constant 39 : index
    %238 = memref.load %arg1[%c39] : memref<395xf32, #tpu.memory_space<smem>>
    %239 = vector.broadcast %238 : f32 to vector<16x128xf32>
    %240 = arith.mulf %237, %239 : vector<16x128xf32>
    %c47 = arith.constant 47 : index
    %241 = memref.load %arg1[%c47] : memref<395xf32, #tpu.memory_space<smem>>
    %242 = vector.broadcast %241 : f32 to vector<16x128xf32>
    %243 = arith.addf %240, %242 : vector<16x128xf32>
    %244 = vector.extract_strided_slice %110 {offsets = [0, 0], sizes = [14, 128], strides = [1, 1]} : vector<16x128xf32> to vector<14x128xf32>
    %245 = vector.extract_strided_slice %110 {offsets = [1, 0], sizes = [14, 128], strides = [1, 1]} : vector<16x128xf32> to vector<14x128xf32>
    %246 = vector.extract_strided_slice %110 {offsets = [2, 0], sizes = [14, 128], strides = [1, 1]} : vector<16x128xf32> to vector<14x128xf32>
    %c48_34 = arith.constant 48 : index
    %247 = memref.load %arg1[%c48_34] : memref<395xf32, #tpu.memory_space<smem>>
    %248 = vector.broadcast %247 : f32 to vector<14x128xf32>
    %249 = arith.mulf %248, %244 : vector<14x128xf32>
    %c49 = arith.constant 49 : index
    %250 = memref.load %arg1[%c49] : memref<395xf32, #tpu.memory_space<smem>>
    %251 = vector.broadcast %250 : f32 to vector<14x128xf32>
    %252 = arith.mulf %251, %245 : vector<14x128xf32>
    %253 = arith.addf %249, %252 : vector<14x128xf32>
    %c50 = arith.constant 50 : index
    %254 = memref.load %arg1[%c50] : memref<395xf32, #tpu.memory_space<smem>>
    %255 = vector.broadcast %254 : f32 to vector<14x128xf32>
    %256 = arith.mulf %255, %246 : vector<14x128xf32>
    %257 = arith.addf %253, %256 : vector<14x128xf32>
    %c72 = arith.constant 72 : index
    %258 = memref.load %arg1[%c72] : memref<395xf32, #tpu.memory_space<smem>>
    %259 = vector.broadcast %258 : f32 to vector<14x128xf32>
    %260 = arith.mulf %259, %244 : vector<14x128xf32>
    %c73 = arith.constant 73 : index
    %261 = memref.load %arg1[%c73] : memref<395xf32, #tpu.memory_space<smem>>
    %262 = vector.broadcast %261 : f32 to vector<14x128xf32>
    %263 = arith.mulf %262, %245 : vector<14x128xf32>
    %264 = arith.addf %260, %263 : vector<14x128xf32>
    %c74 = arith.constant 74 : index
    %265 = memref.load %arg1[%c74] : memref<395xf32, #tpu.memory_space<smem>>
    %266 = vector.broadcast %265 : f32 to vector<14x128xf32>
    %267 = arith.mulf %266, %246 : vector<14x128xf32>
    %268 = arith.addf %264, %267 : vector<14x128xf32>
    %c96_35 = arith.constant 96 : index
    %269 = memref.load %arg1[%c96_35] : memref<395xf32, #tpu.memory_space<smem>>
    %270 = vector.broadcast %269 : f32 to vector<14x128xf32>
    %271 = arith.mulf %270, %244 : vector<14x128xf32>
    %c97 = arith.constant 97 : index
    %272 = memref.load %arg1[%c97] : memref<395xf32, #tpu.memory_space<smem>>
    %273 = vector.broadcast %272 : f32 to vector<14x128xf32>
    %274 = arith.mulf %273, %245 : vector<14x128xf32>
    %275 = arith.addf %271, %274 : vector<14x128xf32>
    %c98 = arith.constant 98 : index
    %276 = memref.load %arg1[%c98] : memref<395xf32, #tpu.memory_space<smem>>
    %277 = vector.broadcast %276 : f32 to vector<14x128xf32>
    %278 = arith.mulf %277, %246 : vector<14x128xf32>
    %279 = arith.addf %275, %278 : vector<14x128xf32>
    %c120 = arith.constant 120 : index
    %280 = memref.load %arg1[%c120] : memref<395xf32, #tpu.memory_space<smem>>
    %281 = vector.broadcast %280 : f32 to vector<14x128xf32>
    %282 = arith.mulf %281, %244 : vector<14x128xf32>
    %c121 = arith.constant 121 : index
    %283 = memref.load %arg1[%c121] : memref<395xf32, #tpu.memory_space<smem>>
    %284 = vector.broadcast %283 : f32 to vector<14x128xf32>
    %285 = arith.mulf %284, %245 : vector<14x128xf32>
    %286 = arith.addf %282, %285 : vector<14x128xf32>
    %c122 = arith.constant 122 : index
    %287 = memref.load %arg1[%c122] : memref<395xf32, #tpu.memory_space<smem>>
    %288 = vector.broadcast %287 : f32 to vector<14x128xf32>
    %289 = arith.mulf %288, %246 : vector<14x128xf32>
    %290 = arith.addf %286, %289 : vector<14x128xf32>
    %c144_36 = arith.constant 144 : index
    %291 = memref.load %arg1[%c144_36] : memref<395xf32, #tpu.memory_space<smem>>
    %292 = vector.broadcast %291 : f32 to vector<14x128xf32>
    %293 = arith.mulf %292, %244 : vector<14x128xf32>
    %c145 = arith.constant 145 : index
    %294 = memref.load %arg1[%c145] : memref<395xf32, #tpu.memory_space<smem>>
    %295 = vector.broadcast %294 : f32 to vector<14x128xf32>
    %296 = arith.mulf %295, %245 : vector<14x128xf32>
    %297 = arith.addf %293, %296 : vector<14x128xf32>
    %c146 = arith.constant 146 : index
    %298 = memref.load %arg1[%c146] : memref<395xf32, #tpu.memory_space<smem>>
    %299 = vector.broadcast %298 : f32 to vector<14x128xf32>
    %300 = arith.mulf %299, %246 : vector<14x128xf32>
    %301 = arith.addf %297, %300 : vector<14x128xf32>
    %c168 = arith.constant 168 : index
    %302 = memref.load %arg1[%c168] : memref<395xf32, #tpu.memory_space<smem>>
    %303 = vector.broadcast %302 : f32 to vector<14x128xf32>
    %304 = arith.mulf %303, %244 : vector<14x128xf32>
    %c169 = arith.constant 169 : index
    %305 = memref.load %arg1[%c169] : memref<395xf32, #tpu.memory_space<smem>>
    %306 = vector.broadcast %305 : f32 to vector<14x128xf32>
    %307 = arith.mulf %306, %245 : vector<14x128xf32>
    %308 = arith.addf %304, %307 : vector<14x128xf32>
    %c170 = arith.constant 170 : index
    %309 = memref.load %arg1[%c170] : memref<395xf32, #tpu.memory_space<smem>>
    %310 = vector.broadcast %309 : f32 to vector<14x128xf32>
    %311 = arith.mulf %310, %246 : vector<14x128xf32>
    %312 = arith.addf %308, %311 : vector<14x128xf32>
    %313 = vector.extract_strided_slice %129 {offsets = [0, 0], sizes = [14, 128], strides = [1, 1]} : vector<16x128xf32> to vector<14x128xf32>
    %314 = vector.extract_strided_slice %129 {offsets = [1, 0], sizes = [14, 128], strides = [1, 1]} : vector<16x128xf32> to vector<14x128xf32>
    %315 = vector.extract_strided_slice %129 {offsets = [2, 0], sizes = [14, 128], strides = [1, 1]} : vector<16x128xf32> to vector<14x128xf32>
    %c51 = arith.constant 51 : index
    %316 = memref.load %arg1[%c51] : memref<395xf32, #tpu.memory_space<smem>>
    %317 = vector.broadcast %316 : f32 to vector<14x128xf32>
    %318 = arith.mulf %317, %313 : vector<14x128xf32>
    %319 = arith.addf %257, %318 : vector<14x128xf32>
    %c52 = arith.constant 52 : index
    %320 = memref.load %arg1[%c52] : memref<395xf32, #tpu.memory_space<smem>>
    %321 = vector.broadcast %320 : f32 to vector<14x128xf32>
    %322 = arith.mulf %321, %314 : vector<14x128xf32>
    %323 = arith.addf %319, %322 : vector<14x128xf32>
    %c53 = arith.constant 53 : index
    %324 = memref.load %arg1[%c53] : memref<395xf32, #tpu.memory_space<smem>>
    %325 = vector.broadcast %324 : f32 to vector<14x128xf32>
    %326 = arith.mulf %325, %315 : vector<14x128xf32>
    %327 = arith.addf %323, %326 : vector<14x128xf32>
    %c75 = arith.constant 75 : index
    %328 = memref.load %arg1[%c75] : memref<395xf32, #tpu.memory_space<smem>>
    %329 = vector.broadcast %328 : f32 to vector<14x128xf32>
    %330 = arith.mulf %329, %313 : vector<14x128xf32>
    %331 = arith.addf %268, %330 : vector<14x128xf32>
    %c76 = arith.constant 76 : index
    %332 = memref.load %arg1[%c76] : memref<395xf32, #tpu.memory_space<smem>>
    %333 = vector.broadcast %332 : f32 to vector<14x128xf32>
    %334 = arith.mulf %333, %314 : vector<14x128xf32>
    %335 = arith.addf %331, %334 : vector<14x128xf32>
    %c77 = arith.constant 77 : index
    %336 = memref.load %arg1[%c77] : memref<395xf32, #tpu.memory_space<smem>>
    %337 = vector.broadcast %336 : f32 to vector<14x128xf32>
    %338 = arith.mulf %337, %315 : vector<14x128xf32>
    %339 = arith.addf %335, %338 : vector<14x128xf32>
    %c99 = arith.constant 99 : index
    %340 = memref.load %arg1[%c99] : memref<395xf32, #tpu.memory_space<smem>>
    %341 = vector.broadcast %340 : f32 to vector<14x128xf32>
    %342 = arith.mulf %341, %313 : vector<14x128xf32>
    %343 = arith.addf %279, %342 : vector<14x128xf32>
    %c100 = arith.constant 100 : index
    %344 = memref.load %arg1[%c100] : memref<395xf32, #tpu.memory_space<smem>>
    %345 = vector.broadcast %344 : f32 to vector<14x128xf32>
    %346 = arith.mulf %345, %314 : vector<14x128xf32>
    %347 = arith.addf %343, %346 : vector<14x128xf32>
    %c101 = arith.constant 101 : index
    %348 = memref.load %arg1[%c101] : memref<395xf32, #tpu.memory_space<smem>>
    %349 = vector.broadcast %348 : f32 to vector<14x128xf32>
    %350 = arith.mulf %349, %315 : vector<14x128xf32>
    %351 = arith.addf %347, %350 : vector<14x128xf32>
    %c123 = arith.constant 123 : index
    %352 = memref.load %arg1[%c123] : memref<395xf32, #tpu.memory_space<smem>>
    %353 = vector.broadcast %352 : f32 to vector<14x128xf32>
    %354 = arith.mulf %353, %313 : vector<14x128xf32>
    %355 = arith.addf %290, %354 : vector<14x128xf32>
    %c124 = arith.constant 124 : index
    %356 = memref.load %arg1[%c124] : memref<395xf32, #tpu.memory_space<smem>>
    %357 = vector.broadcast %356 : f32 to vector<14x128xf32>
    %358 = arith.mulf %357, %314 : vector<14x128xf32>
    %359 = arith.addf %355, %358 : vector<14x128xf32>
    %c125 = arith.constant 125 : index
    %360 = memref.load %arg1[%c125] : memref<395xf32, #tpu.memory_space<smem>>
    %361 = vector.broadcast %360 : f32 to vector<14x128xf32>
    %362 = arith.mulf %361, %315 : vector<14x128xf32>
    %363 = arith.addf %359, %362 : vector<14x128xf32>
    %c147 = arith.constant 147 : index
    %364 = memref.load %arg1[%c147] : memref<395xf32, #tpu.memory_space<smem>>
    %365 = vector.broadcast %364 : f32 to vector<14x128xf32>
    %366 = arith.mulf %365, %313 : vector<14x128xf32>
    %367 = arith.addf %301, %366 : vector<14x128xf32>
    %c148 = arith.constant 148 : index
    %368 = memref.load %arg1[%c148] : memref<395xf32, #tpu.memory_space<smem>>
    %369 = vector.broadcast %368 : f32 to vector<14x128xf32>
    %370 = arith.mulf %369, %314 : vector<14x128xf32>
    %371 = arith.addf %367, %370 : vector<14x128xf32>
    %c149 = arith.constant 149 : index
    %372 = memref.load %arg1[%c149] : memref<395xf32, #tpu.memory_space<smem>>
    %373 = vector.broadcast %372 : f32 to vector<14x128xf32>
    %374 = arith.mulf %373, %315 : vector<14x128xf32>
    %375 = arith.addf %371, %374 : vector<14x128xf32>
    %c171 = arith.constant 171 : index
    %376 = memref.load %arg1[%c171] : memref<395xf32, #tpu.memory_space<smem>>
    %377 = vector.broadcast %376 : f32 to vector<14x128xf32>
    %378 = arith.mulf %377, %313 : vector<14x128xf32>
    %379 = arith.addf %312, %378 : vector<14x128xf32>
    %c172 = arith.constant 172 : index
    %380 = memref.load %arg1[%c172] : memref<395xf32, #tpu.memory_space<smem>>
    %381 = vector.broadcast %380 : f32 to vector<14x128xf32>
    %382 = arith.mulf %381, %314 : vector<14x128xf32>
    %383 = arith.addf %379, %382 : vector<14x128xf32>
    %c173 = arith.constant 173 : index
    %384 = memref.load %arg1[%c173] : memref<395xf32, #tpu.memory_space<smem>>
    %385 = vector.broadcast %384 : f32 to vector<14x128xf32>
    %386 = arith.mulf %385, %315 : vector<14x128xf32>
    %387 = arith.addf %383, %386 : vector<14x128xf32>
    %388 = vector.extract_strided_slice %148 {offsets = [0, 0], sizes = [14, 128], strides = [1, 1]} : vector<16x128xf32> to vector<14x128xf32>
    %389 = vector.extract_strided_slice %148 {offsets = [1, 0], sizes = [14, 128], strides = [1, 1]} : vector<16x128xf32> to vector<14x128xf32>
    %390 = vector.extract_strided_slice %148 {offsets = [2, 0], sizes = [14, 128], strides = [1, 1]} : vector<16x128xf32> to vector<14x128xf32>
    %c54 = arith.constant 54 : index
    %391 = memref.load %arg1[%c54] : memref<395xf32, #tpu.memory_space<smem>>
    %392 = vector.broadcast %391 : f32 to vector<14x128xf32>
    %393 = arith.mulf %392, %388 : vector<14x128xf32>
    %394 = arith.addf %327, %393 : vector<14x128xf32>
    %c55 = arith.constant 55 : index
    %395 = memref.load %arg1[%c55] : memref<395xf32, #tpu.memory_space<smem>>
    %396 = vector.broadcast %395 : f32 to vector<14x128xf32>
    %397 = arith.mulf %396, %389 : vector<14x128xf32>
    %398 = arith.addf %394, %397 : vector<14x128xf32>
    %c56 = arith.constant 56 : index
    %399 = memref.load %arg1[%c56] : memref<395xf32, #tpu.memory_space<smem>>
    %400 = vector.broadcast %399 : f32 to vector<14x128xf32>
    %401 = arith.mulf %400, %390 : vector<14x128xf32>
    %402 = arith.addf %398, %401 : vector<14x128xf32>
    %c78 = arith.constant 78 : index
    %403 = memref.load %arg1[%c78] : memref<395xf32, #tpu.memory_space<smem>>
    %404 = vector.broadcast %403 : f32 to vector<14x128xf32>
    %405 = arith.mulf %404, %388 : vector<14x128xf32>
    %406 = arith.addf %339, %405 : vector<14x128xf32>
    %c79 = arith.constant 79 : index
    %407 = memref.load %arg1[%c79] : memref<395xf32, #tpu.memory_space<smem>>
    %408 = vector.broadcast %407 : f32 to vector<14x128xf32>
    %409 = arith.mulf %408, %389 : vector<14x128xf32>
    %410 = arith.addf %406, %409 : vector<14x128xf32>
    %c80 = arith.constant 80 : index
    %411 = memref.load %arg1[%c80] : memref<395xf32, #tpu.memory_space<smem>>
    %412 = vector.broadcast %411 : f32 to vector<14x128xf32>
    %413 = arith.mulf %412, %390 : vector<14x128xf32>
    %414 = arith.addf %410, %413 : vector<14x128xf32>
    %c102 = arith.constant 102 : index
    %415 = memref.load %arg1[%c102] : memref<395xf32, #tpu.memory_space<smem>>
    %416 = vector.broadcast %415 : f32 to vector<14x128xf32>
    %417 = arith.mulf %416, %388 : vector<14x128xf32>
    %418 = arith.addf %351, %417 : vector<14x128xf32>
    %c103 = arith.constant 103 : index
    %419 = memref.load %arg1[%c103] : memref<395xf32, #tpu.memory_space<smem>>
    %420 = vector.broadcast %419 : f32 to vector<14x128xf32>
    %421 = arith.mulf %420, %389 : vector<14x128xf32>
    %422 = arith.addf %418, %421 : vector<14x128xf32>
    %c104 = arith.constant 104 : index
    %423 = memref.load %arg1[%c104] : memref<395xf32, #tpu.memory_space<smem>>
    %424 = vector.broadcast %423 : f32 to vector<14x128xf32>
    %425 = arith.mulf %424, %390 : vector<14x128xf32>
    %426 = arith.addf %422, %425 : vector<14x128xf32>
    %c126 = arith.constant 126 : index
    %427 = memref.load %arg1[%c126] : memref<395xf32, #tpu.memory_space<smem>>
    %428 = vector.broadcast %427 : f32 to vector<14x128xf32>
    %429 = arith.mulf %428, %388 : vector<14x128xf32>
    %430 = arith.addf %363, %429 : vector<14x128xf32>
    %c127 = arith.constant 127 : index
    %431 = memref.load %arg1[%c127] : memref<395xf32, #tpu.memory_space<smem>>
    %432 = vector.broadcast %431 : f32 to vector<14x128xf32>
    %433 = arith.mulf %432, %389 : vector<14x128xf32>
    %434 = arith.addf %430, %433 : vector<14x128xf32>
    %c128 = arith.constant 128 : index
    %435 = memref.load %arg1[%c128] : memref<395xf32, #tpu.memory_space<smem>>
    %436 = vector.broadcast %435 : f32 to vector<14x128xf32>
    %437 = arith.mulf %436, %390 : vector<14x128xf32>
    %438 = arith.addf %434, %437 : vector<14x128xf32>
    %c150 = arith.constant 150 : index
    %439 = memref.load %arg1[%c150] : memref<395xf32, #tpu.memory_space<smem>>
    %440 = vector.broadcast %439 : f32 to vector<14x128xf32>
    %441 = arith.mulf %440, %388 : vector<14x128xf32>
    %442 = arith.addf %375, %441 : vector<14x128xf32>
    %c151 = arith.constant 151 : index
    %443 = memref.load %arg1[%c151] : memref<395xf32, #tpu.memory_space<smem>>
    %444 = vector.broadcast %443 : f32 to vector<14x128xf32>
    %445 = arith.mulf %444, %389 : vector<14x128xf32>
    %446 = arith.addf %442, %445 : vector<14x128xf32>
    %c152 = arith.constant 152 : index
    %447 = memref.load %arg1[%c152] : memref<395xf32, #tpu.memory_space<smem>>
    %448 = vector.broadcast %447 : f32 to vector<14x128xf32>
    %449 = arith.mulf %448, %390 : vector<14x128xf32>
    %450 = arith.addf %446, %449 : vector<14x128xf32>
    %c174 = arith.constant 174 : index
    %451 = memref.load %arg1[%c174] : memref<395xf32, #tpu.memory_space<smem>>
    %452 = vector.broadcast %451 : f32 to vector<14x128xf32>
    %453 = arith.mulf %452, %388 : vector<14x128xf32>
    %454 = arith.addf %387, %453 : vector<14x128xf32>
    %c175 = arith.constant 175 : index
    %455 = memref.load %arg1[%c175] : memref<395xf32, #tpu.memory_space<smem>>
    %456 = vector.broadcast %455 : f32 to vector<14x128xf32>
    %457 = arith.mulf %456, %389 : vector<14x128xf32>
    %458 = arith.addf %454, %457 : vector<14x128xf32>
    %c176 = arith.constant 176 : index
    %459 = memref.load %arg1[%c176] : memref<395xf32, #tpu.memory_space<smem>>
    %460 = vector.broadcast %459 : f32 to vector<14x128xf32>
    %461 = arith.mulf %460, %390 : vector<14x128xf32>
    %462 = arith.addf %458, %461 : vector<14x128xf32>
    %463 = vector.extract_strided_slice %167 {offsets = [0, 0], sizes = [14, 128], strides = [1, 1]} : vector<16x128xf32> to vector<14x128xf32>
    %464 = vector.extract_strided_slice %167 {offsets = [1, 0], sizes = [14, 128], strides = [1, 1]} : vector<16x128xf32> to vector<14x128xf32>
    %465 = vector.extract_strided_slice %167 {offsets = [2, 0], sizes = [14, 128], strides = [1, 1]} : vector<16x128xf32> to vector<14x128xf32>
    %c57 = arith.constant 57 : index
    %466 = memref.load %arg1[%c57] : memref<395xf32, #tpu.memory_space<smem>>
    %467 = vector.broadcast %466 : f32 to vector<14x128xf32>
    %468 = arith.mulf %467, %463 : vector<14x128xf32>
    %469 = arith.addf %402, %468 : vector<14x128xf32>
    %c58 = arith.constant 58 : index
    %470 = memref.load %arg1[%c58] : memref<395xf32, #tpu.memory_space<smem>>
    %471 = vector.broadcast %470 : f32 to vector<14x128xf32>
    %472 = arith.mulf %471, %464 : vector<14x128xf32>
    %473 = arith.addf %469, %472 : vector<14x128xf32>
    %c59 = arith.constant 59 : index
    %474 = memref.load %arg1[%c59] : memref<395xf32, #tpu.memory_space<smem>>
    %475 = vector.broadcast %474 : f32 to vector<14x128xf32>
    %476 = arith.mulf %475, %465 : vector<14x128xf32>
    %477 = arith.addf %473, %476 : vector<14x128xf32>
    %c81 = arith.constant 81 : index
    %478 = memref.load %arg1[%c81] : memref<395xf32, #tpu.memory_space<smem>>
    %479 = vector.broadcast %478 : f32 to vector<14x128xf32>
    %480 = arith.mulf %479, %463 : vector<14x128xf32>
    %481 = arith.addf %414, %480 : vector<14x128xf32>
    %c82 = arith.constant 82 : index
    %482 = memref.load %arg1[%c82] : memref<395xf32, #tpu.memory_space<smem>>
    %483 = vector.broadcast %482 : f32 to vector<14x128xf32>
    %484 = arith.mulf %483, %464 : vector<14x128xf32>
    %485 = arith.addf %481, %484 : vector<14x128xf32>
    %c83 = arith.constant 83 : index
    %486 = memref.load %arg1[%c83] : memref<395xf32, #tpu.memory_space<smem>>
    %487 = vector.broadcast %486 : f32 to vector<14x128xf32>
    %488 = arith.mulf %487, %465 : vector<14x128xf32>
    %489 = arith.addf %485, %488 : vector<14x128xf32>
    %c105 = arith.constant 105 : index
    %490 = memref.load %arg1[%c105] : memref<395xf32, #tpu.memory_space<smem>>
    %491 = vector.broadcast %490 : f32 to vector<14x128xf32>
    %492 = arith.mulf %491, %463 : vector<14x128xf32>
    %493 = arith.addf %426, %492 : vector<14x128xf32>
    %c106 = arith.constant 106 : index
    %494 = memref.load %arg1[%c106] : memref<395xf32, #tpu.memory_space<smem>>
    %495 = vector.broadcast %494 : f32 to vector<14x128xf32>
    %496 = arith.mulf %495, %464 : vector<14x128xf32>
    %497 = arith.addf %493, %496 : vector<14x128xf32>
    %c107 = arith.constant 107 : index
    %498 = memref.load %arg1[%c107] : memref<395xf32, #tpu.memory_space<smem>>
    %499 = vector.broadcast %498 : f32 to vector<14x128xf32>
    %500 = arith.mulf %499, %465 : vector<14x128xf32>
    %501 = arith.addf %497, %500 : vector<14x128xf32>
    %c129 = arith.constant 129 : index
    %502 = memref.load %arg1[%c129] : memref<395xf32, #tpu.memory_space<smem>>
    %503 = vector.broadcast %502 : f32 to vector<14x128xf32>
    %504 = arith.mulf %503, %463 : vector<14x128xf32>
    %505 = arith.addf %438, %504 : vector<14x128xf32>
    %c130 = arith.constant 130 : index
    %506 = memref.load %arg1[%c130] : memref<395xf32, #tpu.memory_space<smem>>
    %507 = vector.broadcast %506 : f32 to vector<14x128xf32>
    %508 = arith.mulf %507, %464 : vector<14x128xf32>
    %509 = arith.addf %505, %508 : vector<14x128xf32>
    %c131 = arith.constant 131 : index
    %510 = memref.load %arg1[%c131] : memref<395xf32, #tpu.memory_space<smem>>
    %511 = vector.broadcast %510 : f32 to vector<14x128xf32>
    %512 = arith.mulf %511, %465 : vector<14x128xf32>
    %513 = arith.addf %509, %512 : vector<14x128xf32>
    %c153 = arith.constant 153 : index
    %514 = memref.load %arg1[%c153] : memref<395xf32, #tpu.memory_space<smem>>
    %515 = vector.broadcast %514 : f32 to vector<14x128xf32>
    %516 = arith.mulf %515, %463 : vector<14x128xf32>
    %517 = arith.addf %450, %516 : vector<14x128xf32>
    %c154 = arith.constant 154 : index
    %518 = memref.load %arg1[%c154] : memref<395xf32, #tpu.memory_space<smem>>
    %519 = vector.broadcast %518 : f32 to vector<14x128xf32>
    %520 = arith.mulf %519, %464 : vector<14x128xf32>
    %521 = arith.addf %517, %520 : vector<14x128xf32>
    %c155 = arith.constant 155 : index
    %522 = memref.load %arg1[%c155] : memref<395xf32, #tpu.memory_space<smem>>
    %523 = vector.broadcast %522 : f32 to vector<14x128xf32>
    %524 = arith.mulf %523, %465 : vector<14x128xf32>
    %525 = arith.addf %521, %524 : vector<14x128xf32>
    %c177 = arith.constant 177 : index
    %526 = memref.load %arg1[%c177] : memref<395xf32, #tpu.memory_space<smem>>
    %527 = vector.broadcast %526 : f32 to vector<14x128xf32>
    %528 = arith.mulf %527, %463 : vector<14x128xf32>
    %529 = arith.addf %462, %528 : vector<14x128xf32>
    %c178 = arith.constant 178 : index
    %530 = memref.load %arg1[%c178] : memref<395xf32, #tpu.memory_space<smem>>
    %531 = vector.broadcast %530 : f32 to vector<14x128xf32>
    %532 = arith.mulf %531, %464 : vector<14x128xf32>
    %533 = arith.addf %529, %532 : vector<14x128xf32>
    %c179 = arith.constant 179 : index
    %534 = memref.load %arg1[%c179] : memref<395xf32, #tpu.memory_space<smem>>
    %535 = vector.broadcast %534 : f32 to vector<14x128xf32>
    %536 = arith.mulf %535, %465 : vector<14x128xf32>
    %537 = arith.addf %533, %536 : vector<14x128xf32>
    %538 = vector.extract_strided_slice %186 {offsets = [0, 0], sizes = [14, 128], strides = [1, 1]} : vector<16x128xf32> to vector<14x128xf32>
    %539 = vector.extract_strided_slice %186 {offsets = [1, 0], sizes = [14, 128], strides = [1, 1]} : vector<16x128xf32> to vector<14x128xf32>
    %540 = vector.extract_strided_slice %186 {offsets = [2, 0], sizes = [14, 128], strides = [1, 1]} : vector<16x128xf32> to vector<14x128xf32>
    %c60 = arith.constant 60 : index
    %541 = memref.load %arg1[%c60] : memref<395xf32, #tpu.memory_space<smem>>
    %542 = vector.broadcast %541 : f32 to vector<14x128xf32>
    %543 = arith.mulf %542, %538 : vector<14x128xf32>
    %544 = arith.addf %477, %543 : vector<14x128xf32>
    %c61 = arith.constant 61 : index
    %545 = memref.load %arg1[%c61] : memref<395xf32, #tpu.memory_space<smem>>
    %546 = vector.broadcast %545 : f32 to vector<14x128xf32>
    %547 = arith.mulf %546, %539 : vector<14x128xf32>
    %548 = arith.addf %544, %547 : vector<14x128xf32>
    %c62 = arith.constant 62 : index
    %549 = memref.load %arg1[%c62] : memref<395xf32, #tpu.memory_space<smem>>
    %550 = vector.broadcast %549 : f32 to vector<14x128xf32>
    %551 = arith.mulf %550, %540 : vector<14x128xf32>
    %552 = arith.addf %548, %551 : vector<14x128xf32>
    %c84 = arith.constant 84 : index
    %553 = memref.load %arg1[%c84] : memref<395xf32, #tpu.memory_space<smem>>
    %554 = vector.broadcast %553 : f32 to vector<14x128xf32>
    %555 = arith.mulf %554, %538 : vector<14x128xf32>
    %556 = arith.addf %489, %555 : vector<14x128xf32>
    %c85 = arith.constant 85 : index
    %557 = memref.load %arg1[%c85] : memref<395xf32, #tpu.memory_space<smem>>
    %558 = vector.broadcast %557 : f32 to vector<14x128xf32>
    %559 = arith.mulf %558, %539 : vector<14x128xf32>
    %560 = arith.addf %556, %559 : vector<14x128xf32>
    %c86 = arith.constant 86 : index
    %561 = memref.load %arg1[%c86] : memref<395xf32, #tpu.memory_space<smem>>
    %562 = vector.broadcast %561 : f32 to vector<14x128xf32>
    %563 = arith.mulf %562, %540 : vector<14x128xf32>
    %564 = arith.addf %560, %563 : vector<14x128xf32>
    %c108 = arith.constant 108 : index
    %565 = memref.load %arg1[%c108] : memref<395xf32, #tpu.memory_space<smem>>
    %566 = vector.broadcast %565 : f32 to vector<14x128xf32>
    %567 = arith.mulf %566, %538 : vector<14x128xf32>
    %568 = arith.addf %501, %567 : vector<14x128xf32>
    %c109 = arith.constant 109 : index
    %569 = memref.load %arg1[%c109] : memref<395xf32, #tpu.memory_space<smem>>
    %570 = vector.broadcast %569 : f32 to vector<14x128xf32>
    %571 = arith.mulf %570, %539 : vector<14x128xf32>
    %572 = arith.addf %568, %571 : vector<14x128xf32>
    %c110 = arith.constant 110 : index
    %573 = memref.load %arg1[%c110] : memref<395xf32, #tpu.memory_space<smem>>
    %574 = vector.broadcast %573 : f32 to vector<14x128xf32>
    %575 = arith.mulf %574, %540 : vector<14x128xf32>
    %576 = arith.addf %572, %575 : vector<14x128xf32>
    %c132 = arith.constant 132 : index
    %577 = memref.load %arg1[%c132] : memref<395xf32, #tpu.memory_space<smem>>
    %578 = vector.broadcast %577 : f32 to vector<14x128xf32>
    %579 = arith.mulf %578, %538 : vector<14x128xf32>
    %580 = arith.addf %513, %579 : vector<14x128xf32>
    %c133 = arith.constant 133 : index
    %581 = memref.load %arg1[%c133] : memref<395xf32, #tpu.memory_space<smem>>
    %582 = vector.broadcast %581 : f32 to vector<14x128xf32>
    %583 = arith.mulf %582, %539 : vector<14x128xf32>
    %584 = arith.addf %580, %583 : vector<14x128xf32>
    %c134 = arith.constant 134 : index
    %585 = memref.load %arg1[%c134] : memref<395xf32, #tpu.memory_space<smem>>
    %586 = vector.broadcast %585 : f32 to vector<14x128xf32>
    %587 = arith.mulf %586, %540 : vector<14x128xf32>
    %588 = arith.addf %584, %587 : vector<14x128xf32>
    %c156 = arith.constant 156 : index
    %589 = memref.load %arg1[%c156] : memref<395xf32, #tpu.memory_space<smem>>
    %590 = vector.broadcast %589 : f32 to vector<14x128xf32>
    %591 = arith.mulf %590, %538 : vector<14x128xf32>
    %592 = arith.addf %525, %591 : vector<14x128xf32>
    %c157 = arith.constant 157 : index
    %593 = memref.load %arg1[%c157] : memref<395xf32, #tpu.memory_space<smem>>
    %594 = vector.broadcast %593 : f32 to vector<14x128xf32>
    %595 = arith.mulf %594, %539 : vector<14x128xf32>
    %596 = arith.addf %592, %595 : vector<14x128xf32>
    %c158 = arith.constant 158 : index
    %597 = memref.load %arg1[%c158] : memref<395xf32, #tpu.memory_space<smem>>
    %598 = vector.broadcast %597 : f32 to vector<14x128xf32>
    %599 = arith.mulf %598, %540 : vector<14x128xf32>
    %600 = arith.addf %596, %599 : vector<14x128xf32>
    %c180 = arith.constant 180 : index
    %601 = memref.load %arg1[%c180] : memref<395xf32, #tpu.memory_space<smem>>
    %602 = vector.broadcast %601 : f32 to vector<14x128xf32>
    %603 = arith.mulf %602, %538 : vector<14x128xf32>
    %604 = arith.addf %537, %603 : vector<14x128xf32>
    %c181 = arith.constant 181 : index
    %605 = memref.load %arg1[%c181] : memref<395xf32, #tpu.memory_space<smem>>
    %606 = vector.broadcast %605 : f32 to vector<14x128xf32>
    %607 = arith.mulf %606, %539 : vector<14x128xf32>
    %608 = arith.addf %604, %607 : vector<14x128xf32>
    %c182 = arith.constant 182 : index
    %609 = memref.load %arg1[%c182] : memref<395xf32, #tpu.memory_space<smem>>
    %610 = vector.broadcast %609 : f32 to vector<14x128xf32>
    %611 = arith.mulf %610, %540 : vector<14x128xf32>
    %612 = arith.addf %608, %611 : vector<14x128xf32>
    %613 = vector.extract_strided_slice %205 {offsets = [0, 0], sizes = [14, 128], strides = [1, 1]} : vector<16x128xf32> to vector<14x128xf32>
    %614 = vector.extract_strided_slice %205 {offsets = [1, 0], sizes = [14, 128], strides = [1, 1]} : vector<16x128xf32> to vector<14x128xf32>
    %615 = vector.extract_strided_slice %205 {offsets = [2, 0], sizes = [14, 128], strides = [1, 1]} : vector<16x128xf32> to vector<14x128xf32>
    %c63 = arith.constant 63 : index
    %616 = memref.load %arg1[%c63] : memref<395xf32, #tpu.memory_space<smem>>
    %617 = vector.broadcast %616 : f32 to vector<14x128xf32>
    %618 = arith.mulf %617, %613 : vector<14x128xf32>
    %619 = arith.addf %552, %618 : vector<14x128xf32>
    %c64 = arith.constant 64 : index
    %620 = memref.load %arg1[%c64] : memref<395xf32, #tpu.memory_space<smem>>
    %621 = vector.broadcast %620 : f32 to vector<14x128xf32>
    %622 = arith.mulf %621, %614 : vector<14x128xf32>
    %623 = arith.addf %619, %622 : vector<14x128xf32>
    %c65 = arith.constant 65 : index
    %624 = memref.load %arg1[%c65] : memref<395xf32, #tpu.memory_space<smem>>
    %625 = vector.broadcast %624 : f32 to vector<14x128xf32>
    %626 = arith.mulf %625, %615 : vector<14x128xf32>
    %627 = arith.addf %623, %626 : vector<14x128xf32>
    %c87 = arith.constant 87 : index
    %628 = memref.load %arg1[%c87] : memref<395xf32, #tpu.memory_space<smem>>
    %629 = vector.broadcast %628 : f32 to vector<14x128xf32>
    %630 = arith.mulf %629, %613 : vector<14x128xf32>
    %631 = arith.addf %564, %630 : vector<14x128xf32>
    %c88 = arith.constant 88 : index
    %632 = memref.load %arg1[%c88] : memref<395xf32, #tpu.memory_space<smem>>
    %633 = vector.broadcast %632 : f32 to vector<14x128xf32>
    %634 = arith.mulf %633, %614 : vector<14x128xf32>
    %635 = arith.addf %631, %634 : vector<14x128xf32>
    %c89 = arith.constant 89 : index
    %636 = memref.load %arg1[%c89] : memref<395xf32, #tpu.memory_space<smem>>
    %637 = vector.broadcast %636 : f32 to vector<14x128xf32>
    %638 = arith.mulf %637, %615 : vector<14x128xf32>
    %639 = arith.addf %635, %638 : vector<14x128xf32>
    %c111 = arith.constant 111 : index
    %640 = memref.load %arg1[%c111] : memref<395xf32, #tpu.memory_space<smem>>
    %641 = vector.broadcast %640 : f32 to vector<14x128xf32>
    %642 = arith.mulf %641, %613 : vector<14x128xf32>
    %643 = arith.addf %576, %642 : vector<14x128xf32>
    %c112 = arith.constant 112 : index
    %644 = memref.load %arg1[%c112] : memref<395xf32, #tpu.memory_space<smem>>
    %645 = vector.broadcast %644 : f32 to vector<14x128xf32>
    %646 = arith.mulf %645, %614 : vector<14x128xf32>
    %647 = arith.addf %643, %646 : vector<14x128xf32>
    %c113 = arith.constant 113 : index
    %648 = memref.load %arg1[%c113] : memref<395xf32, #tpu.memory_space<smem>>
    %649 = vector.broadcast %648 : f32 to vector<14x128xf32>
    %650 = arith.mulf %649, %615 : vector<14x128xf32>
    %651 = arith.addf %647, %650 : vector<14x128xf32>
    %c135 = arith.constant 135 : index
    %652 = memref.load %arg1[%c135] : memref<395xf32, #tpu.memory_space<smem>>
    %653 = vector.broadcast %652 : f32 to vector<14x128xf32>
    %654 = arith.mulf %653, %613 : vector<14x128xf32>
    %655 = arith.addf %588, %654 : vector<14x128xf32>
    %c136 = arith.constant 136 : index
    %656 = memref.load %arg1[%c136] : memref<395xf32, #tpu.memory_space<smem>>
    %657 = vector.broadcast %656 : f32 to vector<14x128xf32>
    %658 = arith.mulf %657, %614 : vector<14x128xf32>
    %659 = arith.addf %655, %658 : vector<14x128xf32>
    %c137 = arith.constant 137 : index
    %660 = memref.load %arg1[%c137] : memref<395xf32, #tpu.memory_space<smem>>
    %661 = vector.broadcast %660 : f32 to vector<14x128xf32>
    %662 = arith.mulf %661, %615 : vector<14x128xf32>
    %663 = arith.addf %659, %662 : vector<14x128xf32>
    %c159 = arith.constant 159 : index
    %664 = memref.load %arg1[%c159] : memref<395xf32, #tpu.memory_space<smem>>
    %665 = vector.broadcast %664 : f32 to vector<14x128xf32>
    %666 = arith.mulf %665, %613 : vector<14x128xf32>
    %667 = arith.addf %600, %666 : vector<14x128xf32>
    %c160 = arith.constant 160 : index
    %668 = memref.load %arg1[%c160] : memref<395xf32, #tpu.memory_space<smem>>
    %669 = vector.broadcast %668 : f32 to vector<14x128xf32>
    %670 = arith.mulf %669, %614 : vector<14x128xf32>
    %671 = arith.addf %667, %670 : vector<14x128xf32>
    %c161 = arith.constant 161 : index
    %672 = memref.load %arg1[%c161] : memref<395xf32, #tpu.memory_space<smem>>
    %673 = vector.broadcast %672 : f32 to vector<14x128xf32>
    %674 = arith.mulf %673, %615 : vector<14x128xf32>
    %675 = arith.addf %671, %674 : vector<14x128xf32>
    %c183 = arith.constant 183 : index
    %676 = memref.load %arg1[%c183] : memref<395xf32, #tpu.memory_space<smem>>
    %677 = vector.broadcast %676 : f32 to vector<14x128xf32>
    %678 = arith.mulf %677, %613 : vector<14x128xf32>
    %679 = arith.addf %612, %678 : vector<14x128xf32>
    %c184 = arith.constant 184 : index
    %680 = memref.load %arg1[%c184] : memref<395xf32, #tpu.memory_space<smem>>
    %681 = vector.broadcast %680 : f32 to vector<14x128xf32>
    %682 = arith.mulf %681, %614 : vector<14x128xf32>
    %683 = arith.addf %679, %682 : vector<14x128xf32>
    %c185 = arith.constant 185 : index
    %684 = memref.load %arg1[%c185] : memref<395xf32, #tpu.memory_space<smem>>
    %685 = vector.broadcast %684 : f32 to vector<14x128xf32>
    %686 = arith.mulf %685, %615 : vector<14x128xf32>
    %687 = arith.addf %683, %686 : vector<14x128xf32>
    %688 = vector.extract_strided_slice %224 {offsets = [0, 0], sizes = [14, 128], strides = [1, 1]} : vector<16x128xf32> to vector<14x128xf32>
    %689 = vector.extract_strided_slice %224 {offsets = [1, 0], sizes = [14, 128], strides = [1, 1]} : vector<16x128xf32> to vector<14x128xf32>
    %690 = vector.extract_strided_slice %224 {offsets = [2, 0], sizes = [14, 128], strides = [1, 1]} : vector<16x128xf32> to vector<14x128xf32>
    %c66 = arith.constant 66 : index
    %691 = memref.load %arg1[%c66] : memref<395xf32, #tpu.memory_space<smem>>
    %692 = vector.broadcast %691 : f32 to vector<14x128xf32>
    %693 = arith.mulf %692, %688 : vector<14x128xf32>
    %694 = arith.addf %627, %693 : vector<14x128xf32>
    %c67 = arith.constant 67 : index
    %695 = memref.load %arg1[%c67] : memref<395xf32, #tpu.memory_space<smem>>
    %696 = vector.broadcast %695 : f32 to vector<14x128xf32>
    %697 = arith.mulf %696, %689 : vector<14x128xf32>
    %698 = arith.addf %694, %697 : vector<14x128xf32>
    %c68 = arith.constant 68 : index
    %699 = memref.load %arg1[%c68] : memref<395xf32, #tpu.memory_space<smem>>
    %700 = vector.broadcast %699 : f32 to vector<14x128xf32>
    %701 = arith.mulf %700, %690 : vector<14x128xf32>
    %702 = arith.addf %698, %701 : vector<14x128xf32>
    %c90 = arith.constant 90 : index
    %703 = memref.load %arg1[%c90] : memref<395xf32, #tpu.memory_space<smem>>
    %704 = vector.broadcast %703 : f32 to vector<14x128xf32>
    %705 = arith.mulf %704, %688 : vector<14x128xf32>
    %706 = arith.addf %639, %705 : vector<14x128xf32>
    %c91 = arith.constant 91 : index
    %707 = memref.load %arg1[%c91] : memref<395xf32, #tpu.memory_space<smem>>
    %708 = vector.broadcast %707 : f32 to vector<14x128xf32>
    %709 = arith.mulf %708, %689 : vector<14x128xf32>
    %710 = arith.addf %706, %709 : vector<14x128xf32>
    %c92 = arith.constant 92 : index
    %711 = memref.load %arg1[%c92] : memref<395xf32, #tpu.memory_space<smem>>
    %712 = vector.broadcast %711 : f32 to vector<14x128xf32>
    %713 = arith.mulf %712, %690 : vector<14x128xf32>
    %714 = arith.addf %710, %713 : vector<14x128xf32>
    %c114 = arith.constant 114 : index
    %715 = memref.load %arg1[%c114] : memref<395xf32, #tpu.memory_space<smem>>
    %716 = vector.broadcast %715 : f32 to vector<14x128xf32>
    %717 = arith.mulf %716, %688 : vector<14x128xf32>
    %718 = arith.addf %651, %717 : vector<14x128xf32>
    %c115 = arith.constant 115 : index
    %719 = memref.load %arg1[%c115] : memref<395xf32, #tpu.memory_space<smem>>
    %720 = vector.broadcast %719 : f32 to vector<14x128xf32>
    %721 = arith.mulf %720, %689 : vector<14x128xf32>
    %722 = arith.addf %718, %721 : vector<14x128xf32>
    %c116 = arith.constant 116 : index
    %723 = memref.load %arg1[%c116] : memref<395xf32, #tpu.memory_space<smem>>
    %724 = vector.broadcast %723 : f32 to vector<14x128xf32>
    %725 = arith.mulf %724, %690 : vector<14x128xf32>
    %726 = arith.addf %722, %725 : vector<14x128xf32>
    %c138 = arith.constant 138 : index
    %727 = memref.load %arg1[%c138] : memref<395xf32, #tpu.memory_space<smem>>
    %728 = vector.broadcast %727 : f32 to vector<14x128xf32>
    %729 = arith.mulf %728, %688 : vector<14x128xf32>
    %730 = arith.addf %663, %729 : vector<14x128xf32>
    %c139 = arith.constant 139 : index
    %731 = memref.load %arg1[%c139] : memref<395xf32, #tpu.memory_space<smem>>
    %732 = vector.broadcast %731 : f32 to vector<14x128xf32>
    %733 = arith.mulf %732, %689 : vector<14x128xf32>
    %734 = arith.addf %730, %733 : vector<14x128xf32>
    %c140 = arith.constant 140 : index
    %735 = memref.load %arg1[%c140] : memref<395xf32, #tpu.memory_space<smem>>
    %736 = vector.broadcast %735 : f32 to vector<14x128xf32>
    %737 = arith.mulf %736, %690 : vector<14x128xf32>
    %738 = arith.addf %734, %737 : vector<14x128xf32>
    %c162 = arith.constant 162 : index
    %739 = memref.load %arg1[%c162] : memref<395xf32, #tpu.memory_space<smem>>
    %740 = vector.broadcast %739 : f32 to vector<14x128xf32>
    %741 = arith.mulf %740, %688 : vector<14x128xf32>
    %742 = arith.addf %675, %741 : vector<14x128xf32>
    %c163 = arith.constant 163 : index
    %743 = memref.load %arg1[%c163] : memref<395xf32, #tpu.memory_space<smem>>
    %744 = vector.broadcast %743 : f32 to vector<14x128xf32>
    %745 = arith.mulf %744, %689 : vector<14x128xf32>
    %746 = arith.addf %742, %745 : vector<14x128xf32>
    %c164 = arith.constant 164 : index
    %747 = memref.load %arg1[%c164] : memref<395xf32, #tpu.memory_space<smem>>
    %748 = vector.broadcast %747 : f32 to vector<14x128xf32>
    %749 = arith.mulf %748, %690 : vector<14x128xf32>
    %750 = arith.addf %746, %749 : vector<14x128xf32>
    %c186 = arith.constant 186 : index
    %751 = memref.load %arg1[%c186] : memref<395xf32, #tpu.memory_space<smem>>
    %752 = vector.broadcast %751 : f32 to vector<14x128xf32>
    %753 = arith.mulf %752, %688 : vector<14x128xf32>
    %754 = arith.addf %687, %753 : vector<14x128xf32>
    %c187 = arith.constant 187 : index
    %755 = memref.load %arg1[%c187] : memref<395xf32, #tpu.memory_space<smem>>
    %756 = vector.broadcast %755 : f32 to vector<14x128xf32>
    %757 = arith.mulf %756, %689 : vector<14x128xf32>
    %758 = arith.addf %754, %757 : vector<14x128xf32>
    %c188 = arith.constant 188 : index
    %759 = memref.load %arg1[%c188] : memref<395xf32, #tpu.memory_space<smem>>
    %760 = vector.broadcast %759 : f32 to vector<14x128xf32>
    %761 = arith.mulf %760, %690 : vector<14x128xf32>
    %762 = arith.addf %758, %761 : vector<14x128xf32>
    %763 = vector.extract_strided_slice %243 {offsets = [0, 0], sizes = [14, 128], strides = [1, 1]} : vector<16x128xf32> to vector<14x128xf32>
    %764 = vector.extract_strided_slice %243 {offsets = [1, 0], sizes = [14, 128], strides = [1, 1]} : vector<16x128xf32> to vector<14x128xf32>
    %765 = vector.extract_strided_slice %243 {offsets = [2, 0], sizes = [14, 128], strides = [1, 1]} : vector<16x128xf32> to vector<14x128xf32>
    %c69 = arith.constant 69 : index
    %766 = memref.load %arg1[%c69] : memref<395xf32, #tpu.memory_space<smem>>
    %767 = vector.broadcast %766 : f32 to vector<14x128xf32>
    %768 = arith.mulf %767, %763 : vector<14x128xf32>
    %769 = arith.addf %702, %768 : vector<14x128xf32>
    %c70 = arith.constant 70 : index
    %770 = memref.load %arg1[%c70] : memref<395xf32, #tpu.memory_space<smem>>
    %771 = vector.broadcast %770 : f32 to vector<14x128xf32>
    %772 = arith.mulf %771, %764 : vector<14x128xf32>
    %773 = arith.addf %769, %772 : vector<14x128xf32>
    %c71 = arith.constant 71 : index
    %774 = memref.load %arg1[%c71] : memref<395xf32, #tpu.memory_space<smem>>
    %775 = vector.broadcast %774 : f32 to vector<14x128xf32>
    %776 = arith.mulf %775, %765 : vector<14x128xf32>
    %777 = arith.addf %773, %776 : vector<14x128xf32>
    %c93 = arith.constant 93 : index
    %778 = memref.load %arg1[%c93] : memref<395xf32, #tpu.memory_space<smem>>
    %779 = vector.broadcast %778 : f32 to vector<14x128xf32>
    %780 = arith.mulf %779, %763 : vector<14x128xf32>
    %781 = arith.addf %714, %780 : vector<14x128xf32>
    %c94 = arith.constant 94 : index
    %782 = memref.load %arg1[%c94] : memref<395xf32, #tpu.memory_space<smem>>
    %783 = vector.broadcast %782 : f32 to vector<14x128xf32>
    %784 = arith.mulf %783, %764 : vector<14x128xf32>
    %785 = arith.addf %781, %784 : vector<14x128xf32>
    %c95 = arith.constant 95 : index
    %786 = memref.load %arg1[%c95] : memref<395xf32, #tpu.memory_space<smem>>
    %787 = vector.broadcast %786 : f32 to vector<14x128xf32>
    %788 = arith.mulf %787, %765 : vector<14x128xf32>
    %789 = arith.addf %785, %788 : vector<14x128xf32>
    %c117 = arith.constant 117 : index
    %790 = memref.load %arg1[%c117] : memref<395xf32, #tpu.memory_space<smem>>
    %791 = vector.broadcast %790 : f32 to vector<14x128xf32>
    %792 = arith.mulf %791, %763 : vector<14x128xf32>
    %793 = arith.addf %726, %792 : vector<14x128xf32>
    %c118 = arith.constant 118 : index
    %794 = memref.load %arg1[%c118] : memref<395xf32, #tpu.memory_space<smem>>
    %795 = vector.broadcast %794 : f32 to vector<14x128xf32>
    %796 = arith.mulf %795, %764 : vector<14x128xf32>
    %797 = arith.addf %793, %796 : vector<14x128xf32>
    %c119 = arith.constant 119 : index
    %798 = memref.load %arg1[%c119] : memref<395xf32, #tpu.memory_space<smem>>
    %799 = vector.broadcast %798 : f32 to vector<14x128xf32>
    %800 = arith.mulf %799, %765 : vector<14x128xf32>
    %801 = arith.addf %797, %800 : vector<14x128xf32>
    %c141 = arith.constant 141 : index
    %802 = memref.load %arg1[%c141] : memref<395xf32, #tpu.memory_space<smem>>
    %803 = vector.broadcast %802 : f32 to vector<14x128xf32>
    %804 = arith.mulf %803, %763 : vector<14x128xf32>
    %805 = arith.addf %738, %804 : vector<14x128xf32>
    %c142 = arith.constant 142 : index
    %806 = memref.load %arg1[%c142] : memref<395xf32, #tpu.memory_space<smem>>
    %807 = vector.broadcast %806 : f32 to vector<14x128xf32>
    %808 = arith.mulf %807, %764 : vector<14x128xf32>
    %809 = arith.addf %805, %808 : vector<14x128xf32>
    %c143 = arith.constant 143 : index
    %810 = memref.load %arg1[%c143] : memref<395xf32, #tpu.memory_space<smem>>
    %811 = vector.broadcast %810 : f32 to vector<14x128xf32>
    %812 = arith.mulf %811, %765 : vector<14x128xf32>
    %813 = arith.addf %809, %812 : vector<14x128xf32>
    %c165 = arith.constant 165 : index
    %814 = memref.load %arg1[%c165] : memref<395xf32, #tpu.memory_space<smem>>
    %815 = vector.broadcast %814 : f32 to vector<14x128xf32>
    %816 = arith.mulf %815, %763 : vector<14x128xf32>
    %817 = arith.addf %750, %816 : vector<14x128xf32>
    %c166 = arith.constant 166 : index
    %818 = memref.load %arg1[%c166] : memref<395xf32, #tpu.memory_space<smem>>
    %819 = vector.broadcast %818 : f32 to vector<14x128xf32>
    %820 = arith.mulf %819, %764 : vector<14x128xf32>
    %821 = arith.addf %817, %820 : vector<14x128xf32>
    %c167 = arith.constant 167 : index
    %822 = memref.load %arg1[%c167] : memref<395xf32, #tpu.memory_space<smem>>
    %823 = vector.broadcast %822 : f32 to vector<14x128xf32>
    %824 = arith.mulf %823, %765 : vector<14x128xf32>
    %825 = arith.addf %821, %824 : vector<14x128xf32>
    %c189 = arith.constant 189 : index
    %826 = memref.load %arg1[%c189] : memref<395xf32, #tpu.memory_space<smem>>
    %827 = vector.broadcast %826 : f32 to vector<14x128xf32>
    %828 = arith.mulf %827, %763 : vector<14x128xf32>
    %829 = arith.addf %762, %828 : vector<14x128xf32>
    %c190 = arith.constant 190 : index
    %830 = memref.load %arg1[%c190] : memref<395xf32, #tpu.memory_space<smem>>
    %831 = vector.broadcast %830 : f32 to vector<14x128xf32>
    %832 = arith.mulf %831, %764 : vector<14x128xf32>
    %833 = arith.addf %829, %832 : vector<14x128xf32>
    %c191 = arith.constant 191 : index
    %834 = memref.load %arg1[%c191] : memref<395xf32, #tpu.memory_space<smem>>
    %835 = vector.broadcast %834 : f32 to vector<14x128xf32>
    %836 = arith.mulf %835, %765 : vector<14x128xf32>
    %837 = arith.addf %833, %836 : vector<14x128xf32>
    %c192_37 = arith.constant 192 : index
    %838 = memref.load %arg1[%c192_37] : memref<395xf32, #tpu.memory_space<smem>>
    %839 = vector.broadcast %838 : f32 to vector<14x128xf32>
    %840 = arith.addf %777, %839 : vector<14x128xf32>
    %841 = vector.extract_strided_slice %840 {offsets = [0, 0], sizes = [12, 128], strides = [1, 1]} : vector<14x128xf32> to vector<12x128xf32>
    %842 = vector.extract_strided_slice %840 {offsets = [1, 0], sizes = [12, 128], strides = [1, 1]} : vector<14x128xf32> to vector<12x128xf32>
    %843 = arith.maximumf %841, %842 : vector<12x128xf32>
    %844 = vector.extract_strided_slice %840 {offsets = [2, 0], sizes = [12, 128], strides = [1, 1]} : vector<14x128xf32> to vector<12x128xf32>
    %845 = arith.maximumf %843, %844 : vector<12x128xf32>
    %c384 = arith.constant 384 : index
    %c0_38 = arith.constant 0 : index
    %846 = vector.load %arg4[%c384, %c0_38] : memref<552x128xf32, #tpu.memory_space<vmem>>, vector<12x128xf32>
    tpu.vector_store %arg4[%c384, %c0_38], %845 {strides = array<i32>} : memref<552x128xf32, #tpu.memory_space<vmem>>, vector<12x128xf32>,
    %c384_39 = arith.constant 384 : index
    %c0_40 = arith.constant 0 : index
    %847 = tpu.strided_load %arg4[%c384_39, %c0_40] {strides = array<i32: 3, 1>} : memref<552x128xf32, #tpu.memory_space<vmem>>, vector<4x128xf32>
    %cst_41 = arith.constant 1.000000e-01 : f32
    %848 = vector.broadcast %cst_41 : f32 to vector<4x128xf32>
    %849 = arith.mulf %848, %847 : vector<4x128xf32>
    %850 = arith.maximumf %847, %849 : vector<4x128xf32>
    %c198 = arith.constant 198 : index
    %851 = memref.load %arg1[%c198] : memref<395xf32, #tpu.memory_space<smem>>
    %852 = vector.broadcast %851 : f32 to vector<4x128xf32>
    %853 = arith.mulf %850, %852 : vector<4x128xf32>
    %c204 = arith.constant 204 : index
    %854 = memref.load %arg1[%c204] : memref<395xf32, #tpu.memory_space<smem>>
    %855 = vector.broadcast %854 : f32 to vector<4x128xf32>
    %856 = arith.addf %853, %855 : vector<4x128xf32>
    %c193 = arith.constant 193 : index
    %857 = memref.load %arg1[%c193] : memref<395xf32, #tpu.memory_space<smem>>
    %858 = vector.broadcast %857 : f32 to vector<14x128xf32>
    %859 = arith.addf %789, %858 : vector<14x128xf32>
    %860 = vector.extract_strided_slice %859 {offsets = [0, 0], sizes = [12, 128], strides = [1, 1]} : vector<14x128xf32> to vector<12x128xf32>
    %861 = vector.extract_strided_slice %859 {offsets = [1, 0], sizes = [12, 128], strides = [1, 1]} : vector<14x128xf32> to vector<12x128xf32>
    %862 = arith.maximumf %860, %861 : vector<12x128xf32>
    %863 = vector.extract_strided_slice %859 {offsets = [2, 0], sizes = [12, 128], strides = [1, 1]} : vector<14x128xf32> to vector<12x128xf32>
    %864 = arith.maximumf %862, %863 : vector<12x128xf32>
    %c400 = arith.constant 400 : index
    %c0_42 = arith.constant 0 : index
    %865 = vector.load %arg4[%c400, %c0_42] : memref<552x128xf32, #tpu.memory_space<vmem>>, vector<12x128xf32>
    tpu.vector_store %arg4[%c400, %c0_42], %864 {strides = array<i32>} : memref<552x128xf32, #tpu.memory_space<vmem>>, vector<12x128xf32>,
    %c400_43 = arith.constant 400 : index
    %c0_44 = arith.constant 0 : index
    %866 = tpu.strided_load %arg4[%c400_43, %c0_44] {strides = array<i32: 3, 1>} : memref<552x128xf32, #tpu.memory_space<vmem>>, vector<4x128xf32>
    %cst_45 = arith.constant 1.000000e-01 : f32
    %867 = vector.broadcast %cst_45 : f32 to vector<4x128xf32>
    %868 = arith.mulf %867, %866 : vector<4x128xf32>
    %869 = arith.maximumf %866, %868 : vector<4x128xf32>
    %c199 = arith.constant 199 : index
    %870 = memref.load %arg1[%c199] : memref<395xf32, #tpu.memory_space<smem>>
    %871 = vector.broadcast %870 : f32 to vector<4x128xf32>
    %872 = arith.mulf %869, %871 : vector<4x128xf32>
    %c205 = arith.constant 205 : index
    %873 = memref.load %arg1[%c205] : memref<395xf32, #tpu.memory_space<smem>>
    %874 = vector.broadcast %873 : f32 to vector<4x128xf32>
    %875 = arith.addf %872, %874 : vector<4x128xf32>
    %c194 = arith.constant 194 : index
    %876 = memref.load %arg1[%c194] : memref<395xf32, #tpu.memory_space<smem>>
    %877 = vector.broadcast %876 : f32 to vector<14x128xf32>
    %878 = arith.addf %801, %877 : vector<14x128xf32>
    %879 = vector.extract_strided_slice %878 {offsets = [0, 0], sizes = [12, 128], strides = [1, 1]} : vector<14x128xf32> to vector<12x128xf32>
    %880 = vector.extract_strided_slice %878 {offsets = [1, 0], sizes = [12, 128], strides = [1, 1]} : vector<14x128xf32> to vector<12x128xf32>
    %881 = arith.maximumf %879, %880 : vector<12x128xf32>
    %882 = vector.extract_strided_slice %878 {offsets = [2, 0], sizes = [12, 128], strides = [1, 1]} : vector<14x128xf32> to vector<12x128xf32>
    %883 = arith.maximumf %881, %882 : vector<12x128xf32>
    %c416 = arith.constant 416 : index
    %c0_46 = arith.constant 0 : index
    %884 = vector.load %arg4[%c416, %c0_46] : memref<552x128xf32, #tpu.memory_space<vmem>>, vector<12x128xf32>
    tpu.vector_store %arg4[%c416, %c0_46], %883 {strides = array<i32>} : memref<552x128xf32, #tpu.memory_space<vmem>>, vector<12x128xf32>,
    %c416_47 = arith.constant 416 : index
    %c0_48 = arith.constant 0 : index
    %885 = tpu.strided_load %arg4[%c416_47, %c0_48] {strides = array<i32: 3, 1>} : memref<552x128xf32, #tpu.memory_space<vmem>>, vector<4x128xf32>
    %cst_49 = arith.constant 1.000000e-01 : f32
    %886 = vector.broadcast %cst_49 : f32 to vector<4x128xf32>
    %887 = arith.mulf %886, %885 : vector<4x128xf32>
    %888 = arith.maximumf %885, %887 : vector<4x128xf32>
    %c200 = arith.constant 200 : index
    %889 = memref.load %arg1[%c200] : memref<395xf32, #tpu.memory_space<smem>>
    %890 = vector.broadcast %889 : f32 to vector<4x128xf32>
    %891 = arith.mulf %888, %890 : vector<4x128xf32>
    %c206 = arith.constant 206 : index
    %892 = memref.load %arg1[%c206] : memref<395xf32, #tpu.memory_space<smem>>
    %893 = vector.broadcast %892 : f32 to vector<4x128xf32>
    %894 = arith.addf %891, %893 : vector<4x128xf32>
    %c195 = arith.constant 195 : index
    %895 = memref.load %arg1[%c195] : memref<395xf32, #tpu.memory_space<smem>>
    %896 = vector.broadcast %895 : f32 to vector<14x128xf32>
    %897 = arith.addf %813, %896 : vector<14x128xf32>
    %898 = vector.extract_strided_slice %897 {offsets = [0, 0], sizes = [12, 128], strides = [1, 1]} : vector<14x128xf32> to vector<12x128xf32>
    %899 = vector.extract_strided_slice %897 {offsets = [1, 0], sizes = [12, 128], strides = [1, 1]} : vector<14x128xf32> to vector<12x128xf32>
    %900 = arith.maximumf %898, %899 : vector<12x128xf32>
    %901 = vector.extract_strided_slice %897 {offsets = [2, 0], sizes = [12, 128], strides = [1, 1]} : vector<14x128xf32> to vector<12x128xf32>
    %902 = arith.maximumf %900, %901 : vector<12x128xf32>
    %c432 = arith.constant 432 : index
    %c0_50 = arith.constant 0 : index
    %903 = vector.load %arg4[%c432, %c0_50] : memref<552x128xf32, #tpu.memory_space<vmem>>, vector<12x128xf32>
    tpu.vector_store %arg4[%c432, %c0_50], %902 {strides = array<i32>} : memref<552x128xf32, #tpu.memory_space<vmem>>, vector<12x128xf32>,
    %c432_51 = arith.constant 432 : index
    %c0_52 = arith.constant 0 : index
    %904 = tpu.strided_load %arg4[%c432_51, %c0_52] {strides = array<i32: 3, 1>} : memref<552x128xf32, #tpu.memory_space<vmem>>, vector<4x128xf32>
    %cst_53 = arith.constant 1.000000e-01 : f32
    %905 = vector.broadcast %cst_53 : f32 to vector<4x128xf32>
    %906 = arith.mulf %905, %904 : vector<4x128xf32>
    %907 = arith.maximumf %904, %906 : vector<4x128xf32>
    %c201 = arith.constant 201 : index
    %908 = memref.load %arg1[%c201] : memref<395xf32, #tpu.memory_space<smem>>
    %909 = vector.broadcast %908 : f32 to vector<4x128xf32>
    %910 = arith.mulf %907, %909 : vector<4x128xf32>
    %c207 = arith.constant 207 : index
    %911 = memref.load %arg1[%c207] : memref<395xf32, #tpu.memory_space<smem>>
    %912 = vector.broadcast %911 : f32 to vector<4x128xf32>
    %913 = arith.addf %910, %912 : vector<4x128xf32>
    %c196 = arith.constant 196 : index
    %914 = memref.load %arg1[%c196] : memref<395xf32, #tpu.memory_space<smem>>
    %915 = vector.broadcast %914 : f32 to vector<14x128xf32>
    %916 = arith.addf %825, %915 : vector<14x128xf32>
    %917 = vector.extract_strided_slice %916 {offsets = [0, 0], sizes = [12, 128], strides = [1, 1]} : vector<14x128xf32> to vector<12x128xf32>
    %918 = vector.extract_strided_slice %916 {offsets = [1, 0], sizes = [12, 128], strides = [1, 1]} : vector<14x128xf32> to vector<12x128xf32>
    %919 = arith.maximumf %917, %918 : vector<12x128xf32>
    %920 = vector.extract_strided_slice %916 {offsets = [2, 0], sizes = [12, 128], strides = [1, 1]} : vector<14x128xf32> to vector<12x128xf32>
    %921 = arith.maximumf %919, %920 : vector<12x128xf32>
    %c448 = arith.constant 448 : index
    %c0_54 = arith.constant 0 : index
    %922 = vector.load %arg4[%c448, %c0_54] : memref<552x128xf32, #tpu.memory_space<vmem>>, vector<12x128xf32>
    tpu.vector_store %arg4[%c448, %c0_54], %921 {strides = array<i32>} : memref<552x128xf32, #tpu.memory_space<vmem>>, vector<12x128xf32>,
    %c448_55 = arith.constant 448 : index
    %c0_56 = arith.constant 0 : index
    %923 = tpu.strided_load %arg4[%c448_55, %c0_56] {strides = array<i32: 3, 1>} : memref<552x128xf32, #tpu.memory_space<vmem>>, vector<4x128xf32>
    %cst_57 = arith.constant 1.000000e-01 : f32
    %924 = vector.broadcast %cst_57 : f32 to vector<4x128xf32>
    %925 = arith.mulf %924, %923 : vector<4x128xf32>
    %926 = arith.maximumf %923, %925 : vector<4x128xf32>
    %c202 = arith.constant 202 : index
    %927 = memref.load %arg1[%c202] : memref<395xf32, #tpu.memory_space<smem>>
    %928 = vector.broadcast %927 : f32 to vector<4x128xf32>
    %929 = arith.mulf %926, %928 : vector<4x128xf32>
    %c208 = arith.constant 208 : index
    %930 = memref.load %arg1[%c208] : memref<395xf32, #tpu.memory_space<smem>>
    %931 = vector.broadcast %930 : f32 to vector<4x128xf32>
    %932 = arith.addf %929, %931 : vector<4x128xf32>
    %c197 = arith.constant 197 : index
    %933 = memref.load %arg1[%c197] : memref<395xf32, #tpu.memory_space<smem>>
    %934 = vector.broadcast %933 : f32 to vector<14x128xf32>
    %935 = arith.addf %837, %934 : vector<14x128xf32>
    %936 = vector.extract_strided_slice %935 {offsets = [0, 0], sizes = [12, 128], strides = [1, 1]} : vector<14x128xf32> to vector<12x128xf32>
    %937 = vector.extract_strided_slice %935 {offsets = [1, 0], sizes = [12, 128], strides = [1, 1]} : vector<14x128xf32> to vector<12x128xf32>
    %938 = arith.maximumf %936, %937 : vector<12x128xf32>
    %939 = vector.extract_strided_slice %935 {offsets = [2, 0], sizes = [12, 128], strides = [1, 1]} : vector<14x128xf32> to vector<12x128xf32>
    %940 = arith.maximumf %938, %939 : vector<12x128xf32>
    %c464 = arith.constant 464 : index
    %c0_58 = arith.constant 0 : index
    %941 = vector.load %arg4[%c464, %c0_58] : memref<552x128xf32, #tpu.memory_space<vmem>>, vector<12x128xf32>
    tpu.vector_store %arg4[%c464, %c0_58], %940 {strides = array<i32>} : memref<552x128xf32, #tpu.memory_space<vmem>>, vector<12x128xf32>,
    %c464_59 = arith.constant 464 : index
    %c0_60 = arith.constant 0 : index
    %942 = tpu.strided_load %arg4[%c464_59, %c0_60] {strides = array<i32: 3, 1>} : memref<552x128xf32, #tpu.memory_space<vmem>>, vector<4x128xf32>
    %cst_61 = arith.constant 1.000000e-01 : f32
    %943 = vector.broadcast %cst_61 : f32 to vector<4x128xf32>
    %944 = arith.mulf %943, %942 : vector<4x128xf32>
    %945 = arith.maximumf %942, %944 : vector<4x128xf32>
    %c203 = arith.constant 203 : index
    %946 = memref.load %arg1[%c203] : memref<395xf32, #tpu.memory_space<smem>>
    %947 = vector.broadcast %946 : f32 to vector<4x128xf32>
    %948 = arith.mulf %945, %947 : vector<4x128xf32>
    %c209 = arith.constant 209 : index
    %949 = memref.load %arg1[%c209] : memref<395xf32, #tpu.memory_space<smem>>
    %950 = vector.broadcast %949 : f32 to vector<4x128xf32>
    %951 = arith.addf %948, %950 : vector<4x128xf32>
    %952 = vector.extract_strided_slice %856 {offsets = [0, 0], sizes = [2, 128], strides = [1, 1]} : vector<4x128xf32> to vector<2x128xf32>
    %953 = vector.extract_strided_slice %856 {offsets = [1, 0], sizes = [2, 128], strides = [1, 1]} : vector<4x128xf32> to vector<2x128xf32>
    %954 = vector.extract_strided_slice %856 {offsets = [2, 0], sizes = [2, 128], strides = [1, 1]} : vector<4x128xf32> to vector<2x128xf32>
    %c210 = arith.constant 210 : index
    %955 = memref.load %arg1[%c210] : memref<395xf32, #tpu.memory_space<smem>>
    %956 = vector.broadcast %955 : f32 to vector<2x128xf32>
    %957 = arith.mulf %956, %952 : vector<2x128xf32>
    %c211 = arith.constant 211 : index
    %958 = memref.load %arg1[%c211] : memref<395xf32, #tpu.memory_space<smem>>
    %959 = vector.broadcast %958 : f32 to vector<2x128xf32>
    %960 = arith.mulf %959, %953 : vector<2x128xf32>
    %961 = arith.addf %957, %960 : vector<2x128xf32>
    %c212 = arith.constant 212 : index
    %962 = memref.load %arg1[%c212] : memref<395xf32, #tpu.memory_space<smem>>
    %963 = vector.broadcast %962 : f32 to vector<2x128xf32>
    %964 = arith.mulf %963, %954 : vector<2x128xf32>
    %965 = arith.addf %961, %964 : vector<2x128xf32>
    %c228 = arith.constant 228 : index
    %966 = memref.load %arg1[%c228] : memref<395xf32, #tpu.memory_space<smem>>
    %967 = vector.broadcast %966 : f32 to vector<2x128xf32>
    %968 = arith.mulf %967, %952 : vector<2x128xf32>
    %c229 = arith.constant 229 : index
    %969 = memref.load %arg1[%c229] : memref<395xf32, #tpu.memory_space<smem>>
    %970 = vector.broadcast %969 : f32 to vector<2x128xf32>
    %971 = arith.mulf %970, %953 : vector<2x128xf32>
    %972 = arith.addf %968, %971 : vector<2x128xf32>
    %c230 = arith.constant 230 : index
    %973 = memref.load %arg1[%c230] : memref<395xf32, #tpu.memory_space<smem>>
    %974 = vector.broadcast %973 : f32 to vector<2x128xf32>
    %975 = arith.mulf %974, %954 : vector<2x128xf32>
    %976 = arith.addf %972, %975 : vector<2x128xf32>
    %c246 = arith.constant 246 : index
    %977 = memref.load %arg1[%c246] : memref<395xf32, #tpu.memory_space<smem>>
    %978 = vector.broadcast %977 : f32 to vector<2x128xf32>
    %979 = arith.mulf %978, %952 : vector<2x128xf32>
    %c247 = arith.constant 247 : index
    %980 = memref.load %arg1[%c247] : memref<395xf32, #tpu.memory_space<smem>>
    %981 = vector.broadcast %980 : f32 to vector<2x128xf32>
    %982 = arith.mulf %981, %953 : vector<2x128xf32>
    %983 = arith.addf %979, %982 : vector<2x128xf32>
    %c248 = arith.constant 248 : index
    %984 = memref.load %arg1[%c248] : memref<395xf32, #tpu.memory_space<smem>>
    %985 = vector.broadcast %984 : f32 to vector<2x128xf32>
    %986 = arith.mulf %985, %954 : vector<2x128xf32>
    %987 = arith.addf %983, %986 : vector<2x128xf32>
    %c264 = arith.constant 264 : index
    %988 = memref.load %arg1[%c264] : memref<395xf32, #tpu.memory_space<smem>>
    %989 = vector.broadcast %988 : f32 to vector<2x128xf32>
    %990 = arith.mulf %989, %952 : vector<2x128xf32>
    %c265 = arith.constant 265 : index
    %991 = memref.load %arg1[%c265] : memref<395xf32, #tpu.memory_space<smem>>
    %992 = vector.broadcast %991 : f32 to vector<2x128xf32>
    %993 = arith.mulf %992, %953 : vector<2x128xf32>
    %994 = arith.addf %990, %993 : vector<2x128xf32>
    %c266 = arith.constant 266 : index
    %995 = memref.load %arg1[%c266] : memref<395xf32, #tpu.memory_space<smem>>
    %996 = vector.broadcast %995 : f32 to vector<2x128xf32>
    %997 = arith.mulf %996, %954 : vector<2x128xf32>
    %998 = arith.addf %994, %997 : vector<2x128xf32>
    %999 = vector.extract_strided_slice %875 {offsets = [0, 0], sizes = [2, 128], strides = [1, 1]} : vector<4x128xf32> to vector<2x128xf32>
    %1000 = vector.extract_strided_slice %875 {offsets = [1, 0], sizes = [2, 128], strides = [1, 1]} : vector<4x128xf32> to vector<2x128xf32>
    %1001 = vector.extract_strided_slice %875 {offsets = [2, 0], sizes = [2, 128], strides = [1, 1]} : vector<4x128xf32> to vector<2x128xf32>
    %c213 = arith.constant 213 : index
    %1002 = memref.load %arg1[%c213] : memref<395xf32, #tpu.memory_space<smem>>
    %1003 = vector.broadcast %1002 : f32 to vector<2x128xf32>
    %1004 = arith.mulf %1003, %999 : vector<2x128xf32>
    %1005 = arith.addf %965, %1004 : vector<2x128xf32>
    %c214 = arith.constant 214 : index
    %1006 = memref.load %arg1[%c214] : memref<395xf32, #tpu.memory_space<smem>>
    %1007 = vector.broadcast %1006 : f32 to vector<2x128xf32>
    %1008 = arith.mulf %1007, %1000 : vector<2x128xf32>
    %1009 = arith.addf %1005, %1008 : vector<2x128xf32>
    %c215 = arith.constant 215 : index
    %1010 = memref.load %arg1[%c215] : memref<395xf32, #tpu.memory_space<smem>>
    %1011 = vector.broadcast %1010 : f32 to vector<2x128xf32>
    %1012 = arith.mulf %1011, %1001 : vector<2x128xf32>
    %1013 = arith.addf %1009, %1012 : vector<2x128xf32>
    %c231 = arith.constant 231 : index
    %1014 = memref.load %arg1[%c231] : memref<395xf32, #tpu.memory_space<smem>>
    %1015 = vector.broadcast %1014 : f32 to vector<2x128xf32>
    %1016 = arith.mulf %1015, %999 : vector<2x128xf32>
    %1017 = arith.addf %976, %1016 : vector<2x128xf32>
    %c232 = arith.constant 232 : index
    %1018 = memref.load %arg1[%c232] : memref<395xf32, #tpu.memory_space<smem>>
    %1019 = vector.broadcast %1018 : f32 to vector<2x128xf32>
    %1020 = arith.mulf %1019, %1000 : vector<2x128xf32>
    %1021 = arith.addf %1017, %1020 : vector<2x128xf32>
    %c233 = arith.constant 233 : index
    %1022 = memref.load %arg1[%c233] : memref<395xf32, #tpu.memory_space<smem>>
    %1023 = vector.broadcast %1022 : f32 to vector<2x128xf32>
    %1024 = arith.mulf %1023, %1001 : vector<2x128xf32>
    %1025 = arith.addf %1021, %1024 : vector<2x128xf32>
    %c249 = arith.constant 249 : index
    %1026 = memref.load %arg1[%c249] : memref<395xf32, #tpu.memory_space<smem>>
    %1027 = vector.broadcast %1026 : f32 to vector<2x128xf32>
    %1028 = arith.mulf %1027, %999 : vector<2x128xf32>
    %1029 = arith.addf %987, %1028 : vector<2x128xf32>
    %c250 = arith.constant 250 : index
    %1030 = memref.load %arg1[%c250] : memref<395xf32, #tpu.memory_space<smem>>
    %1031 = vector.broadcast %1030 : f32 to vector<2x128xf32>
    %1032 = arith.mulf %1031, %1000 : vector<2x128xf32>
    %1033 = arith.addf %1029, %1032 : vector<2x128xf32>
    %c251 = arith.constant 251 : index
    %1034 = memref.load %arg1[%c251] : memref<395xf32, #tpu.memory_space<smem>>
    %1035 = vector.broadcast %1034 : f32 to vector<2x128xf32>
    %1036 = arith.mulf %1035, %1001 : vector<2x128xf32>
    %1037 = arith.addf %1033, %1036 : vector<2x128xf32>
    %c267 = arith.constant 267 : index
    %1038 = memref.load %arg1[%c267] : memref<395xf32, #tpu.memory_space<smem>>
    %1039 = vector.broadcast %1038 : f32 to vector<2x128xf32>
    %1040 = arith.mulf %1039, %999 : vector<2x128xf32>
    %1041 = arith.addf %998, %1040 : vector<2x128xf32>
    %c268 = arith.constant 268 : index
    %1042 = memref.load %arg1[%c268] : memref<395xf32, #tpu.memory_space<smem>>
    %1043 = vector.broadcast %1042 : f32 to vector<2x128xf32>
    %1044 = arith.mulf %1043, %1000 : vector<2x128xf32>
    %1045 = arith.addf %1041, %1044 : vector<2x128xf32>
    %c269 = arith.constant 269 : index
    %1046 = memref.load %arg1[%c269] : memref<395xf32, #tpu.memory_space<smem>>
    %1047 = vector.broadcast %1046 : f32 to vector<2x128xf32>
    %1048 = arith.mulf %1047, %1001 : vector<2x128xf32>
    %1049 = arith.addf %1045, %1048 : vector<2x128xf32>
    %1050 = vector.extract_strided_slice %894 {offsets = [0, 0], sizes = [2, 128], strides = [1, 1]} : vector<4x128xf32> to vector<2x128xf32>
    %1051 = vector.extract_strided_slice %894 {offsets = [1, 0], sizes = [2, 128], strides = [1, 1]} : vector<4x128xf32> to vector<2x128xf32>
    %1052 = vector.extract_strided_slice %894 {offsets = [2, 0], sizes = [2, 128], strides = [1, 1]} : vector<4x128xf32> to vector<2x128xf32>
    %c216 = arith.constant 216 : index
    %1053 = memref.load %arg1[%c216] : memref<395xf32, #tpu.memory_space<smem>>
    %1054 = vector.broadcast %1053 : f32 to vector<2x128xf32>
    %1055 = arith.mulf %1054, %1050 : vector<2x128xf32>
    %1056 = arith.addf %1013, %1055 : vector<2x128xf32>
    %c217 = arith.constant 217 : index
    %1057 = memref.load %arg1[%c217] : memref<395xf32, #tpu.memory_space<smem>>
    %1058 = vector.broadcast %1057 : f32 to vector<2x128xf32>
    %1059 = arith.mulf %1058, %1051 : vector<2x128xf32>
    %1060 = arith.addf %1056, %1059 : vector<2x128xf32>
    %c218 = arith.constant 218 : index
    %1061 = memref.load %arg1[%c218] : memref<395xf32, #tpu.memory_space<smem>>
    %1062 = vector.broadcast %1061 : f32 to vector<2x128xf32>
    %1063 = arith.mulf %1062, %1052 : vector<2x128xf32>
    %1064 = arith.addf %1060, %1063 : vector<2x128xf32>
    %c234 = arith.constant 234 : index
    %1065 = memref.load %arg1[%c234] : memref<395xf32, #tpu.memory_space<smem>>
    %1066 = vector.broadcast %1065 : f32 to vector<2x128xf32>
    %1067 = arith.mulf %1066, %1050 : vector<2x128xf32>
    %1068 = arith.addf %1025, %1067 : vector<2x128xf32>
    %c235 = arith.constant 235 : index
    %1069 = memref.load %arg1[%c235] : memref<395xf32, #tpu.memory_space<smem>>
    %1070 = vector.broadcast %1069 : f32 to vector<2x128xf32>
    %1071 = arith.mulf %1070, %1051 : vector<2x128xf32>
    %1072 = arith.addf %1068, %1071 : vector<2x128xf32>
    %c236 = arith.constant 236 : index
    %1073 = memref.load %arg1[%c236] : memref<395xf32, #tpu.memory_space<smem>>
    %1074 = vector.broadcast %1073 : f32 to vector<2x128xf32>
    %1075 = arith.mulf %1074, %1052 : vector<2x128xf32>
    %1076 = arith.addf %1072, %1075 : vector<2x128xf32>
    %c252 = arith.constant 252 : index
    %1077 = memref.load %arg1[%c252] : memref<395xf32, #tpu.memory_space<smem>>
    %1078 = vector.broadcast %1077 : f32 to vector<2x128xf32>
    %1079 = arith.mulf %1078, %1050 : vector<2x128xf32>
    %1080 = arith.addf %1037, %1079 : vector<2x128xf32>
    %c253 = arith.constant 253 : index
    %1081 = memref.load %arg1[%c253] : memref<395xf32, #tpu.memory_space<smem>>
    %1082 = vector.broadcast %1081 : f32 to vector<2x128xf32>
    %1083 = arith.mulf %1082, %1051 : vector<2x128xf32>
    %1084 = arith.addf %1080, %1083 : vector<2x128xf32>
    %c254 = arith.constant 254 : index
    %1085 = memref.load %arg1[%c254] : memref<395xf32, #tpu.memory_space<smem>>
    %1086 = vector.broadcast %1085 : f32 to vector<2x128xf32>
    %1087 = arith.mulf %1086, %1052 : vector<2x128xf32>
    %1088 = arith.addf %1084, %1087 : vector<2x128xf32>
    %c270 = arith.constant 270 : index
    %1089 = memref.load %arg1[%c270] : memref<395xf32, #tpu.memory_space<smem>>
    %1090 = vector.broadcast %1089 : f32 to vector<2x128xf32>
    %1091 = arith.mulf %1090, %1050 : vector<2x128xf32>
    %1092 = arith.addf %1049, %1091 : vector<2x128xf32>
    %c271 = arith.constant 271 : index
    %1093 = memref.load %arg1[%c271] : memref<395xf32, #tpu.memory_space<smem>>
    %1094 = vector.broadcast %1093 : f32 to vector<2x128xf32>
    %1095 = arith.mulf %1094, %1051 : vector<2x128xf32>
    %1096 = arith.addf %1092, %1095 : vector<2x128xf32>
    %c272 = arith.constant 272 : index
    %1097 = memref.load %arg1[%c272] : memref<395xf32, #tpu.memory_space<smem>>
    %1098 = vector.broadcast %1097 : f32 to vector<2x128xf32>
    %1099 = arith.mulf %1098, %1052 : vector<2x128xf32>
    %1100 = arith.addf %1096, %1099 : vector<2x128xf32>
    %1101 = vector.extract_strided_slice %913 {offsets = [0, 0], sizes = [2, 128], strides = [1, 1]} : vector<4x128xf32> to vector<2x128xf32>
    %1102 = vector.extract_strided_slice %913 {offsets = [1, 0], sizes = [2, 128], strides = [1, 1]} : vector<4x128xf32> to vector<2x128xf32>
    %1103 = vector.extract_strided_slice %913 {offsets = [2, 0], sizes = [2, 128], strides = [1, 1]} : vector<4x128xf32> to vector<2x128xf32>
    %c219 = arith.constant 219 : index
    %1104 = memref.load %arg1[%c219] : memref<395xf32, #tpu.memory_space<smem>>
    %1105 = vector.broadcast %1104 : f32 to vector<2x128xf32>
    %1106 = arith.mulf %1105, %1101 : vector<2x128xf32>
    %1107 = arith.addf %1064, %1106 : vector<2x128xf32>
    %c220 = arith.constant 220 : index
    %1108 = memref.load %arg1[%c220] : memref<395xf32, #tpu.memory_space<smem>>
    %1109 = vector.broadcast %1108 : f32 to vector<2x128xf32>
    %1110 = arith.mulf %1109, %1102 : vector<2x128xf32>
    %1111 = arith.addf %1107, %1110 : vector<2x128xf32>
    %c221 = arith.constant 221 : index
    %1112 = memref.load %arg1[%c221] : memref<395xf32, #tpu.memory_space<smem>>
    %1113 = vector.broadcast %1112 : f32 to vector<2x128xf32>
    %1114 = arith.mulf %1113, %1103 : vector<2x128xf32>
    %1115 = arith.addf %1111, %1114 : vector<2x128xf32>
    %c237 = arith.constant 237 : index
    %1116 = memref.load %arg1[%c237] : memref<395xf32, #tpu.memory_space<smem>>
    %1117 = vector.broadcast %1116 : f32 to vector<2x128xf32>
    %1118 = arith.mulf %1117, %1101 : vector<2x128xf32>
    %1119 = arith.addf %1076, %1118 : vector<2x128xf32>
    %c238 = arith.constant 238 : index
    %1120 = memref.load %arg1[%c238] : memref<395xf32, #tpu.memory_space<smem>>
    %1121 = vector.broadcast %1120 : f32 to vector<2x128xf32>
    %1122 = arith.mulf %1121, %1102 : vector<2x128xf32>
    %1123 = arith.addf %1119, %1122 : vector<2x128xf32>
    %c239 = arith.constant 239 : index
    %1124 = memref.load %arg1[%c239] : memref<395xf32, #tpu.memory_space<smem>>
    %1125 = vector.broadcast %1124 : f32 to vector<2x128xf32>
    %1126 = arith.mulf %1125, %1103 : vector<2x128xf32>
    %1127 = arith.addf %1123, %1126 : vector<2x128xf32>
    %c255 = arith.constant 255 : index
    %1128 = memref.load %arg1[%c255] : memref<395xf32, #tpu.memory_space<smem>>
    %1129 = vector.broadcast %1128 : f32 to vector<2x128xf32>
    %1130 = arith.mulf %1129, %1101 : vector<2x128xf32>
    %1131 = arith.addf %1088, %1130 : vector<2x128xf32>
    %c256 = arith.constant 256 : index
    %1132 = memref.load %arg1[%c256] : memref<395xf32, #tpu.memory_space<smem>>
    %1133 = vector.broadcast %1132 : f32 to vector<2x128xf32>
    %1134 = arith.mulf %1133, %1102 : vector<2x128xf32>
    %1135 = arith.addf %1131, %1134 : vector<2x128xf32>
    %c257 = arith.constant 257 : index
    %1136 = memref.load %arg1[%c257] : memref<395xf32, #tpu.memory_space<smem>>
    %1137 = vector.broadcast %1136 : f32 to vector<2x128xf32>
    %1138 = arith.mulf %1137, %1103 : vector<2x128xf32>
    %1139 = arith.addf %1135, %1138 : vector<2x128xf32>
    %c273 = arith.constant 273 : index
    %1140 = memref.load %arg1[%c273] : memref<395xf32, #tpu.memory_space<smem>>
    %1141 = vector.broadcast %1140 : f32 to vector<2x128xf32>
    %1142 = arith.mulf %1141, %1101 : vector<2x128xf32>
    %1143 = arith.addf %1100, %1142 : vector<2x128xf32>
    %c274 = arith.constant 274 : index
    %1144 = memref.load %arg1[%c274] : memref<395xf32, #tpu.memory_space<smem>>
    %1145 = vector.broadcast %1144 : f32 to vector<2x128xf32>
    %1146 = arith.mulf %1145, %1102 : vector<2x128xf32>
    %1147 = arith.addf %1143, %1146 : vector<2x128xf32>
    %c275 = arith.constant 275 : index
    %1148 = memref.load %arg1[%c275] : memref<395xf32, #tpu.memory_space<smem>>
    %1149 = vector.broadcast %1148 : f32 to vector<2x128xf32>
    %1150 = arith.mulf %1149, %1103 : vector<2x128xf32>
    %1151 = arith.addf %1147, %1150 : vector<2x128xf32>
    %1152 = vector.extract_strided_slice %932 {offsets = [0, 0], sizes = [2, 128], strides = [1, 1]} : vector<4x128xf32> to vector<2x128xf32>
    %1153 = vector.extract_strided_slice %932 {offsets = [1, 0], sizes = [2, 128], strides = [1, 1]} : vector<4x128xf32> to vector<2x128xf32>
    %1154 = vector.extract_strided_slice %932 {offsets = [2, 0], sizes = [2, 128], strides = [1, 1]} : vector<4x128xf32> to vector<2x128xf32>
    %c222 = arith.constant 222 : index
    %1155 = memref.load %arg1[%c222] : memref<395xf32, #tpu.memory_space<smem>>
    %1156 = vector.broadcast %1155 : f32 to vector<2x128xf32>
    %1157 = arith.mulf %1156, %1152 : vector<2x128xf32>
    %1158 = arith.addf %1115, %1157 : vector<2x128xf32>
    %c223 = arith.constant 223 : index
    %1159 = memref.load %arg1[%c223] : memref<395xf32, #tpu.memory_space<smem>>
    %1160 = vector.broadcast %1159 : f32 to vector<2x128xf32>
    %1161 = arith.mulf %1160, %1153 : vector<2x128xf32>
    %1162 = arith.addf %1158, %1161 : vector<2x128xf32>
    %c224 = arith.constant 224 : index
    %1163 = memref.load %arg1[%c224] : memref<395xf32, #tpu.memory_space<smem>>
    %1164 = vector.broadcast %1163 : f32 to vector<2x128xf32>
    %1165 = arith.mulf %1164, %1154 : vector<2x128xf32>
    %1166 = arith.addf %1162, %1165 : vector<2x128xf32>
    %c240_62 = arith.constant 240 : index
    %1167 = memref.load %arg1[%c240_62] : memref<395xf32, #tpu.memory_space<smem>>
    %1168 = vector.broadcast %1167 : f32 to vector<2x128xf32>
    %1169 = arith.mulf %1168, %1152 : vector<2x128xf32>
    %1170 = arith.addf %1127, %1169 : vector<2x128xf32>
    %c241 = arith.constant 241 : index
    %1171 = memref.load %arg1[%c241] : memref<395xf32, #tpu.memory_space<smem>>
    %1172 = vector.broadcast %1171 : f32 to vector<2x128xf32>
    %1173 = arith.mulf %1172, %1153 : vector<2x128xf32>
    %1174 = arith.addf %1170, %1173 : vector<2x128xf32>
    %c242 = arith.constant 242 : index
    %1175 = memref.load %arg1[%c242] : memref<395xf32, #tpu.memory_space<smem>>
    %1176 = vector.broadcast %1175 : f32 to vector<2x128xf32>
    %1177 = arith.mulf %1176, %1154 : vector<2x128xf32>
    %1178 = arith.addf %1174, %1177 : vector<2x128xf32>
    %c258 = arith.constant 258 : index
    %1179 = memref.load %arg1[%c258] : memref<395xf32, #tpu.memory_space<smem>>
    %1180 = vector.broadcast %1179 : f32 to vector<2x128xf32>
    %1181 = arith.mulf %1180, %1152 : vector<2x128xf32>
    %1182 = arith.addf %1139, %1181 : vector<2x128xf32>
    %c259 = arith.constant 259 : index
    %1183 = memref.load %arg1[%c259] : memref<395xf32, #tpu.memory_space<smem>>
    %1184 = vector.broadcast %1183 : f32 to vector<2x128xf32>
    %1185 = arith.mulf %1184, %1153 : vector<2x128xf32>
    %1186 = arith.addf %1182, %1185 : vector<2x128xf32>
    %c260 = arith.constant 260 : index
    %1187 = memref.load %arg1[%c260] : memref<395xf32, #tpu.memory_space<smem>>
    %1188 = vector.broadcast %1187 : f32 to vector<2x128xf32>
    %1189 = arith.mulf %1188, %1154 : vector<2x128xf32>
    %1190 = arith.addf %1186, %1189 : vector<2x128xf32>
    %c276 = arith.constant 276 : index
    %1191 = memref.load %arg1[%c276] : memref<395xf32, #tpu.memory_space<smem>>
    %1192 = vector.broadcast %1191 : f32 to vector<2x128xf32>
    %1193 = arith.mulf %1192, %1152 : vector<2x128xf32>
    %1194 = arith.addf %1151, %1193 : vector<2x128xf32>
    %c277 = arith.constant 277 : index
    %1195 = memref.load %arg1[%c277] : memref<395xf32, #tpu.memory_space<smem>>
    %1196 = vector.broadcast %1195 : f32 to vector<2x128xf32>
    %1197 = arith.mulf %1196, %1153 : vector<2x128xf32>
    %1198 = arith.addf %1194, %1197 : vector<2x128xf32>
    %c278 = arith.constant 278 : index
    %1199 = memref.load %arg1[%c278] : memref<395xf32, #tpu.memory_space<smem>>
    %1200 = vector.broadcast %1199 : f32 to vector<2x128xf32>
    %1201 = arith.mulf %1200, %1154 : vector<2x128xf32>
    %1202 = arith.addf %1198, %1201 : vector<2x128xf32>
    %1203 = vector.extract_strided_slice %951 {offsets = [0, 0], sizes = [2, 128], strides = [1, 1]} : vector<4x128xf32> to vector<2x128xf32>
    %1204 = vector.extract_strided_slice %951 {offsets = [1, 0], sizes = [2, 128], strides = [1, 1]} : vector<4x128xf32> to vector<2x128xf32>
    %1205 = vector.extract_strided_slice %951 {offsets = [2, 0], sizes = [2, 128], strides = [1, 1]} : vector<4x128xf32> to vector<2x128xf32>
    %c225 = arith.constant 225 : index
    %1206 = memref.load %arg1[%c225] : memref<395xf32, #tpu.memory_space<smem>>
    %1207 = vector.broadcast %1206 : f32 to vector<2x128xf32>
    %1208 = arith.mulf %1207, %1203 : vector<2x128xf32>
    %1209 = arith.addf %1166, %1208 : vector<2x128xf32>
    %c226 = arith.constant 226 : index
    %1210 = memref.load %arg1[%c226] : memref<395xf32, #tpu.memory_space<smem>>
    %1211 = vector.broadcast %1210 : f32 to vector<2x128xf32>
    %1212 = arith.mulf %1211, %1204 : vector<2x128xf32>
    %1213 = arith.addf %1209, %1212 : vector<2x128xf32>
    %c227 = arith.constant 227 : index
    %1214 = memref.load %arg1[%c227] : memref<395xf32, #tpu.memory_space<smem>>
    %1215 = vector.broadcast %1214 : f32 to vector<2x128xf32>
    %1216 = arith.mulf %1215, %1205 : vector<2x128xf32>
    %1217 = arith.addf %1213, %1216 : vector<2x128xf32>
    %c243 = arith.constant 243 : index
    %1218 = memref.load %arg1[%c243] : memref<395xf32, #tpu.memory_space<smem>>
    %1219 = vector.broadcast %1218 : f32 to vector<2x128xf32>
    %1220 = arith.mulf %1219, %1203 : vector<2x128xf32>
    %1221 = arith.addf %1178, %1220 : vector<2x128xf32>
    %c244 = arith.constant 244 : index
    %1222 = memref.load %arg1[%c244] : memref<395xf32, #tpu.memory_space<smem>>
    %1223 = vector.broadcast %1222 : f32 to vector<2x128xf32>
    %1224 = arith.mulf %1223, %1204 : vector<2x128xf32>
    %1225 = arith.addf %1221, %1224 : vector<2x128xf32>
    %c245 = arith.constant 245 : index
    %1226 = memref.load %arg1[%c245] : memref<395xf32, #tpu.memory_space<smem>>
    %1227 = vector.broadcast %1226 : f32 to vector<2x128xf32>
    %1228 = arith.mulf %1227, %1205 : vector<2x128xf32>
    %1229 = arith.addf %1225, %1228 : vector<2x128xf32>
    %c261 = arith.constant 261 : index
    %1230 = memref.load %arg1[%c261] : memref<395xf32, #tpu.memory_space<smem>>
    %1231 = vector.broadcast %1230 : f32 to vector<2x128xf32>
    %1232 = arith.mulf %1231, %1203 : vector<2x128xf32>
    %1233 = arith.addf %1190, %1232 : vector<2x128xf32>
    %c262 = arith.constant 262 : index
    %1234 = memref.load %arg1[%c262] : memref<395xf32, #tpu.memory_space<smem>>
    %1235 = vector.broadcast %1234 : f32 to vector<2x128xf32>
    %1236 = arith.mulf %1235, %1204 : vector<2x128xf32>
    %1237 = arith.addf %1233, %1236 : vector<2x128xf32>
    %c263 = arith.constant 263 : index
    %1238 = memref.load %arg1[%c263] : memref<395xf32, #tpu.memory_space<smem>>
    %1239 = vector.broadcast %1238 : f32 to vector<2x128xf32>
    %1240 = arith.mulf %1239, %1205 : vector<2x128xf32>
    %1241 = arith.addf %1237, %1240 : vector<2x128xf32>
    %c279 = arith.constant 279 : index
    %1242 = memref.load %arg1[%c279] : memref<395xf32, #tpu.memory_space<smem>>
    %1243 = vector.broadcast %1242 : f32 to vector<2x128xf32>
    %1244 = arith.mulf %1243, %1203 : vector<2x128xf32>
    %1245 = arith.addf %1202, %1244 : vector<2x128xf32>
    %c280 = arith.constant 280 : index
    %1246 = memref.load %arg1[%c280] : memref<395xf32, #tpu.memory_space<smem>>
    %1247 = vector.broadcast %1246 : f32 to vector<2x128xf32>
    %1248 = arith.mulf %1247, %1204 : vector<2x128xf32>
    %1249 = arith.addf %1245, %1248 : vector<2x128xf32>
    %c281 = arith.constant 281 : index
    %1250 = memref.load %arg1[%c281] : memref<395xf32, #tpu.memory_space<smem>>
    %1251 = vector.broadcast %1250 : f32 to vector<2x128xf32>
    %1252 = arith.mulf %1251, %1205 : vector<2x128xf32>
    %1253 = arith.addf %1249, %1252 : vector<2x128xf32>
    %c282 = arith.constant 282 : index
    %1254 = memref.load %arg1[%c282] : memref<395xf32, #tpu.memory_space<smem>>
    %1255 = vector.broadcast %1254 : f32 to vector<2x128xf32>
    %1256 = arith.addf %1217, %1255 : vector<2x128xf32>
    %c283 = arith.constant 283 : index
    %1257 = memref.load %arg1[%c283] : memref<395xf32, #tpu.memory_space<smem>>
    %1258 = vector.broadcast %1257 : f32 to vector<2x128xf32>
    %1259 = arith.addf %1229, %1258 : vector<2x128xf32>
    %c284 = arith.constant 284 : index
    %1260 = memref.load %arg1[%c284] : memref<395xf32, #tpu.memory_space<smem>>
    %1261 = vector.broadcast %1260 : f32 to vector<2x128xf32>
    %1262 = arith.addf %1241, %1261 : vector<2x128xf32>
    %c285 = arith.constant 285 : index
    %1263 = memref.load %arg1[%c285] : memref<395xf32, #tpu.memory_space<smem>>
    %1264 = vector.broadcast %1263 : f32 to vector<2x128xf32>
    %1265 = arith.addf %1253, %1264 : vector<2x128xf32>
    %c358 = arith.constant 358 : index
    %1266 = memref.load %arg1[%c358] : memref<395xf32, #tpu.memory_space<smem>>
    %cst_63 = arith.constant 0.000000e+00 : f32
    %1267 = vector.broadcast %cst_63 : f32 to vector<6x128xf32>
    %1268 = vector.broadcast %1266 : f32 to vector<6x128xf32>
    %1269 = arith.addf %1267, %1268 : vector<6x128xf32>
    %c480 = arith.constant 480 : index
    %c0_64 = arith.constant 0 : index
    %1270 = vector.load %arg4[%c480, %c0_64] : memref<552x128xf32, #tpu.memory_space<vmem>>, vector<6x128xf32>
    tpu.vector_store %arg4[%c480, %c0_64], %1269 {strides = array<i32>} : memref<552x128xf32, #tpu.memory_space<vmem>>, vector<6x128xf32>,
    %c286 = arith.constant 286 : index
    %1271 = memref.load %arg1[%c286] : memref<395xf32, #tpu.memory_space<smem>>
    %1272 = vector.broadcast %1271 : f32 to vector<2x128xf32>
    %1273 = arith.mulf %1272, %1256 : vector<2x128xf32>
    %c304 = arith.constant 304 : index
    %1274 = memref.load %arg1[%c304] : memref<395xf32, #tpu.memory_space<smem>>
    %1275 = vector.broadcast %1274 : f32 to vector<2x128xf32>
    %1276 = arith.mulf %1275, %1259 : vector<2x128xf32>
    %1277 = arith.addf %1273, %1276 : vector<2x128xf32>
    %c322 = arith.constant 322 : index
    %1278 = memref.load %arg1[%c322] : memref<395xf32, #tpu.memory_space<smem>>
    %1279 = vector.broadcast %1278 : f32 to vector<2x128xf32>
    %1280 = arith.mulf %1279, %1262 : vector<2x128xf32>
    %1281 = arith.addf %1277, %1280 : vector<2x128xf32>
    %c340 = arith.constant 340 : index
    %1282 = memref.load %arg1[%c340] : memref<395xf32, #tpu.memory_space<smem>>
    %1283 = vector.broadcast %1282 : f32 to vector<2x128xf32>
    %1284 = arith.mulf %1283, %1265 : vector<2x128xf32>
    %1285 = arith.addf %1281, %1284 : vector<2x128xf32>
    %c480_65 = arith.constant 480 : index
    %c0_66 = arith.constant 0 : index
    %1286 = tpu.strided_load %arg4[%c480_65, %c0_66] {strides = array<i32: 2, 1>} : memref<552x128xf32, #tpu.memory_space<vmem>>, vector<2x128xf32>
    %1287 = arith.addf %1286, %1285 : vector<2x128xf32>
    %c480_67 = arith.constant 480 : index
    %c0_68 = arith.constant 0 : index
    %1288 = tpu.strided_load %arg4[%c480_67, %c0_68] {strides = array<i32: 2, 1>} : memref<552x128xf32, #tpu.memory_space<vmem>>, vector<2x128xf32>
    tpu.strided_store %arg4[%c480_67, %c0_68], %1287 {strides = array<i32: 2, 1>} : memref<552x128xf32, #tpu.memory_space<vmem>>, vector<2x128xf32>
    %c287 = arith.constant 287 : index
    %1289 = memref.load %arg1[%c287] : memref<395xf32, #tpu.memory_space<smem>>
    %1290 = vector.broadcast %1289 : f32 to vector<2x128xf32>
    %1291 = arith.mulf %1290, %1256 : vector<2x128xf32>
    %c305 = arith.constant 305 : index
    %1292 = memref.load %arg1[%c305] : memref<395xf32, #tpu.memory_space<smem>>
    %1293 = vector.broadcast %1292 : f32 to vector<2x128xf32>
    %1294 = arith.mulf %1293, %1259 : vector<2x128xf32>
    %1295 = arith.addf %1291, %1294 : vector<2x128xf32>
    %c323 = arith.constant 323 : index
    %1296 = memref.load %arg1[%c323] : memref<395xf32, #tpu.memory_space<smem>>
    %1297 = vector.broadcast %1296 : f32 to vector<2x128xf32>
    %1298 = arith.mulf %1297, %1262 : vector<2x128xf32>
    %1299 = arith.addf %1295, %1298 : vector<2x128xf32>
    %c341 = arith.constant 341 : index
    %1300 = memref.load %arg1[%c341] : memref<395xf32, #tpu.memory_space<smem>>
    %1301 = vector.broadcast %1300 : f32 to vector<2x128xf32>
    %1302 = arith.mulf %1301, %1265 : vector<2x128xf32>
    %1303 = arith.addf %1299, %1302 : vector<2x128xf32>
    %c481 = arith.constant 481 : index
    %c0_69 = arith.constant 0 : index
    %1304 = tpu.strided_load %arg4[%c481, %c0_69] {strides = array<i32: 2, 1>} : memref<552x128xf32, #tpu.memory_space<vmem>>, vector<2x128xf32>
    %1305 = arith.addf %1304, %1303 : vector<2x128xf32>
    %c481_70 = arith.constant 481 : index
    %c0_71 = arith.constant 0 : index
    %1306 = tpu.strided_load %arg4[%c481_70, %c0_71] {strides = array<i32: 2, 1>} : memref<552x128xf32, #tpu.memory_space<vmem>>, vector<2x128xf32>
    tpu.strided_store %arg4[%c481_70, %c0_71], %1305 {strides = array<i32: 2, 1>} : memref<552x128xf32, #tpu.memory_space<vmem>>, vector<2x128xf32>
    %c288_72 = arith.constant 288 : index
    %1307 = memref.load %arg1[%c288_72] : memref<395xf32, #tpu.memory_space<smem>>
    %1308 = vector.broadcast %1307 : f32 to vector<2x128xf32>
    %1309 = arith.mulf %1308, %1256 : vector<2x128xf32>
    %c306 = arith.constant 306 : index
    %1310 = memref.load %arg1[%c306] : memref<395xf32, #tpu.memory_space<smem>>
    %1311 = vector.broadcast %1310 : f32 to vector<2x128xf32>
    %1312 = arith.mulf %1311, %1259 : vector<2x128xf32>
    %1313 = arith.addf %1309, %1312 : vector<2x128xf32>
    %c324 = arith.constant 324 : index
    %1314 = memref.load %arg1[%c324] : memref<395xf32, #tpu.memory_space<smem>>
    %1315 = vector.broadcast %1314 : f32 to vector<2x128xf32>
    %1316 = arith.mulf %1315, %1262 : vector<2x128xf32>
    %1317 = arith.addf %1313, %1316 : vector<2x128xf32>
    %c342 = arith.constant 342 : index
    %1318 = memref.load %arg1[%c342] : memref<395xf32, #tpu.memory_space<smem>>
    %1319 = vector.broadcast %1318 : f32 to vector<2x128xf32>
    %1320 = arith.mulf %1319, %1265 : vector<2x128xf32>
    %1321 = arith.addf %1317, %1320 : vector<2x128xf32>
    %c482 = arith.constant 482 : index
    %c0_73 = arith.constant 0 : index
    %1322 = tpu.strided_load %arg4[%c482, %c0_73] {strides = array<i32: 2, 1>} : memref<552x128xf32, #tpu.memory_space<vmem>>, vector<2x128xf32>
    %1323 = arith.addf %1322, %1321 : vector<2x128xf32>
    %c482_74 = arith.constant 482 : index
    %c0_75 = arith.constant 0 : index
    %1324 = tpu.strided_load %arg4[%c482_74, %c0_75] {strides = array<i32: 2, 1>} : memref<552x128xf32, #tpu.memory_space<vmem>>, vector<2x128xf32>
    tpu.strided_store %arg4[%c482_74, %c0_75], %1323 {strides = array<i32: 2, 1>} : memref<552x128xf32, #tpu.memory_space<vmem>>, vector<2x128xf32>
    %c480_76 = arith.constant 480 : index
    %c0_77 = arith.constant 0 : index
    %1325 = vector.load %arg4[%c480_76, %c0_77] : memref<552x128xf32, #tpu.memory_space<vmem>>, vector<6x128xf32>
    %cst_78 = arith.constant 1.000000e-01 : f32
    %1326 = vector.broadcast %cst_78 : f32 to vector<6x128xf32>
    %1327 = arith.mulf %1326, %1325 : vector<6x128xf32>
    %1328 = arith.maximumf %1325, %1327 : vector<6x128xf32>
    %c364 = arith.constant 364 : index
    %1329 = memref.load %arg1[%c364] : memref<395xf32, #tpu.memory_space<smem>>
    %1330 = vector.broadcast %1329 : f32 to vector<6x128xf32>
    %1331 = arith.mulf %1328, %1330 : vector<6x128xf32>
    %c370 = arith.constant 370 : index
    %1332 = memref.load %arg1[%c370] : memref<395xf32, #tpu.memory_space<smem>>
    %1333 = vector.broadcast %1332 : f32 to vector<6x128xf32>
    %1334 = arith.addf %1331, %1333 : vector<6x128xf32>
    %c359 = arith.constant 359 : index
    %1335 = memref.load %arg1[%c359] : memref<395xf32, #tpu.memory_space<smem>>
    %cst_79 = arith.constant 0.000000e+00 : f32
    %1336 = vector.broadcast %cst_79 : f32 to vector<6x128xf32>
    %1337 = vector.broadcast %1335 : f32 to vector<6x128xf32>
    %1338 = arith.addf %1336, %1337 : vector<6x128xf32>
    %c488 = arith.constant 488 : index
    %c0_80 = arith.constant 0 : index
    %1339 = vector.load %arg4[%c488, %c0_80] : memref<552x128xf32, #tpu.memory_space<vmem>>, vector<6x128xf32>
    tpu.vector_store %arg4[%c488, %c0_80], %1338 {strides = array<i32>} : memref<552x128xf32, #tpu.memory_space<vmem>>, vector<6x128xf32>,
    %c289 = arith.constant 289 : index
    %1340 = memref.load %arg1[%c289] : memref<395xf32, #tpu.memory_space<smem>>
    %1341 = vector.broadcast %1340 : f32 to vector<2x128xf32>
    %1342 = arith.mulf %1341, %1256 : vector<2x128xf32>
    %c307 = arith.constant 307 : index
    %1343 = memref.load %arg1[%c307] : memref<395xf32, #tpu.memory_space<smem>>
    %1344 = vector.broadcast %1343 : f32 to vector<2x128xf32>
    %1345 = arith.mulf %1344, %1259 : vector<2x128xf32>
    %1346 = arith.addf %1342, %1345 : vector<2x128xf32>
    %c325 = arith.constant 325 : index
    %1347 = memref.load %arg1[%c325] : memref<395xf32, #tpu.memory_space<smem>>
    %1348 = vector.broadcast %1347 : f32 to vector<2x128xf32>
    %1349 = arith.mulf %1348, %1262 : vector<2x128xf32>
    %1350 = arith.addf %1346, %1349 : vector<2x128xf32>
    %c343 = arith.constant 343 : index
    %1351 = memref.load %arg1[%c343] : memref<395xf32, #tpu.memory_space<smem>>
    %1352 = vector.broadcast %1351 : f32 to vector<2x128xf32>
    %1353 = arith.mulf %1352, %1265 : vector<2x128xf32>
    %1354 = arith.addf %1350, %1353 : vector<2x128xf32>
    %c488_81 = arith.constant 488 : index
    %c0_82 = arith.constant 0 : index
    %1355 = tpu.strided_load %arg4[%c488_81, %c0_82] {strides = array<i32: 2, 1>} : memref<552x128xf32, #tpu.memory_space<vmem>>, vector<2x128xf32>
    %1356 = arith.addf %1355, %1354 : vector<2x128xf32>
    %c488_83 = arith.constant 488 : index
    %c0_84 = arith.constant 0 : index
    %1357 = tpu.strided_load %arg4[%c488_83, %c0_84] {strides = array<i32: 2, 1>} : memref<552x128xf32, #tpu.memory_space<vmem>>, vector<2x128xf32>
    tpu.strided_store %arg4[%c488_83, %c0_84], %1356 {strides = array<i32: 2, 1>} : memref<552x128xf32, #tpu.memory_space<vmem>>, vector<2x128xf32>
    %c290 = arith.constant 290 : index
    %1358 = memref.load %arg1[%c290] : memref<395xf32, #tpu.memory_space<smem>>
    %1359 = vector.broadcast %1358 : f32 to vector<2x128xf32>
    %1360 = arith.mulf %1359, %1256 : vector<2x128xf32>
    %c308 = arith.constant 308 : index
    %1361 = memref.load %arg1[%c308] : memref<395xf32, #tpu.memory_space<smem>>
    %1362 = vector.broadcast %1361 : f32 to vector<2x128xf32>
    %1363 = arith.mulf %1362, %1259 : vector<2x128xf32>
    %1364 = arith.addf %1360, %1363 : vector<2x128xf32>
    %c326 = arith.constant 326 : index
    %1365 = memref.load %arg1[%c326] : memref<395xf32, #tpu.memory_space<smem>>
    %1366 = vector.broadcast %1365 : f32 to vector<2x128xf32>
    %1367 = arith.mulf %1366, %1262 : vector<2x128xf32>
    %1368 = arith.addf %1364, %1367 : vector<2x128xf32>
    %c344 = arith.constant 344 : index
    %1369 = memref.load %arg1[%c344] : memref<395xf32, #tpu.memory_space<smem>>
    %1370 = vector.broadcast %1369 : f32 to vector<2x128xf32>
    %1371 = arith.mulf %1370, %1265 : vector<2x128xf32>
    %1372 = arith.addf %1368, %1371 : vector<2x128xf32>
    %c489 = arith.constant 489 : index
    %c0_85 = arith.constant 0 : index
    %1373 = tpu.strided_load %arg4[%c489, %c0_85] {strides = array<i32: 2, 1>} : memref<552x128xf32, #tpu.memory_space<vmem>>, vector<2x128xf32>
    %1374 = arith.addf %1373, %1372 : vector<2x128xf32>
    %c489_86 = arith.constant 489 : index
    %c0_87 = arith.constant 0 : index
    %1375 = tpu.strided_load %arg4[%c489_86, %c0_87] {strides = array<i32: 2, 1>} : memref<552x128xf32, #tpu.memory_space<vmem>>, vector<2x128xf32>
    tpu.strided_store %arg4[%c489_86, %c0_87], %1374 {strides = array<i32: 2, 1>} : memref<552x128xf32, #tpu.memory_space<vmem>>, vector<2x128xf32>
    %c291 = arith.constant 291 : index
    %1376 = memref.load %arg1[%c291] : memref<395xf32, #tpu.memory_space<smem>>
    %1377 = vector.broadcast %1376 : f32 to vector<2x128xf32>
    %1378 = arith.mulf %1377, %1256 : vector<2x128xf32>
    %c309 = arith.constant 309 : index
    %1379 = memref.load %arg1[%c309] : memref<395xf32, #tpu.memory_space<smem>>
    %1380 = vector.broadcast %1379 : f32 to vector<2x128xf32>
    %1381 = arith.mulf %1380, %1259 : vector<2x128xf32>
    %1382 = arith.addf %1378, %1381 : vector<2x128xf32>
    %c327 = arith.constant 327 : index
    %1383 = memref.load %arg1[%c327] : memref<395xf32, #tpu.memory_space<smem>>
    %1384 = vector.broadcast %1383 : f32 to vector<2x128xf32>
    %1385 = arith.mulf %1384, %1262 : vector<2x128xf32>
    %1386 = arith.addf %1382, %1385 : vector<2x128xf32>
    %c345 = arith.constant 345 : index
    %1387 = memref.load %arg1[%c345] : memref<395xf32, #tpu.memory_space<smem>>
    %1388 = vector.broadcast %1387 : f32 to vector<2x128xf32>
    %1389 = arith.mulf %1388, %1265 : vector<2x128xf32>
    %1390 = arith.addf %1386, %1389 : vector<2x128xf32>
    %c490 = arith.constant 490 : index
    %c0_88 = arith.constant 0 : index
    %1391 = tpu.strided_load %arg4[%c490, %c0_88] {strides = array<i32: 2, 1>} : memref<552x128xf32, #tpu.memory_space<vmem>>, vector<2x128xf32>
    %1392 = arith.addf %1391, %1390 : vector<2x128xf32>
    %c490_89 = arith.constant 490 : index
    %c0_90 = arith.constant 0 : index
    %1393 = tpu.strided_load %arg4[%c490_89, %c0_90] {strides = array<i32: 2, 1>} : memref<552x128xf32, #tpu.memory_space<vmem>>, vector<2x128xf32>
    tpu.strided_store %arg4[%c490_89, %c0_90], %1392 {strides = array<i32: 2, 1>} : memref<552x128xf32, #tpu.memory_space<vmem>>, vector<2x128xf32>
    %c488_91 = arith.constant 488 : index
    %c0_92 = arith.constant 0 : index
    %1394 = vector.load %arg4[%c488_91, %c0_92] : memref<552x128xf32, #tpu.memory_space<vmem>>, vector<6x128xf32>
    %cst_93 = arith.constant 1.000000e-01 : f32
    %1395 = vector.broadcast %cst_93 : f32 to vector<6x128xf32>
    %1396 = arith.mulf %1395, %1394 : vector<6x128xf32>
    %1397 = arith.maximumf %1394, %1396 : vector<6x128xf32>
    %c365 = arith.constant 365 : index
    %1398 = memref.load %arg1[%c365] : memref<395xf32, #tpu.memory_space<smem>>
    %1399 = vector.broadcast %1398 : f32 to vector<6x128xf32>
    %1400 = arith.mulf %1397, %1399 : vector<6x128xf32>
    %c371 = arith.constant 371 : index
    %1401 = memref.load %arg1[%c371] : memref<395xf32, #tpu.memory_space<smem>>
    %1402 = vector.broadcast %1401 : f32 to vector<6x128xf32>
    %1403 = arith.addf %1400, %1402 : vector<6x128xf32>
    %c360 = arith.constant 360 : index
    %1404 = memref.load %arg1[%c360] : memref<395xf32, #tpu.memory_space<smem>>
    %cst_94 = arith.constant 0.000000e+00 : f32
    %1405 = vector.broadcast %cst_94 : f32 to vector<6x128xf32>
    %1406 = vector.broadcast %1404 : f32 to vector<6x128xf32>
    %1407 = arith.addf %1405, %1406 : vector<6x128xf32>
    %c496 = arith.constant 496 : index
    %c0_95 = arith.constant 0 : index
    %1408 = vector.load %arg4[%c496, %c0_95] : memref<552x128xf32, #tpu.memory_space<vmem>>, vector<6x128xf32>
    tpu.vector_store %arg4[%c496, %c0_95], %1407 {strides = array<i32>} : memref<552x128xf32, #tpu.memory_space<vmem>>, vector<6x128xf32>,
    %c292 = arith.constant 292 : index
    %1409 = memref.load %arg1[%c292] : memref<395xf32, #tpu.memory_space<smem>>
    %1410 = vector.broadcast %1409 : f32 to vector<2x128xf32>
    %1411 = arith.mulf %1410, %1256 : vector<2x128xf32>
    %c310 = arith.constant 310 : index
    %1412 = memref.load %arg1[%c310] : memref<395xf32, #tpu.memory_space<smem>>
    %1413 = vector.broadcast %1412 : f32 to vector<2x128xf32>
    %1414 = arith.mulf %1413, %1259 : vector<2x128xf32>
    %1415 = arith.addf %1411, %1414 : vector<2x128xf32>
    %c328 = arith.constant 328 : index
    %1416 = memref.load %arg1[%c328] : memref<395xf32, #tpu.memory_space<smem>>
    %1417 = vector.broadcast %1416 : f32 to vector<2x128xf32>
    %1418 = arith.mulf %1417, %1262 : vector<2x128xf32>
    %1419 = arith.addf %1415, %1418 : vector<2x128xf32>
    %c346 = arith.constant 346 : index
    %1420 = memref.load %arg1[%c346] : memref<395xf32, #tpu.memory_space<smem>>
    %1421 = vector.broadcast %1420 : f32 to vector<2x128xf32>
    %1422 = arith.mulf %1421, %1265 : vector<2x128xf32>
    %1423 = arith.addf %1419, %1422 : vector<2x128xf32>
    %c496_96 = arith.constant 496 : index
    %c0_97 = arith.constant 0 : index
    %1424 = tpu.strided_load %arg4[%c496_96, %c0_97] {strides = array<i32: 2, 1>} : memref<552x128xf32, #tpu.memory_space<vmem>>, vector<2x128xf32>
    %1425 = arith.addf %1424, %1423 : vector<2x128xf32>
    %c496_98 = arith.constant 496 : index
    %c0_99 = arith.constant 0 : index
    %1426 = tpu.strided_load %arg4[%c496_98, %c0_99] {strides = array<i32: 2, 1>} : memref<552x128xf32, #tpu.memory_space<vmem>>, vector<2x128xf32>
    tpu.strided_store %arg4[%c496_98, %c0_99], %1425 {strides = array<i32: 2, 1>} : memref<552x128xf32, #tpu.memory_space<vmem>>, vector<2x128xf32>
    %c293 = arith.constant 293 : index
    %1427 = memref.load %arg1[%c293] : memref<395xf32, #tpu.memory_space<smem>>
    %1428 = vector.broadcast %1427 : f32 to vector<2x128xf32>
    %1429 = arith.mulf %1428, %1256 : vector<2x128xf32>
    %c311 = arith.constant 311 : index
    %1430 = memref.load %arg1[%c311] : memref<395xf32, #tpu.memory_space<smem>>
    %1431 = vector.broadcast %1430 : f32 to vector<2x128xf32>
    %1432 = arith.mulf %1431, %1259 : vector<2x128xf32>
    %1433 = arith.addf %1429, %1432 : vector<2x128xf32>
    %c329 = arith.constant 329 : index
    %1434 = memref.load %arg1[%c329] : memref<395xf32, #tpu.memory_space<smem>>
    %1435 = vector.broadcast %1434 : f32 to vector<2x128xf32>
    %1436 = arith.mulf %1435, %1262 : vector<2x128xf32>
    %1437 = arith.addf %1433, %1436 : vector<2x128xf32>
    %c347 = arith.constant 347 : index
    %1438 = memref.load %arg1[%c347] : memref<395xf32, #tpu.memory_space<smem>>
    %1439 = vector.broadcast %1438 : f32 to vector<2x128xf32>
    %1440 = arith.mulf %1439, %1265 : vector<2x128xf32>
    %1441 = arith.addf %1437, %1440 : vector<2x128xf32>
    %c497 = arith.constant 497 : index
    %c0_100 = arith.constant 0 : index
    %1442 = tpu.strided_load %arg4[%c497, %c0_100] {strides = array<i32: 2, 1>} : memref<552x128xf32, #tpu.memory_space<vmem>>, vector<2x128xf32>
    %1443 = arith.addf %1442, %1441 : vector<2x128xf32>
    %c497_101 = arith.constant 497 : index
    %c0_102 = arith.constant 0 : index
    %1444 = tpu.strided_load %arg4[%c497_101, %c0_102] {strides = array<i32: 2, 1>} : memref<552x128xf32, #tpu.memory_space<vmem>>, vector<2x128xf32>
    tpu.strided_store %arg4[%c497_101, %c0_102], %1443 {strides = array<i32: 2, 1>} : memref<552x128xf32, #tpu.memory_space<vmem>>, vector<2x128xf32>
    %c294 = arith.constant 294 : index
    %1445 = memref.load %arg1[%c294] : memref<395xf32, #tpu.memory_space<smem>>
    %1446 = vector.broadcast %1445 : f32 to vector<2x128xf32>
    %1447 = arith.mulf %1446, %1256 : vector<2x128xf32>
    %c312 = arith.constant 312 : index
    %1448 = memref.load %arg1[%c312] : memref<395xf32, #tpu.memory_space<smem>>
    %1449 = vector.broadcast %1448 : f32 to vector<2x128xf32>
    %1450 = arith.mulf %1449, %1259 : vector<2x128xf32>
    %1451 = arith.addf %1447, %1450 : vector<2x128xf32>
    %c330 = arith.constant 330 : index
    %1452 = memref.load %arg1[%c330] : memref<395xf32, #tpu.memory_space<smem>>
    %1453 = vector.broadcast %1452 : f32 to vector<2x128xf32>
    %1454 = arith.mulf %1453, %1262 : vector<2x128xf32>
    %1455 = arith.addf %1451, %1454 : vector<2x128xf32>
    %c348 = arith.constant 348 : index
    %1456 = memref.load %arg1[%c348] : memref<395xf32, #tpu.memory_space<smem>>
    %1457 = vector.broadcast %1456 : f32 to vector<2x128xf32>
    %1458 = arith.mulf %1457, %1265 : vector<2x128xf32>
    %1459 = arith.addf %1455, %1458 : vector<2x128xf32>
    %c498 = arith.constant 498 : index
    %c0_103 = arith.constant 0 : index
    %1460 = tpu.strided_load %arg4[%c498, %c0_103] {strides = array<i32: 2, 1>} : memref<552x128xf32, #tpu.memory_space<vmem>>, vector<2x128xf32>
    %1461 = arith.addf %1460, %1459 : vector<2x128xf32>
    %c498_104 = arith.constant 498 : index
    %c0_105 = arith.constant 0 : index
    %1462 = tpu.strided_load %arg4[%c498_104, %c0_105] {strides = array<i32: 2, 1>} : memref<552x128xf32, #tpu.memory_space<vmem>>, vector<2x128xf32>
    tpu.strided_store %arg4[%c498_104, %c0_105], %1461 {strides = array<i32: 2, 1>} : memref<552x128xf32, #tpu.memory_space<vmem>>, vector<2x128xf32>
    %c496_106 = arith.constant 496 : index
    %c0_107 = arith.constant 0 : index
    %1463 = vector.load %arg4[%c496_106, %c0_107] : memref<552x128xf32, #tpu.memory_space<vmem>>, vector<6x128xf32>
    %cst_108 = arith.constant 1.000000e-01 : f32
    %1464 = vector.broadcast %cst_108 : f32 to vector<6x128xf32>
    %1465 = arith.mulf %1464, %1463 : vector<6x128xf32>
    %1466 = arith.maximumf %1463, %1465 : vector<6x128xf32>
    %c366 = arith.constant 366 : index
    %1467 = memref.load %arg1[%c366] : memref<395xf32, #tpu.memory_space<smem>>
    %1468 = vector.broadcast %1467 : f32 to vector<6x128xf32>
    %1469 = arith.mulf %1466, %1468 : vector<6x128xf32>
    %c372 = arith.constant 372 : index
    %1470 = memref.load %arg1[%c372] : memref<395xf32, #tpu.memory_space<smem>>
    %1471 = vector.broadcast %1470 : f32 to vector<6x128xf32>
    %1472 = arith.addf %1469, %1471 : vector<6x128xf32>
    %c361 = arith.constant 361 : index
    %1473 = memref.load %arg1[%c361] : memref<395xf32, #tpu.memory_space<smem>>
    %cst_109 = arith.constant 0.000000e+00 : f32
    %1474 = vector.broadcast %cst_109 : f32 to vector<6x128xf32>
    %1475 = vector.broadcast %1473 : f32 to vector<6x128xf32>
    %1476 = arith.addf %1474, %1475 : vector<6x128xf32>
    %c504 = arith.constant 504 : index
    %c0_110 = arith.constant 0 : index
    %1477 = vector.load %arg4[%c504, %c0_110] : memref<552x128xf32, #tpu.memory_space<vmem>>, vector<6x128xf32>
    tpu.vector_store %arg4[%c504, %c0_110], %1476 {strides = array<i32>} : memref<552x128xf32, #tpu.memory_space<vmem>>, vector<6x128xf32>,
    %c295 = arith.constant 295 : index
    %1478 = memref.load %arg1[%c295] : memref<395xf32, #tpu.memory_space<smem>>
    %1479 = vector.broadcast %1478 : f32 to vector<2x128xf32>
    %1480 = arith.mulf %1479, %1256 : vector<2x128xf32>
    %c313 = arith.constant 313 : index
    %1481 = memref.load %arg1[%c313] : memref<395xf32, #tpu.memory_space<smem>>
    %1482 = vector.broadcast %1481 : f32 to vector<2x128xf32>
    %1483 = arith.mulf %1482, %1259 : vector<2x128xf32>
    %1484 = arith.addf %1480, %1483 : vector<2x128xf32>
    %c331 = arith.constant 331 : index
    %1485 = memref.load %arg1[%c331] : memref<395xf32, #tpu.memory_space<smem>>
    %1486 = vector.broadcast %1485 : f32 to vector<2x128xf32>
    %1487 = arith.mulf %1486, %1262 : vector<2x128xf32>
    %1488 = arith.addf %1484, %1487 : vector<2x128xf32>
    %c349 = arith.constant 349 : index
    %1489 = memref.load %arg1[%c349] : memref<395xf32, #tpu.memory_space<smem>>
    %1490 = vector.broadcast %1489 : f32 to vector<2x128xf32>
    %1491 = arith.mulf %1490, %1265 : vector<2x128xf32>
    %1492 = arith.addf %1488, %1491 : vector<2x128xf32>
    %c504_111 = arith.constant 504 : index
    %c0_112 = arith.constant 0 : index
    %1493 = tpu.strided_load %arg4[%c504_111, %c0_112] {strides = array<i32: 2, 1>} : memref<552x128xf32, #tpu.memory_space<vmem>>, vector<2x128xf32>
    %1494 = arith.addf %1493, %1492 : vector<2x128xf32>
    %c504_113 = arith.constant 504 : index
    %c0_114 = arith.constant 0 : index
    %1495 = tpu.strided_load %arg4[%c504_113, %c0_114] {strides = array<i32: 2, 1>} : memref<552x128xf32, #tpu.memory_space<vmem>>, vector<2x128xf32>
    tpu.strided_store %arg4[%c504_113, %c0_114], %1494 {strides = array<i32: 2, 1>} : memref<552x128xf32, #tpu.memory_space<vmem>>, vector<2x128xf32>
    %c296 = arith.constant 296 : index
    %1496 = memref.load %arg1[%c296] : memref<395xf32, #tpu.memory_space<smem>>
    %1497 = vector.broadcast %1496 : f32 to vector<2x128xf32>
    %1498 = arith.mulf %1497, %1256 : vector<2x128xf32>
    %c314 = arith.constant 314 : index
    %1499 = memref.load %arg1[%c314] : memref<395xf32, #tpu.memory_space<smem>>
    %1500 = vector.broadcast %1499 : f32 to vector<2x128xf32>
    %1501 = arith.mulf %1500, %1259 : vector<2x128xf32>
    %1502 = arith.addf %1498, %1501 : vector<2x128xf32>
    %c332 = arith.constant 332 : index
    %1503 = memref.load %arg1[%c332] : memref<395xf32, #tpu.memory_space<smem>>
    %1504 = vector.broadcast %1503 : f32 to vector<2x128xf32>
    %1505 = arith.mulf %1504, %1262 : vector<2x128xf32>
    %1506 = arith.addf %1502, %1505 : vector<2x128xf32>
    %c350 = arith.constant 350 : index
    %1507 = memref.load %arg1[%c350] : memref<395xf32, #tpu.memory_space<smem>>
    %1508 = vector.broadcast %1507 : f32 to vector<2x128xf32>
    %1509 = arith.mulf %1508, %1265 : vector<2x128xf32>
    %1510 = arith.addf %1506, %1509 : vector<2x128xf32>
    %c505 = arith.constant 505 : index
    %c0_115 = arith.constant 0 : index
    %1511 = tpu.strided_load %arg4[%c505, %c0_115] {strides = array<i32: 2, 1>} : memref<552x128xf32, #tpu.memory_space<vmem>>, vector<2x128xf32>
    %1512 = arith.addf %1511, %1510 : vector<2x128xf32>
    %c505_116 = arith.constant 505 : index
    %c0_117 = arith.constant 0 : index
    %1513 = tpu.strided_load %arg4[%c505_116, %c0_117] {strides = array<i32: 2, 1>} : memref<552x128xf32, #tpu.memory_space<vmem>>, vector<2x128xf32>
    tpu.strided_store %arg4[%c505_116, %c0_117], %1512 {strides = array<i32: 2, 1>} : memref<552x128xf32, #tpu.memory_space<vmem>>, vector<2x128xf32>
    %c297 = arith.constant 297 : index
    %1514 = memref.load %arg1[%c297] : memref<395xf32, #tpu.memory_space<smem>>
    %1515 = vector.broadcast %1514 : f32 to vector<2x128xf32>
    %1516 = arith.mulf %1515, %1256 : vector<2x128xf32>
    %c315 = arith.constant 315 : index
    %1517 = memref.load %arg1[%c315] : memref<395xf32, #tpu.memory_space<smem>>
    %1518 = vector.broadcast %1517 : f32 to vector<2x128xf32>
    %1519 = arith.mulf %1518, %1259 : vector<2x128xf32>
    %1520 = arith.addf %1516, %1519 : vector<2x128xf32>
    %c333 = arith.constant 333 : index
    %1521 = memref.load %arg1[%c333] : memref<395xf32, #tpu.memory_space<smem>>
    %1522 = vector.broadcast %1521 : f32 to vector<2x128xf32>
    %1523 = arith.mulf %1522, %1262 : vector<2x128xf32>
    %1524 = arith.addf %1520, %1523 : vector<2x128xf32>
    %c351 = arith.constant 351 : index
    %1525 = memref.load %arg1[%c351] : memref<395xf32, #tpu.memory_space<smem>>
    %1526 = vector.broadcast %1525 : f32 to vector<2x128xf32>
    %1527 = arith.mulf %1526, %1265 : vector<2x128xf32>
    %1528 = arith.addf %1524, %1527 : vector<2x128xf32>
    %c506 = arith.constant 506 : index
    %c0_118 = arith.constant 0 : index
    %1529 = tpu.strided_load %arg4[%c506, %c0_118] {strides = array<i32: 2, 1>} : memref<552x128xf32, #tpu.memory_space<vmem>>, vector<2x128xf32>
    %1530 = arith.addf %1529, %1528 : vector<2x128xf32>
    %c506_119 = arith.constant 506 : index
    %c0_120 = arith.constant 0 : index
    %1531 = tpu.strided_load %arg4[%c506_119, %c0_120] {strides = array<i32: 2, 1>} : memref<552x128xf32, #tpu.memory_space<vmem>>, vector<2x128xf32>
    tpu.strided_store %arg4[%c506_119, %c0_120], %1530 {strides = array<i32: 2, 1>} : memref<552x128xf32, #tpu.memory_space<vmem>>, vector<2x128xf32>
    %c504_121 = arith.constant 504 : index
    %c0_122 = arith.constant 0 : index
    %1532 = vector.load %arg4[%c504_121, %c0_122] : memref<552x128xf32, #tpu.memory_space<vmem>>, vector<6x128xf32>
    %cst_123 = arith.constant 1.000000e-01 : f32
    %1533 = vector.broadcast %cst_123 : f32 to vector<6x128xf32>
    %1534 = arith.mulf %1533, %1532 : vector<6x128xf32>
    %1535 = arith.maximumf %1532, %1534 : vector<6x128xf32>
    %c367 = arith.constant 367 : index
    %1536 = memref.load %arg1[%c367] : memref<395xf32, #tpu.memory_space<smem>>
    %1537 = vector.broadcast %1536 : f32 to vector<6x128xf32>
    %1538 = arith.mulf %1535, %1537 : vector<6x128xf32>
    %c373 = arith.constant 373 : index
    %1539 = memref.load %arg1[%c373] : memref<395xf32, #tpu.memory_space<smem>>
    %1540 = vector.broadcast %1539 : f32 to vector<6x128xf32>
    %1541 = arith.addf %1538, %1540 : vector<6x128xf32>
    %c362 = arith.constant 362 : index
    %1542 = memref.load %arg1[%c362] : memref<395xf32, #tpu.memory_space<smem>>
    %cst_124 = arith.constant 0.000000e+00 : f32
    %1543 = vector.broadcast %cst_124 : f32 to vector<6x128xf32>
    %1544 = vector.broadcast %1542 : f32 to vector<6x128xf32>
    %1545 = arith.addf %1543, %1544 : vector<6x128xf32>
    %c512 = arith.constant 512 : index
    %c0_125 = arith.constant 0 : index
    %1546 = vector.load %arg4[%c512, %c0_125] : memref<552x128xf32, #tpu.memory_space<vmem>>, vector<6x128xf32>
    tpu.vector_store %arg4[%c512, %c0_125], %1545 {strides = array<i32>} : memref<552x128xf32, #tpu.memory_space<vmem>>, vector<6x128xf32>,
    %c298 = arith.constant 298 : index
    %1547 = memref.load %arg1[%c298] : memref<395xf32, #tpu.memory_space<smem>>
    %1548 = vector.broadcast %1547 : f32 to vector<2x128xf32>
    %1549 = arith.mulf %1548, %1256 : vector<2x128xf32>
    %c316 = arith.constant 316 : index
    %1550 = memref.load %arg1[%c316] : memref<395xf32, #tpu.memory_space<smem>>
    %1551 = vector.broadcast %1550 : f32 to vector<2x128xf32>
    %1552 = arith.mulf %1551, %1259 : vector<2x128xf32>
    %1553 = arith.addf %1549, %1552 : vector<2x128xf32>
    %c334 = arith.constant 334 : index
    %1554 = memref.load %arg1[%c334] : memref<395xf32, #tpu.memory_space<smem>>
    %1555 = vector.broadcast %1554 : f32 to vector<2x128xf32>
    %1556 = arith.mulf %1555, %1262 : vector<2x128xf32>
    %1557 = arith.addf %1553, %1556 : vector<2x128xf32>
    %c352 = arith.constant 352 : index
    %1558 = memref.load %arg1[%c352] : memref<395xf32, #tpu.memory_space<smem>>
    %1559 = vector.broadcast %1558 : f32 to vector<2x128xf32>
    %1560 = arith.mulf %1559, %1265 : vector<2x128xf32>
    %1561 = arith.addf %1557, %1560 : vector<2x128xf32>
    %c512_126 = arith.constant 512 : index
    %c0_127 = arith.constant 0 : index
    %1562 = tpu.strided_load %arg4[%c512_126, %c0_127] {strides = array<i32: 2, 1>} : memref<552x128xf32, #tpu.memory_space<vmem>>, vector<2x128xf32>
    %1563 = arith.addf %1562, %1561 : vector<2x128xf32>
    %c512_128 = arith.constant 512 : index
    %c0_129 = arith.constant 0 : index
    %1564 = tpu.strided_load %arg4[%c512_128, %c0_129] {strides = array<i32: 2, 1>} : memref<552x128xf32, #tpu.memory_space<vmem>>, vector<2x128xf32>
    tpu.strided_store %arg4[%c512_128, %c0_129], %1563 {strides = array<i32: 2, 1>} : memref<552x128xf32, #tpu.memory_space<vmem>>, vector<2x128xf32>
    %c299 = arith.constant 299 : index
    %1565 = memref.load %arg1[%c299] : memref<395xf32, #tpu.memory_space<smem>>
    %1566 = vector.broadcast %1565 : f32 to vector<2x128xf32>
    %1567 = arith.mulf %1566, %1256 : vector<2x128xf32>
    %c317 = arith.constant 317 : index
    %1568 = memref.load %arg1[%c317] : memref<395xf32, #tpu.memory_space<smem>>
    %1569 = vector.broadcast %1568 : f32 to vector<2x128xf32>
    %1570 = arith.mulf %1569, %1259 : vector<2x128xf32>
    %1571 = arith.addf %1567, %1570 : vector<2x128xf32>
    %c335 = arith.constant 335 : index
    %1572 = memref.load %arg1[%c335] : memref<395xf32, #tpu.memory_space<smem>>
    %1573 = vector.broadcast %1572 : f32 to vector<2x128xf32>
    %1574 = arith.mulf %1573, %1262 : vector<2x128xf32>
    %1575 = arith.addf %1571, %1574 : vector<2x128xf32>
    %c353 = arith.constant 353 : index
    %1576 = memref.load %arg1[%c353] : memref<395xf32, #tpu.memory_space<smem>>
    %1577 = vector.broadcast %1576 : f32 to vector<2x128xf32>
    %1578 = arith.mulf %1577, %1265 : vector<2x128xf32>
    %1579 = arith.addf %1575, %1578 : vector<2x128xf32>
    %c513 = arith.constant 513 : index
    %c0_130 = arith.constant 0 : index
    %1580 = tpu.strided_load %arg4[%c513, %c0_130] {strides = array<i32: 2, 1>} : memref<552x128xf32, #tpu.memory_space<vmem>>, vector<2x128xf32>
    %1581 = arith.addf %1580, %1579 : vector<2x128xf32>
    %c513_131 = arith.constant 513 : index
    %c0_132 = arith.constant 0 : index
    %1582 = tpu.strided_load %arg4[%c513_131, %c0_132] {strides = array<i32: 2, 1>} : memref<552x128xf32, #tpu.memory_space<vmem>>, vector<2x128xf32>
    tpu.strided_store %arg4[%c513_131, %c0_132], %1581 {strides = array<i32: 2, 1>} : memref<552x128xf32, #tpu.memory_space<vmem>>, vector<2x128xf32>
    %c300 = arith.constant 300 : index
    %1583 = memref.load %arg1[%c300] : memref<395xf32, #tpu.memory_space<smem>>
    %1584 = vector.broadcast %1583 : f32 to vector<2x128xf32>
    %1585 = arith.mulf %1584, %1256 : vector<2x128xf32>
    %c318 = arith.constant 318 : index
    %1586 = memref.load %arg1[%c318] : memref<395xf32, #tpu.memory_space<smem>>
    %1587 = vector.broadcast %1586 : f32 to vector<2x128xf32>
    %1588 = arith.mulf %1587, %1259 : vector<2x128xf32>
    %1589 = arith.addf %1585, %1588 : vector<2x128xf32>
    %c336_133 = arith.constant 336 : index
    %1590 = memref.load %arg1[%c336_133] : memref<395xf32, #tpu.memory_space<smem>>
    %1591 = vector.broadcast %1590 : f32 to vector<2x128xf32>
    %1592 = arith.mulf %1591, %1262 : vector<2x128xf32>
    %1593 = arith.addf %1589, %1592 : vector<2x128xf32>
    %c354 = arith.constant 354 : index
    %1594 = memref.load %arg1[%c354] : memref<395xf32, #tpu.memory_space<smem>>
    %1595 = vector.broadcast %1594 : f32 to vector<2x128xf32>
    %1596 = arith.mulf %1595, %1265 : vector<2x128xf32>
    %1597 = arith.addf %1593, %1596 : vector<2x128xf32>
    %c514 = arith.constant 514 : index
    %c0_134 = arith.constant 0 : index
    %1598 = tpu.strided_load %arg4[%c514, %c0_134] {strides = array<i32: 2, 1>} : memref<552x128xf32, #tpu.memory_space<vmem>>, vector<2x128xf32>
    %1599 = arith.addf %1598, %1597 : vector<2x128xf32>
    %c514_135 = arith.constant 514 : index
    %c0_136 = arith.constant 0 : index
    %1600 = tpu.strided_load %arg4[%c514_135, %c0_136] {strides = array<i32: 2, 1>} : memref<552x128xf32, #tpu.memory_space<vmem>>, vector<2x128xf32>
    tpu.strided_store %arg4[%c514_135, %c0_136], %1599 {strides = array<i32: 2, 1>} : memref<552x128xf32, #tpu.memory_space<vmem>>, vector<2x128xf32>
    %c512_137 = arith.constant 512 : index
    %c0_138 = arith.constant 0 : index
    %1601 = vector.load %arg4[%c512_137, %c0_138] : memref<552x128xf32, #tpu.memory_space<vmem>>, vector<6x128xf32>
    %cst_139 = arith.constant 1.000000e-01 : f32
    %1602 = vector.broadcast %cst_139 : f32 to vector<6x128xf32>
    %1603 = arith.mulf %1602, %1601 : vector<6x128xf32>
    %1604 = arith.maximumf %1601, %1603 : vector<6x128xf32>
    %c368 = arith.constant 368 : index
    %1605 = memref.load %arg1[%c368] : memref<395xf32, #tpu.memory_space<smem>>
    %1606 = vector.broadcast %1605 : f32 to vector<6x128xf32>
    %1607 = arith.mulf %1604, %1606 : vector<6x128xf32>
    %c374 = arith.constant 374 : index
    %1608 = memref.load %arg1[%c374] : memref<395xf32, #tpu.memory_space<smem>>
    %1609 = vector.broadcast %1608 : f32 to vector<6x128xf32>
    %1610 = arith.addf %1607, %1609 : vector<6x128xf32>
    %c363 = arith.constant 363 : index
    %1611 = memref.load %arg1[%c363] : memref<395xf32, #tpu.memory_space<smem>>
    %cst_140 = arith.constant 0.000000e+00 : f32
    %1612 = vector.broadcast %cst_140 : f32 to vector<6x128xf32>
    %1613 = vector.broadcast %1611 : f32 to vector<6x128xf32>
    %1614 = arith.addf %1612, %1613 : vector<6x128xf32>
    %c520 = arith.constant 520 : index
    %c0_141 = arith.constant 0 : index
    %1615 = vector.load %arg4[%c520, %c0_141] : memref<552x128xf32, #tpu.memory_space<vmem>>, vector<6x128xf32>
    tpu.vector_store %arg4[%c520, %c0_141], %1614 {strides = array<i32>} : memref<552x128xf32, #tpu.memory_space<vmem>>, vector<6x128xf32>,
    %c301 = arith.constant 301 : index
    %1616 = memref.load %arg1[%c301] : memref<395xf32, #tpu.memory_space<smem>>
    %1617 = vector.broadcast %1616 : f32 to vector<2x128xf32>
    %1618 = arith.mulf %1617, %1256 : vector<2x128xf32>
    %c319 = arith.constant 319 : index
    %1619 = memref.load %arg1[%c319] : memref<395xf32, #tpu.memory_space<smem>>
    %1620 = vector.broadcast %1619 : f32 to vector<2x128xf32>
    %1621 = arith.mulf %1620, %1259 : vector<2x128xf32>
    %1622 = arith.addf %1618, %1621 : vector<2x128xf32>
    %c337 = arith.constant 337 : index
    %1623 = memref.load %arg1[%c337] : memref<395xf32, #tpu.memory_space<smem>>
    %1624 = vector.broadcast %1623 : f32 to vector<2x128xf32>
    %1625 = arith.mulf %1624, %1262 : vector<2x128xf32>
    %1626 = arith.addf %1622, %1625 : vector<2x128xf32>
    %c355 = arith.constant 355 : index
    %1627 = memref.load %arg1[%c355] : memref<395xf32, #tpu.memory_space<smem>>
    %1628 = vector.broadcast %1627 : f32 to vector<2x128xf32>
    %1629 = arith.mulf %1628, %1265 : vector<2x128xf32>
    %1630 = arith.addf %1626, %1629 : vector<2x128xf32>
    %c520_142 = arith.constant 520 : index
    %c0_143 = arith.constant 0 : index
    %1631 = tpu.strided_load %arg4[%c520_142, %c0_143] {strides = array<i32: 2, 1>} : memref<552x128xf32, #tpu.memory_space<vmem>>, vector<2x128xf32>
    %1632 = arith.addf %1631, %1630 : vector<2x128xf32>
    %c520_144 = arith.constant 520 : index
    %c0_145 = arith.constant 0 : index
    %1633 = tpu.strided_load %arg4[%c520_144, %c0_145] {strides = array<i32: 2, 1>} : memref<552x128xf32, #tpu.memory_space<vmem>>, vector<2x128xf32>
    tpu.strided_store %arg4[%c520_144, %c0_145], %1632 {strides = array<i32: 2, 1>} : memref<552x128xf32, #tpu.memory_space<vmem>>, vector<2x128xf32>
    %c302 = arith.constant 302 : index
    %1634 = memref.load %arg1[%c302] : memref<395xf32, #tpu.memory_space<smem>>
    %1635 = vector.broadcast %1634 : f32 to vector<2x128xf32>
    %1636 = arith.mulf %1635, %1256 : vector<2x128xf32>
    %c320 = arith.constant 320 : index
    %1637 = memref.load %arg1[%c320] : memref<395xf32, #tpu.memory_space<smem>>
    %1638 = vector.broadcast %1637 : f32 to vector<2x128xf32>
    %1639 = arith.mulf %1638, %1259 : vector<2x128xf32>
    %1640 = arith.addf %1636, %1639 : vector<2x128xf32>
    %c338 = arith.constant 338 : index
    %1641 = memref.load %arg1[%c338] : memref<395xf32, #tpu.memory_space<smem>>
    %1642 = vector.broadcast %1641 : f32 to vector<2x128xf32>
    %1643 = arith.mulf %1642, %1262 : vector<2x128xf32>
    %1644 = arith.addf %1640, %1643 : vector<2x128xf32>
    %c356 = arith.constant 356 : index
    %1645 = memref.load %arg1[%c356] : memref<395xf32, #tpu.memory_space<smem>>
    %1646 = vector.broadcast %1645 : f32 to vector<2x128xf32>
    %1647 = arith.mulf %1646, %1265 : vector<2x128xf32>
    %1648 = arith.addf %1644, %1647 : vector<2x128xf32>
    %c521 = arith.constant 521 : index
    %c0_146 = arith.constant 0 : index
    %1649 = tpu.strided_load %arg4[%c521, %c0_146] {strides = array<i32: 2, 1>} : memref<552x128xf32, #tpu.memory_space<vmem>>, vector<2x128xf32>
    %1650 = arith.addf %1649, %1648 : vector<2x128xf32>
    %c521_147 = arith.constant 521 : index
    %c0_148 = arith.constant 0 : index
    %1651 = tpu.strided_load %arg4[%c521_147, %c0_148] {strides = array<i32: 2, 1>} : memref<552x128xf32, #tpu.memory_space<vmem>>, vector<2x128xf32>
    tpu.strided_store %arg4[%c521_147, %c0_148], %1650 {strides = array<i32: 2, 1>} : memref<552x128xf32, #tpu.memory_space<vmem>>, vector<2x128xf32>
    %c303 = arith.constant 303 : index
    %1652 = memref.load %arg1[%c303] : memref<395xf32, #tpu.memory_space<smem>>
    %1653 = vector.broadcast %1652 : f32 to vector<2x128xf32>
    %1654 = arith.mulf %1653, %1256 : vector<2x128xf32>
    %c321 = arith.constant 321 : index
    %1655 = memref.load %arg1[%c321] : memref<395xf32, #tpu.memory_space<smem>>
    %1656 = vector.broadcast %1655 : f32 to vector<2x128xf32>
    %1657 = arith.mulf %1656, %1259 : vector<2x128xf32>
    %1658 = arith.addf %1654, %1657 : vector<2x128xf32>
    %c339 = arith.constant 339 : index
    %1659 = memref.load %arg1[%c339] : memref<395xf32, #tpu.memory_space<smem>>
    %1660 = vector.broadcast %1659 : f32 to vector<2x128xf32>
    %1661 = arith.mulf %1660, %1262 : vector<2x128xf32>
    %1662 = arith.addf %1658, %1661 : vector<2x128xf32>
    %c357 = arith.constant 357 : index
    %1663 = memref.load %arg1[%c357] : memref<395xf32, #tpu.memory_space<smem>>
    %1664 = vector.broadcast %1663 : f32 to vector<2x128xf32>
    %1665 = arith.mulf %1664, %1265 : vector<2x128xf32>
    %1666 = arith.addf %1662, %1665 : vector<2x128xf32>
    %c522 = arith.constant 522 : index
    %c0_149 = arith.constant 0 : index
    %1667 = tpu.strided_load %arg4[%c522, %c0_149] {strides = array<i32: 2, 1>} : memref<552x128xf32, #tpu.memory_space<vmem>>, vector<2x128xf32>
    %1668 = arith.addf %1667, %1666 : vector<2x128xf32>
    %c522_150 = arith.constant 522 : index
    %c0_151 = arith.constant 0 : index
    %1669 = tpu.strided_load %arg4[%c522_150, %c0_151] {strides = array<i32: 2, 1>} : memref<552x128xf32, #tpu.memory_space<vmem>>, vector<2x128xf32>
    tpu.strided_store %arg4[%c522_150, %c0_151], %1668 {strides = array<i32: 2, 1>} : memref<552x128xf32, #tpu.memory_space<vmem>>, vector<2x128xf32>
    %c520_152 = arith.constant 520 : index
    %c0_153 = arith.constant 0 : index
    %1670 = vector.load %arg4[%c520_152, %c0_153] : memref<552x128xf32, #tpu.memory_space<vmem>>, vector<6x128xf32>
    %cst_154 = arith.constant 1.000000e-01 : f32
    %1671 = vector.broadcast %cst_154 : f32 to vector<6x128xf32>
    %1672 = arith.mulf %1671, %1670 : vector<6x128xf32>
    %1673 = arith.maximumf %1670, %1672 : vector<6x128xf32>
    %c369 = arith.constant 369 : index
    %1674 = memref.load %arg1[%c369] : memref<395xf32, #tpu.memory_space<smem>>
    %1675 = vector.broadcast %1674 : f32 to vector<6x128xf32>
    %1676 = arith.mulf %1673, %1675 : vector<6x128xf32>
    %c375 = arith.constant 375 : index
    %1677 = memref.load %arg1[%c375] : memref<395xf32, #tpu.memory_space<smem>>
    %1678 = vector.broadcast %1677 : f32 to vector<6x128xf32>
    %1679 = arith.addf %1676, %1678 : vector<6x128xf32>
    %c394 = arith.constant 394 : index
    %1680 = memref.load %arg1[%c394] : memref<395xf32, #tpu.memory_space<smem>>
    %cst_155 = arith.constant 0.000000e+00 : f32
    %1681 = vector.broadcast %cst_155 : f32 to vector<19x128xf32>
    %1682 = vector.broadcast %1680 : f32 to vector<19x128xf32>
    %1683 = arith.addf %1681, %1682 : vector<19x128xf32>
    %c528 = arith.constant 528 : index
    %c0_156 = arith.constant 0 : index
    %1684 = vector.load %arg4[%c528, %c0_156] : memref<552x128xf32, #tpu.memory_space<vmem>>, vector<19x128xf32>
    tpu.vector_store %arg4[%c528, %c0_156], %1683 {strides = array<i32>} : memref<552x128xf32, #tpu.memory_space<vmem>>, vector<19x128xf32>,
    %c376 = arith.constant 376 : index
    %1685 = memref.load %arg1[%c376] : memref<395xf32, #tpu.memory_space<smem>>
    %1686 = vector.broadcast %1685 : f32 to vector<6x128xf32>
    %1687 = arith.mulf %1686, %1334 : vector<6x128xf32>
    %c379 = arith.constant 379 : index
    %1688 = memref.load %arg1[%c379] : memref<395xf32, #tpu.memory_space<smem>>
    %1689 = vector.broadcast %1688 : f32 to vector<6x128xf32>
    %1690 = arith.mulf %1689, %1403 : vector<6x128xf32>
    %1691 = arith.addf %1687, %1690 : vector<6x128xf32>
    %c382 = arith.constant 382 : index
    %1692 = memref.load %arg1[%c382] : memref<395xf32, #tpu.memory_space<smem>>
    %1693 = vector.broadcast %1692 : f32 to vector<6x128xf32>
    %1694 = arith.mulf %1693, %1472 : vector<6x128xf32>
    %1695 = arith.addf %1691, %1694 : vector<6x128xf32>
    %c385 = arith.constant 385 : index
    %1696 = memref.load %arg1[%c385] : memref<395xf32, #tpu.memory_space<smem>>
    %1697 = vector.broadcast %1696 : f32 to vector<6x128xf32>
    %1698 = arith.mulf %1697, %1541 : vector<6x128xf32>
    %1699 = arith.addf %1695, %1698 : vector<6x128xf32>
    %c388 = arith.constant 388 : index
    %1700 = memref.load %arg1[%c388] : memref<395xf32, #tpu.memory_space<smem>>
    %1701 = vector.broadcast %1700 : f32 to vector<6x128xf32>
    %1702 = arith.mulf %1701, %1610 : vector<6x128xf32>
    %1703 = arith.addf %1699, %1702 : vector<6x128xf32>
    %c391 = arith.constant 391 : index
    %1704 = memref.load %arg1[%c391] : memref<395xf32, #tpu.memory_space<smem>>
    %1705 = vector.broadcast %1704 : f32 to vector<6x128xf32>
    %1706 = arith.mulf %1705, %1679 : vector<6x128xf32>
    %1707 = arith.addf %1703, %1706 : vector<6x128xf32>
    %c528_157 = arith.constant 528 : index
    %c0_158 = arith.constant 0 : index
    %1708 = tpu.strided_load %arg4[%c528_157, %c0_158] {strides = array<i32: 3, 1>} : memref<552x128xf32, #tpu.memory_space<vmem>>, vector<6x128xf32>
    %1709 = arith.addf %1708, %1707 : vector<6x128xf32>
    %c528_159 = arith.constant 528 : index
    %c0_160 = arith.constant 0 : index
    %1710 = tpu.strided_load %arg4[%c528_159, %c0_160] {strides = array<i32: 3, 1>} : memref<552x128xf32, #tpu.memory_space<vmem>>, vector<6x128xf32>
    tpu.strided_store %arg4[%c528_159, %c0_160], %1709 {strides = array<i32: 3, 1>} : memref<552x128xf32, #tpu.memory_space<vmem>>, vector<6x128xf32>
    %c377 = arith.constant 377 : index
    %1711 = memref.load %arg1[%c377] : memref<395xf32, #tpu.memory_space<smem>>
    %1712 = vector.broadcast %1711 : f32 to vector<6x128xf32>
    %1713 = arith.mulf %1712, %1334 : vector<6x128xf32>
    %c380 = arith.constant 380 : index
    %1714 = memref.load %arg1[%c380] : memref<395xf32, #tpu.memory_space<smem>>
    %1715 = vector.broadcast %1714 : f32 to vector<6x128xf32>
    %1716 = arith.mulf %1715, %1403 : vector<6x128xf32>
    %1717 = arith.addf %1713, %1716 : vector<6x128xf32>
    %c383 = arith.constant 383 : index
    %1718 = memref.load %arg1[%c383] : memref<395xf32, #tpu.memory_space<smem>>
    %1719 = vector.broadcast %1718 : f32 to vector<6x128xf32>
    %1720 = arith.mulf %1719, %1472 : vector<6x128xf32>
    %1721 = arith.addf %1717, %1720 : vector<6x128xf32>
    %c386 = arith.constant 386 : index
    %1722 = memref.load %arg1[%c386] : memref<395xf32, #tpu.memory_space<smem>>
    %1723 = vector.broadcast %1722 : f32 to vector<6x128xf32>
    %1724 = arith.mulf %1723, %1541 : vector<6x128xf32>
    %1725 = arith.addf %1721, %1724 : vector<6x128xf32>
    %c389 = arith.constant 389 : index
    %1726 = memref.load %arg1[%c389] : memref<395xf32, #tpu.memory_space<smem>>
    %1727 = vector.broadcast %1726 : f32 to vector<6x128xf32>
    %1728 = arith.mulf %1727, %1610 : vector<6x128xf32>
    %1729 = arith.addf %1725, %1728 : vector<6x128xf32>
    %c392 = arith.constant 392 : index
    %1730 = memref.load %arg1[%c392] : memref<395xf32, #tpu.memory_space<smem>>
    %1731 = vector.broadcast %1730 : f32 to vector<6x128xf32>
    %1732 = arith.mulf %1731, %1679 : vector<6x128xf32>
    %1733 = arith.addf %1729, %1732 : vector<6x128xf32>
    %c529 = arith.constant 529 : index
    %c0_161 = arith.constant 0 : index
    %1734 = tpu.strided_load %arg4[%c529, %c0_161] {strides = array<i32: 3, 1>} : memref<552x128xf32, #tpu.memory_space<vmem>>, vector<6x128xf32>
    %1735 = arith.addf %1734, %1733 : vector<6x128xf32>
    %c529_162 = arith.constant 529 : index
    %c0_163 = arith.constant 0 : index
    %1736 = tpu.strided_load %arg4[%c529_162, %c0_163] {strides = array<i32: 3, 1>} : memref<552x128xf32, #tpu.memory_space<vmem>>, vector<6x128xf32>
    tpu.strided_store %arg4[%c529_162, %c0_163], %1735 {strides = array<i32: 3, 1>} : memref<552x128xf32, #tpu.memory_space<vmem>>, vector<6x128xf32>
    %c378 = arith.constant 378 : index
    %1737 = memref.load %arg1[%c378] : memref<395xf32, #tpu.memory_space<smem>>
    %1738 = vector.broadcast %1737 : f32 to vector<6x128xf32>
    %1739 = arith.mulf %1738, %1334 : vector<6x128xf32>
    %c381 = arith.constant 381 : index
    %1740 = memref.load %arg1[%c381] : memref<395xf32, #tpu.memory_space<smem>>
    %1741 = vector.broadcast %1740 : f32 to vector<6x128xf32>
    %1742 = arith.mulf %1741, %1403 : vector<6x128xf32>
    %1743 = arith.addf %1739, %1742 : vector<6x128xf32>
    %c384_164 = arith.constant 384 : index
    %1744 = memref.load %arg1[%c384_164] : memref<395xf32, #tpu.memory_space<smem>>
    %1745 = vector.broadcast %1744 : f32 to vector<6x128xf32>
    %1746 = arith.mulf %1745, %1472 : vector<6x128xf32>
    %1747 = arith.addf %1743, %1746 : vector<6x128xf32>
    %c387 = arith.constant 387 : index
    %1748 = memref.load %arg1[%c387] : memref<395xf32, #tpu.memory_space<smem>>
    %1749 = vector.broadcast %1748 : f32 to vector<6x128xf32>
    %1750 = arith.mulf %1749, %1541 : vector<6x128xf32>
    %1751 = arith.addf %1747, %1750 : vector<6x128xf32>
    %c390 = arith.constant 390 : index
    %1752 = memref.load %arg1[%c390] : memref<395xf32, #tpu.memory_space<smem>>
    %1753 = vector.broadcast %1752 : f32 to vector<6x128xf32>
    %1754 = arith.mulf %1753, %1610 : vector<6x128xf32>
    %1755 = arith.addf %1751, %1754 : vector<6x128xf32>
    %c393 = arith.constant 393 : index
    %1756 = memref.load %arg1[%c393] : memref<395xf32, #tpu.memory_space<smem>>
    %1757 = vector.broadcast %1756 : f32 to vector<6x128xf32>
    %1758 = arith.mulf %1757, %1679 : vector<6x128xf32>
    %1759 = arith.addf %1755, %1758 : vector<6x128xf32>
    %c530 = arith.constant 530 : index
    %c0_165 = arith.constant 0 : index
    %1760 = tpu.strided_load %arg4[%c530, %c0_165] {strides = array<i32: 3, 1>} : memref<552x128xf32, #tpu.memory_space<vmem>>, vector<6x128xf32>
    %1761 = arith.addf %1760, %1759 : vector<6x128xf32>
    %c530_166 = arith.constant 530 : index
    %c0_167 = arith.constant 0 : index
    %1762 = tpu.strided_load %arg4[%c530_166, %c0_167] {strides = array<i32: 3, 1>} : memref<552x128xf32, #tpu.memory_space<vmem>>, vector<6x128xf32>
    tpu.strided_store %arg4[%c530_166, %c0_167], %1761 {strides = array<i32: 3, 1>} : memref<552x128xf32, #tpu.memory_space<vmem>>, vector<6x128xf32>
    %c528_168 = arith.constant 528 : index
    %c0_169 = arith.constant 0 : index
    %1763 = vector.load %arg4[%c528_168, %c0_169] : memref<552x128xf32, #tpu.memory_space<vmem>>, vector<19x128xf32>
    %c0_170 = arith.constant 0 : index
    %c0_171 = arith.constant 0 : index
    %c0_172 = arith.constant 0 : index
    %1764 = vector.load %arg3[%c0_170, %c0_171, %c0_172] : memref<1x19x128xf32, #tpu.memory_space<vmem>>, vector<1x19x128xf32>
    %1765 = vector.shape_cast %1764 : vector<1x19x128xf32> to vector<19x128xf32>
    %1766 = vector.shape_cast %1763 : vector<19x128xf32> to vector<1x19x128xf32>
    tpu.vector_store %arg3[%c0_170, %c0_171, %c0_172], %1766 {strides = array<i32>} : memref<1x19x128xf32, #tpu.memory_space<vmem>>, vector<1x19x128xf32>,
    return
  }
  func.func @transform_0(%arg0: i32) -> i32 {
    %c0_i32 = arith.constant 0 : i32
    %c0_i32_0 = arith.constant 0 : i32
    return %c0_i32 : i32
  }
  func.func @transform_1(%arg0: i32) -> (i32, i32) {
    %c0_i32 = arith.constant 0 : i32
    %c0_i32_0 = arith.constant 0 : i32
    return %c0_i32, %arg0 : i32, i32
  }
  func.func @transform_2(%arg0: i32) -> (i32, i32, i32) {
    %c0_i32 = arith.constant 0 : i32
    %c0_i32_0 = arith.constant 0 : i32
    %c0_i32_1 = arith.constant 0 : i32
    return %c0_i32, %c0_i32_0, %arg0 : i32, i32, i32
  }
}

</mosaic_0001>

<bundles_post_ra>
// kernel: sae_forward_pallas.1
= control target key start
LH: loop header
LB: loop body
LE: loop exit
PB: predicated region body
PF: predicated region fallthrough
CT: control target
= control target key end

     0   :  { %s9190_s0 = inlined_call_operand.vmem [shape: f32[395], index: 0, kind: input, shape index: {}]   ;;  %s9191_s1 = inlined_call_operand.vmem [shape: f32[50,128], index: 1, kind: input, shape index: {}]   ;;  %s9192_s2 = inlined_call_operand.vmem [shape: f32[1,19,128], index: 2, kind: output, shape index: {}]  }
   0x1   :  { %9699 = sst [smem:[#allocation209_spill]] %s9192_s2 }
   0x2   :  { %7 = vsyncpa [#allocation4], 0  ;;  %s14_s11 = sshll.u32 %s9190_s0, 4  ;;  %s15_s11 = int_to_ptr.vmem [resolvable:$true] %s14_s11 }
   0x3   :  { %s4484_s12 = scalar_lea.vmem %s15_s11, 64  ;;  %p4489_p1 = scmp.lt.s32.totalorder %s15_s11, %s15_s11 }
   0x4   :  { %p4485_p0 = scmp.ne.s32.totalorder %s15_s11, %s4484_s12  ;;  %p4490_p2 = scmp.lt.s32.totalorder %s4484_s12, %s4484_s12 }
   0x6   :  { %p4491_p3 = por %p4490_p2, %p4489_p1 }
   0x8   :  { %p4492_p4 = pnand %p4491_p3, %p4485_p0 }
   0xa   :  { %4495 = shalt.err (!%p4492_p4)
}
   0xb   :  { %s4498_s13 = smov [#allocation3]  }
   0xc   :  { %17 = dma.vmem_to_smem %s15_s11, 64, %s4498_s13, [#allocation4]  }
   0xd   :  { %4496 = dma.done.wait [#allocation4], 64  }
   0xe   :  { %4497 = vsyncadd [#allocation4], 4294967232 }
   0xf   :  { %23 = sfence }
  0x10   :  { %s31_s14 = sld [smem:[#allocation3]]  ;;  %s4082_s15 = sld [smem:[#allocation3 + $0x1]]  ;;  %v4520_v0 = vld [vmem:[%s9191_s1] sm:$0xff]  ;;  %v4525_v1 = vld [vmem:[%s9191_s1 + $0x8] sm:$0xff]  ;;  %v4530_v2 = vld [vmem:[%s9191_s1 + $0x10] sm:$0xff]  ;;  %vm55_vm0 = vcmask 1046528  }
  0x11   :  { %s4083_s16 = sld [smem:[#allocation3 + $0x2]]  ;;  %s4105_s17 = sld [smem:[#allocation3 + $0x18]]  ;;  %vm97_vm1 = vcmask 1045504   ;;  %v4557_v12 = vld [vmem:[%s9191_s1 + $0x18] sm:$0xff]  ;;  %v4570_v17 = vld [vmem:[%s9191_s1 + $0x20] sm:$0xff]  ;;  %v4591_v42 = vld [vmem:[%s9191_s1 + $0x28] sm:$0xff] }
  0x12   :  { %s4542_s23 = sld [smem:[#allocation3 + $0x20]]  ;;  %v4608_v55 = vld [vmem:[%s9191_s1 + $0x30] sm:$0x3]  ;;  %s4610_s5 = sld [smem:[#allocation3 + $0x3]] }
  0x13   :  { %s4544_s24 = sld [smem:[#allocation3 + $0x28]]  ;;  %s4612_s6 = sld [smem:[#allocation3 + $0x4]] }
  0x14   :  { %s4614_s7 = sld [smem:[#allocation3 + $0x5]]  ;;  %s4650_s8 = sld [smem:[#allocation3 + $0x19]] }
  0x15   :  { %s4691_s9 = sld [smem:[#allocation3 + $0x21]]  ;;  %s4706_s11 = sld [smem:[#allocation3 + $0x6]] }
  0x16   :  { %v4532_v3 = vstv %s31_s14  ;;  %v4538_v6 = vstv %s4082_s15  ;;  %s4702_s10 = sld [smem:[#allocation3 + $0x29]]  ;;  %s4708_s12 = sld [smem:[#allocation3 + $0x7]] }
  0x17   :  { %v33_v4 = vmul.f32 %v4532_v3, %v4520_v0  ;;  %v34_v5 = vmul.f32 %v4532_v3, %v4525_v1  ;;  %v4540_v7 = vstv %s4083_s16  ;;  %v41_v8 = vmul.f32 %v4538_v6, %v4520_v0  ;;  %s4722_s13 = sld [smem:[#allocation3 + $0x8]]  ;;  %s4724_s14 = sld [smem:[#allocation3 + $0x1a]] }
  0x18   :  { %v42_v9 = vmul.f32 %v4538_v6, %v4525_v1  ;;  %v43_v10 = vmul.f32 %v4538_v6, %v4530_v2  ;;  %v83_v11 = vmul.f32 %v4540_v7, %v4520_v0  ;;  %v84_v13 = vmul.f32 %v4540_v7, %v4525_v1  ;;  %s4803_s15 = sld [smem:[#allocation3 + $0x9]]  ;;  %s4805_s16 = sld [smem:[#allocation3 + $0x22]] }
  0x19   :  { %v85_v14 = vmul.f32 %v4540_v7, %v4530_v2  ;;  %v4563_v15 = vstv %s4105_s17  ;;  %v35_v16 = vmul.f32 %v4532_v3, %v4530_v2  ;;  %v56_v18 = vrot.slane %v41_v8, 1  ;;  %s4813_s17 = sld [smem:[#allocation3 + $0xa]]  ;;  %s4815_s18 = sld [smem:[#allocation3 + $0xb]] }
  0x1a   :  { %v57_v19 = vrot.slane %v42_v9, 1  ;;  %v59_v20 = vrot.slane %v43_v10, 1  ;;  %v98_v21 = vrot.slane %v83_v11, 2  ;;  %v99_v22 = vrot.slane %v84_v13, 2  ;;  %s4845_s19 = sld [smem:[#allocation3 + $0x1b]]  ;;  %s4858_s0 = sld [smem:[#allocation3 + $0x2a]] }
  0x1b   :  { %v101_v23 = vrot.slane %v85_v14, 2  ;;  %v44_v24 = vmul.f32 %v4538_v6, %v4557_v12  ;;  %v86_v25 = vmul.f32 %v4540_v7, %v4557_v12  ;;  %v36_v28 = vmul.f32 %v4532_v3, %v4557_v12  ;;  %s4885_s20 = sld [smem:[#allocation3 + $0x23]]  ;;  %s4902_s22 = sld [smem:[#allocation3 + $0xc]] }
  0x1c   :  { %v58_v26 = vsel %vm55_vm0, %v56_v18, %v57_v19  ;;  %v60_v27 = vsel %vm55_vm0, %v57_v19, %v59_v20  ;;  %v45_v29 = vmul.f32 %v4538_v6, %v4570_v17  ;;  %v100_v32 = vsel %vm97_vm1, %v98_v21, %v99_v22  ;;  %s4893_s21 = sld [smem:[#allocation3 + $0x2b]]  ;;  %s4914_s25 = sld [smem:[#allocation3 + $0xd]] }
  0x1d   :  { %v75_v30 = vadd.f32 %v58_v26, %v33_v4  ;;  %v76_v31 = vadd.f32 %v60_v27, %v34_v5  ;;  %v102_v33 = vsel %vm97_vm1, %v99_v22, %v101_v23  ;;  %v61_v34 = vrot.slane %v44_v24, 1  ;;  %s4916_s26 = sld [smem:[#allocation3 + $0xe]]  ;;  %s4949_s27 = sld [smem:[#allocation3 + $0x1c]] }
  0x1e   :  { %v103_v35 = vrot.slane %v86_v25, 2  ;;  %v63_v36 = vrot.slane %v45_v29, 1  ;;  %v87_v37 = vmul.f32 %v4540_v7, %v4570_v17  ;;  %v827_v40 = vstv %s4542_s23  ;;  %s5013_s30 = sld [smem:[#allocation3 + $0xf]]  ;;  %s5021_s3 = sld [smem:[#allocation3 + $0x24]] }
  0x1f   :  { %v117_v38 = vadd.f32 %v100_v32, %v75_v30  ;;  %v118_v39 = vadd.f32 %v102_v33, %v76_v31  ;;  %v831_v41 = vstv %s4544_s24  ;;  %v62_v43 = vsel %vm55_vm0, %v59_v20, %v61_v34  ;;  %s5027_s4 = sld [smem:[#allocation3 + $0x10]]  ;;  %s5158_s28 = sld [smem:[#allocation3 + $0x12]] }
  0x20   :  { %v104_v44 = vsel %vm97_vm1, %v101_v23, %v103_v35  ;;  %v64_v45 = vsel %vm55_vm0, %v61_v34, %v63_v36  ;;  %v105_v46 = vrot.slane %v87_v37, 2  ;;  %v77_v49 = vadd.f32 %v62_v43, %v35_v16  ;;  %s5160_s29 = sld [smem:[#allocation3 + $0x14]]  ;;  %s5385_s23 = sld [smem:[#allocation3 + $0x30]] }
  0x21   :  { %v755_v47 = vadd.f32 %v4563_v15, %v117_v38  ;;  %v756_v48 = vadd.f32 %v4563_v15, %v118_v39  ;;  %v78_v50 = vadd.f32 %v64_v45, %v36_v28  ;;  %v37_v52 = vmul.f32 %v4532_v3, %v4570_v17  ;;  %s5407_s24 = sld [smem:[#allocation3 + $0x33]]  ;;  %s5622_s2 = sld [smem:[#allocation3 + $0x46]] }
  0x22   :  { %v106_v51 = vsel %vm97_vm1, %v103_v35, %v105_v46  ;;  %v46_v53 = vmul.f32 %v4538_v6, %v4591_v42  ;;  %v88_v54 = vmul.f32 %v4540_v7, %v4591_v42  ;;  %v119_v60 = vadd.f32 %v104_v44, %v77_v49 }
  0x23   :  { %v767_v56 = vrot.slane %v755_v47, 1  ;;  %v768_v57 = vrot.slane %v756_v48, 1  ;;  %v790_v58 = vrot.slane %v755_v47, 2  ;;  %v791_v59 = vrot.slane %v756_v48, 2 }
  0x24   :  { %v120_v61 = vadd.f32 %v106_v51, %v78_v50  ;;  %v65_v62 = vrot.slane %v46_v53, 1  ;;  %v107_v63 = vrot.slane %v88_v54, 2  ;;  %v38_v8 = vmul.f32 %v4532_v3, %v4591_v42 }
  0x25   :  { %v769_v4 = vsel %vm55_vm0, %v767_v56, %v768_v57  ;;  %v792_v5 = vsel %vm97_vm1, %v790_v58, %v791_v59  ;;  %v47_v9 = vmul.f32 %v4538_v6, %v4608_v55  ;;  %v757_v11 = vadd.f32 %v4563_v15, %v119_v60 }
  0x26   :  { %v784_v10 = vmax.f32 %v755_v47, %v769_v4  ;;  %v758_v13 = vadd.f32 %v4563_v15, %v120_v61  ;;  %v66_v14 = vsel %vm55_vm0, %v63_v36, %v65_v62  ;;  %v108_v18 = vsel %vm97_vm1, %v105_v46, %v107_v63  ;;  %9700 = sst [smem:[#allocation6_spill]] %s5385_s23 }
  0x27   :  { %v79_v16 = vadd.f32 %v66_v14, %v37_v52  ;;  %v67_v19 = vrot.slane %v47_v9, 1  ;;  %v89_v20 = vmul.f32 %v4540_v7, %v4608_v55  ;;  %v770_v22 = vrot.slane %v757_v11, 1  ;;  %9701 = sst [smem:[#allocation7_spill]] %s5407_s24 }
  0x28   :  { %v807_v21 = vmax.f32 %v784_v10, %v792_v5  ;;  %v793_v3 = vrot.slane %v757_v11, 2  ;;  %v772_v23 = vrot.slane %v758_v13, 1  ;;  %v795_v6 = vrot.slane %v758_v13, 2 }
  0x29   :  { %v121_v24 = vadd.f32 %v108_v18, %v79_v16  ;;  %v68_v25 = vsel %vm55_vm0, %v65_v62, %v67_v19  ;;  %v109_v26 = vrot.slane %v89_v20, 2  ;;  %v771_v27 = vsel %vm55_vm0, %v768_v57, %v770_v22 }
  0x2a   :  { %813 = vst [vmem:[#allocation2] sm:$0xff] %v807_v21  ;;  %v794_v28 = vsel %vm97_vm1, %v791_v59, %v793_v3  ;;  %v773_v29 = vsel %vm55_vm0, %v770_v22, %v772_v23  ;;  %v80_v7 = vadd.f32 %v68_v25, %v38_v8  ;;  %v785_v30 = vmax.f32 %v756_v48, %v771_v27 }
  0x2b   :  { %v786_v31 = vmax.f32 %v757_v11, %v773_v29  ;;  %v796_v32 = vsel %vm97_vm1, %v793_v3, %v795_v6  ;;  %v759_v33 = vadd.f32 %v4563_v15, %v121_v24  ;;  %v110_v34 = vsel %vm97_vm1, %v107_v63, %v109_v26 }
  0x2c   :  { %v4636_v35 = vstv %s4610_s5  ;;  %v4639_v36 = vstv %s4612_s6  ;;  %v4642_v37 = vstv %s4614_s7  ;;  %v808_v38 = vmax.f32 %v785_v30, %v794_v28  ;;  %s5029_s5 = sld [smem:[#allocation3 + $0x2c]]  ;;  %s5033_s6 = sld [smem:[#allocation3 + $0x11]] }
  0x2d   :  { %v809_v39 = vmax.f32 %v786_v31, %v796_v32  ;;  %v774_v43 = vrot.slane %v759_v33, 1  ;;  %v797_v44 = vrot.slane %v759_v33, 2  ;;  %v122_v45 = vadd.f32 %v110_v34, %v80_v7  ;;  %s5260_s7 = sld [smem:[#allocation3 + $0x16]] }
  0x2e   :  { %v125_v46 = vmul.f32 %v4636_v35, %v4520_v0  ;;  %v126_v47 = vmul.f32 %v4636_v35, %v4525_v1  ;;  %v133_v48 = vmul.f32 %v4639_v36, %v4520_v0  ;;  %814 = vst [vmem:[#allocation2 + $0x8] sm:$0xff] %v808_v38  ;;  %v134_v51 = vmul.f32 %v4639_v36, %v4525_v1 }
  0x2f   :  { %815 = vst [vmem:[#allocation2 + $0x10] sm:$0xff] %v809_v39  ;;  %v775_v49 = vsel %vm55_vm0, %v772_v23, %v774_v43  ;;  %v798_v50 = vsel %vm97_vm1, %v795_v6, %v797_v44  ;;  %v135_v52 = vmul.f32 %v4639_v36, %v4530_v2  ;;  %v760_v54 = vadd.f32 %v4563_v15, %v122_v45 }
  0x30   :  { %v787_v53 = vmax.f32 %v758_v13, %v775_v49  ;;  %v147_v56 = vrot.slane %v133_v48, 1  ;;  %v174_v57 = vmul.f32 %v4642_v37, %v4520_v0  ;;  %v148_v58 = vrot.slane %v134_v51, 1 }
  0x31   :  { %v150_v59 = vrot.slane %v135_v52, 1  ;;  %v175_v60 = vmul.f32 %v4642_v37, %v4525_v1  ;;  %v176_v61 = vmul.f32 %v4642_v37, %v4530_v2  ;;  %v776_v63 = vrot.slane %v760_v54, 1 }
  0x32   :  { %v810_v62 = vmax.f32 %v787_v53, %v798_v50  ;;  %v799_v4 = vrot.slane %v760_v54, 2  ;;  %v188_v5 = vrot.slane %v174_v57, 2  ;;  %v149_v8 = vsel %vm55_vm0, %v147_v56, %v148_v58 }
  0x33   :  { %v151_v15 = vsel %vm55_vm0, %v148_v58, %v150_v59  ;;  %v189_v9 = vrot.slane %v175_v60, 2  ;;  %v191_v10 = vrot.slane %v176_v61, 2  ;;  %v777_v11 = vsel %vm55_vm0, %v774_v43, %v776_v63 }
  0x34   :  { %816 = vst [vmem:[#allocation2 + $0x18] sm:$0xff] %v810_v62  ;;  %v800_v13 = vsel %vm97_vm1, %v797_v44, %v799_v4  ;;  %v789_v14 = vmax.f32 %v760_v54, %v776_v63  ;;  %v166_v16 = vadd.f32 %v149_v8, %v125_v46  ;;  %v788_v18 = vmax.f32 %v759_v33, %v777_v11 }
  0x35   :  { %v167_v19 = vadd.f32 %v151_v15, %v126_v47  ;;  %v190_v20 = vsel %vm97_vm1, %v188_v5, %v189_v9  ;;  %v192_v21 = vsel %vm97_vm1, %v189_v9, %v191_v10  ;;  %v4672_v6 = vstv %s4650_s8  ;;  %s5267_s8 = sld [smem:[#allocation3 + $0x2e]] }
  0x36   :  { %v819_v22 = vld [vmem:[#allocation2] ss:$3 sm:$0xff]  ;;  %v812_v3 = vmax.f32 %v789_v14, %v799_v4  ;;  %v207_v23 = vadd.f32 %v190_v20, %v166_v16  ;;  %v127_v24 = vmul.f32 %v4636_v35, %v4530_v2  ;;  %v811_v26 = vmax.f32 %v788_v18, %v800_v13 }
  0x37   :  { %v822_v25 = vmul.f32 0.1, %v819_v22  ;;  %v208_v27 = vadd.f32 %v192_v21, %v167_v19  ;;  %v136_v28 = vmul.f32 %v4639_v36, %v4557_v12  ;;  %v177_v7 = vmul.f32 %v4642_v37, %v4557_v12 }
  0x38   :  { %818 = vst [vmem:[#allocation2 + $0x28] sm:$0x3f] %v812_v3  ;;  %v836_v29 = vadd.f32 %v4672_v6, %v207_v23  ;;  %v128_v30 = vmul.f32 %v4636_v35, %v4557_v12  ;;  %v137_v31 = vmul.f32 %v4639_v36, %v4570_v17  ;;  %817 = vst [vmem:[#allocation2 + $0x20] sm:$0xff] %v811_v26  ;;  %v909_v21 = vstv %s4691_s9  ;;  %s5415_s9 = sld [smem:[#allocation3 + $0x34]] }
  0x39   :  { %v824_v32 = vmax.f32 %v819_v22, %v822_v25  ;;  %v837_v33 = vadd.f32 %v4672_v6, %v208_v27  ;;  %v152_v34 = vrot.slane %v136_v28, 1  ;;  %v178_v38 = vmul.f32 %v4642_v37, %v4570_v17 }
  0x3a   :  { %v848_v39 = vrot.slane %v836_v29, 1  ;;  %v871_v43 = vrot.slane %v836_v29, 2  ;;  %v193_v44 = vrot.slane %v177_v7, 2  ;;  %v154_v45 = vrot.slane %v137_v31, 1 }
  0x3b   :  { %v828_v46 = vmul.f32 %v827_v40, %v824_v32  ;;  %v849_v47 = vrot.slane %v837_v33, 1  ;;  %v872_v48 = vrot.slane %v837_v33, 2  ;;  %v153_v49 = vsel %vm55_vm0, %v150_v59, %v152_v34 }
  0x3c   :  { %v168_v50 = vadd.f32 %v153_v49, %v127_v24  ;;  %v194_v51 = vsel %vm97_vm1, %v191_v10, %v193_v44  ;;  %v155_v52 = vsel %vm55_vm0, %v152_v34, %v154_v45  ;;  %v195_v53 = vrot.slane %v178_v38, 2 }
  0x3d   :  { %v4697_v54 = vadd.f32 %v831_v41, %v828_v46  ;;  %v850_v56 = vsel %vm55_vm0, %v848_v39, %v849_v47  ;;  %v873_v57 = vsel %vm97_vm1, %v871_v43, %v872_v48  ;;  %v169_v58 = vadd.f32 %v155_v52, %v128_v30 }
  0x3e   :  { %v865_v60 = vmax.f32 %v836_v29, %v850_v56  ;;  %v209_v61 = vadd.f32 %v194_v51, %v168_v50  ;;  %v196_v59 = vsel %vm97_vm1, %v193_v44, %v195_v53  ;;  %v138_v63 = vmul.f32 %v4639_v36, %v4591_v42 }
  0x3f   :  { %v210_v62 = vadd.f32 %v196_v59, %v169_v58  ;;  %v129_v8 = vmul.f32 %v4636_v35, %v4570_v17  ;;  %v179_v15 = vmul.f32 %v4642_v37, %v4591_v42  ;;  %v139_v11 = vmul.f32 %v4639_v36, %v4608_v55 }
  0x40   :  { %v888_v4 = vmax.f32 %v865_v60, %v873_v57  ;;  %v838_v5 = vadd.f32 %v4672_v6, %v209_v61  ;;  %v156_v10 = vrot.slane %v138_v63, 1  ;;  %v180_v18 = vmul.f32 %v4642_v37, %v4608_v55 }
  0x41   :  { %v839_v9 = vadd.f32 %v4672_v6, %v210_v62  ;;  %v197_v16 = vrot.slane %v179_v15, 2  ;;  %v130_v27 = vmul.f32 %v4636_v35, %v4591_v42  ;;  %v158_v7 = vrot.slane %v139_v11, 1 }
  0x42   :  { %894 = vst [vmem:[#allocation2 + $0x30] sm:$0xff] %v888_v4  ;;  %v851_v13 = vrot.slane %v838_v5, 1  ;;  %v874_v14 = vrot.slane %v838_v5, 2  ;;  %v157_v22 = vsel %vm55_vm0, %v154_v45, %v156_v10  ;;  %v199_v30 = vrot.slane %v180_v18, 2 }
  0x43   :  { %v853_v19 = vrot.slane %v839_v9, 1  ;;  %v876_v20 = vrot.slane %v839_v9, 2  ;;  %v170_v23 = vadd.f32 %v157_v22, %v129_v8  ;;  %v198_v24 = vsel %vm97_vm1, %v195_v53, %v197_v16 }
  0x44   :  { %v852_v36 = vsel %vm55_vm0, %v849_v47, %v851_v13  ;;  %v875_v3 = vsel %vm97_vm1, %v872_v48, %v874_v14  ;;  %v913_v32 = vstv %s4702_s10  ;;  %v4735_v34 = vstv %s4706_s11  ;;  %s5271_s11 = sld [smem:[#allocation3 + $0x15]]  ;;  %s5447_s10 = sld [smem:[#allocation3 + $0x36]] }
  0x45   :  { %v866_v37 = vmax.f32 %v837_v33, %v852_v36  ;;  %v854_v25 = vsel %vm55_vm0, %v851_v13, %v853_v19  ;;  %v877_v26 = vsel %vm97_vm1, %v874_v14, %v876_v20  ;;  %v211_v29 = vadd.f32 %v198_v24, %v170_v23 }
  0x46   :  { %v867_v28 = vmax.f32 %v838_v5, %v854_v25  ;;  %v4738_v38 = vstv %s4708_s12  ;;  %v159_v43 = vsel %vm55_vm0, %v156_v10, %v158_v7  ;;  %v200_v44 = vsel %vm97_vm1, %v197_v16, %v199_v30  ;;  %s5288_s12 = sld [smem:[#allocation3 + $0x17]] }
  0x47   :  { %v889_v31 = vmax.f32 %v866_v37, %v875_v3  ;;  %v840_v33 = vadd.f32 %v4672_v6, %v211_v29  ;;  %v171_v35 = vadd.f32 %v159_v43, %v130_v27  ;;  %v215_v45 = vmul.f32 %v4735_v34, %v4520_v0 }
  0x48   :  { %v890_v39 = vmax.f32 %v867_v28, %v877_v26  ;;  %v216_v46 = vmul.f32 %v4735_v34, %v4525_v1  ;;  %v223_v47 = vmul.f32 %v4738_v38, %v4520_v0  ;;  %v224_v50 = vmul.f32 %v4738_v38, %v4525_v1 }
  0x49   :  { %895 = vst [vmem:[#allocation2 + $0x38] sm:$0xff] %v889_v31  ;;  %v855_v48 = vrot.slane %v840_v33, 1  ;;  %v878_v49 = vrot.slane %v840_v33, 2  ;;  %v225_v51 = vmul.f32 %v4738_v38, %v4530_v2  ;;  %v212_v52 = vadd.f32 %v200_v44, %v171_v35 }
  0x4a   :  { %896 = vst [vmem:[#allocation2 + $0x40] sm:$0xff] %v890_v39  ;;  %v237_v53 = vrot.slane %v223_v47, 1  ;;  %v4754_v56 = vstv %s4722_s13  ;;  %v4757_v57 = vstv %s4724_s14  ;;  %v238_v61 = vrot.slane %v224_v50, 1  ;;  %s5290_s13 = sld [smem:[#allocation3 + $0x1f]]  ;;  %s5387_s14 = sld [smem:[#allocation3 + $0x31]] }
  0x4b   :  { %v856_v58 = vsel %vm55_vm0, %v853_v19, %v855_v48  ;;  %v879_v60 = vsel %vm97_vm1, %v876_v20, %v878_v49  ;;  %v240_v59 = vrot.slane %v225_v51, 1  ;;  %v841_v63 = vadd.f32 %v4672_v6, %v212_v52  ;;  %9702 = sst [smem:[#allocation8_spill]] %s5447_s10 }
  0x4c   :  { %v868_v62 = vmax.f32 %v839_v9, %v856_v58  ;;  %v264_v4 = vmul.f32 %v4754_v56, %v4520_v0  ;;  %v265_v5 = vmul.f32 %v4754_v56, %v4525_v1  ;;  %v239_v8 = vsel %vm55_vm0, %v237_v53, %v238_v61 }
  0x4d   :  { %v241_v15 = vsel %vm55_vm0, %v238_v61, %v240_v59  ;;  %v266_v10 = vmul.f32 %v4754_v56, %v4530_v2  ;;  %v217_v11 = vmul.f32 %v4735_v34, %v4530_v2  ;;  %v857_v9 = vrot.slane %v841_v63, 1 }
  0x4e   :  { %v891_v13 = vmax.f32 %v868_v62, %v879_v60  ;;  %v880_v14 = vrot.slane %v841_v63, 2  ;;  %v256_v6 = vadd.f32 %v239_v8, %v215_v45  ;;  %v257_v16 = vadd.f32 %v241_v15, %v216_v46 }
  0x4f   :  { %v278_v18 = vrot.slane %v264_v4, 2  ;;  %v279_v19 = vrot.slane %v265_v5, 2  ;;  %v281_v20 = vrot.slane %v266_v10, 2  ;;  %v858_v36 = vsel %vm55_vm0, %v855_v48, %v857_v9 }
  0x50   :  { %897 = vst [vmem:[#allocation2 + $0x48] sm:$0xff] %v891_v13  ;;  %v881_v3 = vsel %vm97_vm1, %v878_v49, %v880_v14  ;;  %v870_v23 = vmax.f32 %v841_v63, %v857_v9  ;;  %v226_v24 = vmul.f32 %v4738_v38, %v4557_v12  ;;  %v869_v25 = vmax.f32 %v840_v33, %v858_v36 }
  0x51   :  { %v901_v22 = vld [vmem:[#allocation2 + $0x30] ss:$3 sm:$0xff]  ;;  %v280_v26 = vsel %vm97_vm1, %v278_v18, %v279_v19  ;;  %v282_v27 = vsel %vm97_vm1, %v279_v19, %v281_v20  ;;  %v267_v43 = vmul.f32 %v4754_v56, %v4557_v12  ;;  %v218_v44 = vmul.f32 %v4735_v34, %v4557_v12 }
  0x52   :  { %v904_v37 = vmul.f32 0.1, %v901_v22  ;;  %v893_v28 = vmax.f32 %v870_v23, %v880_v14  ;;  %v297_v29 = vadd.f32 %v280_v26, %v256_v6  ;;  %v298_v7 = vadd.f32 %v282_v27, %v257_v16 }
  0x53   :  { %v242_v30 = vrot.slane %v226_v24, 1  ;;  %v892_v39 = vmax.f32 %v869_v25, %v881_v3  ;;  %v227_v46 = vmul.f32 %v4738_v38, %v4570_v17  ;;  %v283_v49 = vrot.slane %v267_v43, 2 }
  0x54   :  { %v906_v31 = vmax.f32 %v901_v22, %v904_v37  ;;  %899 = vst [vmem:[#allocation2 + $0x58] sm:$0x3f] %v893_v28  ;;  %v918_v33 = vadd.f32 %v4757_v57, %v297_v29  ;;  %v919_v35 = vadd.f32 %v4757_v57, %v298_v7  ;;  %v268_v50 = vmul.f32 %v4754_v56, %v4570_v17 }
  0x55   :  { %v243_v45 = vsel %vm55_vm0, %v240_v59, %v242_v30  ;;  %898 = vst [vmem:[#allocation2 + $0x50] sm:$0xff] %v892_v39  ;;  %v284_v61 = vsel %vm97_vm1, %v281_v20, %v283_v49  ;;  %v244_v59 = vrot.slane %v227_v46, 1  ;;  %v228_v9 = vmul.f32 %v4738_v38, %v4591_v42 }
  0x56   :  { %v910_v47 = vmul.f32 %v909_v21, %v906_v31  ;;  %v258_v48 = vadd.f32 %v243_v45, %v217_v11  ;;  %v930_v51 = vrot.slane %v918_v33, 1  ;;  %v931_v52 = vrot.slane %v919_v35, 1 }
  0x57   :  { %v953_v53 = vrot.slane %v918_v33, 2  ;;  %v954_v58 = vrot.slane %v919_v35, 2  ;;  %v285_v62 = vrot.slane %v268_v50, 2  ;;  %v245_v15 = vsel %vm55_vm0, %v242_v30, %v244_v59 }
  0x58   :  { %v4793_v60 = vadd.f32 %v913_v32, %v910_v47  ;;  %v932_v63 = vsel %vm55_vm0, %v930_v51, %v931_v52  ;;  %v299_v5 = vadd.f32 %v284_v61, %v258_v48  ;;  %v259_v13 = vadd.f32 %v245_v15, %v218_v44 }
  0x59   :  { %v955_v4 = vsel %vm97_vm1, %v953_v53, %v954_v58  ;;  %v947_v8 = vmax.f32 %v918_v33, %v932_v63  ;;  %v286_v10 = vsel %vm97_vm1, %v283_v49, %v285_v62  ;;  %v219_v6 = vmul.f32 %v4735_v34, %v4570_v17 }
  0x5a   :  { %v920_v11 = vadd.f32 %v4757_v57, %v299_v5  ;;  %v269_v16 = vmul.f32 %v4754_v56, %v4591_v42  ;;  %v229_v18 = vmul.f32 %v4738_v38, %v4608_v55  ;;  %v300_v22 = vadd.f32 %v286_v10, %v259_v13 }
  0x5b   :  { %v970_v14 = vmax.f32 %v947_v8, %v955_v4  ;;  %v246_v36 = vrot.slane %v228_v9, 1  ;;  %v220_v23 = vmul.f32 %v4735_v34, %v4591_v42  ;;  %v270_v37 = vmul.f32 %v4754_v56, %v4608_v55 }
  0x5c   :  { %v933_v19 = vrot.slane %v920_v11, 1  ;;  %v956_v20 = vrot.slane %v920_v11, 2  ;;  %v287_v3 = vrot.slane %v269_v16, 2  ;;  %v248_v24 = vrot.slane %v229_v18, 1 }
  0x5d   :  { %976 = vst [vmem:[#allocation2 + $0x60] sm:$0xff] %v970_v14  ;;  %v921_v26 = vadd.f32 %v4757_v57, %v300_v22  ;;  %v247_v27 = vsel %vm55_vm0, %v244_v59, %v246_v36  ;;  %v289_v56 = vrot.slane %v270_v37, 2  ;;  %v4831_v46 = vstv %s4803_s15  ;;  %s5078_s15 = sld [smem:[#allocation3 + $0x1d]] }
  0x5e   :  { %v934_v25 = vsel %vm55_vm0, %v931_v52, %v933_v19  ;;  %v957_v38 = vsel %vm97_vm1, %v954_v58, %v956_v20  ;;  %v260_v29 = vadd.f32 %v247_v27, %v219_v6  ;;  %v288_v7 = vsel %vm97_vm1, %v285_v62, %v287_v3 }
  0x5f   :  { %v948_v28 = vmax.f32 %v919_v35, %v934_v25  ;;  %v935_v30 = vrot.slane %v921_v26, 1  ;;  %v958_v34 = vrot.slane %v921_v26, 2  ;;  %v249_v31 = vsel %vm55_vm0, %v246_v36, %v248_v24 }
  0x60   :  { %v301_v43 = vadd.f32 %v288_v7, %v260_v29  ;;  %v261_v44 = vadd.f32 %v249_v31, %v220_v23  ;;  %v290_v35 = vsel %vm97_vm1, %v287_v3, %v289_v56  ;;  %v991_v48 = vstv %s4805_s16  ;;  %s5423_s16 = sld [smem:[#allocation3 + $0x37]] }
  0x61   :  { %v971_v39 = vmax.f32 %v948_v28, %v957_v38  ;;  %v936_v33 = vsel %vm55_vm0, %v933_v19, %v935_v30  ;;  %v959_v45 = vsel %vm97_vm1, %v956_v20, %v958_v34  ;;  %v305_v51 = vmul.f32 %v4831_v46, %v4520_v0 }
  0x62   :  { %v949_v47 = vmax.f32 %v920_v11, %v936_v33  ;;  %v922_v49 = vadd.f32 %v4757_v57, %v301_v43  ;;  %v302_v50 = vadd.f32 %v290_v35, %v261_v44  ;;  %v306_v52 = vmul.f32 %v4831_v46, %v4525_v1 }
  0x63   :  { %977 = vst [vmem:[#allocation2 + $0x68] sm:$0xff] %v971_v39  ;;  %v4840_v53 = vstv %s4813_s17  ;;  %v4843_v58 = vstv %s4815_s18  ;;  %v4869_v7 = vstv %s4845_s19  ;;  %v308_v44 = vmul.f32 %v4831_v46, %v4557_v12  ;;  %s5417_s17 = sld [smem:[#allocation3 + $0x35]]  ;;  %s5443_s18 = sld [smem:[#allocation3 + $0x27]] }
  0x64   :  { %v972_v61 = vmax.f32 %v949_v47, %v959_v45  ;;  %v937_v59 = vrot.slane %v922_v49, 1  ;;  %v960_v62 = vrot.slane %v922_v49, 2  ;;  %v923_v63 = vadd.f32 %v4757_v57, %v302_v50  ;;  %s5458_s19 = sld [smem:[#allocation3 + $0x2f]] }
  0x65   :  { %v313_v4 = vmul.f32 %v4840_v53, %v4520_v0  ;;  %v314_v5 = vmul.f32 %v4840_v53, %v4525_v1  ;;  %v315_v8 = vmul.f32 %v4840_v53, %v4530_v2  ;;  %v354_v15 = vmul.f32 %v4843_v58, %v4520_v0 }
  0x66   :  { %978 = vst [vmem:[#allocation2 + $0x70] sm:$0xff] %v972_v61  ;;  %v938_v10 = vsel %vm55_vm0, %v935_v30, %v937_v59  ;;  %v961_v11 = vsel %vm97_vm1, %v958_v34, %v960_v62  ;;  %v939_v13 = vrot.slane %v923_v63, 1  ;;  %v962_v9 = vrot.slane %v923_v63, 2 }
  0x67   :  { %v950_v57 = vmax.f32 %v921_v26, %v938_v10  ;;  %v327_v14 = vrot.slane %v313_v4, 1  ;;  %v328_v6 = vrot.slane %v314_v5, 1  ;;  %v330_v16 = vrot.slane %v315_v8, 1 }
  0x68   :  { %v940_v18 = vsel %vm55_vm0, %v937_v59, %v939_v13  ;;  %v963_v19 = vsel %vm97_vm1, %v960_v62, %v962_v9  ;;  %v952_v20 = vmax.f32 %v923_v63, %v939_v13  ;;  %v355_v22 = vmul.f32 %v4843_v58, %v4525_v1 }
  0x69   :  { %v973_v36 = vmax.f32 %v950_v57, %v961_v11  ;;  %v951_v3 = vmax.f32 %v922_v49, %v940_v18  ;;  %v329_v23 = vsel %vm55_vm0, %v327_v14, %v328_v6  ;;  %v331_v24 = vsel %vm55_vm0, %v328_v6, %v330_v16 }
  0x6a   :  { %v975_v37 = vmax.f32 %v952_v20, %v962_v9  ;;  %v346_v25 = vadd.f32 %v329_v23, %v305_v51  ;;  %v347_v38 = vadd.f32 %v331_v24, %v306_v52  ;;  %v356_v26 = vmul.f32 %v4843_v58, %v4530_v2 }
  0x6b   :  { %979 = vst [vmem:[#allocation2 + $0x78] sm:$0xff] %v973_v36  ;;  %v974_v27 = vmax.f32 %v951_v3, %v963_v19  ;;  %v368_v28 = vrot.slane %v354_v15, 2  ;;  %v369_v29 = vrot.slane %v355_v22, 2  ;;  %v307_v34 = vmul.f32 %v4831_v46, %v4530_v2 }
  0x6c   :  { %981 = vst [vmem:[#allocation2 + $0x88] sm:$0x3f] %v975_v37  ;;  %v371_v30 = vrot.slane %v356_v26, 2  ;;  %v316_v31 = vmul.f32 %v4840_v53, %v4557_v12  ;;  %v357_v56 = vmul.f32 %v4843_v58, %v4557_v12  ;;  %v317_v33 = vmul.f32 %v4840_v53, %v4570_v17 }
  0x6d   :  { %v983_v39 = vld [vmem:[#allocation2 + $0x60] ss:$3 sm:$0xff]  ;;  %980 = vst [vmem:[#allocation2 + $0x80] sm:$0xff] %v974_v27  ;;  %v370_v43 = vsel %vm97_vm1, %v368_v28, %v369_v29  ;;  %v358_v45 = vmul.f32 %v4843_v58, %v4570_v17  ;;  %v995_v63 = vstv %s4858_s0  ;;  %v1073_v28 = vstv %s4885_s20  ;;  %s5453_s0 = sld [smem:[#allocation3 + $0x38]]  ;;  %s5505_s20 = sld [smem:[#allocation3 + $0x3d]] }
  0x6e   :  { %v986_v35 = vmul.f32 0.1, %v983_v39  ;;  %v372_v47 = vsel %vm97_vm1, %v369_v29, %v371_v30  ;;  %v387_v49 = vadd.f32 %v370_v43, %v346_v25  ;;  %v332_v50 = vrot.slane %v316_v31, 1 }
  0x6f   :  { %v388_v51 = vadd.f32 %v372_v47, %v347_v38  ;;  %v373_v52 = vrot.slane %v357_v56, 2  ;;  %v334_v61 = vrot.slane %v317_v33, 1  ;;  %v375_v59 = vrot.slane %v358_v45, 2 }
  0x70   :  { %v988_v62 = vmax.f32 %v983_v39, %v986_v35  ;;  %v1000_v4 = vadd.f32 %v4869_v7, %v387_v49  ;;  %v333_v5 = vsel %vm55_vm0, %v330_v16, %v332_v50  ;;  %v318_v25 = vmul.f32 %v4840_v53, %v4591_v42 }
  0x71   :  { %v1001_v8 = vadd.f32 %v4869_v7, %v388_v51  ;;  %v348_v15 = vadd.f32 %v333_v5, %v307_v34  ;;  %v374_v10 = vsel %vm97_vm1, %v371_v30, %v373_v52  ;;  %v335_v11 = vsel %vm55_vm0, %v332_v50, %v334_v61 }
  0x72   :  { %v992_v13 = vmul.f32 %v991_v48, %v988_v62  ;;  %v1012_v9 = vrot.slane %v1000_v4, 1  ;;  %v1035_v57 = vrot.slane %v1000_v4, 2  ;;  %v349_v14 = vadd.f32 %v335_v11, %v308_v44 }
  0x73   :  { %v1013_v6 = vrot.slane %v1001_v8, 1  ;;  %v1036_v18 = vrot.slane %v1001_v8, 2  ;;  %v389_v19 = vadd.f32 %v374_v10, %v348_v15  ;;  %v376_v16 = vsel %vm97_vm1, %v373_v52, %v375_v59 }
  0x74   :  { %v4900_v20 = vadd.f32 %v995_v63, %v992_v13  ;;  %v390_v22 = vadd.f32 %v376_v16, %v349_v14  ;;  %v359_v38 = vmul.f32 %v4843_v58, %v4591_v42  ;;  %v309_v29 = vmul.f32 %v4831_v46, %v4570_v17 }
  0x75   :  { %v1014_v36 = vsel %vm55_vm0, %v1012_v9, %v1013_v6  ;;  %v1037_v3 = vsel %vm97_vm1, %v1035_v57, %v1036_v18  ;;  %v1002_v23 = vadd.f32 %v4869_v7, %v389_v19  ;;  %v336_v56 = vrot.slane %v318_v25, 1 }
  0x76   :  { %v1029_v24 = vmax.f32 %v1000_v4, %v1014_v36  ;;  %v4908_v37 = vadd.f32 %v4869_v7, %v390_v22  ;;  %v1077_v44 = vstv %s4893_s21  ;;  %v377_v33 = vrot.slane %v359_v38, 2  ;;  %s5523_s21 = sld [smem:[#allocation3 + $0x3c]] }
  0x77   :  { %v1015_v26 = vrot.slane %v1002_v23, 1  ;;  %v1038_v27 = vrot.slane %v1002_v23, 2  ;;  %v337_v49 = vsel %vm55_vm0, %v334_v61, %v336_v56  ;;  %v310_v62 = vmul.f32 %v4831_v46, %v4591_v42 }
  0x78   :  { %v1052_v30 = vmax.f32 %v1029_v24, %v1037_v3  ;;  %v1017_v34 = vrot.slane %v4908_v37, 1  ;;  %v1040_v31 = vrot.slane %v4908_v37, 2  ;;  %v350_v51 = vadd.f32 %v337_v49, %v309_v29 }
  0x79   :  { %v1016_v39 = vsel %vm55_vm0, %v1013_v6, %v1015_v26  ;;  %v1039_v43 = vsel %vm97_vm1, %v1036_v18, %v1038_v27  ;;  %v378_v52 = vsel %vm97_vm1, %v375_v59, %v377_v33  ;;  %v319_v5 = vmul.f32 %v4840_v53, %v4608_v55 }
  0x7a   :  { %1058 = vst [vmem:[#allocation2 + $0x90] sm:$0xff] %v1052_v30  ;;  %v1030_v45 = vmax.f32 %v1001_v8, %v1016_v39  ;;  %v1018_v35 = vsel %vm55_vm0, %v1015_v26, %v1017_v34  ;;  %v1041_v47 = vsel %vm97_vm1, %v1038_v27, %v1040_v31  ;;  %v360_v8 = vmul.f32 %v4843_v58, %v4608_v55 }
  0x7b   :  { %v1031_v50 = vmax.f32 %v1002_v23, %v1018_v35  ;;  %v4937_v15 = vstv %s4902_s22  ;;  %v391_v61 = vadd.f32 %v378_v52, %v350_v51  ;;  %v338_v13 = vrot.slane %v319_v5, 1  ;;  %s5465_s22 = sld [smem:[#allocation3 + $0x3a]] }
  0x7c   :  { %v1053_v4 = vmax.f32 %v1030_v45, %v1039_v43  ;;  %v395_v11 = vmul.f32 %v4937_v15, %v4520_v0  ;;  %v396_v59 = vmul.f32 %v4937_v15, %v4525_v1  ;;  %v379_v46 = vrot.slane %v360_v8, 2  ;;  %9704 = sst [smem:[#allocation10_spill]] %s5523_s21 }
  0x7d   :  { %v1054_v10 = vmax.f32 %v1031_v50, %v1041_v47  ;;  %v4944_v9 = vstv %s4914_s25  ;;  %v4947_v57 = vstv %s4916_s26  ;;  %v1004_v53 = vadd.f32 %v4869_v7, %v391_v61  ;;  %s5129_s25 = sld [smem:[#allocation3 + $0x25]] }
  0x7e   :  { %1059 = vst [vmem:[#allocation2 + $0x98] sm:$0xff] %v1053_v4  ;;  %v403_v58 = vmul.f32 %v4944_v9, %v4520_v0  ;;  %v404_v14 = vmul.f32 %v4944_v9, %v4525_v1  ;;  %v405_v6 = vmul.f32 %v4944_v9, %v4530_v2  ;;  %v339_v18 = vsel %vm55_vm0, %v336_v56, %v338_v13  ;;  %s5143_s26 = sld [smem:[#allocation3 + $0x2d]] }
  0x7f   :  { %1060 = vst [vmem:[#allocation2 + $0xa0] sm:$0xff] %v1054_v10  ;;  %v380_v19 = vsel %vm97_vm1, %v377_v33, %v379_v46  ;;  %v444_v16 = vmul.f32 %v4947_v57, %v4520_v0  ;;  %v445_v22 = vmul.f32 %v4947_v57, %v4525_v1  ;;  %v1019_v36 = vrot.slane %v1004_v53, 1 }
  0x80   :  { %v1042_v3 = vrot.slane %v1004_v53, 2  ;;  %v351_v23 = vadd.f32 %v339_v18, %v310_v62  ;;  %v417_v24 = vrot.slane %v403_v58, 1  ;;  %v418_v25 = vrot.slane %v404_v14, 1 }
  0x81   :  { %v420_v38 = vrot.slane %v405_v6, 1  ;;  %v446_v26 = vmul.f32 %v4947_v57, %v4530_v2  ;;  %v458_v27 = vrot.slane %v444_v16, 2  ;;  %v1020_v29 = vsel %vm55_vm0, %v1017_v34, %v1019_v36 }
  0x82   :  { %v1043_v30 = vsel %vm97_vm1, %v1040_v31, %v1042_v3  ;;  %v392_v56 = vadd.f32 %v380_v19, %v351_v23  ;;  %v459_v0 = vrot.slane %v445_v22, 2  ;;  %v1032_v39 = vmax.f32 %v4908_v37, %v1020_v29 }
  0x83   :  { %v419_v1 = vsel %vm55_vm0, %v417_v24, %v418_v25  ;;  %v421_v43 = vsel %vm55_vm0, %v418_v25, %v420_v38  ;;  %v461_v33 = vrot.slane %v446_v26, 2  ;;  %v4975_v31 = vstv %s4949_s27  ;;  %s5149_s27 = sld [smem:[#allocation3 + $0x13]] }
  0x84   :  { %v1005_v45 = vadd.f32 %v4869_v7, %v392_v56  ;;  %v436_v35 = vadd.f32 %v419_v1, %v395_v11  ;;  %v437_v47 = vadd.f32 %v421_v43, %v396_v59  ;;  %v460_v49 = vsel %vm97_vm1, %v458_v27, %v459_v0 }
  0x85   :  { %v1055_v51 = vmax.f32 %v1032_v39, %v1043_v30  ;;  %v462_v34 = vsel %vm97_vm1, %v459_v0, %v461_v33  ;;  %v397_v37 = vmul.f32 %v4937_v15, %v4530_v2  ;;  %v406_v8 = vmul.f32 %v4944_v9, %v4557_v12  ;;  %v5007_v30 = vld [vmem:[%s9191_s1 + $0x20] sm:$0xff] }
  0x86   :  { %v1065_v50 = vld [vmem:[#allocation2 + $0x90] ss:$3 sm:$0xff]  ;;  %v1021_v62 = vrot.slane %v1005_v45, 1  ;;  %v1044_v4 = vrot.slane %v1005_v45, 2  ;;  %v477_v5 = vadd.f32 %v460_v49, %v436_v35  ;;  %v478_v7 = vadd.f32 %v462_v34, %v437_v47 }
  0x87   :  { %v1068_v52 = vmul.f32 0.1, %v1065_v50  ;;  %1061 = vst [vmem:[#allocation2 + $0xa8] sm:$0xff] %v1055_v51  ;;  %v447_v10 = vmul.f32 %v4947_v57, %v4557_v12  ;;  %v398_v61 = vmul.f32 %v4937_v15, %v4557_v12  ;;  %v422_v6 = vrot.slane %v406_v8, 1 }
  0x88   :  { %v1022_v2 = vsel %vm55_vm0, %v1019_v36, %v1021_v62  ;;  %v1045_v59 = vsel %vm97_vm1, %v1042_v3, %v1044_v4  ;;  %v1034_v13 = vmax.f32 %v1005_v45, %v1021_v62  ;;  %v1082_v58 = vadd.f32 %v4975_v31, %v477_v5 }
  0x89   :  { %v1070_v11 = vmax.f32 %v1065_v50, %v1068_v52  ;;  %v1033_v46 = vmax.f32 %v1004_v53, %v1022_v2  ;;  %v4989_v14 = vadd.f32 %v4975_v31, %v478_v7  ;;  %v463_v16 = vrot.slane %v447_v10, 2  ;;  %v5038_v7 = vld [vmem:[%s9191_s1 + $0x28] sm:$0xff] }
  0x8a   :  { %v1057_v19 = vmax.f32 %v1034_v13, %v1044_v4  ;;  %v407_v12 = vmul.f32 %v4944_v9, %v4570_v17  ;;  %v1094_v23 = vrot.slane %v1082_v58, 1  ;;  %v1117_v3 = vrot.slane %v1082_v58, 2 }
  0x8b   :  { %v1074_v18 = vmul.f32 %v1073_v28, %v1070_v11  ;;  %v1056_v22 = vmax.f32 %v1033_v46, %v1045_v59  ;;  %v1095_v36 = vrot.slane %v4989_v14, 1  ;;  %v1118_v24 = vrot.slane %v4989_v14, 2 }
  0x8c   :  { %1063 = vst [vmem:[#allocation2 + $0xb8] sm:$0x3f] %v1057_v19  ;;  %v423_v25 = vsel %vm55_vm0, %v420_v38, %v422_v6  ;;  %v464_v26 = vsel %vm97_vm1, %v461_v33, %v463_v16  ;;  %v424_v17 = vrot.slane %v407_v12, 1  ;;  %v448_v56 = vmul.f32 %v5007_v30, %v4947_v57 }
  0x8d   :  { %v4998_v53 = vadd.f32 %v1077_v44, %v1074_v18  ;;  %1062 = vst [vmem:[#allocation2 + $0xb0] sm:$0xff] %v1056_v22  ;;  %v1096_v27 = vsel %vm55_vm0, %v1094_v23, %v1095_v36  ;;  %v438_v29 = vadd.f32 %v423_v25, %v397_v37  ;;  %v1119_v39 = vsel %vm97_vm1, %v1117_v3, %v1118_v24 }
  0x8e   :  { %v1111_v0 = vmax.f32 %v1082_v58, %v1096_v27  ;;  %v425_v38 = vsel %vm55_vm0, %v422_v6, %v424_v17  ;;  %v465_v43 = vrot.slane %v448_v56, 2  ;;  %v408_v35 = vmul.f32 %v4944_v9, %v4591_v42 }
  0x8f   :  { %v479_v1 = vadd.f32 %v464_v26, %v438_v29  ;;  %v439_v45 = vadd.f32 %v425_v38, %v398_v61  ;;  %v449_v47 = vmul.f32 %v4947_v57, %v4591_v42  ;;  %v399_v51 = vmul.f32 %v5007_v30, %v4937_v15  ;;  %v5061_v26 = vld [vmem:[%s9191_s1] sm:$0xff] }
  0x90   :  { %v1134_v33 = vmax.f32 %v1111_v0, %v1119_v39  ;;  %v466_v50 = vsel %vm97_vm1, %v463_v16, %v465_v43  ;;  %v409_v34 = vmul.f32 %v4944_v9, %v4608_v55  ;;  %v426_v52 = vrot.slane %v408_v35, 1  ;;  %v5088_v35 = vld [vmem:[%s9191_s1 + $0x10] sm:$0xff] }
  0x91   :  { %v1084_v49 = vadd.f32 %v4975_v31, %v479_v1  ;;  %v480_v37 = vadd.f32 %v466_v50, %v439_v45  ;;  %v467_v42 = vrot.slane %v449_v47, 2  ;;  %v450_v62 = vmul.f32 %v4947_v57, %v4608_v55  ;;  %v5074_v1 = vld [vmem:[%s9191_s1 + $0x8] sm:$0xff] }
  0x92   :  { %1140 = vst [vmem:[#allocation2 + $0xc0] sm:$0xff] %v1134_v33  ;;  %v400_v9 = vmul.f32 %v5038_v7, %v4937_v15  ;;  %v428_v8 = vrot.slane %v409_v34, 1  ;;  %v427_v61 = vsel %vm55_vm0, %v424_v17, %v426_v52  ;;  %v5051_v16 = vstv %s5013_s30  ;;  %s5559_s30 = sld [smem:[#allocation3 + $0x3f]] }
  0x93   :  { %v1097_v4 = vrot.slane %v1084_v49, 1  ;;  %v1120_v5 = vrot.slane %v1084_v49, 2  ;;  %v1085_v10 = vadd.f32 %v4975_v31, %v480_v37  ;;  %v468_v55 = vsel %vm97_vm1, %v465_v43, %v467_v42 }
  0x94   :  { %v469_v57 = vrot.slane %v450_v62, 2  ;;  %v440_v59 = vadd.f32 %v427_v61, %v399_v51  ;;  %v429_v58 = vsel %vm55_vm0, %v426_v52, %v428_v8  ;;  %v1159_v25 = vstv %s5029_s5  ;;  %s5561_s5 = sld [smem:[#allocation3 + $0x41]] }
  0x95   :  { %v1098_v11 = vsel %vm55_vm0, %v1095_v36, %v1097_v4  ;;  %v1121_v2 = vsel %vm97_vm1, %v1118_v24, %v1120_v5  ;;  %v1099_v46 = vrot.slane %v1085_v10, 1  ;;  %v1122_v15 = vrot.slane %v1085_v10, 2 }
  0x96   :  { %v1112_v13 = vmax.f32 %v4989_v14, %v1098_v11  ;;  %v481_v6 = vadd.f32 %v468_v55, %v440_v59  ;;  %v441_v18 = vadd.f32 %v429_v58, %v400_v9  ;;  %v470_v19 = vsel %vm97_vm1, %v467_v42, %v469_v57 }
  0x97   :  { %v1100_v22 = vsel %vm55_vm0, %v1097_v4, %v1099_v46  ;;  %v1123_v23 = vsel %vm97_vm1, %v1120_v5, %v1122_v15  ;;  %v1155_v14 = vstv %s5021_s3  ;;  %v485_v27 = vmul.f32 %v5061_v26, %v5051_v16  ;;  %s5546_s3 = sld [smem:[#allocation3 + $0x40]] }
  0x98   :  { %v1135_v12 = vmax.f32 %v1112_v13, %v1121_v2  ;;  %v1113_v36 = vmax.f32 %v1084_v49, %v1100_v22  ;;  %v1086_v3 = vadd.f32 %v4975_v31, %v481_v6  ;;  %v482_v24 = vadd.f32 %v470_v19, %v441_v18  ;;  %9705 = sst [smem:[#allocation11_spill]] %s5559_s30 }
  0x99   :  { %v5066_v29 = vstv %s5027_s4  ;;  %v5069_v17 = vstv %s5033_s6  ;;  %v486_v38 = vmul.f32 %v5074_v1, %v5051_v16  ;;  %v5106_v19 = vstv %s5078_s15  ;;  %s5245_s6 = sld [smem:[#allocation3 + $0x26]]  ;;  %s5389_s15 = sld [smem:[#allocation3 + $0x32]] }
  0x9a   :  { %1141 = vst [vmem:[#allocation2 + $0xc8] sm:$0xff] %v1135_v12  ;;  %v1136_v56 = vmax.f32 %v1113_v36, %v1123_v23  ;;  %v1101_v0 = vrot.slane %v1086_v3, 1  ;;  %v1124_v39 = vrot.slane %v1086_v3, 2  ;;  %v1087_v43 = vadd.f32 %v4975_v31, %v482_v24  ;;  %v5111_v12 = vld [vmem:[%s9191_s1 + $0x18] sm:$0xff]  ;;  %s5578_s4 = sld [smem:[#allocation3 + $0x43]] }
  0x9b   :  { %v493_v33 = vmul.f32 %v5061_v26, %v5066_v29  ;;  %v494_v45 = vmul.f32 %v5074_v1, %v5066_v29  ;;  %v495_v47 = vmul.f32 %v5088_v35, %v5066_v29  ;;  %v534_v31 = vmul.f32 %v5061_v26, %v5069_v17 }
  0x9c   :  { %1142 = vst [vmem:[#allocation2 + $0xd0] sm:$0xff] %v1136_v56  ;;  %v1102_v49 = vsel %vm55_vm0, %v1099_v46, %v1101_v0  ;;  %v1125_v50 = vsel %vm97_vm1, %v1122_v15, %v1124_v39  ;;  %v535_v51 = vmul.f32 %v5074_v1, %v5069_v17  ;;  %v1103_v37 = vrot.slane %v1087_v43, 1 }
  0x9d   :  { %v1114_v34 = vmax.f32 %v1085_v10, %v1102_v49  ;;  %v1126_v52 = vrot.slane %v1087_v43, 2  ;;  %v507_v42 = vrot.slane %v493_v33, 1  ;;  %v508_v62 = vrot.slane %v494_v45, 1 }
  0x9e   :  { %v510_v4 = vrot.slane %v495_v47, 1  ;;  %v536_v5 = vmul.f32 %v5088_v35, %v5069_v17  ;;  %v548_v9 = vrot.slane %v534_v31, 2  ;;  %v1104_v61 = vsel %vm55_vm0, %v1101_v0, %v1103_v37 }
  0x9f   :  { %v1137_v8 = vmax.f32 %v1114_v34, %v1125_v50  ;;  %v1127_v55 = vsel %vm97_vm1, %v1124_v39, %v1126_v52  ;;  %v1116_v57 = vmax.f32 %v1087_v43, %v1103_v37  ;;  %v1115_v11 = vmax.f32 %v1086_v3, %v1104_v61  ;;  %v5135_v61 = vld [vmem:[#allocation2 + $0x18] ss:$3 sm:$0xff] }
  0xa0   :  { %v509_v2 = vsel %vm55_vm0, %v507_v42, %v508_v62  ;;  %v511_v10 = vsel %vm55_vm0, %v508_v62, %v510_v4  ;;  %v549_v59 = vrot.slane %v535_v51, 2  ;;  %v551_v58 = vrot.slane %v536_v5, 2 }
  0xa1   :  { %1143 = vst [vmem:[#allocation2 + $0xd8] sm:$0xff] %v1137_v8  ;;  %v1139_v13 = vmax.f32 %v1116_v57, %v1126_v52  ;;  %v526_v46 = vadd.f32 %v509_v2, %v485_v27  ;;  %v527_v15 = vadd.f32 %v511_v10, %v486_v38  ;;  %v1138_v6 = vmax.f32 %v1115_v11, %v1127_v55 }
  0xa2   :  { %v550_v18 = vsel %vm97_vm1, %v548_v9, %v549_v59  ;;  %v496_v22 = vmul.f32 %v5111_v12, %v5066_v29  ;;  %v552_v36 = vsel %vm97_vm1, %v549_v59, %v551_v58  ;;  %v487_v24 = vmul.f32 %v5088_v35, %v5051_v16 }
  0xa3   :  { %v1147_v23 = vld [vmem:[#allocation2 + $0xc0] ss:$3 sm:$0xff]  ;;  %1145 = vst [vmem:[#allocation2 + $0xe8] sm:$0x3f] %v1139_v13  ;;  %v567_v3 = vadd.f32 %v550_v18, %v526_v46  ;;  %v537_v27 = vmul.f32 %v5111_v12, %v5069_v17  ;;  %1144 = vst [vmem:[#allocation2 + $0xe0] sm:$0xff] %v1138_v6  ;;  %v568_v0 = vadd.f32 %v552_v36, %v527_v15 }
  0xa4   :  { %v1150_v56 = vmul.f32 0.1, %v1147_v23  ;;  %v512_v39 = vrot.slane %v496_v22, 1  ;;  %v497_v38 = vmul.f32 %v5007_v30, %v5066_v29  ;;  %v488_v45 = vmul.f32 %v5111_v12, %v5051_v16 }
  0xa5   :  { %v1164_v43 = vadd.f32 %v5106_v19, %v567_v3  ;;  %v553_v33 = vrot.slane %v537_v27, 2  ;;  %v538_v47 = vmul.f32 %v5007_v30, %v5069_v17  ;;  %v1165_v50 = vadd.f32 %v5106_v19, %v568_v0 }
  0xa6   :  { %v1152_v49 = vmax.f32 %v1147_v23, %v1150_v56  ;;  %v513_v31 = vsel %vm55_vm0, %v510_v4, %v512_v39  ;;  %v514_v51 = vrot.slane %v497_v38, 1  ;;  %v498_v15 = vmul.f32 %v5038_v7, %v5066_v29 }
  0xa7   :  { %v1176_v34 = vrot.slane %v1164_v43, 1  ;;  %v1199_v37 = vrot.slane %v1164_v43, 2  ;;  %v528_v52 = vadd.f32 %v513_v31, %v487_v24  ;;  %v554_v42 = vsel %vm97_vm1, %v551_v58, %v553_v33 }
  0xa8   :  { %v1156_v62 = vmul.f32 %v1155_v14, %v1152_v49  ;;  %v1177_v5 = vrot.slane %v1165_v50, 1  ;;  %v1200_v9 = vrot.slane %v1165_v50, 2  ;;  %v515_v8 = vsel %vm55_vm0, %v512_v39, %v514_v51  ;;  %v5167_v39 = vld [vmem:[%s9191_s1 + $0x30] sm:$0x3]  ;;  %s5204_s1 = sld [smem:[#allocation3 + $0x1e]] }
  0xa9   :  { %v569_v55 = vadd.f32 %v554_v42, %v528_v52  ;;  %v529_v57 = vadd.f32 %v515_v8, %v488_v45  ;;  %v555_v11 = vrot.slane %v538_v47, 2  ;;  %v5152_v58 = vmul.f32 0.1, %v5135_v61 }
  0xaa   :  { %v5139_v4 = vadd.f32 %v1159_v25, %v1156_v62  ;;  %v1178_v2 = vsel %vm55_vm0, %v1176_v34, %v1177_v5  ;;  %v1201_v10 = vsel %vm97_vm1, %v1199_v37, %v1200_v9  ;;  %v489_v18 = vmul.f32 %v5007_v30, %v5051_v16 }
  0xab   :  { %v1193_v59 = vmax.f32 %v1164_v43, %v1178_v2  ;;  %v1166_v13 = vadd.f32 %v5106_v19, %v569_v55  ;;  %v556_v46 = vsel %vm97_vm1, %v553_v33, %v555_v11  ;;  %v539_v22 = vmul.f32 %v5038_v7, %v5069_v17 }
  0xac   :  { %v570_v6 = vadd.f32 %v556_v46, %v529_v57  ;;  %v516_v24 = vrot.slane %v498_v15, 1  ;;  %v1237_v56 = vstv %s5129_s25  ;;  %v499_v38 = vmul.f32 %v5167_v39, %v5066_v29  ;;  %s5576_s25 = sld [smem:[#allocation3 + $0x49]] }
  0xad   :  { %v1216_v23 = vmax.f32 %v1193_v59, %v1201_v10  ;;  %v1179_v36 = vrot.slane %v1166_v13, 1  ;;  %v1202_v3 = vrot.slane %v1166_v13, 2  ;;  %v557_v0 = vrot.slane %v539_v22, 2 }
  0xae   :  { %v1167_v27 = vadd.f32 %v5106_v19, %v570_v6  ;;  %v517_v45 = vsel %vm55_vm0, %v514_v51, %v516_v24  ;;  %v540_v47 = vmul.f32 %v5167_v39, %v5069_v17  ;;  %v490_v37 = vmul.f32 %v5038_v7, %v5051_v16 }
  0xaf   :  { %1222 = vst [vmem:[#allocation2 + $0xf0] sm:$0xff] %v1216_v23  ;;  %v1180_v43 = vsel %vm55_vm0, %v1177_v5, %v1179_v36  ;;  %v1203_v33 = vsel %vm97_vm1, %v1200_v9, %v1202_v3  ;;  %v530_v29 = vadd.f32 %v517_v45, %v489_v18  ;;  %v558_v52 = vsel %vm97_vm1, %v555_v11, %v557_v0 }
  0xb0   :  { %v1194_v49 = vmax.f32 %v1165_v50, %v1180_v43  ;;  %v1181_v31 = vrot.slane %v1167_v27, 1  ;;  %v1204_v34 = vrot.slane %v1167_v27, 2  ;;  %v518_v42 = vrot.slane %v499_v38, 1 }
  0xb1   :  { %v559_v62 = vrot.slane %v540_v47, 2  ;;  %v9193_v17 = vstv %s5143_s26  ;;  %v571_v8 = vadd.f32 %v558_v52, %v530_v29  ;;  %v5185_v2 = vstv %s5158_s28  ;;  %s5487_s28 = sld [smem:[#allocation3 + $0x3b]] }
  0xb2   :  { %v1217_v5 = vmax.f32 %v1194_v49, %v1203_v33  ;;  %v1182_v51 = vsel %vm55_vm0, %v1179_v36, %v1181_v31  ;;  %v1205_v9 = vsel %vm97_vm1, %v1202_v3, %v1204_v34  ;;  %v519_v55 = vsel %vm55_vm0, %v516_v24, %v518_v42 }
  0xb3   :  { %v1195_v50 = vmax.f32 %v1166_v13, %v1182_v51  ;;  %v560_v57 = vsel %vm97_vm1, %v557_v0, %v559_v62  ;;  %v531_v16 = vadd.f32 %v519_v55, %v490_v37  ;;  %v5188_v10 = vstv %s5149_s27  ;;  %s5485_s27 = sld [smem:[#allocation3 + $0x39]] }
  0xb4   :  { %1223 = vst [vmem:[#allocation2 + $0xf8] sm:$0xff] %v1217_v5  ;;  %v5191_v11 = vstv %s5160_s29  ;;  %v1168_v46 = vadd.f32 %v5106_v19, %v571_v8  ;;  %v575_v15 = vmul.f32 %v5061_v26, %v5185_v2  ;;  %v576_v13 = vmul.f32 %v5074_v1, %v5185_v2  ;;  %s5525_s29 = sld [smem:[#allocation3 + $0x3e]] }
  0xb5   :  { %v1218_v59 = vmax.f32 %v1195_v50, %v1205_v9  ;;  %v572_v6 = vadd.f32 %v560_v57, %v531_v16  ;;  %v583_v18 = vmul.f32 %v5061_v26, %v5188_v10  ;;  %v584_v22 = vmul.f32 %v5074_v1, %v5188_v10 }
  0xb6   :  { %v585_v23 = vmul.f32 %v5088_v35, %v5188_v10  ;;  %v1183_v36 = vrot.slane %v1168_v46, 1  ;;  %v1206_v3 = vrot.slane %v1168_v46, 2  ;;  %v624_v24 = vmul.f32 %v5061_v26, %v5191_v11 }
  0xb7   :  { %1224 = vst [vmem:[#allocation2 + $0x100] sm:$0xff] %v1218_v59  ;;  %v625_v0 = vmul.f32 %v5074_v1, %v5191_v11  ;;  %v1169_v38 = vadd.f32 %v5106_v19, %v572_v6  ;;  %v597_v43 = vrot.slane %v583_v18, 1  ;;  %v598_v33 = vrot.slane %v584_v22, 1 }
  0xb8   :  { %v600_v45 = vrot.slane %v585_v23, 1  ;;  %v1184_v47 = vsel %vm55_vm0, %v1181_v31, %v1183_v36  ;;  %v1207_v49 = vsel %vm97_vm1, %v1204_v34, %v1206_v3  ;;  %v626_v37 = vmul.f32 %v5088_v35, %v5191_v11 }
  0xb9   :  { %v638_v29 = vrot.slane %v624_v24, 2  ;;  %v1196_v52 = vmax.f32 %v1167_v27, %v1184_v47  ;;  %v1185_v42 = vrot.slane %v1169_v38, 1  ;;  %v1208_v62 = vrot.slane %v1169_v38, 2  ;;  %9703 = sst [smem:[#allocation9_spill]] %s5485_s27 }
  0xba   :  { %v599_v5 = vsel %vm55_vm0, %v597_v43, %v598_v33  ;;  %v601_v51 = vsel %vm55_vm0, %v598_v33, %v600_v45  ;;  %v639_v9 = vrot.slane %v625_v0, 2  ;;  %v641_v50 = vrot.slane %v626_v37, 2 }
  0xbb   :  { %v616_v19 = vadd.f32 %v599_v5, %v575_v15  ;;  %v1219_v8 = vmax.f32 %v1196_v52, %v1207_v49  ;;  %v1186_v31 = vsel %vm55_vm0, %v1183_v36, %v1185_v42  ;;  %v1209_v34 = vsel %vm97_vm1, %v1206_v3, %v1208_v62 }
  0xbc   :  { %v1198_v55 = vmax.f32 %v1169_v38, %v1185_v42  ;;  %v1197_v57 = vmax.f32 %v1168_v46, %v1186_v31  ;;  %v617_v16 = vadd.f32 %v601_v51, %v576_v13  ;;  %v640_v27 = vsel %vm97_vm1, %v638_v29, %v639_v9 }
  0xbd   :  { %v642_v59 = vsel %vm97_vm1, %v639_v9, %v641_v50  ;;  %1225 = vst [vmem:[#allocation2 + $0x108] sm:$0xff] %v1219_v8  ;;  %v657_v22 = vadd.f32 %v640_v27, %v616_v19  ;;  %v5222_v23 = vstv %s5204_s1  ;;  %v577_v15 = vmul.f32 %v5088_v35, %v5185_v2  ;;  %v5247_v8 = vld [vmem:[#allocation2 + $0x48] ss:$3 sm:$0xff]  ;;  %s5580_s1 = sld [smem:[#allocation3 + $0x4a]] }
  0xbe   :  { %v1229_v6 = vld [vmem:[#allocation2 + $0xf0] ss:$3 sm:$0xff]  ;;  %v1221_v18 = vmax.f32 %v1198_v55, %v1208_v62  ;;  %v1220_v36 = vmax.f32 %v1197_v57, %v1209_v34  ;;  %v658_v0 = vadd.f32 %v642_v59, %v617_v16  ;;  %v586_v46 = vmul.f32 %v5111_v12, %v5188_v10 }
  0xbf   :  { %v1232_v24 = vmul.f32 0.1, %v1229_v6  ;;  %v1246_v13 = vadd.f32 %v5222_v23, %v657_v22  ;;  %v627_v3 = vmul.f32 %v5111_v12, %v5191_v11  ;;  %v578_v38 = vmul.f32 %v5111_v12, %v5185_v2 }
  0xc0   :  { %1227 = vst [vmem:[#allocation2 + $0x118] sm:$0x3f] %v1221_v18  ;;  %v587_v43 = vmul.f32 %v5007_v30, %v5188_v10  ;;  %1226 = vst [vmem:[#allocation2 + $0x110] sm:$0xff] %v1220_v36  ;;  %v5236_v47 = vadd.f32 %v5222_v23, %v658_v0  ;;  %v602_v49 = vrot.slane %v586_v46, 1  ;;  %v628_v37 = vmul.f32 %v5007_v30, %v5191_v11  ;;  %v5257_v18 = vld [vmem:[#allocation2 + $0x78] ss:$3 sm:$0xff] }
  0xc1   :  { %v1234_v33 = vmax.f32 %v1229_v6, %v1232_v24  ;;  %v1258_v29 = vrot.slane %v1246_v13, 1  ;;  %v1281_v52 = vrot.slane %v1246_v13, 2  ;;  %v643_v42 = vrot.slane %v627_v3, 2 }
  0xc2   :  { %v604_v62 = vrot.slane %v587_v43, 1  ;;  %v1259_v51 = vrot.slane %v5236_v47, 1  ;;  %v1282_v19 = vrot.slane %v5236_v47, 2  ;;  %v603_v9 = vsel %vm55_vm0, %v600_v45, %v602_v49 }
  0xc3   :  { %v1238_v5 = vmul.f32 %v1237_v56, %v1234_v33  ;;  %v618_v31 = vadd.f32 %v603_v9, %v577_v15  ;;  %v644_v34 = vsel %vm97_vm1, %v641_v50, %v643_v42  ;;  %v645_v57 = vrot.slane %v628_v37, 2 }
  0xc4   :  { %v605_v55 = vsel %vm55_vm0, %v602_v49, %v604_v62  ;;  %v1260_v27 = vsel %vm55_vm0, %v1258_v29, %v1259_v51  ;;  %v1283_v59 = vsel %vm97_vm1, %v1281_v52, %v1282_v19  ;;  %v825_v50 = vmax.f32 %v5135_v61, %v5152_v58 }
  0xc5   :  { %v5253_v16 = vadd.f32 %v9193_v17, %v1238_v5  ;;  %v619_v6 = vadd.f32 %v605_v55, %v578_v38  ;;  %v1275_v45 = vmax.f32 %v1246_v13, %v1260_v27  ;;  %v659_v22 = vadd.f32 %v644_v34, %v618_v31 }
  0xc6   :  { %v646_v24 = vsel %vm97_vm1, %v643_v42, %v645_v57  ;;  %v5265_v15 = vmul.f32 0.1, %v5247_v8  ;;  %v588_v0 = vmul.f32 %v5038_v7, %v5188_v10  ;;  %v579_v3 = vmul.f32 %v5007_v30, %v5185_v2 }
  0xc7   :  { %v660_v36 = vadd.f32 %v646_v24, %v619_v6  ;;  %v1298_v46 = vmax.f32 %v1275_v45, %v1283_v59  ;;  %v1248_v13 = vadd.f32 %v5222_v23, %v659_v22  ;;  %v629_v38 = vmul.f32 %v5038_v7, %v5191_v11 }
  0xc8   :  { %v5279_v43 = vmul.f32 0.1, %v5257_v18  ;;  %v606_v49 = vrot.slane %v588_v0, 1  ;;  %v589_v37 = vmul.f32 %v5167_v39, %v5188_v10  ;;  %v630_v5 = vmul.f32 %v5167_v39, %v5191_v11 }
  0xc9   :  { %v1249_v33 = vadd.f32 %v5222_v23, %v660_v36  ;;  %1304 = vst [vmem:[#allocation2 + $0x120] sm:$0xff] %v1298_v46  ;;  %v1261_v29 = vrot.slane %v1248_v13, 1  ;;  %v1284_v52 = vrot.slane %v1248_v13, 2  ;;  %v647_v42 = vrot.slane %v629_v38, 2 }
  0xca   :  { %v1319_v34 = vstv %s5245_s6  ;;  %v607_v55 = vsel %vm55_vm0, %v604_v62, %v606_v49  ;;  %v580_v22 = vmul.f32 %v5038_v7, %v5185_v2  ;;  %v608_v0 = vrot.slane %v589_v37, 1  ;;  %s5618_s6 = sld [smem:[#allocation3 + $0x4b]] }
  0xcb   :  { %v1263_v9 = vrot.slane %v1249_v33, 1  ;;  %v1286_v31 = vrot.slane %v1249_v33, 2  ;;  %v1262_v10 = vsel %vm55_vm0, %v1259_v51, %v1261_v29  ;;  %v1285_v27 = vsel %vm97_vm1, %v1282_v19, %v1284_v52 }
  0xcc   :  { %v620_v59 = vadd.f32 %v607_v55, %v579_v3  ;;  %v648_v6 = vsel %vm97_vm1, %v645_v57, %v647_v42  ;;  %v1276_v11 = vmax.f32 %v5236_v47, %v1262_v10  ;;  %v649_v46 = vrot.slane %v630_v5, 2 }
  0xcd   :  { %v1264_v45 = vsel %vm55_vm0, %v1261_v29, %v1263_v9  ;;  %v1287_v62 = vsel %vm97_vm1, %v1284_v52, %v1286_v31  ;;  %v1323_v51 = vstv %s5267_s8  ;;  %v5302_v17 = vstv %s5271_s11  ;;  %s5598_s11 = sld [smem:[#allocation3 + $0x48]]  ;;  %s5643_s8 = sld [smem:[#allocation3 + $0x47]] }
  0xce   :  { %v1277_v24 = vmax.f32 %v1248_v13, %v1264_v45  ;;  %v661_v36 = vadd.f32 %v648_v6, %v620_v59  ;;  %v1299_v38 = vmax.f32 %v1276_v11, %v1285_v27  ;;  %v5305_v19 = vstv %s5260_s7  ;;  %s5596_s7 = sld [smem:[#allocation3 + $0x42]] }
  0xcf   :  { %v609_v3 = vsel %vm55_vm0, %v606_v49, %v608_v0  ;;  %v650_v29 = vsel %vm97_vm1, %v647_v42, %v649_v46  ;;  %v665_v13 = vmul.f32 %v5061_v26, %v5302_v17  ;;  %v666_v37 = vmul.f32 %v5074_v1, %v5302_v17 }
  0xd0   :  { %v1300_v57 = vmax.f32 %v1277_v24, %v1287_v62  ;;  %v1250_v47 = vadd.f32 %v5222_v23, %v661_v36  ;;  %1305 = vst [vmem:[#allocation2 + $0x128] sm:$0xff] %v1299_v38  ;;  %v621_v2 = vadd.f32 %v609_v3, %v580_v22  ;;  %v673_v52 = vmul.f32 %v5061_v26, %v5305_v19  ;;  %9713 = sst [smem:[#allocation18_spill]] %s5618_s6 }
  0xd1   :  { %v674_v10 = vmul.f32 %v5074_v1, %v5305_v19  ;;  %v675_v49 = vmul.f32 %v5088_v35, %v5305_v19  ;;  %v5321_v59 = vstv %s5288_s12  ;;  %v5324_v6 = vstv %s5290_s13  ;;  %s5606_s12 = sld [smem:[#allocation3 + $0x4c]]  ;;  %s5620_s13 = sld [smem:[#allocation3 + $0x4d]] }
  0xd2   :  { %1306 = vst [vmem:[#allocation2 + $0x130] sm:$0xff] %v1300_v57  ;;  %v1265_v5 = vrot.slane %v1250_v47, 1  ;;  %v1288_v55 = vrot.slane %v1250_v47, 2  ;;  %v662_v42 = vadd.f32 %v650_v29, %v621_v2  ;;  %v687_v27 = vrot.slane %v673_v52, 1 }
  0xd3   :  { %v688_v62 = vrot.slane %v674_v10, 1  ;;  %v690_v22 = vrot.slane %v675_v49, 1  ;;  %v714_v0 = vmul.f32 %v5061_v26, %v5321_v59  ;;  %v715_v46 = vmul.f32 %v5074_v1, %v5321_v59  ;;  %9710 = sst [smem:[#allocation15_spill]] %s5598_s11 }
  0xd4   :  { %v1266_v11 = vsel %vm55_vm0, %v1263_v9, %v1265_v5  ;;  %v1289_v45 = vsel %vm97_vm1, %v1286_v31, %v1288_v55  ;;  %v1251_v36 = vadd.f32 %v5222_v23, %v662_v42  ;;  %v716_v9 = vmul.f32 %v5088_v35, %v5321_v59  ;;  %9709 = sst [smem:[#allocation14_spill]] %s5596_s7 }
  0xd5   :  { %v1278_v24 = vmax.f32 %v1249_v33, %v1266_v11  ;;  %v689_v38 = vsel %vm55_vm0, %v687_v27, %v688_v62  ;;  %v691_v57 = vsel %vm55_vm0, %v688_v62, %v690_v22  ;;  %v667_v31 = vmul.f32 %v5088_v35, %v5302_v17 }
  0xd6   :  { %v1267_v33 = vrot.slane %v1251_v36, 1  ;;  %v1290_v29 = vrot.slane %v1251_v36, 2  ;;  %v706_v23 = vadd.f32 %v689_v38, %v665_v13  ;;  %v707_v2 = vadd.f32 %v691_v57, %v666_v37 }
  0xd7   :  { %v1301_v3 = vmax.f32 %v1278_v24, %v1289_v45  ;;  %v728_v52 = vrot.slane %v714_v0, 2  ;;  %v729_v26 = vrot.slane %v715_v46, 2  ;;  %v731_v10 = vrot.slane %v716_v9, 2  ;;  %9711 = sst [smem:[#allocation16_spill]] %s5606_s12 }
  0xd8   :  { %v1268_v1 = vsel %vm55_vm0, %v1265_v5, %v1267_v33  ;;  %v1291_v42 = vsel %vm97_vm1, %v1288_v55, %v1290_v29  ;;  %v1280_v27 = vmax.f32 %v1251_v36, %v1267_v33  ;;  %v676_v11 = vmul.f32 %v5111_v12, %v5305_v19  ;;  %9714 = sst [smem:[#allocation19_spill]] %s5620_s13 }
  0xd9   :  { %v1311_v49 = vld [vmem:[#allocation2 + $0x120] ss:$3 sm:$0xff]  ;;  %1307 = vst [vmem:[#allocation2 + $0x138] sm:$0xff] %v1301_v3  ;;  %v1279_v35 = vmax.f32 %v1250_v47, %v1268_v1  ;;  %v730_v45 = vsel %vm97_vm1, %v728_v52, %v729_v26  ;;  %v732_v13 = vsel %vm97_vm1, %v729_v26, %v731_v10  ;;  %v717_v5 = vmul.f32 %v5111_v12, %v5321_v59 }
  0xda   :  { %v1314_v62 = vmul.f32 0.1, %v1311_v49  ;;  %v1303_v37 = vmax.f32 %v1280_v27, %v1290_v29  ;;  %v747_v24 = vadd.f32 %v730_v45, %v706_v23  ;;  %v748_v0 = vadd.f32 %v732_v13, %v707_v2 }
  0xdb   :  { %v692_v46 = vrot.slane %v676_v11, 1  ;;  %v1302_v57 = vmax.f32 %v1279_v35, %v1291_v42  ;;  %v668_v55 = vmul.f32 %v5111_v12, %v5302_v17  ;;  %v677_v3 = vmul.f32 %v5007_v30, %v5305_v19 }
  0xdc   :  { %v1316_v38 = vmax.f32 %v1311_v49, %v1314_v62  ;;  %1309 = vst [vmem:[#allocation2 + $0x148] sm:$0x3f] %v1303_v37  ;;  %v1328_v47 = vadd.f32 %v5324_v6, %v747_v24  ;;  %v1329_v36 = vadd.f32 %v5324_v6, %v748_v0  ;;  %v733_v23 = vrot.slane %v717_v5, 2 }
  0xdd   :  { %v693_v9 = vsel %vm55_vm0, %v690_v22, %v692_v46  ;;  %1308 = vst [vmem:[#allocation2 + $0x140] sm:$0xff] %v1302_v57  ;;  %v718_v2 = vmul.f32 %v5007_v30, %v5321_v59  ;;  %v694_v42 = vrot.slane %v677_v3, 1  ;;  %v907_v45 = vmax.f32 %v5247_v8, %v5265_v15 }
  0xde   :  { %v1320_v33 = vmul.f32 %v1319_v34, %v1316_v38  ;;  %v708_v29 = vadd.f32 %v693_v9, %v667_v31  ;;  %v1340_v12 = vrot.slane %v1328_v47, 1  ;;  %v1341_v52 = vrot.slane %v1329_v36, 1 }
  0xdf   :  { %v1363_v26 = vrot.slane %v1328_v47, 2  ;;  %v1364_v49 = vrot.slane %v1329_v36, 2  ;;  %v734_v22 = vsel %vm97_vm1, %v731_v10, %v733_v23  ;;  %v735_v27 = vrot.slane %v718_v2, 2 }
  0xe0   :  { %v5360_v1 = vadd.f32 %v1323_v51, %v1320_v33  ;;  %v829_v31 = vmul.f32 %v827_v40, %v825_v50  ;;  %v1342_v11 = vsel %vm55_vm0, %v1340_v12, %v1341_v52  ;;  %v749_v35 = vadd.f32 %v734_v22, %v708_v29 }
  0xe1   :  { %v1365_v62 = vsel %vm97_vm1, %v1363_v26, %v1364_v49  ;;  %v1357_v13 = vmax.f32 %v1328_v47, %v1342_v11  ;;  %v695_v37 = vsel %vm55_vm0, %v692_v46, %v694_v42  ;;  %v736_v10 = vsel %vm97_vm1, %v733_v23, %v735_v27 }
  0xe2   :  { %v989_v24 = vmax.f32 %v5257_v18, %v5279_v43  ;;  %v1330_v61 = vadd.f32 %v5324_v6, %v749_v35  ;;  %v709_v58 = vadd.f32 %v695_v37, %v668_v55  ;;  %v678_v40 = vmul.f32 %v5038_v7, %v5305_v19 }
  0xe3   :  { %v1380_v50 = vmax.f32 %v1357_v13, %v1365_v62  ;;  %v669_v0 = vmul.f32 %v5007_v30, %v5302_v17  ;;  %v719_v8 = vmul.f32 %v5038_v7, %v5321_v59  ;;  %v679_v15 = vmul.f32 %v5167_v39, %v5305_v19 }
  0xe4   :  { %v1343_v18 = vrot.slane %v1330_v61, 1  ;;  %v1366_v43 = vrot.slane %v1330_v61, 2  ;;  %v750_v46 = vadd.f32 %v736_v10, %v709_v58  ;;  %v696_v38 = vrot.slane %v678_v40, 1 }
  0xe5   :  { %1386 = vst [vmem:[#allocation2 + $0x150] sm:$0xff] %v1380_v50  ;;  %v737_v57 = vrot.slane %v719_v8, 2  ;;  %v670_v30 = vmul.f32 %v5038_v7, %v5302_v17  ;;  %v698_v5 = vrot.slane %v679_v15, 1  ;;  %v720_v19 = vmul.f32 %v5167_v39, %v5321_v59  ;;  %v1149_v15 = vld [vmem:[#allocation2 + $0xd8] ss:$3 sm:$0xff] }
  0xe6   :  { %v1344_v55 = vsel %vm55_vm0, %v1341_v52, %v1343_v18  ;;  %v1367_v47 = vsel %vm97_vm1, %v1364_v49, %v1366_v43  ;;  %v1331_v9 = vadd.f32 %v5324_v6, %v750_v46  ;;  %v697_v3 = vsel %vm55_vm0, %v694_v42, %v696_v38  ;;  %v1067_v52 = vld [vmem:[#allocation2 + $0xa8] ss:$3 sm:$0xff] }
  0xe7   :  { %v5401_v33 = vadd.f32 %v831_v41, %v829_v31  ;;  %v1358_v29 = vmax.f32 %v1329_v36, %v1344_v55  ;;  %v710_v23 = vadd.f32 %v697_v3, %v669_v0  ;;  %v738_v7 = vsel %vm97_vm1, %v735_v27, %v737_v57 }
  0xe8   :  { %v1345_v17 = vrot.slane %v1331_v9, 1  ;;  %v1368_v2 = vrot.slane %v1331_v9, 2  ;;  %v699_v39 = vsel %vm55_vm0, %v696_v38, %v698_v5  ;;  %v739_v59 = vrot.slane %v720_v19, 2 }
  0xe9   :  { %v911_v12 = vmul.f32 %v909_v21, %v907_v45  ;;  %v1381_v26 = vmax.f32 %v1358_v29, %v1367_v47  ;;  %v751_v49 = vadd.f32 %v738_v7, %v710_v23  ;;  %v711_v22 = vadd.f32 %v699_v39, %v670_v30 }
  0xea   :  { %v993_v41 = vmul.f32 %v991_v48, %v989_v24  ;;  %v1346_v36 = vsel %vm55_vm0, %v1343_v18, %v1345_v17  ;;  %v1369_v42 = vsel %vm97_vm1, %v1366_v43, %v1368_v2  ;;  %v740_v27 = vsel %vm97_vm1, %v737_v57, %v739_v59 }
  0xeb   :  { %1387 = vst [vmem:[#allocation2 + $0x158] sm:$0xff] %v1381_v26  ;;  %v1359_v21 = vmax.f32 %v1330_v61, %v1346_v36  ;;  %v1332_v31 = vadd.f32 %v5324_v6, %v751_v49  ;;  %v752_v11 = vadd.f32 %v740_v27, %v711_v22  ;;  %v1069_v48 = vmul.f32 0.1, %v1067_v52  ;;  %v1231_v49 = vld [vmem:[#allocation2 + $0x108] ss:$3 sm:$0xff] }
  0xec   :  { %v9219_v62 = vstv %s5385_s23  ;;  %v1413_v35 = vstv %s5387_s14  ;;  %v1426_v45 = vstv %s5389_s15  ;;  %v5427_v61 = vadd.f32 %v913_v32, %v911_v12  ;;  %s5807_s23 = sld [smem:[#allocation3 + $0x59]]  ;;  %s5885_s14 = sld [smem:[#allocation3 + $0x5e]] }
  0xed   :  { %v1382_v13 = vmax.f32 %v1359_v21, %v1369_v42  ;;  %v1347_v37 = vrot.slane %v1332_v31, 1  ;;  %v1370_v10 = vrot.slane %v1332_v31, 2  ;;  %v1333_v24 = vadd.f32 %v5324_v6, %v752_v11  ;;  %s5895_s15 = sld [smem:[#allocation3 + $0x5d]] }
  0xee   :  { %v5431_v58 = vadd.f32 %v995_v63, %v993_v41  ;;  %v5436_v40 = vmul.f32 %v1413_v35, %v5401_v33  ;;  %v5441_v50 = vmul.f32 %v1426_v45, %v5401_v33  ;;  %v1071_v63 = vmax.f32 %v1067_v52, %v1069_v48 }
  0xef   :  { %1388 = vst [vmem:[#allocation2 + $0x160] sm:$0xff] %v1382_v13  ;;  %v1348_v6 = vsel %vm55_vm0, %v1345_v17, %v1347_v37  ;;  %v1371_v32 = vsel %vm97_vm1, %v1368_v2, %v1370_v10  ;;  %v1349_v0 = vrot.slane %v1333_v24, 1  ;;  %v1372_v8 = vrot.slane %v1333_v24, 2 }
  0xf0   :  { %v1360_v18 = vmax.f32 %v1331_v9, %v1348_v6  ;;  %v1411_v43 = vmul.f32 %v9219_v62, %v5401_v33  ;;  %v9216_v46 = vrot.slane %v5436_v40, 1  ;;  %v9213_v5 = vstv %s5407_s24  ;;  %s5775_s24 = sld [smem:[#allocation3 + $0x56]] }
  0xf1   :  { %v1350_v38 = vsel %vm55_vm0, %v1347_v37, %v1349_v0  ;;  %v1373_v57 = vsel %vm97_vm1, %v1370_v10, %v1372_v8  ;;  %v1362_v30 = vmax.f32 %v1333_v24, %v1349_v0  ;;  %v9215_v9 = vrot.slane %v5441_v50, 2 }
  0xf2   :  { %v1383_v19 = vmax.f32 %v1360_v18, %v1371_v32  ;;  %v1361_v55 = vmax.f32 %v1332_v31, %v1350_v38  ;;  %v1424_v47 = vadd.f32 %v9216_v46, %v1411_v43  ;;  %v1151_v3 = vmul.f32 0.1, %v1149_v15  ;;  %v1313_v38 = vld [vmem:[#allocation2 + $0x138] ss:$3 sm:$0xff]  ;;  %9737 = sst [smem:[#allocation42_spill]] %s5807_s23 }
  0xf3   :  { %v1385_v29 = vmax.f32 %v1362_v30, %v1372_v8  ;;  %v1595_v23 = vstv %s5415_s9  ;;  %v9289_v7 = vstv %s5417_s17  ;;  %v1591_v39 = vmul.f32 %v9213_v5, %v5427_v61  ;;  %9746 = sst [smem:[#allocation51_spill]] %s5895_s15  ;;  %s5980_s9 = sld [smem:[#allocation3 + $0x69]] }
  0xf4   :  { %1389 = vst [vmem:[#allocation2 + $0x168] sm:$0xff] %v1383_v19  ;;  %v1384_v17 = vmax.f32 %v1361_v55, %v1373_v57  ;;  %v1437_v2 = vadd.f32 %v9215_v9, %v1424_v47  ;;  %v5475_v59 = vmul.f32 %v1595_v23, %v5427_v61  ;;  %v1075_v12 = vmul.f32 %v1073_v28, %v1071_v63 }
  0xf5   :  { %1391 = vst [vmem:[#allocation2 + $0x178] sm:$0x3f] %v1385_v29  ;;  %v5482_v52 = vmul.f32 %v9289_v7, %v5427_v61  ;;  %v9288_v26 = vstv %s5423_s16  ;;  %v1153_v36 = vmax.f32 %v1149_v15, %v1151_v3  ;;  %v1401_v27 = vstv %s5443_s18  ;;  %s5672_s18 = sld [smem:[#allocation3 + $0x4e]] }
  0xf6   :  { %v1393_v22 = vld [vmem:[#allocation2 + $0x150] ss:$3 sm:$0xff]  ;;  %1390 = vst [vmem:[#allocation2 + $0x170] sm:$0xff] %v1384_v17  ;;  %v1593_v41 = vadd.f32 %v1591_v39, %v1437_v2  ;;  %v9210_v28 = vrot.slane %v5475_v59, 1  ;;  %v9208_v21 = vstv %s5447_s10  ;;  %v5498_v48 = vmul.f32 %v9288_v26, %v5431_v58  ;;  %s5773_s10 = sld [smem:[#allocation3 + $0x54]]  ;;  %9732 = sst [smem:[#allocation37_spill]] %s5775_s24 }
  0xf7   :  { %v1396_v42 = vmul.f32 0.1, %v1393_v22  ;;  %v9209_v11 = vrot.slane %v5482_v52, 2  ;;  %v9287_v13 = vstv %s5453_s0  ;;  %v5503_v37 = vadd.f32 %v1077_v44, %v1075_v12 }
  0xf8   :  { %v1606_v31 = vadd.f32 %v9210_v28, %v1593_v41  ;;  %v1233_v10 = vmul.f32 0.1, %v1231_v49  ;;  %v1405_v6 = vstv %s5458_s19  ;;  %v1783_v0 = vmul.f32 %v9208_v21, %v5431_v58  ;;  %s5707_s19 = sld [smem:[#allocation3 + $0x52]] }
  0xf9   :  { %v1398_v24 = vmax.f32 %v1393_v22, %v1396_v42  ;;  %v5516_v8 = vmul.f32 %v9287_v13, %v5431_v58  ;;  %v1157_v44 = vmul.f32 %v1155_v14, %v1153_v36  ;;  %v9285_v15 = vstv %s5465_s22  ;;  %9760 = sst [smem:[#allocation59_spill]] %s5980_s9 }
  0xfa   :  { %v1619_v32 = vadd.f32 %v9209_v11, %v1606_v31  ;;  %v9207_v43 = vrot.slane %v5498_v48, 1  ;;  %v9203_v30 = vstv %s5485_s27  ;;  %v9281_v14 = vstv %s5487_s28  ;;  %s5674_s27 = sld [smem:[#allocation3 + $0x50]] }
  0xfb   :  { %v1402_v63 = vmul.f32 %v1401_v27, %v1398_v24  ;;  %v1235_v19 = vmax.f32 %v1231_v49, %v1233_v10  ;;  %v9205_v47 = vrot.slane %v5516_v8, 2  ;;  %v5540_v3 = vmul.f32 %v9285_v15, %v5503_v37  ;;  %9719 = sst [smem:[#allocation24_spill]] %s5672_s18 }
  0xfc   :  { %v1785_v18 = vadd.f32 %v1783_v0, %v1619_v32  ;;  %v5544_v29 = vadd.f32 %v1159_v25, %v1157_v44  ;;  %v1315_v17 = vmul.f32 0.1, %v1313_v38  ;;  %v1975_v39 = vmul.f32 %v9203_v30, %v5503_v37  ;;  %9731 = sst [smem:[#allocation36_spill]] %s5773_s10 }
  0xfd   :  { %v5530_v57 = vadd.f32 %v1405_v6, %v1402_v63  ;;  %v5556_v12 = vmul.f32 %v9281_v14, %v5503_v37  ;;  %v9277_v49 = vstv %s5505_s20  ;;  %v1239_v25 = vmul.f32 %v1237_v56, %v1235_v19  ;;  %v1395_v22 = vld [vmem:[#allocation2 + $0x168] ss:$3 sm:$0xff] }
  0xfe   :  { %v1798_v55 = vadd.f32 %v9207_v43, %v1785_v18  ;;  %v9202_v36 = vrot.slane %v5540_v3, 1  ;;  %v9194_v42 = vstv %s5523_s21  ;;  %v9273_v31 = vstv %s5525_s29  ;;  %s5638_s21 = sld [smem:[#allocation3 + $0x45]]  ;;  %9722 = sst [smem:[#allocation27_spill]] %s5707_s19 }
  0xff   :  { %v1317_v10 = vmax.f32 %v1313_v38, %v1315_v17  ;;  %v9201_v32 = vrot.slane %v5556_v12, 2  ;;  %v5574_v0 = vmul.f32 %v9277_v49, %v5544_v29  ;;  %v1397_v56 = vmul.f32 0.1, %v1395_v22 }
 0x100   :  { %v1811_v2 = vadd.f32 %v9205_v47, %v1798_v55  ;;  %v9707_v44 = vstv %s5143_s26  ;;  %v2167_v38 = vmul.f32 %v9194_v42, %v5544_v29  ;;  %v5594_v19 = vmul.f32 %v9273_v31, %v5544_v29  ;;  %s5601_s26 = sld [smem:[#allocation3 + $0x44]]  ;;  %9720 = sst [smem:[#allocation25_spill]] %s5674_s27 }
 0x101   :  { %9706 = vst [vmem:[#allocation12_spill] sm:$0xff] %v5574_v0  ;;  %v5584_v63 = vadd.f32 %v9707_v44, %v1239_v25  ;;  %v9271_v55 = vstv %s5546_s3  ;;  %v1321_v17 = vmul.f32 %v1319_v34, %v1317_v10  ;;  %v1399_v25 = vmax.f32 %v1395_v22, %v1397_v56 }
 0x102   :  { %v1977_v41 = vadd.f32 %v1975_v39, %v1811_v2  ;;  %9708 = vst [vmem:[#allocation13_spill] sm:$0xff] %v5594_v19  ;;  %v9199_v39 = vrot.slane %v5574_v0, 1  ;;  %v9198_v42 = vrot.slane %v5594_v19, 2  ;;  %v9220_v30 = vstv %s5606_s12  ;;  %s5919_s12 = sld [smem:[#allocation3 + $0x68]] }
 0x103   :  { %v5616_v34 = vmul.f32 %v9271_v55, %v5584_v63  ;;  %v5626_v22 = vadd.f32 %v1323_v51, %v1321_v17  ;;  %v9243_v51 = vstv %s5578_s4  ;;  %v9228_v17 = vstv %s5576_s25 }
 0x104   :  { %v1990_v24 = vadd.f32 %v9202_v36, %v1977_v41  ;;  %v9197_v41 = vstv %s5559_s30  ;;  %9716 = sst [smem:[#allocation21_spill]] %s5638_s21  ;;  %s5650_s30 = sld [smem:[#allocation3 + $0x4f]]  ;;  %v9229_v28 = vstv %s5622_s2  ;;  %v5703_v5 = vmul.f32 %v9220_v30, %v5427_v61 }
 0x105   :  { %9712 = vst [vmem:[#allocation17_spill] sm:$0xff] %v5616_v34  ;;  %v2359_v56 = vmul.f32 %v9197_v41, %v5584_v63  ;;  %v9206_v41 = vrot.slane %v5616_v34, 1  ;;  %v5669_v36 = vmul.f32 %v9243_v51, %v5626_v22  ;;  %v9232_v9 = vstv %s5638_s21  ;;  %s5757_s21 = sld [smem:[#allocation3 + $0x55]] }
 0x106   :  { %v2003_v18 = vadd.f32 %v9201_v32, %v1990_v24  ;;  %v9259_v24 = vstv %s5561_s5  ;;  %v9230_v32 = vstv %s5601_s26  ;;  %v9241_v46 = vstv %s5643_s8 }
 0x107   :  { %9718 = vst [vmem:[#allocation23_spill] sm:$0xff] %v5669_v36  ;;  %v5692_v11 = vmul.f32 %v9230_v32, %v5626_v22 }
 0x108   :  { %v2169_v2 = vadd.f32 %v2167_v38, %v2003_v18  ;;  %v5636_v18 = vmul.f32 %v9259_v24, %v5584_v63  ;;  %v1403_v38 = vmul.f32 %v1401_v27, %v1399_v25  ;;  %v5656_v27 = vmul.f32 %v9228_v17, %v5401_v33 }
 0x109   :  { %9721 = vst [vmem:[#allocation26_spill] sm:$0xff] %v5692_v11  ;;  %v9233_v62 = vrot.slane %v5692_v11, 2  ;;  %v9239_v17 = vstv %s5674_s27  ;;  %s5836_s27 = sld [smem:[#allocation3 + $0x5b]]  ;;  %v9321_v11 = vstv %s5980_s9  ;;  %s6235_s9 = sld [smem:[#allocation3 + $0x77]] }
 0x10a   :  { %v2182_v44 = vadd.f32 %v9199_v39, %v2169_v2  ;;  %9715 = vst [vmem:[#allocation20_spill] sm:$0xff] %v5636_v18  ;;  %v9221_v2 = vstv %s5580_s1  ;;  %v9212_v39 = vstv %s5598_s11  ;;  %9717 = sst [smem:[#allocation22_spill]] %s5650_s30  ;;  %v5678_v47 = vadd.f32 %v1405_v6, %v1403_v38  ;;  %s5731_s11 = sld [smem:[#allocation3 + $0x51]] }
 0x10b   :  { %v5661_v25 = vmul.f32 %v9221_v2, %v5401_v33  ;;  %v9218_v43 = vrot.slane %v5656_v27, 1  ;;  %v9224_v6 = vstv %s5618_s6  ;;  %v9227_v38 = vstv %s5620_s13  ;;  %s5733_s6 = sld [smem:[#allocation3 + $0x53]]  ;;  %s5853_s13 = sld [smem:[#allocation3 + $0x5a]] }
 0x10c   :  { %v2195_v10 = vadd.f32 %v9198_v42, %v2182_v44  ;;  %v9211_v42 = vstv %s5596_s7  ;;  %s5710_s7 = sld [smem:[#allocation3 + $0xc0]]  ;;  %v5728_v30 = vmul.f32 %v9229_v28, %v5678_v47  ;;  %v9240_v2 = vstv %s5650_s30  ;;  %9729 = sst [smem:[#allocation34_spill]] %s5757_s21 }
 0x10d   :  { %s5850_s30 = sld [smem:[#allocation3 + $0x64]] }
 0x10e   :  { %v2361_v44 = vadd.f32 %v2359_v56, %v2195_v10  ;;  %v9214_v56 = vrot.slane %v5636_v18, 2  ;;  %9724 = vst [vmem:[#allocation29_spill] sm:$0xff] %v5728_v30 }
 0x10f   :  { %v9292_v49 = vstv %s5836_s27 }
 0x110   :  { %v2374_v10 = vadd.f32 %v9206_v41, %v2361_v44  ;;  %v2551_v44 = vmul.f32 %v9211_v42, %v5626_v22  ;;  %v1441_v41 = vmul.f32 %v9212_v39, %v5401_v33  ;;  %v9225_v39 = vrot.slane %v5661_v25, 2  ;;  %9725 = sst [smem:[#allocation30_spill]] %s5731_s11 }
 0x111   :  { %9726 = sst [smem:[#allocation31_spill]] %s5733_s6  ;;  %v5932_v13 = vmul.f32 %v9292_v49, %v5626_v22  ;;  %v9753_v49 = vstv %s5417_s17  ;;  %s5982_s17 = sld [smem:[#allocation3 + $0x6b]] }
 0x112   :  { %v2387_v21 = vadd.f32 %v9214_v56, %v2374_v10  ;;  %v1454_v42 = vadd.f32 %v9218_v43, %v1441_v41  ;;  %v9226_v56 = vrot.slane %v5669_v36, 1  ;;  %9723 = sst [smem:[#allocation28_spill]] %s5710_s7  ;;  %v1623_v43 = vmul.f32 %v9224_v6, %v5427_v61 }
 0x113   :  { %9742 = sst [smem:[#allocation47_spill]] %s5853_s13  ;;  %v9296_v14 = vstv %s5850_s30  ;;  %9750 = vst [vmem:[#allocation55_spill] sm:$0xff] %v5932_v13  ;;  %v5957_v7 = vmul.f32 %v9753_v49, %v4793_v60  ;;  %v2039_v36 = vmul.f32 %v9321_v11, %v5503_v37  ;;  %v9787_v11 = vstv %s5525_s29  ;;  %s6123_s29 = sld [smem:[#allocation3 + $0x79]] }
 0x114   :  { %v2553_v10 = vadd.f32 %v2551_v44, %v2387_v21  ;;  %v1467_v41 = vadd.f32 %v9225_v39, %v1454_v42  ;;  %v5720_v21 = vmul.f32 %v9227_v38, %v5427_v61  ;;  %v2743_v42 = vmul.f32 %v9232_v9, %v5678_v47 }
 0x115   :  { %v9234_v39 = vrot.slane %v5703_v5, 1  ;;  %v9237_v38 = vstv %s5672_s18  ;;  %s5795_s18 = sld [smem:[#allocation3 + $0x58]] }
 0x116   :  { %v2566_v44 = vadd.f32 %v9226_v56, %v2553_v10  ;;  %v1625_v6 = vadd.f32 %v1623_v43, %v1467_v41  ;;  %v5744_v56 = vmul.f32 %v9241_v46, %v5678_v47  ;;  %v9238_v32 = vrot.slane %v5720_v21, 2 }
 0x117   :  { %v5754_v43 = vmul.f32 %v9240_v2, %v5431_v58  ;;  %v9250_v2 = vstv %s5731_s11  ;;  %v9252_v46 = vstv %s5733_s6  ;;  %s5820_s11 = sld [smem:[#allocation3 + $0x61]]  ;;  %s5822_s6 = sld [smem:[#allocation3 + $0x62]] }
 0x118   :  { %v2579_v10 = vadd.f32 %v9233_v62, %v2566_v44  ;;  %9727 = vst [vmem:[#allocation32_spill] sm:$0xff] %v5744_v56  ;;  %v1638_v28 = vadd.f32 %v9234_v39, %v1625_v6  ;;  %v9242_v44 = vrot.slane %v5728_v30, 1  ;;  %v1815_v6 = vmul.f32 %v9237_v38, %v5431_v58 }
 0x119   :  { %9728 = vst [vmem:[#allocation33_spill] sm:$0xff] %v5754_v43  ;;  %v5767_v62 = vmul.f32 %v9239_v17, %v5431_v58  ;;  %v9255_v39 = vstv %s5707_s19  ;;  %s5832_s19 = sld [smem:[#allocation3 + $0x60]]  ;;  %9793 = sst [smem:[#allocation75_spill]] %s6123_s29 }
 0x11a   :  { %v2745_v41 = vadd.f32 %v2743_v42, %v2579_v10  ;;  %v1651_v9 = vadd.f32 %v9238_v32, %v1638_v28  ;;  %v9246_v10 = vrot.slane %v5744_v56, 2  ;;  %v9249_v28 = vstv %s5710_s7  ;;  %s5811_s7 = sld [smem:[#allocation3 + $0x57]] }
 0x11b   :  { %9730 = vst [vmem:[#allocation35_spill] sm:$0xff] %v5767_v62  ;;  %v9247_v32 = vrot.slane %v5754_v43, 1  ;;  %v5789_v51 = vmul.f32 %v9255_v39, %v5503_v37  ;;  %9735 = sst [smem:[#allocation40_spill]] %s5795_s18 }
 0x11c   :  { %v2758_v42 = vadd.f32 %v9242_v44, %v2745_v41  ;;  %v1817_v38 = vadd.f32 %v1815_v6, %v1651_v9  ;;  %v9251_v44 = vrot.slane %v5767_v62, 2 }
 0x11d   :  { %9733 = vst [vmem:[#allocation38_spill] sm:$0xff] %v5789_v51  ;;  %v9286_v55 = vstv %s5822_s6 }
 0x11e   :  { %v2771_v17 = vadd.f32 %v9246_v10, %v2758_v42  ;;  %v1830_v41 = vadd.f32 %v9247_v32, %v1817_v38  ;;  %v2007_v42 = vmul.f32 %v9250_v2, %v5503_v37  ;;  %v5805_v38 = vmul.f32 %v9252_v46, %v5503_v37 }
 0x11f   :  { %v9270_v32 = vstv %s5757_s21  ;;  %v9269_v46 = vstv %s5775_s24  ;;  %9740 = sst [smem:[#allocation45_spill]] %s5832_s19  ;;  %s5848_s21 = sld [smem:[#allocation3 + $0x5c]] }
 0x120   :  { %v5793_v9 = vadd.f32 %v9249_v28, %v2771_v17  ;;  %v1843_v6 = vadd.f32 %v9251_v44, %v1830_v41  ;;  %9736 = vst [vmem:[#allocation41_spill] sm:$0xff] %v5805_v38  ;;  %9738 = sst [smem:[#allocation43_spill]] %s5811_s7  ;;  %v9260_v41 = vrot.slane %v5789_v51, 1  ;;  %v9265_v44 = vstv %s5773_s10  ;;  %s5862_s10 = sld [smem:[#allocation3 + $0x63]] }
 0x121   :  { %v5830_v39 = vmul.f32 %v9270_v32, %v5544_v29  ;;  %s5864_s24 = sld [smem:[#allocation3 + $0x65]] }
 0x122   :  { %9734 = vst [vmem:[#allocation39_spill] sm:$0xff] %v5793_v9  ;;  %v9257_v10 = vrot.slane %v5793_v9, 1  ;;  %v2009_v17 = vadd.f32 %v2007_v42, %v1843_v6  ;;  %v9264_v2 = vrot.slane %v5793_v9, 2  ;;  %v9266_v42 = vrot.slane %v5805_v38, 2 }
 0x123   :  { %9739 = vst [vmem:[#allocation44_spill] sm:$0xff] %v5830_v39 }
 0x124   :  { %v2944_v28 = vmax.f32 %v5793_v9, %v9257_v10  ;;  %v2022_v6 = vadd.f32 %v9260_v41, %v2009_v17  ;;  %v2199_v17 = vmul.f32 %v9265_v44, %v5544_v29  ;;  %v5846_v41 = vmul.f32 %v9269_v46, %v5544_v29 }
 0x125   :  { %v9272_v44 = vrot.slane %v5830_v39, 1  ;;  %v9279_v46 = vstv %s5811_s7  ;;  %s5917_s7 = sld [smem:[#allocation3 + $0x66]] }
 0x126   :  { %v2951_v10 = vmax.f32 %v2944_v28, %v9264_v2  ;;  %v2035_v24 = vadd.f32 %v9266_v42, %v2022_v6  ;;  %9741 = vst [vmem:[#allocation46_spill] sm:$0xff] %v5846_v41  ;;  %v9276_v28 = vstv %s5795_s18  ;;  %v5858_v6 = vmul.f32 %v1413_v35, %v4697_v54  ;;  %9743 = sst [smem:[#allocation48_spill]] %s5862_s10  ;;  %s5902_s18 = sld [smem:[#allocation3 + $0x5f]] }
 0x127   :  { %v9274_v42 = vstv %s5807_s23  ;;  %v2391_v31 = vmul.f32 %v9279_v46, %v5584_v63  ;;  %s5898_s23 = sld [smem:[#allocation3 + $0x67]]  ;;  %v5912_v46 = vmul.f32 %v9286_v55, %v5401_v33  ;;  %v9758_v49 = vstv %s5864_s24 }
 0x128   :  { %2953 = vst [vmem:[#allocation2 + $0x188] sm:$0xf] %v2951_v10  ;;  %v2201_v2 = vadd.f32 %v2199_v17, %v2035_v24  ;;  %v5869_v10 = vmul.f32 %v1426_v45, %v4697_v54  ;;  %v9280_v24 = vrot.slane %v5846_v41, 2  ;;  %v5878_v17 = vmul.f32 %v9276_v28, %v5584_v63 }
 0x129   :  { %v5883_v32 = vmul.f32 %v9274_v42, %v5584_v63  ;;  %v9284_v45 = vstv %s5820_s11  ;;  %v9290_v42 = vstv %s5832_s19  ;;  %9748 = vst [vmem:[#allocation53_spill] sm:$0xff] %v5912_v46  ;;  %v9293_v28 = vstv %s5848_s21  ;;  %s5964_s19 = sld [smem:[#allocation3 + $0x6a]] }
 0x12a   :  { %v2214_v35 = vadd.f32 %v9272_v44, %v2201_v2  ;;  %9744 = vst [vmem:[#allocation49_spill] sm:$0xff] %v5878_v17  ;;  %v9291_v2 = vrot.slane %v5878_v17, 1  ;;  %v1471_v55 = vmul.f32 %v9290_v42, %v5401_v33  ;;  %v5939_v15 = vmul.f32 %v9293_v28, %v5626_v22 }
 0x12b   :  { %9745 = vst [vmem:[#allocation50_spill] sm:$0xff] %v5883_v32  ;;  %9749 = sst [smem:[#allocation54_spill]] %s5917_s7  ;;  %v9754_v28 = vrot.slane %v5883_v32, 2  ;;  %v5975_v56 = vmul.f32 %v9758_v49, %v5427_v61 }
 0x12c   :  { %v2227_v44 = vadd.f32 %v9280_v24, %v2214_v35  ;;  %v5907_v35 = vmul.f32 %v9284_v45, %v5401_v33  ;;  %9751 = vst [vmem:[#allocation56_spill] sm:$0xff] %v5939_v15  ;;  %v9305_v45 = vstv %s5885_s14 }
 0x12d   :  { %9759 = vst [vmem:[#allocation58_spill] sm:$0xff] %v5975_v56  ;;  %v9308_v32 = vstv %s5898_s23  ;;  %v5994_v49 = vmul.f32 %v9305_v45, %v5678_v47  ;;  %v9765_v45 = vrot.slane %v5939_v15, 2  ;;  %v9771_v15 = vstv %s5917_s7  ;;  %s6250_s7 = sld [smem:[#allocation3 + $0x7e]] }
 0x12e   :  { %9747 = vst [vmem:[#allocation52_spill] sm:$0xff] %v5907_v35  ;;  %v2393_v24 = vadd.f32 %v2391_v31, %v2227_v44  ;;  %v9294_v31 = vrot.slane %v5907_v35, 1 }
 0x12f   :  { %9762 = vst [vmem:[#allocation61_spill] sm:$0xff] %v5994_v49 }
 0x130   :  { %v2406_v44 = vadd.f32 %v9291_v2, %v2393_v24  ;;  %v1484_v42 = vadd.f32 %v9294_v31, %v1471_v55  ;;  %v5947_v24 = vmul.f32 %v9296_v14, %v5427_v61  ;;  %v5952_v2 = vmul.f32 %v1595_v23, %v4793_v60 }
 0x131   :  { %v9755_v55 = vstv %s5853_s13  ;;  %v9756_v14 = vrot.slane %v5912_v46, 2  ;;  %v9757_v23 = vstv %s5862_s10  ;;  %s5986_s13 = sld [smem:[#allocation3 + $0xc1]]  ;;  %s6022_s10 = sld [smem:[#allocation3 + $0x6d]] }
 0x132   :  { %9752 = vst [vmem:[#allocation57_spill] sm:$0xff] %v5947_v24  ;;  %v2419_v26 = vadd.f32 %v9754_v28, %v2406_v44  ;;  %v2583_v31 = vmul.f32 %v9755_v55, %v5626_v22  ;;  %v1655_v17 = vmul.f32 %v9757_v23, %v5427_v61  ;;  %v9304_v44 = vrot.slane %v5932_v13, 1 }
 0x133   :  { %v1497_v9 = vadd.f32 %v9756_v14, %v1484_v42  ;;  %v6005_v13 = vmul.f32 %v9308_v32, %v5431_v58  ;;  %v9766_v42 = vstv %s5895_s15  ;;  %v9769_v32 = vstv %s5453_s0  ;;  %s6048_s0 = sld [smem:[#allocation3 + $0x6e]]  ;;  %s6191_s15 = sld [smem:[#allocation3 + $0x7b]] }
 0x134   :  { %v2585_v28 = vadd.f32 %v2583_v31, %v2419_v26  ;;  %v9306_v26 = vrot.slane %v5947_v24, 1  ;;  %v2775_v55 = vmul.f32 %v9766_v42, %v5678_v47  ;;  %v9772_v42 = vstv %s5919_s12 }
 0x135   :  { %v1657_v23 = vadd.f32 %v1655_v17, %v1497_v9  ;;  %9763 = vst [vmem:[#allocation62_spill] sm:$0xff] %v6005_v13  ;;  %v6027_v17 = vmul.f32 %v9769_v32, %v4900_v20  ;;  %v9317_v32 = vrot.slane %v5994_v49, 1 }
 0x136   :  { %v2598_v31 = vadd.f32 %v9304_v44, %v2585_v28  ;;  %v9764_v28 = vstv %s5423_s16  ;;  %s6046_s16 = sld [smem:[#allocation3 + $0x6c]] }
 0x137   :  { %9761 = sst [smem:[#allocation60_spill]] %s5986_s13  ;;  %v1670_v9 = vadd.f32 %v9306_v26, %v1657_v23  ;;  %v6010_v44 = vmul.f32 %v9764_v28, %v4900_v20  ;;  %v9767_v23 = vstv %s5902_s18  ;;  %v9770_v28 = vrot.slane %v5975_v56, 2 }
 0x138   :  { %v2611_v14 = vadd.f32 %v9765_v45, %v2598_v31  ;;  %v6020_v26 = vmul.f32 %v9767_v23, %v5678_v47  ;;  %v1847_v45 = vmul.f32 %v9771_v15, %v5431_v58  ;;  %v6037_v31 = vmul.f32 %v9772_v42, %v5431_v58 }
 0x139   :  { %v1683_v30 = vadd.f32 %v9770_v28, %v1670_v9  ;;  %v9774_v23 = vstv %s5465_s22  ;;  %v9776_v15 = vstv %s5487_s28  ;;  %v9777_v28 = vstv %s5505_s20  ;;  %s6075_s22 = sld [smem:[#allocation3 + $0x70]]  ;;  %s6093_s28 = sld [smem:[#allocation3 + $0x71]] }
 0x13a   :  { %9768 = vst [vmem:[#allocation63_spill] sm:$0xff] %v6020_v26  ;;  %9773 = vst [vmem:[#allocation64_spill] sm:$0xff] %v6037_v31  ;;  %v6042_v41 = vmul.f32 %v9774_v23, %v4998_v53  ;;  %v2777_v39 = vadd.f32 %v2775_v55, %v2611_v14  ;;  %v6053_v9 = vmul.f32 %v9776_v15, %v4998_v53  ;;  %v9318_v23 = vrot.slane %v6005_v13, 1  ;;  %s6102_s20 = sld [smem:[#allocation3 + $0x6f]]  ;;  %9815 = sst [smem:[#allocation87_spill]] %s6191_s15 }
 0x13b   :  { %v6058_v42 = vmul.f32 %v9777_v28, %v5139_v4  ;;  %v1849_v56 = vadd.f32 %v1847_v45, %v1683_v30  ;;  %v9320_v14 = vrot.slane %v6020_v26, 2  ;;  %v9322_v28 = vrot.slane %v6037_v31, 2 }
 0x13c   :  { %9775 = sst [smem:[#allocation65_spill]] %s6046_s16  ;;  %v2790_v55 = vadd.f32 %v9317_v32, %v2777_v39  ;;  %v9779_v30 = vstv %s5964_s19  ;;  %v9781_v39 = vstv %s5982_s17  ;;  %v9791_v26 = vstv %s5561_s5  ;;  %s6154_s5 = sld [smem:[#allocation3 + $0x73]] }
 0x13d   :  { %9778 = vst [vmem:[#allocation66_spill] sm:$0xff] %v6058_v42  ;;  %v1862_v15 = vadd.f32 %v9318_v23, %v1849_v56  ;;  %v6073_v45 = vmul.f32 %v9779_v30, %v5503_v37  ;;  %v6091_v49 = vmul.f32 %v9781_v39, %v5503_v37  ;;  %v6107_v39 = vmul.f32 %v9787_v11, %v5139_v4 }
 0x13e   :  { %v2803_v56 = vadd.f32 %v9320_v14, %v2790_v55  ;;  %v9784_v14 = vstv %s5986_s13  ;;  %v9794_v11 = vstv %s5578_s4  ;;  %v9799_v31 = vstv %s5601_s26  ;;  %s6156_s4 = sld [smem:[#allocation3 + $0x7a]]  ;;  %s6171_s26 = sld [smem:[#allocation3 + $0x7c]] }
 0x13f   :  { %9780 = vst [vmem:[#allocation67_spill] sm:$0xff] %v6073_v45  ;;  %v1875_v30 = vadd.f32 %v9322_v28, %v1862_v15  ;;  %9782 = vst [vmem:[#allocation68_spill] sm:$0xff] %v6091_v49  ;;  %9783 = sst [smem:[#allocation69_spill]] %s6093_s28  ;;  %v9789_v28 = vstv %s5546_s3  ;;  %v9327_v55 = vrot.slane %v6073_v45, 1  ;;  %s6138_s3 = sld [smem:[#allocation3 + $0x78]]  ;;  %v6143_v15 = vmul.f32 %v9799_v31, %v5360_v1 }
 0x140   :  { %v6099_v23 = vadd.f32 %v9784_v14, %v2803_v56  ;;  %9786 = sst [smem:[#allocation71_spill]] %s6102_s20  ;;  %9788 = vst [vmem:[#allocation72_spill] sm:$0xff] %v6107_v39  ;;  %v6112_v32 = vmul.f32 %v9789_v28, %v5253_v16  ;;  %v6118_v14 = vmul.f32 %v9791_v26, %v5253_v16  ;;  %v6128_v28 = vmul.f32 %v9794_v11, %v5360_v1 }
 0x141   :  { %v2041_v24 = vadd.f32 %v2039_v36, %v1875_v30  ;;  %v9331_v30 = vrot.slane %v6091_v49, 2  ;;  %v9796_v26 = vstv %s6022_s10  ;;  %9800 = vst [vmem:[#allocation79_spill] sm:$0xff] %v6143_v15  ;;  %v9801_v56 = vstv %s5622_s2  ;;  %s6169_s2 = sld [smem:[#allocation3 + $0x74]]  ;;  %s6182_s13 = sld [smem:[#allocation3 + $0x72]] }
 0x142   :  { %9785 = vst [vmem:[#allocation70_spill] sm:$0xff] %v6099_v23  ;;  %9790 = vst [vmem:[#allocation73_spill] sm:$0xff] %v6112_v32  ;;  %v6136_v13 = vmul.f32 %v9796_v26, %v5544_v29  ;;  %v6148_v11 = vmul.f32 %v9801_v56, %v5530_v57  ;;  %v9803_v45 = vrot.slane %v6099_v23, 1  ;;  %v9805_v26 = vstv %s6046_s16  ;;  %s6231_s16 = sld [smem:[#allocation3 + $0x7f]] }
 0x143   :  { %9792 = vst [vmem:[#allocation74_spill] sm:$0xff] %v6118_v14  ;;  %9795 = vst [vmem:[#allocation76_spill] sm:$0xff] %v6128_v28  ;;  %v2054_v36 = vadd.f32 %v9327_v55, %v2041_v24  ;;  %v2231_v38 = vmul.f32 %v9805_v26, %v5544_v29  ;;  %v9806_v56 = vstv %s6048_s0  ;;  %v9812_v26 = vrot.slane %v6099_v23, 2 }
 0x144   :  { %9797 = vst [vmem:[#allocation77_spill] sm:$0xff] %v6136_v13  ;;  %9802 = vst [vmem:[#allocation80_spill] sm:$0xff] %v6148_v11  ;;  %v2976_v24 = vmax.f32 %v6099_v23, %v9803_v45  ;;  %9804 = sst [smem:[#allocation81_spill]] %s6156_s4  ;;  %v6166_v51 = vmul.f32 %v9806_v56, %v5544_v29  ;;  %v9814_v56 = vstv %s5576_s25  ;;  %v9337_v45 = vrot.slane %v6136_v13, 1  ;;  %s6219_s25 = sld [smem:[#allocation3 + $0x76]] }
 0x145   :  { %9798 = sst [smem:[#allocation78_spill]] %s6138_s3  ;;  %v2067_v31 = vadd.f32 %v9331_v30, %v2054_v36  ;;  %v9810_v36 = vstv %s5643_s8  ;;  %v6187_v18 = vmul.f32 %v9814_v56, %v4697_v54  ;;  %s6193_s8 = sld [smem:[#allocation3 + $0x7d]]  ;;  %v9817_v56 = vstv %s6075_s22 }
 0x146   :  { %9807 = vst [vmem:[#allocation82_spill] sm:$0xff] %v6166_v51  ;;  %9809 = sst [smem:[#allocation84_spill]] %s6171_s26  ;;  %v6178_v30 = vmul.f32 %v9810_v36, %v5530_v57  ;;  %v2983_v49 = vmax.f32 %v2976_v24, %v9812_v26  ;;  %v9343_v36 = vrot.slane %v6166_v51, 2  ;;  %v9819_v24 = vstv %s5580_s1  ;;  %s6228_s1 = sld [smem:[#allocation3 + $0x75]] }
 0x147   :  { %9808 = sst [smem:[#allocation83_spill]] %s6169_s2  ;;  %v2233_v46 = vadd.f32 %v2231_v38, %v2067_v31  ;;  %v6201_v38 = vmul.f32 %v9817_v56, %v5584_v63  ;;  %v6212_v26 = vmul.f32 %v9819_v24, %v4697_v54  ;;  %v9820_v56 = vstv %s6093_s28  ;;  %s6252_s28 = sld [smem:[#allocation3 + $0x80]] }
 0x148   :  { %9811 = vst [vmem:[#allocation85_spill] sm:$0xff] %v6178_v30  ;;  %9813 = sst [smem:[#allocation86_spill]] %s6182_s13  ;;  %2985 = vst [vmem:[#allocation2 + $0x198] sm:$0xf] %v2983_v49  ;;  %v6217_v31 = vmul.f32 %v9820_v56, %v5584_v63  ;;  %v9823_v49 = vstv %s6102_s20  ;;  %v9829_v51 = vstv %s6138_s3  ;;  %v9831_v56 = vstv %s6154_s5  ;;  %s6293_s3 = sld [smem:[#allocation3 + $0x82]] }
 0x149   :  { %9818 = vst [vmem:[#allocation89_spill] sm:$0xff] %v6201_v38  ;;  %v2246_v34 = vadd.f32 %v9337_v45, %v2233_v46  ;;  %v9347_v46 = vstv %s6123_s29  ;;  %v2423_v23 = vmul.f32 %v9823_v49, %v5584_v63  ;;  %v9349_v49 = vstv %s6156_s4  ;;  %s9827_s20 = sld [smem:[#allocation16_spill]]  ;;  %s6311_s4 = sld [smem:[#allocation3 + $0x83]] }
 0x14a   :  { %9821 = vst [vmem:[#allocation90_spill] sm:$0xff] %v6217_v31  ;;  %9822 = sst [smem:[#allocation91_spill]] %s6219_s25  ;;  %v6247_v24 = vmul.f32 %v9349_v49, %v5401_v33  ;;  %v9830_v45 = vrot.slane %v6201_v38, 1  ;;  %v6265_v30 = vmul.f32 %v9831_v56, %v5626_v22  ;;  %v9833_v13 = vstv %s6169_s2  ;;  %s9851_s29 = sld [smem:[#allocation27_spill]] }
 0x14b   :  { %9816 = sst [smem:[#allocation88_spill]] %s6193_s8  ;;  %v2259_v55 = vadd.f32 %v9343_v36, %v2246_v34  ;;  %v6240_v34 = vmul.f32 %v9347_v46, %v5401_v33  ;;  %v6272_v46 = vmul.f32 %v9833_v13, %v5626_v22  ;;  %v9838_v13 = vrot.slane %v6217_v31, 2  ;;  %s6355_s2 = sld [smem:[#allocation3 + $0x85]] }
 0x14c   :  { %9824 = sst [smem:[#allocation92_spill]] %s6228_s1  ;;  %9826 = vst [vmem:[#allocation94_spill] sm:$0xff] %v6247_v24  ;;  %9832 = vst [vmem:[#allocation95_spill] sm:$0xff] %v6265_v30  ;;  %v9365_v38 = vrot.slane %v6247_v24, 2 }
 0x14d   :  { %9825 = vst [vmem:[#allocation93_spill] sm:$0xff] %v6240_v34  ;;  %v2425_v36 = vadd.f32 %v2423_v23, %v2259_v55  ;;  %9828 = sst [smem:[#allocation16_spill]] %s6250_s7  ;;  %v1501_v23 = vmul.f32 %v9829_v51, %v5401_v33  ;;  %v9358_v55 = vrot.slane %v6240_v34, 1  ;;  %9834 = vst [vmem:[#allocation96_spill] sm:$0xff] %v6272_v46  ;;  %v9839_v34 = vstv %s6182_s13  ;;  %s9845_s13 = sld [smem:[#allocation22_spill]] }
 0x14e   :  { %v2615_v14 = vmul.f32 %v9839_v34, %v5626_v22  ;;  %9840 = sst [smem:[#allocation98_spill]] %s6293_s3  ;;  %v9368_v34 = vrot.slane %v6265_v30, 1 }
 0x14f   :  { %v2438_v49 = vadd.f32 %v9830_v45, %v2425_v36  ;;  %v1514_v51 = vadd.f32 %v9358_v55, %v1501_v23  ;;  %v9835_v45 = vstv %s6171_s26  ;;  %v9837_v11 = vstv %s9827_s20  ;;  %s9844_s20 = sld [smem:[#allocation19_spill]]  ;;  %s6309_s26 = sld [smem:[#allocation3 + $0x81]] }
 0x150   :  { %v6280_v36 = vmul.f32 %v9835_v45, %v5427_v61  ;;  %v6286_v15 = vmul.f32 %v9837_v11, %v4793_v60  ;;  %v9841_v55 = vstv %s6191_s15  ;;  %v9842_v11 = vstv %s6193_s8  ;;  %s6315_s15 = sld [smem:[#allocation3 + $0xc2]]  ;;  %s9848_s8 = sld [smem:[#allocation25_spill]] }
 0x151   :  { %v2451_v28 = vadd.f32 %v9838_v13, %v2438_v49  ;;  %v1527_v45 = vadd.f32 %v9365_v38, %v1514_v51  ;;  %v1687_v56 = vmul.f32 %v9841_v55, %v5427_v61  ;;  %v6304_v32 = vmul.f32 %v9842_v11, %v5427_v61 }
 0x152   :  { %9836 = vst [vmem:[#allocation97_spill] sm:$0xff] %v6280_v36  ;;  %v9849_v38 = vstv %s6219_s25  ;;  %s9857_s25 = sld [smem:[#allocation31_spill]]  ;;  %v9859_v55 = vrot.slane %v6272_v46, 2  ;;  %v9861_v23 = vstv %s6228_s1  ;;  %v9867_v46 = vstv %s6250_s7  ;;  %s9883_s1 = sld [smem:[#allocation42_spill]] }
 0x153   :  { %9843 = vst [vmem:[#allocation99_spill] sm:$0xff] %v6304_v32  ;;  %v2617_v49 = vadd.f32 %v2615_v14, %v2451_v28  ;;  %v1689_v11 = vadd.f32 %v1687_v56, %v1527_v45  ;;  %v9372_v14 = vrot.slane %v6280_v36, 1  ;;  %v6323_v13 = vmul.f32 %v9849_v38, %v5678_v47  ;;  %s6426_s7 = sld [smem:[#allocation3 + $0x89]] }
 0x154   :  { %v9856_v38 = vstv %s9845_s13  ;;  %v2807_v36 = vmul.f32 %v9861_v23, %v5678_v47  ;;  %v9868_v23 = vstv %s6252_s28  ;;  %s6379_s13 = sld [smem:[#allocation3 + $0x84]]  ;;  %v9391_v39 = vstv %s6311_s4 }
 0x155   :  { %9846 = sst [smem:[#allocation19_spill]] %s6309_s26  ;;  %v2630_v28 = vadd.f32 %v9368_v34, %v2617_v49  ;;  %9850 = vst [vmem:[#allocation100_spill] sm:$0xff] %v6323_v13  ;;  %v9852_v51 = vstv %s9844_s20  ;;  %v1702_v56 = vadd.f32 %v9372_v14, %v1689_v11  ;;  %v9854_v49 = vstv %s6231_s16  ;;  %s9860_s20 = sld [smem:[#allocation34_spill]] }
 0x156   :  { %9847 = sst [smem:[#allocation22_spill]] %s6315_s15  ;;  %v6330_v31 = vmul.f32 %v9852_v51, %v4793_v60  ;;  %v6338_v34 = vmul.f32 %v9854_v49, %v5431_v58  ;;  %v6343_v30 = vmul.f32 %v9856_v38, %v4900_v20  ;;  %v9862_v11 = vstv %s6235_s9 }
 0x157   :  { %v2643_v51 = vadd.f32 %v9859_v55, %v2630_v28  ;;  %v6353_v14 = vmul.f32 %v9862_v11, %v5678_v47  ;;  %v9864_v49 = vstv %s9848_s8  ;;  %v9866_v38 = vrot.slane %v6304_v32, 2  ;;  %s6381_s8 = sld [smem:[#allocation3 + $0x86]] }
 0x158   :  { %9853 = vst [vmem:[#allocation101_spill] sm:$0xff] %v6330_v31  ;;  %9855 = vst [vmem:[#allocation102_spill] sm:$0xff] %v6338_v34  ;;  %v6360_v45 = vmul.f32 %v9864_v49, %v4900_v20  ;;  %v1879_v55 = vmul.f32 %v9867_v46, %v5431_v58  ;;  %v6370_v28 = vmul.f32 %v9868_v23, %v5431_v58  ;;  %v9870_v11 = vstv %s9851_s29  ;;  %s9879_s29 = sld [smem:[#allocation37_spill]] }
 0x159   :  { %9858 = vst [vmem:[#allocation103_spill] sm:$0xff] %v6343_v30  ;;  %9863 = vst [vmem:[#allocation104_spill] sm:$0xff] %v6353_v14  ;;  %v1715_v24 = vadd.f32 %v9866_v38, %v1702_v56  ;;  %v6375_v35 = vmul.f32 %v9870_v11, %v4998_v53  ;;  %v2809_v62 = vadd.f32 %v2807_v36, %v2643_v51  ;;  %v9383_v49 = vrot.slane %v6323_v13, 1  ;;  %9884 = sst [smem:[#allocation31_spill]] %s6426_s7 }
 0x15a   :  { %9865 = vst [vmem:[#allocation105_spill] sm:$0xff] %v6360_v45  ;;  %9869 = vst [vmem:[#allocation106_spill] sm:$0xff] %v6370_v28  ;;  %9872 = sst [smem:[#allocation25_spill]] %s6379_s13  ;;  %v9873_v46 = vstv %s9857_s25  ;;  %v9384_v11 = vrot.slane %v6338_v34, 1  ;;  %v9387_v51 = vrot.slane %v6353_v14, 2  ;;  %v9389_v32 = vstv %s6309_s26  ;;  %s6487_s26 = sld [smem:[#allocation3 + $0x8b]] }
 0x15b   :  { %9871 = vst [vmem:[#allocation107_spill] sm:$0xff] %v6375_v35  ;;  %v6386_v56 = vmul.f32 %v9873_v46, %v4998_v53  ;;  %v9875_v38 = vstv %s9860_s20  ;;  %v1881_v43 = vadd.f32 %v1879_v55, %v1715_v24  ;;  %v2822_v36 = vadd.f32 %v9383_v49, %v2809_v62  ;;  %s9880_s25 = sld [smem:[#allocation40_spill]]  ;;  %s6413_s20 = sld [smem:[#allocation3 + $0x88]] }
 0x15c   :  { %v6391_v23 = vmul.f32 %v9875_v38, %v5139_v4  ;;  %v9390_v38 = vrot.slane %v6370_v28, 2  ;;  %v9877_v24 = vstv %s6293_s3  ;;  %v6424_v62 = vmul.f32 %v9391_v39, %v5503_v37  ;;  %s6435_s3 = sld [smem:[#allocation3 + $0x87]] }
 0x15d   :  { %9874 = vst [vmem:[#allocation108_spill] sm:$0xff] %v6386_v56  ;;  %v1894_v46 = vadd.f32 %v9384_v11, %v1881_v43  ;;  %v6406_v55 = vmul.f32 %v9877_v24, %v5503_v37  ;;  %v2835_v19 = vadd.f32 %v9387_v51, %v2822_v36  ;;  %v2071_v11 = vmul.f32 %v9389_v32, %v5503_v37 }
 0x15e   :  { %9876 = vst [vmem:[#allocation109_spill] sm:$0xff] %v6391_v23  ;;  %9882 = vst [vmem:[#allocation111_spill] sm:$0xff] %v6424_v62  ;;  %v9885_v43 = vstv %s6315_s15  ;;  %s6452_s15 = sld [smem:[#allocation3 + $0x91]]  ;;  %v9892_v32 = vstv %s9883_s1  ;;  %s6485_s1 = sld [smem:[#allocation3 + $0x8a]]  ;;  %v9907_v56 = vstv %s6381_s8  ;;  %v9909_v35 = vstv %s5902_s18 }
 0x15f   :  { %9878 = vst [vmem:[#allocation110_spill] sm:$0xff] %v6406_v55  ;;  %v1907_v24 = vadd.f32 %v9390_v38, %v1894_v46  ;;  %v6432_v49 = vadd.f32 %v9885_v43, %v2835_v19  ;;  %v9888_v38 = vstv %s9879_s29  ;;  %v9395_v36 = vrot.slane %v6406_v55, 1  ;;  %s6467_s29 = sld [smem:[#allocation3 + $0x90]]  ;;  %s6522_s18 = sld [smem:[#allocation3 + $0x95]] }
 0x160   :  { %v6441_v13 = vmul.f32 %v9888_v38, %v5139_v4  ;;  %v6457_v38 = vmul.f32 %v9892_v32, %v5253_v16  ;;  %v9897_v46 = vstv %s5836_s27  ;;  %v9899_v32 = vstv %s5848_s21  ;;  %s6504_s27 = sld [smem:[#allocation3 + $0x8c]] }
 0x161   :  { %9881 = sst [smem:[#allocation27_spill]] %s6413_s20  ;;  %9886 = vst [vmem:[#allocation112_spill] sm:$0xff] %v6432_v49  ;;  %v2073_v39 = vadd.f32 %v2071_v11, %v1907_v24  ;;  %v9890_v51 = vstv %s9880_s25  ;;  %s6469_s25 = sld [smem:[#allocation3 + $0x92]]  ;;  %v6474_v43 = vmul.f32 %v9897_v46, %v5360_v1  ;;  %v6479_v55 = vmul.f32 %v9899_v32, %v5360_v1 }
 0x162   :  { %9887 = sst [smem:[#allocation34_spill]] %s6435_s3  ;;  %9889 = vst [vmem:[#allocation113_spill] sm:$0xff] %v6441_v13  ;;  %v6447_v14 = vmul.f32 %v9890_v51, %v5253_v16  ;;  %9893 = vst [vmem:[#allocation115_spill] sm:$0xff] %v6457_v38  ;;  %v9894_v51 = vstv %s6355_s2  ;;  %v9903_v24 = vstv %s5885_s14  ;;  %v9905_v46 = vrot.slane %v6424_v62, 2  ;;  %s6515_s21 = sld [smem:[#allocation3 + $0x94]] }
 0x163   :  { %v2086_v11 = vadd.f32 %v9395_v36, %v2073_v39  ;;  %v6465_v19 = vmul.f32 %v9894_v51, %v5544_v29  ;;  %9898 = vst [vmem:[#allocation117_spill] sm:$0xff] %v6474_v43  ;;  %9900 = vst [vmem:[#allocation118_spill] sm:$0xff] %v6479_v55  ;;  %v9901_v39 = vrot.slane %v6432_v49, 1  ;;  %v6492_v28 = vmul.f32 %v9903_v24, %v5530_v57  ;;  %s6520_s14 = sld [smem:[#allocation3 + $0x93]] }
 0x164   :  { %9891 = vst [vmem:[#allocation114_spill] sm:$0xff] %v6447_v14  ;;  %9902 = sst [smem:[#allocation40_spill]] %s6485_s1  ;;  %v9906_v32 = vstv %s6379_s13  ;;  %v6510_v45 = vmul.f32 %v9909_v35, %v5530_v57  ;;  %v9911_v24 = vrot.slane %v6432_v49, 2  ;;  %v9408_v30 = vstv %s6426_s7  ;;  %s6564_s7 = sld [smem:[#allocation3 + $0x97]] }
 0x165   :  { %9895 = vst [vmem:[#allocation116_spill] sm:$0xff] %v6465_v19  ;;  %9896 = sst [smem:[#allocation37_spill]] %s6467_s29  ;;  %v3008_v36 = vmax.f32 %v6432_v49, %v9901_v39  ;;  %9904 = vst [vmem:[#allocation119_spill] sm:$0xff] %v6492_v28  ;;  %v2099_v34 = vadd.f32 %v9905_v46, %v2086_v11  ;;  %v2263_v23 = vmul.f32 %v9906_v32, %v5544_v29  ;;  %v9407_v11 = vstv %s6413_s20  ;;  %s6548_s13 = sld [smem:[#allocation3 + $0x8e]] }
 0x166   :  { %v6502_v39 = vmul.f32 %v9907_v56, %v5544_v29  ;;  %9910 = vst [vmem:[#allocation121_spill] sm:$0xff] %v6510_v45  ;;  %v9406_v32 = vrot.slane %v6465_v19, 1  ;;  %v6535_v35 = vmul.f32 %v9407_v11, %v5584_v63  ;;  %s6585_s20 = sld [smem:[#allocation3 + $0x98]]  ;;  %v9930_v28 = vstv %s5850_s30  ;;  %s6642_s30 = sld [smem:[#allocation3 + $0x99]] }
 0x167   :  { %v3015_v62 = vmax.f32 %v3008_v36, %v9911_v24  ;;  %v2265_v56 = vadd.f32 %v2263_v23, %v2099_v34  ;;  %v9412_v34 = vstv %s6435_s3  ;;  %v6546_v23 = vmul.f32 %v9408_v30, %v5584_v63  ;;  %s6583_s3 = sld [smem:[#allocation3 + $0x96]] }
 0x168   :  { %9908 = vst [vmem:[#allocation120_spill] sm:$0xff] %v6502_v39  ;;  %v9413_v51 = vrot.slane %v6502_v39, 2  ;;  %9913 = vst [vmem:[#allocation122_spill] sm:$0xff] %v6535_v35  ;;  %v9423_v39 = vrot.slane %v6535_v35, 1  ;;  %v9924_v30 = vstv %s6487_s26  ;;  %v6619_v55 = vmul.f32 %v9930_v28, %v4793_v60 }
 0x169   :  { %9912 = sst [smem:[#allocation42_spill]] %s6520_s14  ;;  %3017 = vst [vmem:[#allocation2 + $0x1a8] sm:$0xf] %v3015_v62  ;;  %v2278_v46 = vadd.f32 %v9406_v32, %v2265_v56  ;;  %v9914_v62 = vstv %s5820_s11  ;;  %9916 = vst [vmem:[#allocation124_spill] sm:$0xff] %v6546_v23  ;;  %v9917_v32 = vstv %s5822_s6  ;;  %s6561_s11 = sld [smem:[#allocation3 + $0x8d]]  ;;  %v9923_v56 = vstv %s6467_s29 }
 0x16a   :  { %v6541_v36 = vmul.f32 %v9914_v62, %v4697_v54  ;;  %v6554_v11 = vmul.f32 %v9917_v32, %v4697_v54  ;;  %v2455_v62 = vmul.f32 %v9412_v34, %v5584_v63  ;;  %s6568_s6 = sld [smem:[#allocation3 + $0x8f]]  ;;  %v9919_v32 = vstv %s6452_s15  ;;  %s6626_s29 = sld [smem:[#allocation3 + $0x9a]] }
 0x16b   :  { %v2291_v24 = vadd.f32 %v9413_v51, %v2278_v46  ;;  %v6573_v46 = vmul.f32 %v9919_v32, %v5401_v33  ;;  %v9418_v34 = vstv %s6469_s25  ;;  %v1531_v19 = vmul.f32 %v9923_v56, %v5401_v33 }
 0x16c   :  { %9915 = vst [vmem:[#allocation123_spill] sm:$0xff] %v6541_v36  ;;  %v6581_v49 = vmul.f32 %v9418_v34, %v5401_v33  ;;  %v6598_v45 = vmul.f32 %v9924_v30, %v5626_v22  ;;  %v9926_v32 = vstv %s6504_s27  ;;  %v9935_v28 = vstv %s6522_s18  ;;  %9937 = sst [smem:[#allocation134_spill]] %s6642_s30 }
 0x16d   :  { %9920 = vst [vmem:[#allocation126_spill] sm:$0xff] %v6573_v46  ;;  %v2457_v51 = vadd.f32 %v2455_v62, %v2291_v24  ;;  %9922 = sst [smem:[#allocation128_spill]] %s6583_s3  ;;  %v9428_v24 = vrot.slane %v6573_v46, 1  ;;  %v6605_v43 = vmul.f32 %v9926_v32, %v5626_v22  ;;  %v9931_v32 = vrot.slane %v6546_v23, 2 }
 0x16e   :  { %9921 = vst [vmem:[#allocation127_spill] sm:$0xff] %v6581_v49  ;;  %9925 = vst [vmem:[#allocation129_spill] sm:$0xff] %v6598_v45  ;;  %v9432_v62 = vrot.slane %v6581_v49, 2  ;;  %v9932_v46 = vstv %s6485_s1  ;;  %v6637_v14 = vmul.f32 %v9935_v28, %v5427_v61  ;;  %s6644_s1 = sld [smem:[#allocation3 + $0x9b]] }
 0x16f   :  { %9918 = sst [smem:[#allocation125_spill]] %s6561_s11  ;;  %v2470_v34 = vadd.f32 %v9423_v39, %v2457_v51  ;;  %9927 = vst [vmem:[#allocation130_spill] sm:$0xff] %v6605_v43  ;;  %v1544_v56 = vadd.f32 %v9428_v24, %v1531_v19  ;;  %v9928_v51 = vstv %s6515_s21  ;;  %v2647_v38 = vmul.f32 %v9932_v46, %v5626_v22 }
 0x170   :  { %v6613_v39 = vmul.f32 %v9928_v51, %v5427_v61  ;;  %9933 = sst [smem:[#allocation132_spill]] %s6626_s29  ;;  %v9934_v24 = vstv %s6520_s14  ;;  %9936 = vst [vmem:[#allocation133_spill] sm:$0xff] %v6637_v14  ;;  %v9434_v46 = vrot.slane %v6598_v45, 1  ;;  %s6648_s14 = sld [smem:[#allocation3 + $0xc3]]  ;;  %v9948_v19 = vstv %s6561_s11 }
 0x171   :  { %v2483_v35 = vadd.f32 %v9931_v32, %v2470_v34  ;;  %v1557_v51 = vadd.f32 %v9432_v62, %v1544_v56  ;;  %v1719_v30 = vmul.f32 %v9934_v24, %v5427_v61  ;;  %v9940_v62 = vstv %s6548_s13  ;;  %s9977_s11 = sld [smem:[#allocation83_spill]] }
 0x172   :  { %9929 = vst [vmem:[#allocation131_spill] sm:$0xff] %v6613_v39  ;;  %v6656_v32 = vmul.f32 %v9940_v62, %v5678_v47  ;;  %v9942_v56 = vstv %s5864_s24  ;;  %v9945_v62 = vstv %s5898_s23  ;;  %v9947_v24 = vrot.slane %v6605_v43, 2  ;;  %s6688_s24 = sld [smem:[#allocation3 + $0x9d]]  ;;  %s6712_s23 = sld [smem:[#allocation3 + $0x9c]] }
 0x173   :  { %v2649_v34 = vadd.f32 %v2647_v38, %v2483_v35  ;;  %v1721_v28 = vadd.f32 %v1719_v30, %v1557_v51  ;;  %v9437_v38 = vrot.slane %v6613_v39, 1  ;;  %v6663_v23 = vmul.f32 %v9942_v56, %v4793_v60 }
 0x174   :  { %9938 = sst [smem:[#allocation135_spill]] %s6644_s1  ;;  %9941 = vst [vmem:[#allocation137_spill] sm:$0xff] %v6656_v32  ;;  %v6676_v45 = vmul.f32 %v9945_v62, %v4900_v20  ;;  %v2839_v39 = vmul.f32 %v9948_v19, %v5678_v47  ;;  %v9954_v62 = vrot.slane %v6637_v14, 2  ;;  %v9955_v43 = vstv %s6583_s3  ;;  %s6796_s3 = sld [smem:[#allocation3 + $0xa9]] }
 0x175   :  { %v2662_v35 = vadd.f32 %v9434_v46, %v2649_v34  ;;  %v1734_v30 = vadd.f32 %v9437_v38, %v1721_v28  ;;  %v9943_v34 = vstv %s6564_s7  ;;  %v9949_v28 = vstv %s6568_s6 }
 0x176   :  { %9939 = sst [smem:[#allocation136_spill]] %s6648_s14  ;;  %v6671_v46 = vmul.f32 %v9943_v34, %v5431_v58  ;;  %9946 = vst [vmem:[#allocation139_spill] sm:$0xff] %v6676_v45  ;;  %v6686_v38 = vmul.f32 %v9949_v28, %v5678_v47  ;;  %v9952_v34 = vstv %s5919_s12  ;;  %v9956_v19 = vstv %s6585_s20  ;;  %s6714_s12 = sld [smem:[#allocation3 + $0x9e]] }
 0x177   :  { %v2675_v56 = vadd.f32 %v9947_v24, %v2662_v35  ;;  %v6693_v51 = vmul.f32 %v9952_v34, %v4900_v20  ;;  %v1747_v49 = vadd.f32 %v9954_v62, %v1734_v30  ;;  %v1911_v24 = vmul.f32 %v9955_v43, %v5431_v58 }
 0x178   :  { %9944 = vst [vmem:[#allocation138_spill] sm:$0xff] %v6671_v46  ;;  %9950 = vst [vmem:[#allocation140_spill] sm:$0xff] %v6686_v38  ;;  %9951 = sst [smem:[#allocation141_spill]] %s6688_s24  ;;  %v6703_v35 = vmul.f32 %v9956_v19, %v5431_v58  ;;  %v9958_v28 = vstv %s5964_s19  ;;  %v9447_v34 = vrot.slane %v6656_v32, 1  ;;  %v9962_v43 = vstv %s5982_s17  ;;  %s6759_s19 = sld [smem:[#allocation3 + $0x9f]] }
 0x179   :  { %9953 = vst [vmem:[#allocation142_spill] sm:$0xff] %v6693_v51  ;;  %v6708_v13 = vmul.f32 %v9958_v28, %v4998_v53  ;;  %v2841_v36 = vadd.f32 %v2839_v39, %v2675_v56  ;;  %9960 = sst [smem:[#allocation145_spill]] %s6712_s23  ;;  %v6719_v30 = vmul.f32 %v9962_v43, %v4998_v53  ;;  %v9964_v62 = vstv %s6022_s10  ;;  %s6746_s10 = sld [smem:[#allocation3 + $0xa0]] }
 0x17a   :  { %9957 = vst [vmem:[#allocation143_spill] sm:$0xff] %v6703_v35  ;;  %v6724_v19 = vmul.f32 %v9964_v62, %v5139_v4  ;;  %v1913_v42 = vadd.f32 %v1911_v24, %v1747_v49  ;;  %v9448_v28 = vrot.slane %v6671_v46, 1  ;;  %v9449_v56 = vrot.slane %v6686_v38, 2  ;;  %s6761_s17 = sld [smem:[#allocation3 + $0xa1]] }
 0x17b   :  { %9959 = vst [vmem:[#allocation144_spill] sm:$0xff] %v6708_v13  ;;  %9963 = vst [vmem:[#allocation147_spill] sm:$0xff] %v6719_v30  ;;  %v2854_v39 = vadd.f32 %v9447_v34, %v2841_v36  ;;  %v9452_v14 = vstv %s6642_s30  ;;  %v9453_v0 = vstv %s6644_s1  ;;  %v9450_v62 = vrot.slane %v6703_v35, 2  ;;  %s9974_s30 = sld [smem:[#allocation69_spill]]  ;;  %s6798_s1 = sld [smem:[#allocation3 + $0xaa]] }
 0x17c   :  { %9961 = sst [smem:[#allocation146_spill]] %s6714_s12  ;;  %9965 = vst [vmem:[#allocation148_spill] sm:$0xff] %v6724_v19  ;;  %v1926_v43 = vadd.f32 %v9448_v28, %v1913_v42  ;;  %v9966_v49 = vstv %s6626_s29  ;;  %v6757_v36 = vmul.f32 %v9453_v0, %v5503_v37  ;;  %v9972_v42 = vstv %s6648_s14  ;;  %s6781_s14 = sld [smem:[#allocation3 + $0xa8]] }
 0x17d   :  { %v6739_v24 = vmul.f32 %v9966_v49, %v5503_v37  ;;  %v2867_v31 = vadd.f32 %v9449_v56, %v2854_v39  ;;  %v2103_v49 = vmul.f32 %v9452_v14, %v5503_v37  ;;  %v9975_v35 = vstv %s6048_s0  ;;  %s9981_s0 = sld [smem:[#allocation91_spill]]  ;;  %s6914_s29 = sld [smem:[#allocation3 + $0xb0]] }
 0x17e   :  { %v1939_v28 = vadd.f32 %v9450_v62, %v1926_v43  ;;  %9969 = vst [vmem:[#allocation151_spill] sm:$0xff] %v6757_v36  ;;  %9970 = sst [smem:[#allocation152_spill]] %s6759_s19  ;;  %v9461_v62 = vstv %s6688_s24  ;;  %v6776_v38 = vmul.f32 %v9975_v35, %v5139_v4  ;;  %v9470_v35 = vrot.slane %v6757_v36, 2  ;;  %s6816_s24 = sld [smem:[#allocation3 + $0xa4]] }
 0x17f   :  { %9967 = vst [vmem:[#allocation149_spill] sm:$0xff] %v6739_v24  ;;  %9968 = sst [smem:[#allocation150_spill]] %s6746_s10  ;;  %v6767_v43 = vadd.f32 %v9972_v42, %v2867_v31  ;;  %v9460_v0 = vrot.slane %v6739_v24, 1  ;;  %v9979_v42 = vstv %s6075_s22  ;;  %v9986_v31 = vstv %s6154_s5  ;;  %s6814_s22 = sld [smem:[#allocation3 + $0xa3]] }
 0x180   :  { %9971 = sst [smem:[#allocation153_spill]] %s6761_s17  ;;  %v2105_v32 = vadd.f32 %v2103_v49, %v1939_v28  ;;  %9976 = vst [vmem:[#allocation155_spill] sm:$0xff] %v6776_v38  ;;  %v6786_v14 = vmul.f32 %v9979_v42, %v5253_v16  ;;  %v6794_v49 = vmul.f32 %v9461_v62, %v5544_v29  ;;  %v9988_v56 = vstv %s9977_s11  ;;  %s6833_s5 = sld [smem:[#allocation3 + $0xa2]] }
 0x181   :  { %9973 = vst [vmem:[#allocation154_spill] sm:$0xff] %v6767_v43  ;;  %v9465_v39 = vrot.slane %v6767_v43, 1  ;;  %9983 = sst [smem:[#allocation83_spill]] %s6798_s1  ;;  %v9984_v34 = vstv %s9974_s30  ;;  %v9990_v24 = vstv %s6712_s23  ;;  %v9996_v13 = vstv %s6235_s9  ;;  %s6848_s11 = sld [smem:[#allocation3 + $0xac]] }
 0x182   :  { %9978 = sst [smem:[#allocation69_spill]] %s6781_s14  ;;  %9980 = vst [vmem:[#allocation156_spill] sm:$0xff] %v6786_v14  ;;  %v2118_v28 = vadd.f32 %v9460_v0, %v2105_v32  ;;  %9982 = vst [vmem:[#allocation157_spill] sm:$0xff] %v6794_v49  ;;  %v6803_v42 = vmul.f32 %v9984_v34, %v5253_v16  ;;  %v6808_v32 = vmul.f32 %v9986_v31, %v5360_v1  ;;  %v9998_v36 = vrot.slane %v6767_v43, 2  ;;  %s6853_s30 = sld [smem:[#allocation3 + $0xab]] }
 0x183   :  { %v3040_v0 = vmax.f32 %v6767_v43, %v9465_v39  ;;  %v6821_v34 = vmul.f32 %v9988_v56, %v5360_v1  ;;  %v2295_v46 = vmul.f32 %v9990_v24, %v5544_v29  ;;  %v9991_v39 = vstv %s6714_s12  ;;  %s6859_s9 = sld [smem:[#allocation3 + $0xad]]  ;;  %s6880_s23 = sld [smem:[#allocation3 + $0xa6]] }
 0x184   :  { %9985 = vst [vmem:[#allocation158_spill] sm:$0xff] %v6803_v42  ;;  %9987 = vst [vmem:[#allocation159_spill] sm:$0xff] %v6808_v32  ;;  %v2131_v31 = vadd.f32 %v9470_v35, %v2118_v28  ;;  %v6831_v19 = vmul.f32 %v9991_v39, %v5544_v29  ;;  %v9994_v62 = vstv %s9981_s0  ;;  %v6843_v56 = vmul.f32 %v9996_v13, %v5530_v57  ;;  %s10002_s0 = sld [smem:[#allocation75_spill]]  ;;  %s6912_s12 = sld [smem:[#allocation3 + $0xae]] }
 0x185   :  { %9989 = vst [vmem:[#allocation160_spill] sm:$0xff] %v6821_v34  ;;  %v6838_v30 = vmul.f32 %v9994_v62, %v5530_v57  ;;  %v3047_v28 = vmax.f32 %v3040_v0, %v9998_v36  ;;  %v9478_v35 = vstv %s6746_s10  ;;  %v9475_v39 = vrot.slane %v6794_v49, 1  ;;  %s6884_s10 = sld [smem:[#allocation3 + $0xa5]] }
 0x186   :  { %9992 = vst [vmem:[#allocation161_spill] sm:$0xff] %v6831_v19  ;;  %9993 = sst [smem:[#allocation91_spill]] %s6833_s5  ;;  %9997 = vst [vmem:[#allocation163_spill] sm:$0xff] %v6843_v56  ;;  %v2297_v24 = vadd.f32 %v2295_v46, %v2131_v31  ;;  %v9477_v51 = vstv %s6759_s19  ;;  %v9479_v45 = vstv %s6761_s17  ;;  %v9483_v13 = vrot.slane %v6831_v19, 2  ;;  %s6889_s19 = sld [smem:[#allocation3 + $0xaf]] }
 0x187   :  { %9995 = vst [vmem:[#allocation162_spill] sm:$0xff] %v6838_v30  ;;  %9999 = sst [smem:[#allocation164_spill]] %s6848_s11  ;;  %3049 = vst [vmem:[#allocation2 + $0x1b8] sm:$0xf] %v3047_v28  ;;  %v6868_v0 = vmul.f32 %v9478_v35, %v5584_v63  ;;  %v2487_v62 = vmul.f32 %v9477_v51, %v5584_v63  ;;  %v6878_v46 = vmul.f32 %v9479_v45, %v5584_v63  ;;  %v9487_v36 = vstv %s6796_s3  ;;  %s6898_s17 = sld [smem:[#allocation3 + $0xa7]] }
 0x188   :  { %10000 = sst [smem:[#allocation165_spill]] %s6853_s30  ;;  %v2310_v31 = vadd.f32 %v9475_v39, %v2297_v24  ;;  %v9496_v45 = vstv %s6848_s11  ;;  %v10013_v28 = vstv %s6814_s22  ;;  %v10015_v56 = vstv %s6816_s24  ;;  %s6971_s11 = sld [smem:[#allocation3 + $0xb1]] }
 0x189   :  { %10001 = sst [smem:[#allocation166_spill]] %s6859_s9  ;;  %10003 = vst [vmem:[#allocation167_spill] sm:$0xff] %v6868_v0  ;;  %10004 = vst [vmem:[#allocation168_spill] sm:$0xff] %v6878_v46  ;;  %v9491_v39 = vrot.slane %v6868_v0, 1  ;;  %v6927_v49 = vmul.f32 %v10013_v28, %v5626_v22  ;;  %v6932_v30 = vmul.f32 %v10015_v56, %v5626_v22  ;;  %v10019_v43 = vrot.slane %v6878_v46, 2 }
 0x18a   :  { %v2323_v24 = vadd.f32 %v9483_v13, %v2310_v31  ;;  %v10006_v51 = vstv %s10002_s0  ;;  %v6903_v31 = vmul.f32 %v9487_v36, %v5401_v33  ;;  %s10010_s0 = sld [smem:[#allocation81_spill]]  ;;  %v10012_v36 = vstv %s6781_s14  ;;  %s6955_s14 = sld [smem:[#allocation3 + $0xb2]] }
 0x18b   :  { %10005 = sst [smem:[#allocation75_spill]] %s6884_s10  ;;  %v6894_v35 = vmul.f32 %v10006_v51, %v4697_v54  ;;  %v10008_v51 = vstv %s6798_s1  ;;  %10014 = vst [vmem:[#allocation171_spill] sm:$0xff] %v6927_v49  ;;  %10016 = vst [vmem:[#allocation172_spill] sm:$0xff] %v6932_v30  ;;  %v10022_v28 = vstv %s6853_s30  ;;  %s6977_s30 = sld [smem:[#allocation3 + $0xc4]] }
 0x18c   :  { %10007 = vst [vmem:[#allocation169_spill] sm:$0xff] %v6903_v31  ;;  %v2489_v13 = vadd.f32 %v2487_v62, %v2323_v24  ;;  %v6910_v19 = vmul.f32 %v10008_v51, %v5401_v33  ;;  %10011 = sst [smem:[#allocation81_spill]] %s6912_s12  ;;  %v1561_v62 = vmul.f32 %v10012_v36, %v5401_v33  ;;  %v9494_v24 = vrot.slane %v6903_v31, 1  ;;  %s6973_s1 = sld [smem:[#allocation3 + $0xb3]] }
 0x18d   :  { %v1751_v34 = vmul.f32 %v10022_v28, %v5427_v61  ;;  %v10029_v28 = vstv %s6880_s23 }
 0x18e   :  { %10009 = vst [vmem:[#allocation170_spill] sm:$0xff] %v6910_v19  ;;  %v2502_v51 = vadd.f32 %v9491_v39, %v2489_v13  ;;  %v1574_v33 = vadd.f32 %v9494_v24, %v1561_v62  ;;  %v6941_v13 = vmul.f32 %v9496_v45, %v5427_v61  ;;  %v10020_v62 = vstv %s6833_s5  ;;  %s10026_s5 = sld [smem:[#allocation88_spill]] }
 0x18f   :  { %v2679_v24 = vmul.f32 %v10020_v62, %v5626_v22  ;;  %v10021_v45 = vrot.slane %v6910_v19, 2  ;;  %v10037_v62 = vstv %s6884_s10  ;;  %s7095_s10 = sld [smem:[#allocation3 + $0xb7]] }
 0x190   :  { %10017 = vst [vmem:[#allocation173_spill] sm:$0xff] %v6941_v13  ;;  %v10018_v0 = vstv %s10010_s0  ;;  %v2515_v31 = vadd.f32 %v10019_v43, %v2502_v51  ;;  %s10025_s0 = sld [smem:[#allocation84_spill]]  ;;  %v9503_v51 = vrot.slane %v6927_v49, 1  ;;  %v2871_v46 = vmul.f32 %v10037_v62, %v5678_v47 }
 0x191   :  { %v6948_v56 = vmul.f32 %v10018_v0, %v4697_v54  ;;  %v1587_v39 = vadd.f32 %v10021_v45, %v1574_v33  ;;  %v10023_v0 = vstv %s6859_s9  ;;  %10027 = sst [smem:[#allocation84_spill]] %s6971_s11  ;;  %s10035_s9 = sld [smem:[#allocation98_spill]]  ;;  %v10036_v45 = vrot.slane %v6932_v30, 2 }
 0x192   :  { %v6966_v32 = vmul.f32 %v10023_v0, %v5427_v61  ;;  %v2681_v43 = vadd.f32 %v2679_v24, %v2515_v31  ;;  %10028 = sst [smem:[#allocation88_spill]] %s6977_s30  ;;  %v9507_v31 = vrot.slane %v6941_v13, 1  ;;  %v6985_v0 = vmul.f32 %v10029_v28, %v5678_v47 }
 0x193   :  { %v1753_v61 = vadd.f32 %v1751_v34, %v1587_v39  ;;  %v10042_v30 = vstv %s6912_s12  ;;  %v10043_v62 = vstv %s6914_s29  ;;  %v9523_v14 = vstv %s6973_s1  ;;  %s7940_s12 = sld [smem:[#allocation3 + $0xce]] }
 0x194   :  { %10024 = vst [vmem:[#allocation174_spill] sm:$0xff] %v6966_v32  ;;  %v2694_v24 = vadd.f32 %v9503_v51, %v2681_v43  ;;  %10030 = vst [vmem:[#allocation175_spill] sm:$0xff] %v6985_v0  ;;  %v10032_v43 = vstv %s6889_s19  ;;  %v10034_v28 = vstv %s10026_s5  ;;  %s7043_s5 = sld [smem:[#allocation3 + $0xb6]] }
 0x195   :  { %v1766_v34 = vadd.f32 %v9507_v31, %v1753_v61  ;;  %v7000_v51 = vmul.f32 %v10032_v43, %v5431_v58  ;;  %v7005_v49 = vmul.f32 %v10034_v28, %v4793_v60  ;;  %v10038_v61 = vstv %s6898_s17 }
 0x196   :  { %v10031_v33 = vstv %s10025_s0  ;;  %v7015_v31 = vmul.f32 %v10038_v61, %v5678_v47  ;;  %s7017_s0 = sld [smem:[#allocation3 + $0xb5]]  ;;  %v10040_v43 = vstv %s6231_s16  ;;  %v10041_v28 = vrot.slane %v6966_v32, 2  ;;  %s7041_s16 = sld [smem:[#allocation3 + $0xb4]] }
 0x197   :  { %v6992_v36 = vmul.f32 %v10031_v33, %v4793_v60  ;;  %10033 = vst [vmem:[#allocation176_spill] sm:$0xff] %v7000_v51  ;;  %v2707_v33 = vadd.f32 %v10036_v45, %v2694_v24  ;;  %v7022_v39 = vmul.f32 %v10040_v43, %v4900_v20  ;;  %v1943_v45 = vmul.f32 %v10042_v30, %v5431_v58 }
 0x198   :  { %10039 = vst [vmem:[#allocation177_spill] sm:$0xff] %v7015_v31  ;;  %v1779_v13 = vadd.f32 %v10041_v28, %v1766_v34  ;;  %v7032_v24 = vmul.f32 %v10043_v62, %v5431_v58  ;;  %v10045_v61 = vstv %s6252_s28  ;;  %v9516_v43 = vrot.slane %v6985_v0, 1  ;;  %s7075_s28 = sld [smem:[#allocation3 + $0xb8]] }
 0x199   :  { %v7037_v19 = vmul.f32 %v10045_v61, %v4900_v20  ;;  %v2873_v42 = vadd.f32 %v2871_v46, %v2707_v33  ;;  %v10047_v30 = vstv %s10035_s9  ;;  %v10049_v58 = vstv %s6311_s4  ;;  %s10053_s4 = sld [smem:[#allocation27_spill]]  ;;  %s10057_s9 = sld [smem:[#allocation31_spill]] }
 0x19a   :  { %10044 = vst [vmem:[#allocation178_spill] sm:$0xff] %v7032_v24  ;;  %v7048_v34 = vmul.f32 %v10047_v30, %v4998_v53  ;;  %v7053_v28 = vmul.f32 %v10049_v58, %v4998_v53  ;;  %v1945_v62 = vadd.f32 %v1943_v45, %v1779_v13  ;;  %v9517_v61 = vrot.slane %v7000_v51, 1  ;;  %10058 = sst [smem:[#allocation27_spill]] %s7095_s10 }
 0x19b   :  { %v2886_v46 = vadd.f32 %v9516_v43, %v2873_v42  ;;  %v9518_v33 = vrot.slane %v7015_v31, 2  ;;  %v9521_v32 = vstv %s6971_s11  ;;  %v9522_v58 = vrot.slane %v7032_v24, 2  ;;  %s7097_s11 = sld [smem:[#allocation3 + $0xb9]] }
 0x19c   :  { %10046 = sst [smem:[#allocation98_spill]] %s7041_s16  ;;  %10048 = vst [vmem:[#allocation179_spill] sm:$0xff] %v7048_v34  ;;  %10050 = vst [vmem:[#allocation180_spill] sm:$0xff] %v7053_v28  ;;  %v1958_v30 = vadd.f32 %v9517_v61, %v1945_v62  ;;  %v10051_v13 = vstv %s6955_s14  ;;  %v2135_v61 = vmul.f32 %v9521_v32, %v5503_v37  ;;  %v7086_v43 = vmul.f32 %v9523_v14, %v5503_v37 }
 0x19d   :  { %v7068_v45 = vmul.f32 %v10051_v13, %v5503_v37  ;;  %v2899_v38 = vadd.f32 %v9518_v33, %v2886_v46  ;;  %v10055_v42 = vstv %s6977_s30  ;;  %v10059_v37 = vstv %s6355_s2  ;;  %s7141_s2 = sld [smem:[#allocation3 + $0xbb]]  ;;  %s7930_s30 = sld [smem:[#allocation3 + $0x10c]] }
 0x19e   :  { %v1971_v13 = vadd.f32 %v9522_v58, %v1958_v30  ;;  %10054 = vst [vmem:[#allocation182_spill] sm:$0xff] %v7086_v43  ;;  %v7103_v32 = vmul.f32 %v10059_v37, %v5139_v4  ;;  %v10060_v46 = vstv %s6381_s8  ;;  %v10065_v0 = vstv %s6487_s26  ;;  %s7167_s26 = sld [smem:[#allocation3 + $0xba]]  ;;  %s7169_s8 = sld [smem:[#allocation3 + $0xbc]] }
 0x19f   :  { %10052 = vst [vmem:[#allocation181_spill] sm:$0xff] %v7068_v45  ;;  %v7092_v62 = vadd.f32 %v10055_v42, %v2899_v38  ;;  %v9527_v33 = vrot.slane %v7068_v45, 1  ;;  %v7109_v38 = vmul.f32 %v10060_v46, %v5139_v4  ;;  %v10061_v30 = vstv %s10053_s4  ;;  %s7231_s4 = sld [smem:[#allocation3 + $0xbf]] }
 0x1a0   :  { %v2137_v58 = vadd.f32 %v2135_v61, %v1971_v13  ;;  %v7117_v31 = vmul.f32 %v10061_v30, %v5253_v16  ;;  %v9531_v13 = vrot.slane %v7086_v43, 2  ;;  %v10062_v46 = vstv %s7017_s0 }
 0x1a1   :  { %10056 = vst [vmem:[#allocation183_spill] sm:$0xff] %v7092_v62  ;;  %v7125_v37 = vmul.f32 %v10062_v46, %v5544_v29  ;;  %v10064_v42 = vstv %s10057_s9  ;;  %v7135_v14 = vmul.f32 %v10065_v0, %v5360_v1  ;;  %v10067_v30 = vrot.slane %v7092_v62, 1  ;;  %s10112_s9 = sld [smem:[#allocation141_spill]] }
 0x1a2   :  { %v2150_v61 = vadd.f32 %v9527_v33, %v2137_v58  ;;  %v7130_v24 = vmul.f32 %v10064_v42, %v5253_v16  ;;  %v10068_v42 = vstv %s7041_s16  ;;  %v10069_v0 = vstv %s7043_s5  ;;  %s7938_s16 = sld [smem:[#allocation3 + $0xc8]] }
 0x1a3   :  { %10063 = vst [vmem:[#allocation184_spill] sm:$0xff] %v7125_v37  ;;  %10066 = vst [vmem:[#allocation185_spill] sm:$0xff] %v7135_v14  ;;  %v3072_v45 = vmax.f32 %v7092_v62, %v10067_v30  ;;  %v2327_v51 = vmul.f32 %v10068_v42, %v5544_v29  ;;  %v7152_v28 = vmul.f32 %v10069_v0, %v5544_v29  ;;  %v10071_v30 = vstv %s6504_s27  ;;  %s10077_s27 = sld [smem:[#allocation6_spill]] }
 0x1a4   :  { %v2163_v46 = vadd.f32 %v9531_v13, %v2150_v61  ;;  %v7157_v58 = vmul.f32 %v10071_v30, %v5360_v1  ;;  %v10073_v34 = vstv %s6548_s13  ;;  %v10075_v61 = vrot.slane %v7092_v62, 2  ;;  %10076 = sst [smem:[#allocation31_spill]] %s7167_s26  ;;  %s7193_s13 = sld [smem:[#allocation3 + $0xbe]] }
 0x1a5   :  { %10070 = vst [vmem:[#allocation186_spill] sm:$0xff] %v7152_v28  ;;  %v7162_v33 = vmul.f32 %v10073_v34, %v5530_v57  ;;  %v9536_v30 = vrot.slane %v7125_v37, 1  ;;  %v10078_v29 = vstv %s6568_s6  ;;  %v10079_v34 = vstv %s7075_s28  ;;  %s10086_s6 = sld [smem:[#allocation7_spill]] }
 0x1a6   :  { %10072 = vst [vmem:[#allocation187_spill] sm:$0xff] %v7157_v58  ;;  %v3079_v13 = vmax.f32 %v3072_v45, %v10075_v61  ;;  %v2329_v0 = vadd.f32 %v2327_v51, %v2163_v46  ;;  %v7181_v62 = vmul.f32 %v10078_v29, %v5530_v57  ;;  %v9539_v46 = vrot.slane %v7152_v28, 2 }
 0x1a7   :  { %10074 = vst [vmem:[#allocation188_spill] sm:$0xff] %v7162_v33  ;;  %v7189_v42 = vmul.f32 %v10079_v34, %v5584_v63  ;;  %v10082_v29 = vrot.slane %v5436_v40, 1  ;;  %v10083_v37 = vrot.slane %v5858_v6, 1  ;;  %v10089_v6 = vstv %s6469_s25  ;;  %s10095_s25 = sld [smem:[#allocation132_spill]] }
 0x1a8   :  { %3081 = vst [vmem:[#allocation2 + $0x1c8] sm:$0xf] %v3079_v13  ;;  %v2342_v51 = vadd.f32 %v9536_v30, %v2329_v0  ;;  %v10084_v30 = vstv %s6452_s15  ;;  %v10085_v13 = vstv %s7095_s10  ;;  %v7221_v58 = vmul.f32 %v10089_v6, %v4697_v54  ;;  %s7229_s15 = sld [smem:[#allocation3 + $0xbd]] }
 0x1a9   :  { %10080 = vst [vmem:[#allocation189_spill] sm:$0xff] %v7189_v42  ;;  %v10081_v43 = vstv %s10077_s27  ;;  %v1420_v0 = vsel %vm55_vm0, %v10083_v37, %v10082_v29  ;;  %v7206_v34 = vmul.f32 %v10084_v30, %v4697_v54  ;;  %v2519_v33 = vmul.f32 %v10085_v13, %v5584_v63  ;;  %s10114_s27 = sld [smem:[#allocation146_spill]]  ;;  %s7932_s10 = sld [smem:[#allocation3 + $0x10d]] }
 0x1aa   :  { %v1410_v61 = vmul.f32 %v10081_v43, %v4697_v54  ;;  %v2355_v45 = vadd.f32 %v9539_v46, %v2342_v51  ;;  %v10087_v43 = vstv %s7097_s11  ;;  %v10090_v37 = vstv %s6515_s21  ;;  %s10099_s21 = sld [smem:[#allocation8_spill]] }
 0x1ab   :  { %v7216_v40 = vmul.f32 %v10087_v43, %v5584_v63  ;;  %v7226_v29 = vmul.f32 %v10090_v37, %v4793_v60  ;;  %v9542_v43 = vrot.slane %v7189_v42, 1  ;;  %v10092_v6 = vrot.slane %v5441_v50, 2  ;;  %v10237_v42 = vld [vmem:[#allocation44_spill] sm:$0xff] }
 0x1ac   :  { %v1423_v51 = vadd.f32 %v1420_v0, %v1410_v61  ;;  %v2521_v63 = vadd.f32 %v2519_v33, %v2355_v45  ;;  %v10093_v46 = vrot.slane %v5869_v10, 2  ;;  %v9543_v30 = vstv %s7167_s26  ;;  %s10428_s26 = sld [smem:[#allocation34_spill]] }
 0x1ad   :  { %10088 = vst [vmem:[#allocation190_spill] sm:$0xff] %v7216_v40  ;;  %v9545_v28 = vstv %s7169_s8  ;;  %v10094_v61 = vstv %s10086_s6  ;;  %v9544_v10 = vrot.slane %v7216_v40, 2  ;;  %v10096_v45 = vstv %s7141_s2  ;;  %s10116_s6 = sld [smem:[#allocation9_spill]] }
 0x1ae   :  { %10091 = sst [smem:[#allocation6_spill]] %s7229_s15  ;;  %v1433_v37 = vsel %vm97_vm1, %v10093_v46, %v10092_v6  ;;  %v1590_v0 = vmul.f32 %v10094_v61, %v4793_v60  ;;  %v2534_v50 = vadd.f32 %v9542_v43, %v2521_v63  ;;  %v7252_v46 = vmul.f32 %v10096_v45, %v5626_v22 }
 0x1af   :  { %v1436_v14 = vadd.f32 %v1433_v37, %v1423_v51  ;;  %v10098_v37 = vstv %s6522_s18  ;;  %v2711_v43 = vmul.f32 %v9543_v30, %v5626_v22  ;;  %v7269_v45 = vmul.f32 %v9545_v28, %v5626_v22  ;;  %s10106_s18 = sld [smem:[#allocation135_spill]] }
 0x1b0   :  { %10097 = vst [vmem:[#allocation191_spill] sm:$0xff] %v7252_v46  ;;  %v7259_v61 = vmul.f32 %v10098_v37, %v4793_v60  ;;  %v2547_v63 = vadd.f32 %v9544_v10, %v2534_v50  ;;  %v10101_v6 = vrot.slane %v5475_v59, 1  ;;  %v10102_v51 = vrot.slane %v5952_v2, 1 }
 0x1b1   :  { %v1592_v13 = vadd.f32 %v1590_v0, %v1436_v14  ;;  %10100 = vst [vmem:[#allocation192_spill] sm:$0xff] %v7269_v45  ;;  %v10103_v37 = vstv %s6564_s7  ;;  %v10104_v0 = vstv %s6585_s20  ;;  %v9548_v30 = vstv %s7193_s13  ;;  %s7300_s7 = sld [smem:[#allocation3 + $0xc5]]  ;;  %s10111_s20 = sld [smem:[#allocation15_spill]] }
 0x1b2   :  { %v1602_v33 = vsel %vm55_vm0, %v10102_v51, %v10101_v6  ;;  %v7279_v14 = vmul.f32 %v10103_v37, %v4900_v20  ;;  %v7284_v50 = vmul.f32 %v10104_v0, %v4900_v20  ;;  %v10105_v22 = vstv %s10095_s25  ;;  %s10124_s25 = sld [smem:[#allocation18_spill]] }
 0x1b3   :  { %v1605_v10 = vadd.f32 %v1602_v33, %v1592_v13  ;;  %v7290_v28 = vmul.f32 %v10105_v22, %v4998_v53  ;;  %v2713_v59 = vadd.f32 %v2711_v43, %v2547_v63  ;;  %v9547_v2 = vrot.slane %v7252_v46, 1 }
 0x1b4   :  { %v10107_v6 = vrot.slane %v5482_v52, 2  ;;  %v10108_v51 = vrot.slane %v5957_v7, 2  ;;  %v9550_v0 = vstv %s7229_s15  ;;  %v9551_v40 = vstv %s7231_s4  ;;  %s7924_s15 = sld [smem:[#allocation3 + $0x10b]] }
 0x1b5   :  { %v10110_v33 = vstv %s10099_s21  ;;  %v2726_v52 = vadd.f32 %v9547_v2, %v2713_v59  ;;  %v9549_v7 = vrot.slane %v7269_v45, 2  ;;  %v7312_v63 = vmul.f32 %v9548_v30, %v5678_v47  ;;  %s10125_s21 = sld [smem:[#allocation150_spill]] }
 0x1b6   :  { %v1615_v37 = vsel %vm97_vm1, %v10108_v51, %v10107_v6  ;;  %v1782_v22 = vmul.f32 %v10110_v33, %v4900_v20  ;;  %v10115_v51 = vstv %s10106_s18  ;;  %v2903_v2 = vmul.f32 %v9550_v0, %v5678_v47  ;;  %s10126_s18 = sld [smem:[#allocation153_spill]] }
 0x1b7   :  { %10109 = sst [smem:[#allocation7_spill]] %s7300_s7  ;;  %v1618_v13 = vadd.f32 %v1615_v37, %v1605_v10  ;;  %10113 = vst [vmem:[#allocation193_spill] sm:$0xff] %v7312_v63  ;;  %v7319_v37 = vmul.f32 %v10115_v51, %v4998_v53  ;;  %v2739_v59 = vadd.f32 %v9549_v7, %v2726_v52  ;;  %v7329_v43 = vmul.f32 %v9551_v40, %v5678_v47 }
 0x1b8   :  { %v10118_v6 = vrot.slane %v5498_v48, 1  ;;  %v10119_v10 = vrot.slane %v6010_v44, 1  ;;  %v10121_v7 = vrot.slane %v5656_v27, 1  ;;  %v10122_v0 = vrot.slane %v6187_v18, 1 }
 0x1b9   :  { %v1784_v33 = vadd.f32 %v1782_v22, %v1618_v13  ;;  %10117 = vst [vmem:[#allocation194_spill] sm:$0xff] %v7329_v43  ;;  %v10120_v22 = vstv %s10111_s20  ;;  %v10123_v40 = vstv %s10112_s9  ;;  %v2905_v44 = vadd.f32 %v2903_v2, %v2739_v59  ;;  %s10134_s20 = sld [smem:[#allocation10_spill]]  ;;  %s10140_s9 = sld [smem:[#allocation24_spill]] }
 0x1ba   :  { %v1794_v30 = vsel %vm55_vm0, %v10119_v10, %v10118_v6  ;;  %v1440_v52 = vmul.f32 %v10120_v22, %v4697_v54  ;;  %v1450_v47 = vsel %vm55_vm0, %v10122_v0, %v10121_v7  ;;  %v7348_v48 = vmul.f32 %v10123_v40, %v5139_v4 }
 0x1bb   :  { %v1797_v13 = vadd.f32 %v1794_v30, %v1784_v33  ;;  %v9552_v6 = vrot.slane %v7312_v63, 1  ;;  %v10127_v30 = vrot.slane %v5516_v8, 2  ;;  %v10128_v10 = vrot.slane %v6027_v17, 2 }
 0x1bc   :  { %v10129_v18 = vstv %s10114_s27  ;;  %v10130_v7 = vstv %s10116_s6  ;;  %v1453_v22 = vadd.f32 %v1450_v47, %v1440_v52  ;;  %v9554_v8 = vrot.slane %v7329_v43, 2  ;;  %s10174_s27 = sld [smem:[#allocation164_spill]]  ;;  %s10187_s6 = sld [smem:[#allocation48_spill]] }
 0x1bd   :  { %v1807_v27 = vsel %vm97_vm1, %v10128_v10, %v10127_v30  ;;  %v7359_v33 = vmul.f32 %v10129_v18, %v5139_v4  ;;  %v1974_v40 = vmul.f32 %v10130_v7, %v4998_v53  ;;  %v2918_v59 = vadd.f32 %v9552_v6, %v2905_v44  ;;  %10427 = sst [smem:[#allocation48_spill]] %s7924_s15  ;;  %s8053_s15 = sld [smem:[#allocation3 + $0xff]] }
 0x1be   :  { %v1810_v0 = vadd.f32 %v1807_v27, %v1797_v13  ;;  %v10131_v17 = vrot.slane %v5661_v25, 2  ;;  %v10132_v30 = vrot.slane %v6212_v26, 2  ;;  %v9553_v13 = vstv %s7300_s7  ;;  %s7922_s7 = sld [smem:[#allocation3 + $0xfb]] }
 0x1bf   :  { %v10133_v52 = vstv %s10124_s25  ;;  %v10135_v7 = vstv %s10125_s21  ;;  %v10136_v6 = vstv %s10126_s18  ;;  %v2931_v25 = vadd.f32 %v9554_v8, %v2918_v59  ;;  %s10189_s25 = sld [smem:[#allocation14_spill]]  ;;  %s10200_s21 = sld [smem:[#allocation36_spill]] }
 0x1c0   :  { %v1463_v10 = vsel %vm97_vm1, %v10132_v30, %v10131_v17  ;;  %v1976_v27 = vadd.f32 %v1974_v40, %v1810_v0  ;;  %v1622_v47 = vmul.f32 %v10133_v52, %v4793_v60  ;;  %v7380_v44 = vmul.f32 %v10135_v7, %v5253_v16  ;;  %v10168_v17 = vld [vmem:[#allocation72_spill] sm:$0xff]  ;;  %s10232_s18 = sld [smem:[#allocation43_spill]]  ;;  %10429 = sst [smem:[#allocation14_spill]] %s7930_s30 }
 0x1c1   :  { %v1466_v18 = vadd.f32 %v1463_v10, %v1453_v22  ;;  %v7385_v2 = vmul.f32 %v10136_v6, %v5253_v16  ;;  %v10137_v26 = vrot.slane %v5540_v3, 1  ;;  %v10138_v0 = vrot.slane %v6042_v41, 1  ;;  %10430 = sst [smem:[#allocation36_spill]] %s7932_s10  ;;  %s8042_s10 = sld [smem:[#allocation3 + $0xed]] }
 0x1c2   :  { %v10139_v52 = vstv %s6814_s22  ;;  %v7403_v59 = vadd.f32 %v9553_v13, %v2931_v25  ;;  %v10142_v3 = vrot.slane %v5556_v12, 2  ;;  %v10143_v41 = vrot.slane %v6053_v9, 2  ;;  %s10165_s22 = sld [smem:[#allocation30_spill]]  ;;  %s10471_s30 = sld [smem:[#allocation125_spill]] }
 0x1c3   :  { %v1986_v40 = vsel %vm55_vm0, %v10138_v0, %v10137_v26  ;;  %v1624_v10 = vadd.f32 %v1622_v47, %v1466_v18  ;;  %v7399_v6 = vmul.f32 %v10139_v52, %v5360_v1  ;;  %v10144_v26 = vrot.slane %v5703_v5, 1 }
 0x1c4   :  { %v1989_v30 = vadd.f32 %v1986_v40, %v1976_v27  ;;  %10141 = vst [vmem:[#allocation195_spill] sm:$0xff] %v7403_v59  ;;  %v1999_v7 = vsel %vm97_vm1, %v10143_v41, %v10142_v3  ;;  %v10145_v27 = vrot.slane %v6286_v15, 1  ;;  %v10146_v47 = vstv %s6816_s24  ;;  %v10150_v3 = vld [vmem:[#allocation101_spill] sm:$0xff]  ;;  %s10155_s24 = sld [smem:[#allocation11_spill]] }
 0x1c5   :  { %v7418_v0 = vmul.f32 %v10146_v47, %v5360_v1  ;;  %v10148_v25 = vstv %s10134_s20  ;;  %v9555_v5 = vrot.slane %v7403_v59, 1  ;;  %v10149_v15 = vrot.slane %v5720_v21, 2  ;;  %s10244_s20 = sld [smem:[#allocation78_spill]] }
 0x1c6   :  { %v1634_v18 = vsel %vm55_vm0, %v10145_v27, %v10144_v26  ;;  %v2002_v40 = vadd.f32 %v1999_v7, %v1989_v30  ;;  %v2166_v52 = vmul.f32 %v10148_v25, %v5139_v4  ;;  %v10151_v41 = vrot.slane %v10150_v3, 2  ;;  %v10158_v3 = vld [vmem:[#allocation12_spill] sm:$0xff] }
 0x1c7   :  { %10147 = vst [vmem:[#allocation196_spill] sm:$0xff] %v7418_v0  ;;  %v1637_v13 = vadd.f32 %v1634_v18, %v1624_v10  ;;  %v10152_v27 = vstv %s6880_s23  ;;  %v10154_v10 = vstv %s10140_s9  ;;  %v10156_v25 = vstv %s6898_s17  ;;  %s10162_s23 = sld [smem:[#allocation45_spill]]  ;;  %s10163_s17 = sld [smem:[#allocation83_spill]] }
 0x1c8   :  { %v1647_v26 = vsel %vm97_vm1, %v10151_v41, %v10149_v15  ;;  %v7434_v30 = vmul.f32 %v10152_v27, %v5530_v57  ;;  %v2168_v7 = vadd.f32 %v2166_v52, %v2002_v40  ;;  %v1814_v18 = vmul.f32 %v10154_v10, %v4900_v20  ;;  %v10160_v27 = vld [vmem:[#allocation66_spill] sm:$0xff]  ;;  %v10170_v40 = vld [vmem:[#allocation33_spill] sm:$0xff]  ;;  %s10250_s9 = sld [smem:[#allocation59_spill]] }
 0x1c9   :  { %v1650_v47 = vadd.f32 %v1647_v26, %v1637_v13  ;;  %v7442_v8 = vmul.f32 %v10156_v25, %v5530_v57  ;;  %v3104_v21 = vmax.f32 %v7403_v59, %v9555_v5  ;;  %v9556_v15 = vrot.slane %v7403_v59, 2  ;;  %v10166_v5 = vld [vmem:[#allocation13_spill] sm:$0xff]  ;;  %v10172_v52 = vld [vmem:[#allocation103_spill] sm:$0xff]  ;;  %10468 = sst [smem:[#allocation59_spill]] %s8042_s10  ;;  %s8282_s10 = sld [smem:[#allocation3 + $0x104]] }
 0x1ca   :  { %10153 = vst [vmem:[#allocation101_spill] sm:$0xff] %v7434_v30  ;;  %v10159_v41 = vrot.slane %v10158_v3, 1  ;;  %v10161_v9 = vrot.slane %v10160_v27, 1  ;;  %v10164_v25 = vstv %s6796_s3  ;;  %v10167_v27 = vrot.slane %v10166_v5, 2  ;;  %s10176_s3 = sld [smem:[#allocation166_spill]] }
 0x1cb   :  { %10157 = vst [vmem:[#allocation197_spill] sm:$0xff] %v7442_v8  ;;  %v1816_v10 = vadd.f32 %v1814_v18, %v1650_v47  ;;  %v7458_v12 = vmul.f32 %v10164_v25, %v4697_v54  ;;  %v3111_v3 = vmax.f32 %v3104_v21, %v9556_v15  ;;  %v10171_v22 = vrot.slane %v10170_v40, 1  ;;  %10426 = sst [smem:[#allocation166_spill]] %s7922_s7  ;;  %s8044_s7 = sld [smem:[#allocation3 + $0xee]] }
 0x1cc   :  { %v2178_v13 = vsel %vm55_vm0, %v10161_v9, %v10159_v41  ;;  %v10169_v9 = vrot.slane %v10168_v17, 2  ;;  %v10173_v51 = vrot.slane %v10172_v52, 1  ;;  %v10177_v17 = vld [vmem:[#allocation35_spill] sm:$0xff]  ;;  %v10199_v43 = vrot.slane %v6554_v11, 2 }
 0x1cd   :  { %v2181_v26 = vadd.f32 %v2178_v13, %v2168_v7  ;;  %v10175_v13 = vstv %s10155_s24  ;;  %3113 = vst [vmem:[#allocation2 + $0x1d8] sm:$0xf] %v3111_v3  ;;  %v10181_v15 = vstv %s10162_s23  ;;  %v10210_v11 = vstv %s6889_s19  ;;  %s10219_s19 = sld [smem:[#allocation54_spill]]  ;;  %s10293_s24 = sld [smem:[#allocation65_spill]] }
 0x1ce   :  { %v2191_v41 = vsel %vm97_vm1, %v10169_v9, %v10167_v27  ;;  %v1826_v7 = vsel %vm55_vm0, %v10173_v51, %v10171_v22  ;;  %v2358_v21 = vmul.f32 %v10175_v13, %v5253_v16  ;;  %v10178_v27 = vrot.slane %v10177_v17, 2  ;;  %v10179_v9 = vld [vmem:[#allocation105_spill] sm:$0xff]  ;;  %s10296_s23 = sld [smem:[#allocation51_spill]]  ;;  %10431 = sst [smem:[#allocation54_spill]] %s7938_s16 }
 0x1cf   :  { %v2194_v18 = vadd.f32 %v2191_v41, %v2181_v26  ;;  %v1829_v25 = vadd.f32 %v1826_v7, %v1816_v10  ;;  %v10180_v40 = vrot.slane %v10179_v9, 2  ;;  %v1470_v51 = vmul.f32 %v10181_v15, %v4697_v54  ;;  %v10182_v22 = vld [vmem:[#allocation52_spill] sm:$0xff]  ;;  %v10184_v26 = vld [vmem:[#allocation123_spill] sm:$0xff]  ;;  %s8048_s16 = sld [smem:[#allocation3 + $0xef]] }
 0x1d0   :  { %v10183_v47 = vrot.slane %v10182_v22, 1  ;;  %v10185_v41 = vrot.slane %v10184_v26, 1  ;;  %v10186_v10 = vstv %s10163_s17  ;;  %v10188_v17 = vstv %s10165_s22  ;;  %v10191_v22 = vld [vmem:[#allocation17_spill] sm:$0xff]  ;;  %v10193_v26 = vld [vmem:[#allocation73_spill] sm:$0xff]  ;;  %s10326_s17 = sld [smem:[#allocation71_spill]]  ;;  %s10346_s22 = sld [smem:[#allocation60_spill]] }
 0x1d1   :  { %v1839_v52 = vsel %vm97_vm1, %v10180_v40, %v10178_v27  ;;  %v7493_v7 = vmul.f32 %v10186_v10, %v4697_v54  ;;  %v2360_v3 = vadd.f32 %v2358_v21, %v2194_v18  ;;  %v2006_v27 = vmul.f32 %v10188_v17, %v4998_v53  ;;  %v10197_v17 = vld [vmem:[#allocation53_spill] sm:$0xff] }
 0x1d2   :  { %v1480_v59 = vsel %vm55_vm0, %v10185_v41, %v10183_v47  ;;  %v1842_v13 = vadd.f32 %v1839_v52, %v1829_v25  ;;  %v10190_v9 = vstv %s10174_s27  ;;  %v10192_v47 = vrot.slane %v10191_v22, 1  ;;  %v10201_v22 = vld [vmem:[#allocation20_spill] sm:$0xff]  ;;  %s10350_s27 = sld [smem:[#allocation86_spill]] }
 0x1d3   :  { %v7502_v40 = vmul.f32 %v10190_v9, %v4793_v60  ;;  %v10194_v41 = vrot.slane %v10193_v26, 1  ;;  %v1483_v5 = vadd.f32 %v1480_v59, %v1470_v51  ;;  %v10195_v18 = vstv %s10176_s3  ;;  %v10203_v26 = vld [vmem:[#allocation74_spill] sm:$0xff]  ;;  %v10205_v59 = vld [vmem:[#allocation38_spill] sm:$0xff]  ;;  %s10358_s3 = sld [smem:[#allocation37_spill]] }
 0x1d4   :  { %v7512_v21 = vmul.f32 %v10195_v18, %v4793_v60  ;;  %v2008_v52 = vadd.f32 %v2006_v27, %v1842_v13  ;;  %v10198_v15 = vrot.slane %v10197_v17, 2  ;;  %v10202_v63 = vrot.slane %v10201_v22, 2 }
 0x1d5   :  { %v2370_v10 = vsel %vm55_vm0, %v10194_v41, %v10192_v47  ;;  %v10204_v45 = vrot.slane %v10203_v26, 2  ;;  %v10206_v51 = vrot.slane %v10205_v59, 1  ;;  %v10207_v41 = vld [vmem:[#allocation107_spill] sm:$0xff]  ;;  %v10209_v27 = vstv %s10187_s6  ;;  %s7782_s6 = sld [smem:[#allocation3 + $0xc6]] }
 0x1d6   :  { %10196 = vst [vmem:[#allocation12_spill] sm:$0xff] %v7512_v21  ;;  %v2373_v25 = vadd.f32 %v2370_v10, %v2360_v3  ;;  %v1493_v9 = vsel %vm97_vm1, %v10199_v43, %v10198_v15  ;;  %v10208_v18 = vrot.slane %v10207_v41, 1  ;;  %v1654_v10 = vmul.f32 %v10209_v27, %v4793_v60 }
 0x1d7   :  { %v2383_v47 = vsel %vm97_vm1, %v10204_v45, %v10202_v63  ;;  %v1496_v13 = vadd.f32 %v1493_v9, %v1483_v5  ;;  %v7535_v17 = vmul.f32 %v10210_v11, %v4900_v20  ;;  %v10212_v15 = vstv %s10189_s25  ;;  %v10217_v9 = vld [vmem:[#allocation108_spill] sm:$0xff]  ;;  %s7784_s25 = sld [smem:[#allocation3 + $0xcc]] }
 0x1d8   :  { %v2018_v3 = vsel %vm55_vm0, %v10208_v18, %v10206_v51  ;;  %v2386_v43 = vadd.f32 %v2383_v47, %v2373_v25  ;;  %v2550_v22 = vmul.f32 %v10212_v15, %v5360_v1  ;;  %v10213_v63 = vstv %s6914_s29  ;;  %v10215_v51 = vld [vmem:[#allocation41_spill] sm:$0xff]  ;;  %s10224_s29 = sld [smem:[#allocation21_spill]] }
 0x1d9   :  { %10211 = vst [vmem:[#allocation66_spill] sm:$0xff] %v7535_v17  ;;  %v2021_v26 = vadd.f32 %v2018_v3, %v2008_v52  ;;  %v7544_v59 = vmul.f32 %v10213_v63, %v4900_v20  ;;  %v10216_v5 = vrot.slane %v10215_v51, 2  ;;  %v10218_v41 = vrot.slane %v10217_v9, 2  ;;  %v10221_v52 = vld [vmem:[#allocation57_spill] sm:$0xff] }
 0x1da   :  { %v1656_v27 = vadd.f32 %v1654_v10, %v1496_v13  ;;  %v2552_v11 = vadd.f32 %v2550_v22, %v2386_v43  ;;  %v10220_v47 = vstv %s10200_s21  ;;  %v10222_v3 = vrot.slane %v10221_v52, 1  ;;  %v10227_v10 = vld [vmem:[#allocation76_spill] sm:$0xff]  ;;  %v10233_v9 = vld [vmem:[#allocation26_spill] sm:$0xff]  ;;  %s7786_s21 = sld [smem:[#allocation3 + $0xd2]] }
 0x1db   :  { %10214 = vst [vmem:[#allocation13_spill] sm:$0xff] %v7544_v59  ;;  %v2031_v18 = vsel %vm97_vm1, %v10218_v41, %v10216_v5  ;;  %v2198_v15 = vmul.f32 %v10220_v47, %v5139_v4  ;;  %v10223_v45 = vrot.slane %v6619_v55, 1  ;;  %v10225_v5 = vld [vmem:[#allocation23_spill] sm:$0xff]  ;;  %v10228_v43 = vrot.slane %v10227_v10, 1  ;;  %v10229_v47 = vld [vmem:[#allocation58_spill] sm:$0xff] }
 0x1dc   :  { %v2034_v25 = vadd.f32 %v2031_v18, %v2021_v26  ;;  %v10226_v13 = vrot.slane %v10225_v5, 1  ;;  %v10230_v52 = vrot.slane %v10229_v47, 2  ;;  %v10234_v51 = vrot.slane %v10233_v9, 2  ;;  %v10235_v5 = vld [vmem:[#allocation79_spill] sm:$0xff] }
 0x1dd   :  { %v1666_v63 = vsel %vm55_vm0, %v10223_v45, %v10222_v3  ;;  %v10231_v45 = vrot.slane %v6663_v23, 2  ;;  %v10236_v46 = vrot.slane %v10235_v5, 2  ;;  %v10248_v5 = vld [vmem:[#allocation113_spill] sm:$0xff]  ;;  %v10256_v41 = vstv %s7017_s0  ;;  %s10276_s0 = sld [smem:[#allocation87_spill]] }
 0x1de   :  { %v2562_v22 = vsel %vm55_vm0, %v10228_v43, %v10226_v13  ;;  %v1669_v26 = vadd.f32 %v1666_v63, %v1656_v27  ;;  %v2200_v55 = vadd.f32 %v2198_v15, %v2034_v25  ;;  %v10238_v13 = vrot.slane %v10237_v42, 1  ;;  %v10239_v27 = vld [vmem:[#allocation109_spill] sm:$0xff]  ;;  %10472 = sst [smem:[#allocation87_spill]] %s8053_s15 }
 0x1df   :  { %v2565_v18 = vadd.f32 %v2562_v22, %v2552_v11  ;;  %v1679_v3 = vsel %vm97_vm1, %v10231_v45, %v10230_v52  ;;  %v2575_v10 = vsel %vm97_vm1, %v10236_v46, %v10234_v51  ;;  %v10240_v63 = vrot.slane %v10239_v27, 1 }
 0x1e0   :  { %v1682_v25 = vadd.f32 %v1679_v3, %v1669_v26  ;;  %v10241_v15 = vstv %s10219_s19  ;;  %v10242_v9 = vstv %s10224_s29  ;;  %v10243_v46 = vstv %s6955_s14  ;;  %v10246_v26 = vld [vmem:[#allocation46_spill] sm:$0xff]  ;;  %s10266_s14 = sld [smem:[#allocation28_spill]]  ;;  %s10376_s19 = sld [smem:[#allocation25_spill]] }
 0x1e1   :  { %v2210_v11 = vsel %vm55_vm0, %v10240_v63, %v10238_v13  ;;  %v1846_v23 = vmul.f32 %v10241_v15, %v4900_v20  ;;  %v2578_v22 = vadd.f32 %v2575_v10, %v2565_v18  ;;  %v2742_v47 = vmul.f32 %v10242_v9, %v5530_v57  ;;  %v10252_v15 = vld [vmem:[#allocation62_spill] sm:$0xff]  ;;  %s7822_s29 = sld [smem:[#allocation3 + $0xe5]]  ;;  %10470 = sst [smem:[#allocation28_spill]] %s8048_s16 }
 0x1e2   :  { %v2213_v52 = vadd.f32 %v2210_v11, %v2200_v55  ;;  %v7592_v42 = vmul.f32 %v10243_v46, %v4998_v53  ;;  %v10245_v51 = vstv %s6973_s1  ;;  %v10247_v3 = vrot.slane %v10246_v26, 2  ;;  %v10254_v46 = vld [vmem:[#allocation139_spill] sm:$0xff]  ;;  %s10261_s1 = sld [smem:[#allocation47_spill]] }
 0x1e3   :  { %v7597_v45 = vmul.f32 %v10245_v51, %v4998_v53  ;;  %v10249_v13 = vrot.slane %v10248_v5, 2  ;;  %v1848_v18 = vadd.f32 %v1846_v23, %v1682_v25  ;;  %v2744_v10 = vadd.f32 %v2742_v47, %v2578_v22  ;;  %v10257_v5 = vld [vmem:[#allocation29_spill] sm:$0xff]  ;;  %v10262_v23 = vld [vmem:[#allocation32_spill] sm:$0xff]  ;;  %10469 = sst [smem:[#allocation47_spill]] %s8044_s7  ;;  %s8280_s7 = sld [smem:[#allocation3 + $0x103]] }
 0x1e4   :  { %v10251_v55 = vstv %s10232_s18  ;;  %v10253_v9 = vrot.slane %v10252_v15, 1  ;;  %v10255_v43 = vrot.slane %v10254_v46, 1  ;;  %v7615_v26 = vmul.f32 %v10256_v41, %v5139_v4  ;;  %v10264_v47 = vld [vmem:[#allocation85_spill] sm:$0xff]  ;;  %s7824_s18 = sld [smem:[#allocation3 + $0xe6]] }
 0x1e5   :  { %v2223_v27 = vsel %vm97_vm1, %v10249_v13, %v10247_v3  ;;  %v2390_v11 = vmul.f32 %v10251_v55, %v5253_v16  ;;  %v10258_v8 = vrot.slane %v10257_v5, 1  ;;  %v10259_v3 = vld [vmem:[#allocation80_spill] sm:$0xff]  ;;  %v10263_v22 = vrot.slane %v10262_v23, 2  ;;  %v10269_v46 = vld [vmem:[#allocation142_spill] sm:$0xff]  ;;  %v10274_v23 = vld [vmem:[#allocation114_spill] sm:$0xff] }
 0x1e6   :  { %v2226_v63 = vadd.f32 %v2223_v27, %v2213_v52  ;;  %v1858_v51 = vsel %vm55_vm0, %v10255_v43, %v10253_v9  ;;  %v10260_v13 = vrot.slane %v10259_v3, 1  ;;  %v10265_v52 = vrot.slane %v10264_v47, 2  ;;  %v10267_v9 = vld [vmem:[#allocation64_spill] sm:$0xff] }
 0x1e7   :  { %v1861_v55 = vadd.f32 %v1858_v51, %v1848_v18  ;;  %v10268_v41 = vrot.slane %v10267_v9, 2  ;;  %v10270_v30 = vrot.slane %v10269_v46, 2  ;;  %v10271_v3 = vstv %s10244_s20  ;;  %v10281_v9 = vld [vmem:[#allocation50_spill] sm:$0xff]  ;;  %v10283_v46 = vld [vmem:[#allocation115_spill] sm:$0xff]  ;;  %s7826_s20 = sld [smem:[#allocation3 + $0xf6]] }
 0x1e8   :  { %v2754_v25 = vsel %vm55_vm0, %v10260_v13, %v10258_v8  ;;  %v2767_v27 = vsel %vm97_vm1, %v10265_v52, %v10263_v22  ;;  %v2392_v43 = vadd.f32 %v2390_v11, %v2226_v63  ;;  %v1500_v59 = vmul.f32 %v10271_v3, %v4697_v54  ;;  %v10272_v8 = vld [vmem:[#allocation49_spill] sm:$0xff]  ;;  %v10278_v11 = vld [vmem:[#allocation93_spill] sm:$0xff] }
 0x1e9   :  { %v2757_v15 = vadd.f32 %v2754_v25, %v2744_v10  ;;  %v1871_v5 = vsel %vm97_vm1, %v10270_v30, %v10268_v41  ;;  %v10273_v13 = vrot.slane %v10272_v8, 1  ;;  %v10275_v17 = vrot.slane %v10274_v23, 1  ;;  %v10286_v23 = vld [vmem:[#allocation67_spill] sm:$0xff] }
 0x1ea   :  { %v1874_v18 = vadd.f32 %v1871_v5, %v1861_v55  ;;  %v10277_v10 = vstv %s10250_s9  ;;  %v10279_v51 = vrot.slane %v10278_v11, 1  ;;  %v10280_v25 = vrot.slane %v6894_v35, 1  ;;  %v10288_v11 = vld [vmem:[#allocation144_spill] sm:$0xff]  ;;  %10377 = sst [smem:[#allocation8_spill]] %s7824_s18  ;;  %s7828_s9 = sld [smem:[#allocation3 + $0xf7]] }
 0x1eb   :  { %v2402_v22 = vsel %vm55_vm0, %v10275_v17, %v10273_v13  ;;  %v2038_v63 = vmul.f32 %v10277_v10, %v4998_v53  ;;  %v2770_v47 = vadd.f32 %v2767_v27, %v2757_v15  ;;  %v10282_v41 = vrot.slane %v10281_v9, 2 }
 0x1ec   :  { %v1510_v30 = vsel %vm55_vm0, %v10280_v25, %v10279_v51  ;;  %v2405_v52 = vadd.f32 %v2402_v22, %v2392_v43  ;;  %v10284_v3 = vrot.slane %v10283_v46, 2  ;;  %v10285_v55 = vstv %s10261_s1  ;;  %v10290_v51 = vld [vmem:[#allocation94_spill] sm:$0xff]  ;;  %s10379_s1 = sld [smem:[#allocation42_spill]] }
 0x1ed   :  { %v1513_v17 = vadd.f32 %v1510_v30, %v1500_v59  ;;  %v2582_v5 = vmul.f32 %v10285_v55, %v5360_v1  ;;  %v2040_v13 = vadd.f32 %v2038_v63, %v1874_v18  ;;  %v10287_v10 = vrot.slane %v10286_v23, 1  ;;  %10378 = sst [smem:[#allocation135_spill]] %s7826_s20 }
 0x1ee   :  { %v2415_v8 = vsel %vm97_vm1, %v10284_v3, %v10282_v41  ;;  %v10289_v21 = vrot.slane %v10288_v11, 1  ;;  %v10291_v27 = vrot.slane %v10290_v51, 2  ;;  %v10292_v15 = vrot.slane %v6948_v56, 2  ;;  %v10300_v3 = vld [vmem:[#allocation117_spill] sm:$0xff] }
 0x1ef   :  { %v10294_v22 = vstv %s10266_s14  ;;  %v2418_v59 = vadd.f32 %v2415_v8, %v2405_v52  ;;  %v10295_v9 = vstv %s10276_s0  ;;  %v10297_v63 = vstv %s7043_s5  ;;  %s10310_s5 = sld [smem:[#allocation16_spill]]  ;;  %s7855_s0 = sld [smem:[#allocation3 + $0x109]] }
 0x1f0   :  { %v2050_v35 = vsel %vm55_vm0, %v10289_v21, %v10287_v10  ;;  %v1523_v43 = vsel %vm97_vm1, %v10292_v15, %v10291_v27  ;;  %v2934_v25 = vadd.f32 %v10294_v22, %v2770_v47  ;;  %v1686_v18 = vmul.f32 %v10295_v9, %v4793_v60  ;;  %v10298_v21 = vld [vmem:[#allocation55_spill] sm:$0xff]  ;;  %v10302_v10 = vld [vmem:[#allocation68_spill] sm:$0xff]  ;;  %v10304_v47 = vld [vmem:[#allocation147_spill] sm:$0xff]  ;;  %s7842_s14 = sld [smem:[#allocation3 + $0x108]] }
 0x1f1   :  { %v1526_v30 = vadd.f32 %v1523_v43, %v1513_v17  ;;  %v7674_v41 = vmul.f32 %v10297_v63, %v5139_v4  ;;  %v10299_v46 = vrot.slane %v10298_v21, 1  ;;  %v10301_v55 = vrot.slane %v10300_v3, 1  ;;  %v10306_v43 = vld [vmem:[#allocation56_spill] sm:$0xff]  ;;  %v10308_v9 = vld [vmem:[#allocation118_spill] sm:$0xff] }
 0x1f2   :  { %v2053_v23 = vadd.f32 %v2050_v35, %v2040_v13  ;;  %v10303_v11 = vrot.slane %v10302_v10, 2  ;;  %v10305_v52 = vrot.slane %v10304_v47, 2  ;;  %v2938_v17 = vrot.slane %v2934_v25, 1 }
 0x1f3   :  { %v2594_v56 = vsel %vm55_vm0, %v10301_v55, %v10299_v46  ;;  %v2945_v51 = vrot.slane %v2934_v25, 2  ;;  %v2584_v27 = vadd.f32 %v2582_v5, %v2418_v59  ;;  %v1688_v15 = vadd.f32 %v1686_v18, %v1526_v30  ;;  %v10312_v46 = vld [vmem:[#allocation97_spill] sm:$0xff]  ;;  %v10315_v5 = vld [vmem:[#allocation39_spill] sm:$0xff] }
 0x1f4   :  { %v2063_v8 = vsel %vm97_vm1, %v10305_v52, %v10303_v11  ;;  %v10307_v22 = vrot.slane %v10306_v43, 2  ;;  %v10309_v63 = vrot.slane %v10308_v9, 2  ;;  %v10311_v13 = vstv %s10293_s24  ;;  %s7857_s24 = sld [smem:[#allocation3 + $0x10a]] }
 0x1f5   :  { %v2066_v3 = vadd.f32 %v2063_v8, %v2053_v23  ;;  %v2230_v35 = vmul.f32 %v10311_v13, %v5139_v4  ;;  %v10313_v55 = vrot.slane %v10312_v46, 1  ;;  %v10314_v10 = vrot.slane %v6992_v36, 1  ;;  %v10322_v36 = vld [vmem:[#allocation99_spill] sm:$0xff]  ;;  %10396 = sst [smem:[#allocation146_spill]] %s7855_s0 }
 0x1f6   :  { %v2607_v21 = vsel %vm97_vm1, %v10309_v63, %v10307_v22  ;;  %v10316_v59 = vrot.slane %v10315_v5, 1  ;;  %v2597_v18 = vadd.f32 %v2594_v56, %v2584_v27  ;;  %v10317_v47 = vstv %s10296_s23  ;;  %v10318_v22 = vld [vmem:[#allocation77_spill] sm:$0xff]  ;;  %10389 = sst [smem:[#allocation141_spill]] %s7842_s14  ;;  %s7870_s23 = sld [smem:[#allocation3 + $0xc7]] }
 0x1f7   :  { %v1698_v11 = vsel %vm55_vm0, %v10314_v10, %v10313_v55  ;;  %v2774_v52 = vmul.f32 %v10317_v47, %v5530_v57  ;;  %v2232_v8 = vadd.f32 %v2230_v35, %v2066_v3  ;;  %v10319_v9 = vrot.slane %v10318_v22, 1  ;;  %v10320_v63 = vld [vmem:[#allocation148_spill] sm:$0xff]  ;;  %s7961_s14 = sld [smem:[#allocation3 + $0xea]]  ;;  %s10524_s16 = sld [smem:[#allocation141_spill]] }
 0x1f8   :  { %v2940_v30 = vsel %vm55_vm0, %v2938_v17, %v10316_v59  ;;  %v1701_v43 = vadd.f32 %v1698_v11, %v1688_v15  ;;  %v10321_v13 = vrot.slane %v10320_v63, 1  ;;  %v10323_v0 = vrot.slane %v10322_v36, 2 }
 0x1f9   :  { %v2943_v23 = vmax.f32 %v2934_v25, %v2940_v30  ;;  %v10324_v55 = vrot.slane %v7005_v49, 2  ;;  %v10325_v56 = vrot.slane %v10315_v5, 2  ;;  %v2610_v27 = vadd.f32 %v2607_v21, %v2597_v18  ;;  %v10329_v5 = vld [vmem:[#allocation82_spill] sm:$0xff] }
 0x1fa   :  { %v2242_v46 = vsel %vm55_vm0, %v10321_v13, %v10319_v9  ;;  %v10327_v15 = vstv %s10310_s5  ;;  %v10328_v11 = vstv %s7075_s28  ;;  %v10330_v22 = vrot.slane %v10329_v5, 2  ;;  %v10331_v9 = vld [vmem:[#allocation155_spill] sm:$0xff]  ;;  %s10337_s28 = sld [smem:[#allocation19_spill]]  ;;  %v10344_v5 = vld [vmem:[#allocation121_spill] sm:$0xff]  ;;  %10397 = sst [smem:[#allocation9_spill]] %s7857_s24 }
 0x1fb   :  { %v1711_v10 = vsel %vm97_vm1, %v10324_v55, %v10323_v0  ;;  %v2947_v17 = vsel %vm97_vm1, %v2945_v51, %v10325_v56  ;;  %v1878_v3 = vmul.f32 %v10327_v15, %v4900_v20  ;;  %v7725_v59 = vmul.f32 %v10328_v11, %v5253_v16  ;;  %v10335_v13 = vld [vmem:[#allocation119_spill] sm:$0xff]  ;;  %s7872_s5 = sld [smem:[#allocation3 + $0xcd]]  ;;  %s7959_s24 = sld [smem:[#allocation3 + $0xda]] }
 0x1fc   :  { %v1714_v25 = vadd.f32 %v1711_v10, %v1701_v43  ;;  %v2950_v30 = vmax.f32 %v2943_v23, %v2947_v17  ;;  %v2245_v49 = vadd.f32 %v2242_v46, %v2232_v8  ;;  %v2776_v47 = vadd.f32 %v2774_v52, %v2610_v27  ;;  %v10333_v43 = vld [vmem:[#allocation61_spill] sm:$0xff]  ;;  %v10339_v46 = vld [vmem:[#allocation102_spill] sm:$0xff]  ;;  %10401 = sst [smem:[#allocation18_spill]] %s7870_s23 }
 0x1fd   :  { %v10332_v51 = vrot.slane %v10331_v9, 2  ;;  %v10334_v63 = vrot.slane %v10333_v43, 1  ;;  %v10336_v36 = vrot.slane %v10335_v13, 1  ;;  %v10338_v8 = vstv %s10326_s17  ;;  %s10407_s17 = sld [smem:[#allocation92_spill]]  ;;  %v10439_v0 = vld [vmem:[#allocation163_spill] sm:$0xff] }
 0x1fe   :  { %v1880_v18 = vadd.f32 %v1878_v3, %v1714_v25  ;;  %2952 = vst [vmem:[#allocation2 + $0x180] sm:$0xff] %v2950_v30  ;;  %v2422_v52 = vmul.f32 %v10338_v8, %v5253_v16  ;;  %v10340_v10 = vrot.slane %v10339_v46, 1  ;;  %v10341_v56 = vrot.slane %v7022_v39, 1  ;;  %v10342_v30 = vld [vmem:[#allocation63_spill] sm:$0xff]  ;;  %v10347_v39 = vld [vmem:[#allocation106_spill] sm:$0xff] }
 0x1ff   :  { %v2255_v21 = vsel %vm97_vm1, %v10332_v51, %v10330_v22  ;;  %v2786_v55 = vsel %vm55_vm0, %v10336_v36, %v10334_v63  ;;  %v10345_v22 = vrot.slane %v10344_v5, 2  ;;  %v10349_v43 = vrot.slane %v7037_v19, 2  ;;  %v10353_v36 = vld [vmem:[#allocation156_spill] sm:$0xff] }
 0x200   :  { %v2258_v23 = vadd.f32 %v2255_v21, %v2245_v49  ;;  %v1890_v17 = vsel %vm55_vm0, %v10341_v56, %v10340_v10  ;;  %v2789_v15 = vadd.f32 %v2786_v55, %v2776_v47  ;;  %v10343_v49 = vrot.slane %v10342_v30, 2  ;;  %v10351_v47 = vld [vmem:[#allocation89_spill] sm:$0xff] }
 0x201   :  { %v1893_v3 = vadd.f32 %v1890_v17, %v1880_v18  ;;  %v10348_v21 = vrot.slane %v10347_v39, 2  ;;  %v10352_v18 = vrot.slane %v10351_v47, 1  ;;  %v10354_v55 = vrot.slane %v10353_v36, 1  ;;  %v10363_v39 = vld [vmem:[#allocation158_spill] sm:$0xff]  ;;  %10402 = sst [smem:[#allocation150_spill]] %s7872_s5  ;;  %s7972_s5 = sld [smem:[#allocation3 + $0xec]] }
 0x202   :  { %v2799_v9 = vsel %vm97_vm1, %v10345_v22, %v10343_v49  ;;  %v2424_v51 = vadd.f32 %v2422_v52, %v2258_v23  ;;  %v10355_v10 = vstv %s10337_s28  ;;  %v10356_v23 = vstv %s7097_s11  ;;  %s7788_s11 = sld [smem:[#allocation3 + $0xd3]]  ;;  %v10361_v22 = vld [vmem:[#allocation90_spill] sm:$0xff]  ;;  %v10367_v36 = vld [vmem:[#allocation110_spill] sm:$0xff]  ;;  %s7881_s28 = sld [smem:[#allocation3 + $0xd6]] }
 0x203   :  { %v1903_v63 = vsel %vm97_vm1, %v10349_v43, %v10348_v21  ;;  %v2802_v13 = vadd.f32 %v2799_v9, %v2789_v15  ;;  %v2434_v8 = vsel %vm55_vm0, %v10354_v55, %v10352_v18  ;;  %v2070_v56 = vmul.f32 %v10355_v10, %v4998_v53 }
 0x204   :  { %v1906_v46 = vadd.f32 %v1903_v63, %v1893_v3  ;;  %v7770_v52 = vmul.f32 %v10356_v23, %v5253_v16  ;;  %v10357_v19 = vstv %s7141_s2  ;;  %v10359_v15 = vstv %s7169_s8  ;;  %s7800_s2 = sld [smem:[#allocation3 + $0xd4]] }
 0x205   :  { %v7775_v17 = vmul.f32 %v10357_v19, %v5360_v1  ;;  %v7780_v30 = vmul.f32 %v10359_v15, %v5360_v1  ;;  %v2437_v3 = vadd.f32 %v2434_v8, %v2424_v51  ;;  %v10360_v49 = vstv %s10346_s22  ;;  %s7802_s8 = sld [smem:[#allocation3 + $0xe4]]  ;;  %v10369_v8 = vld [vmem:[#allocation179_spill] sm:$0xff]  ;;  %v10372_v15 = vld [vmem:[#allocation126_spill] sm:$0xff]  ;;  %s7890_s22 = sld [smem:[#allocation3 + $0xd7]] }
 0x206   :  { %v2966_v5 = vadd.f32 %v10360_v49, %v2802_v13  ;;  %v10362_v9 = vrot.slane %v10361_v22, 2  ;;  %v10364_v21 = vrot.slane %v10363_v39, 2  ;;  %v10365_v63 = vstv %s10350_s27  ;;  %s7892_s27 = sld [smem:[#allocation3 + $0xe7]] }
 0x207   :  { %v2614_v47 = vmul.f32 %v10365_v63, %v5360_v1  ;;  %v2072_v18 = vadd.f32 %v2070_v56, %v1906_v46  ;;  %v10368_v55 = vrot.slane %v10367_v36, 1  ;;  %v10370_v10 = vrot.slane %v10369_v8, 1  ;;  %v10382_v36 = vld [vmem:[#allocation159_spill] sm:$0xff] }
 0x208   :  { %v2447_v43 = vsel %vm97_vm1, %v10364_v21, %v10362_v9  ;;  %v10371_v23 = vstv %s10358_s3  ;;  %v10373_v49 = vrot.slane %v10372_v15, 1  ;;  %v10374_v22 = vrot.slane %v7206_v34, 1  ;;  %v10386_v15 = vld [vmem:[#allocation180_spill] sm:$0xff]  ;;  %10409 = sst [smem:[#allocation10_spill]] %s7881_s28  ;;  %s7900_s3 = sld [smem:[#allocation3 + $0xe8]] }
 0x209   :  { %v2450_v51 = vadd.f32 %v2447_v43, %v2437_v3  ;;  %v2082_v13 = vsel %vm55_vm0, %v10370_v10, %v10368_v55  ;;  %v1530_v19 = vmul.f32 %v10371_v23, %v4697_v54  ;;  %v10375_v56 = vstv %s7193_s13  ;;  %v10380_v43 = vld [vmem:[#allocation95_spill] sm:$0xff]  ;;  %v10384_v10 = vld [vmem:[#allocation111_spill] sm:$0xff]  ;;  %s7840_s13 = sld [smem:[#allocation3 + $0xf8]]  ;;  %s7976_s28 = sld [smem:[#allocation3 + $0xfc]] }
 0x20a   :  { %v1540_v46 = vsel %vm55_vm0, %v10374_v22, %v10373_v49  ;;  %v7820_v9 = vmul.f32 %v10375_v56, %v5530_v57  ;;  %v2970_v3 = vrot.slane %v2966_v5, 1  ;;  %v2977_v39 = vrot.slane %v2966_v5, 2 }
 0x20b   :  { %10366 = sst [smem:[#allocation132_spill]] %s7802_s8  ;;  %v2085_v21 = vadd.f32 %v2082_v13, %v2072_v18  ;;  %v2616_v34 = vadd.f32 %v2614_v47, %v2450_v51  ;;  %v10381_v63 = vrot.slane %v10380_v43, 1  ;;  %v10383_v55 = vrot.slane %v10382_v36, 1  ;;  %v10390_v13 = vld [vmem:[#allocation70_spill] sm:$0xff] }
 0x20c   :  { %v10385_v23 = vrot.slane %v10384_v10, 2  ;;  %v10387_v49 = vrot.slane %v10386_v15, 2  ;;  %v1543_v18 = vadd.f32 %v1540_v46, %v1530_v19  ;;  %v10391_v47 = vrot.slane %v10390_v13, 1  ;;  %10413 = sst [smem:[#allocation24_spill]] %s7890_s22  ;;  %s10446_s22 = sld [smem:[#allocation40_spill]] }
 0x20d   :  { %v2626_v8 = vsel %vm55_vm0, %v10383_v55, %v10381_v63  ;;  %v10392_v43 = vstv %s10376_s19  ;;  %v10393_v63 = vld [vmem:[#allocation127_spill] sm:$0xff]  ;;  %v10395_v10 = vrot.slane %v7221_v58, 2  ;;  %10414 = sst [smem:[#allocation11_spill]] %s7892_s27  ;;  %s7902_s19 = sld [smem:[#allocation3 + $0xe9]]  ;;  %v10440_v35 = vrot.slane %v10439_v0, 2 }
 0x20e   :  { %v2095_v22 = vsel %vm97_vm1, %v10387_v49, %v10385_v23  ;;  %v2972_v51 = vsel %vm55_vm0, %v2970_v3, %v10391_v47  ;;  %v2262_v36 = vmul.f32 %v10392_v43, %v5139_v4  ;;  %v10394_v55 = vrot.slane %v10393_v63, 2  ;;  %v10403_v43 = vld [vmem:[#allocation96_spill] sm:$0xff]  ;;  %10418 = sst [smem:[#allocation45_spill]] %s7900_s3  ;;  %s7996_s3 = sld [smem:[#allocation3 + $0x10e]] }
 0x20f   :  { %10388 = sst [smem:[#allocation15_spill]] %s7840_s13  ;;  %v2098_v56 = vadd.f32 %v2095_v22, %v2085_v21  ;;  %v2975_v19 = vmax.f32 %v2966_v5, %v2972_v51  ;;  %v2629_v46 = vadd.f32 %v2626_v8, %v2616_v34  ;;  %v10398_v49 = vstv %s10379_s1  ;;  %v10405_v5 = vld [vmem:[#allocation160_spill] sm:$0xff]  ;;  %s7915_s1 = sld [smem:[#allocation3 + $0xf9]] }
 0x210   :  { %v1553_v15 = vsel %vm97_vm1, %v10395_v10, %v10394_v55  ;;  %v1718_v3 = vmul.f32 %v10398_v49, %v4793_v60  ;;  %v10399_v21 = vstv %s7231_s4  ;;  %v10400_v47 = vrot.slane %v10390_v13, 2  ;;  %s7879_s4 = sld [smem:[#allocation3 + $0xd5]]  ;;  %v10410_v55 = vld [vmem:[#allocation116_spill] sm:$0xff]  ;;  %s8018_s27 = sld [smem:[#allocation3 + $0xcf]] }
 0x211   :  { %v1556_v23 = vadd.f32 %v1553_v15, %v1543_v18  ;;  %v7865_v22 = vmul.f32 %v10399_v21, %v5530_v57  ;;  %v10404_v63 = vrot.slane %v10403_v43, 2  ;;  %v10406_v34 = vrot.slane %v10405_v5, 2  ;;  %v10421_v43 = vld [vmem:[#allocation120_spill] sm:$0xff]  ;;  %10602 = sst [smem:[#allocation40_spill]] %s8282_s10 }
 0x212   :  { %v2979_v58 = vsel %vm97_vm1, %v2977_v39, %v10400_v47  ;;  %v2264_v18 = vadd.f32 %v2262_v36, %v2098_v56  ;;  %v10411_v39 = vrot.slane %v10410_v55, 1  ;;  %v10412_v10 = vrot.slane %v7103_v32, 1  ;;  %v10415_v36 = vld [vmem:[#allocation131_spill] sm:$0xff] }
 0x213   :  { %v2639_v8 = vsel %vm97_vm1, %v10406_v34, %v10404_v63  ;;  %v2982_v51 = vmax.f32 %v2975_v19, %v2979_v58  ;;  %v1720_v49 = vadd.f32 %v1718_v3, %v1556_v23  ;;  %v10416_v19 = vrot.slane %v10415_v36, 1  ;;  %10419 = sst [smem:[#allocation83_spill]] %s7902_s19  ;;  %s7998_s19 = sld [smem:[#allocation3 + $0x10f]] }
 0x214   :  { %v2642_v13 = vadd.f32 %v2639_v8, %v2629_v46  ;;  %v2274_v15 = vsel %vm55_vm0, %v10412_v10, %v10411_v39  ;;  %v10417_v46 = vrot.slane %v7226_v29, 1  ;;  %v10420_v3 = vstv %s10407_s17  ;;  %s7917_s17 = sld [smem:[#allocation3 + $0xfa]] }
 0x215   :  { %v2277_v56 = vadd.f32 %v2274_v15, %v2264_v18  ;;  %2984 = vst [vmem:[#allocation2 + $0x190] sm:$0xff] %v2982_v51  ;;  %v2806_v58 = vmul.f32 %v10420_v3, %v5530_v57  ;;  %v10422_v63 = vrot.slane %v10421_v43, 2  ;;  %v10423_v5 = vrot.slane %v7109_v38, 2  ;;  %10424 = sst [smem:[#allocation30_spill]] %s7915_s1 }
 0x216   :  { %10408 = sst [smem:[#allocation153_spill]] %s7879_s4  ;;  %v1730_v32 = vsel %vm55_vm0, %v10417_v46, %v10416_v19  ;;  %v2959_v51 = vstv %s7782_s6  ;;  %v2962_v38 = vstv %s7784_s25  ;;  %v3125_v39 = vstv %s7786_s21  ;;  %s10442_s4 = sld [smem:[#allocation128_spill]] }
 0x217   :  { %v2287_v29 = vsel %vm97_vm1, %v10423_v5, %v10422_v63  ;;  %v1733_v34 = vadd.f32 %v1730_v32, %v1720_v49  ;;  %v3128_v10 = vstv %s7788_s11  ;;  %v2808_v15 = vadd.f32 %v2806_v58, %v2642_v13  ;;  %v10432_v63 = vld [vmem:[#allocation100_spill] sm:$0xff]  ;;  %s8014_s1 = sld [smem:[#allocation3 + $0xc9]]  ;;  %s10544_s21 = sld [smem:[#allocation24_spill]] }
 0x218   :  { %v2290_v55 = vadd.f32 %v2287_v29, %v2277_v56  ;;  %v3135_v49 = vstv %s7800_s2  ;;  %v3142_v36 = vstv %s7802_s8  ;;  %v3145_v19 = vstv %s7822_s29  ;;  %v10434_v29 = vld [vmem:[#allocation162_spill] sm:$0xff]  ;;  %s7987_s8 = sld [smem:[#allocation3 + $0xfe]]  ;;  %s10487_s6 = sld [smem:[#allocation134_spill]] }
 0x219   :  { %v3152_v46 = vstv %s7824_s18  ;;  %v3159_v56 = vstv %s7826_s20  ;;  %v3162_v32 = vstv %s7828_s9  ;;  %v3169_v3 = vstv %s7840_s13  ;;  %s7949_s18 = sld [smem:[#allocation3 + $0xd8]]  ;;  %s7951_s20 = sld [smem:[#allocation3 + $0xd9]] }
 0x21a   :  { %10425 = sst [smem:[#allocation164_spill]] %s7917_s17  ;;  %v3179_v13 = vstv %s7855_s0  ;;  %v10433_v5 = vrot.slane %v10432_v63, 1  ;;  %v10435_v18 = vrot.slane %v10434_v29, 1  ;;  %v10436_v23 = vstv %s10428_s26  ;;  %s10441_s26 = sld [smem:[#allocation22_spill]]  ;;  %v10443_v63 = vld [vmem:[#allocation122_spill] sm:$0xff] }
 0x21b   :  { %v2454_v47 = vmul.f32 %v10436_v23, %v5253_v16  ;;  %v2991_v21 = vstv %s7870_s23  ;;  %s7970_s13 = sld [smem:[#allocation3 + $0xeb]]  ;;  %v10445_v0 = vrot.slane %v7117_v31, 1  ;;  %s7985_s23 = sld [smem:[#allocation3 + $0xfd]] }
 0x21c   :  { %v2818_v8 = vsel %vm55_vm0, %v10435_v18, %v10433_v5  ;;  %v10437_v5 = vld [vmem:[#allocation104_spill] sm:$0xff]  ;;  %v10453_v18 = vrot.slane %v7130_v24, 2  ;;  %s8020_s0 = sld [smem:[#allocation3 + $0xdb]]  ;;  %s8055_s17 = sld [smem:[#allocation3 + $0x100]] }
 0x21d   :  { %v2821_v27 = vadd.f32 %v2818_v8, %v2808_v15  ;;  %v10438_v29 = vrot.slane %v10437_v5, 2  ;;  %v2456_v23 = vadd.f32 %v2454_v47, %v2290_v55  ;;  %v2955_v8 = vld [vmem:[#allocation2 + $0x180] ss:$3 sm:$0xf]  ;;  %v10444_v5 = vrot.slane %v10443_v63, 1  ;;  %10456 = sst [smem:[#allocation21_spill]] %s8014_s1 }
 0x21e   :  { %v10462_v24 = vld [vmem:[#allocation112_spill] sm:$0xff]  ;;  %s8162_s2 = sld [smem:[#allocation3 + $0x101]]  ;;  %s10522_s29 = sld [smem:[#allocation165_spill]] }
 0x21f   :  { %v2831_v58 = vsel %vm97_vm1, %v10440_v35, %v10438_v29  ;;  %v2466_v35 = vsel %vm55_vm0, %v10445_v0, %v10444_v5  ;;  %v10451_v5 = vld [vmem:[#allocation124_spill] sm:$0xff]  ;;  %s8164_s9 = sld [smem:[#allocation3 + $0x111]]  ;;  %s10545_s11 = sld [smem:[#allocation11_spill]] }
 0x220   :  { %v2834_v11 = vadd.f32 %v2831_v58, %v2821_v27  ;;  %v2469_v47 = vadd.f32 %v2466_v35, %v2456_v23  ;;  %v10447_v27 = vld [vmem:[#allocation133_spill] sm:$0xff]  ;;  %v10449_v58 = vrot.slane %v7259_v61, 2  ;;  %v10450_v25 = vstv %s10441_s26  ;;  %s8009_s26 = sld [smem:[#allocation3 + $0x110]]  ;;  %s10541_s25 = sld [smem:[#allocation153_spill]] }
 0x221   :  { %v10448_v55 = vrot.slane %v10447_v27, 2  ;;  %v10452_v0 = vrot.slane %v10451_v5, 2  ;;  %v10454_v35 = vstv %s10442_s4  ;;  %v2956_v27 = vmul.f32 0.1, %v2955_v8  ;;  %s8024_s4 = sld [smem:[#allocation3 + $0xdc]]  ;;  %10601 = sst [smem:[#allocation128_spill]] %s8280_s7 }
 0x222   :  { %v2998_v31 = vadd.f32 %v10450_v25, %v2834_v11  ;;  %v1910_v61 = vmul.f32 %v10454_v35, %v4900_v20  ;;  %v10455_v11 = vstv %s10446_s22  ;;  %s8026_s22 = sld [smem:[#allocation3 + $0xdd]]  ;;  %v10461_v35 = vrot.slane %v7279_v14, 1  ;;  %10473 = sst [smem:[#allocation65_spill]] %s8055_s17 }
 0x223   :  { %v1743_v63 = vsel %vm97_vm1, %v10449_v58, %v10448_v55  ;;  %v2479_v29 = vsel %vm97_vm1, %v10453_v18, %v10452_v0  ;;  %v2646_v58 = vmul.f32 %v10455_v11, %v5360_v1  ;;  %v10463_v5 = vrot.slane %v10462_v24, 1  ;;  %s8166_s17 = sld [smem:[#allocation3 + $0x112]] }
 0x224   :  { %v1746_v23 = vadd.f32 %v1743_v63, %v1733_v34  ;;  %v2482_v25 = vadd.f32 %v2479_v29, %v2469_v47  ;;  %v3002_v15 = vrot.slane %v2998_v31, 1  ;;  %v10459_v29 = vld [vmem:[#allocation138_spill] sm:$0xff]  ;;  %v10464_v63 = vld [vmem:[#allocation129_spill] sm:$0xff]  ;;  %10521 = sst [smem:[#allocation51_spill]] %s8162_s2 }
 0x225   :  { %v10460_v47 = vrot.slane %v10459_v29, 1  ;;  %v2957_v29 = vmax.f32 %v2955_v8, %v2956_v27  ;;  %10523 = sst [smem:[#allocation16_spill]] %s8164_s9 }
 0x226   :  { %v1912_v34 = vadd.f32 %v1910_v61, %v1746_v23  ;;  %v2648_v0 = vadd.f32 %v2646_v58, %v2482_v25  ;;  %v3004_v23 = vsel %vm55_vm0, %v3002_v15, %v10463_v5  ;;  %v10465_v25 = vrot.slane %v10464_v63, 1  ;;  %v10466_v58 = vld [vmem:[#allocation185_spill] sm:$0xff]  ;;  %v10474_v63 = vld [vmem:[#allocation130_spill] sm:$0xff] }
 0x227   :  { %10457 = sst [smem:[#allocation43_spill]] %s8024_s4  ;;  %v1922_v11 = vsel %vm55_vm0, %v10461_v35, %v10460_v47  ;;  %v10467_v18 = vrot.slane %v10466_v58, 1  ;;  %v3007_v8 = vmax.f32 %v2998_v31, %v3004_v23  ;;  %v10475_v47 = vrot.slane %v10474_v63, 2  ;;  %v10480_v58 = vld [vmem:[#allocation137_spill] sm:$0xff]  ;;  %v10482_v35 = vld [vmem:[#allocation188_spill] sm:$0xff]  ;;  %s8284_s4 = sld [smem:[#allocation3 + $0x114]] }
 0x228   :  { %10458 = sst [smem:[#allocation78_spill]] %s8026_s22  ;;  %v1925_v14 = vadd.f32 %v1922_v11, %v1912_v34  ;;  %v10481_v61 = vrot.slane %v10480_v58, 1  ;;  %v10483_v43 = vrot.slane %v10482_v35, 1  ;;  %v10486_v63 = vrot.slane %v7181_v62, 2  ;;  %s10530_s22 = sld [smem:[#allocation150_spill]] }
 0x229   :  { %v2658_v55 = vsel %vm55_vm0, %v10467_v18, %v10465_v25  ;;  %v3009_v18 = vrot.slane %v2998_v31, 2  ;;  %v2960_v25 = vmul.f32 %v2959_v51, %v2957_v29  ;;  %v10476_v31 = vld [vmem:[#allocation187_spill] sm:$0xff]  ;;  %v10484_v29 = vld [vmem:[#allocation140_spill] sm:$0xff]  ;;  %v10493_v58 = vstv %s10487_s6  ;;  %s10503_s6 = sld [smem:[#allocation69_spill]]  ;;  %10526 = sst [smem:[#allocation71_spill]] %s8166_s17 }
 0x22a   :  { %v2661_v5 = vadd.f32 %v2658_v55, %v2648_v0  ;;  %v10477_v23 = vrot.slane %v10476_v31, 2  ;;  %v10478_v55 = vstv %s10471_s30  ;;  %v10479_v0 = vrot.slane %v10462_v24, 2  ;;  %s10488_s30 = sld [smem:[#allocation145_spill]] }
 0x22b   :  { %v2838_v27 = vmul.f32 %v10478_v55, %v5530_v57  ;;  %v2850_v51 = vsel %vm55_vm0, %v10483_v43, %v10481_v61  ;;  %v10485_v15 = vrot.slane %v10484_v29, 2  ;;  %v3055_v31 = vstv %s8014_s1  ;;  %v10489_v43 = vld [vmem:[#allocation143_spill] sm:$0xff]  ;;  %s10492_s1 = sld [smem:[#allocation152_spill]] }
 0x22c   :  { %v2671_v34 = vsel %vm97_vm1, %v10477_v23, %v10475_v47  ;;  %v3011_v11 = vsel %vm97_vm1, %v3009_v18, %v10479_v0  ;;  %v3058_v24 = vstv %s8018_s27  ;;  %v10490_v61 = vrot.slane %v10489_v43, 2  ;;  %v10504_v0 = vld [vmem:[#allocation157_spill] sm:$0xff]  ;;  %s10695_s27 = sld [smem:[#allocation43_spill]] }
 0x22d   :  { %v2863_v47 = vsel %vm97_vm1, %v10486_v63, %v10485_v15  ;;  %v3014_v55 = vmax.f32 %v3007_v8, %v3011_v11  ;;  %v10491_v29 = vrot.slane %v7284_v50, 2  ;;  %v2963_v15 = vadd.f32 %v2962_v38, %v2960_v25  ;;  %v2987_v63 = vld [vmem:[#allocation2 + $0x190] ss:$3 sm:$0xf]  ;;  %v10494_v50 = vld [vmem:[#allocation149_spill] sm:$0xff]  ;;  %10603 = sst [smem:[#allocation125_spill]] %s8284_s4 }
 0x22e   :  { %v2674_v8 = vadd.f32 %v2671_v34, %v2661_v5  ;;  %v2102_v23 = vmul.f32 %v10493_v58, %v4998_v53  ;;  %v3373_v35 = vstv %s8053_s15  ;;  %v10495_v18 = vrot.slane %v10494_v50, 1  ;;  %s8278_s15 = sld [smem:[#allocation3 + $0x102]] }
 0x22f   :  { %v1935_v62 = vsel %vm97_vm1, %v10491_v29, %v10490_v61  ;;  %3016 = vst [vmem:[#allocation2 + $0x1a0] sm:$0xff] %v3014_v55  ;;  %v10496_v61 = vrot.slane %v7290_v28, 1  ;;  %v10501_v55 = vrot.slane %v7319_v37, 2  ;;  %v2988_v50 = vmul.f32 0.1, %v2987_v63 }
 0x230   :  { %v1938_v11 = vadd.f32 %v1935_v62, %v1925_v14  ;;  %v2840_v25 = vadd.f32 %v2838_v27, %v2674_v8  ;;  %v10499_v14 = vld [vmem:[#allocation151_spill] sm:$0xff]  ;;  %v10502_v29 = vstv %s10488_s30  ;;  %v10505_v28 = vrot.slane %v10504_v0, 1  ;;  %s10513_s30 = sld [smem:[#allocation136_spill]] }
 0x231   :  { %v2114_v38 = vsel %vm55_vm0, %v10496_v61, %v10495_v18  ;;  %v10500_v34 = vrot.slane %v10499_v14, 2  ;;  %v2294_v62 = vmul.f32 %v10502_v29, %v5139_v4  ;;  %v10506_v43 = vrot.slane %v7348_v48, 1  ;;  %v10508_v18 = vld [vmem:[#allocation161_spill] sm:$0xff] }
 0x232   :  { %v2104_v5 = vadd.f32 %v2102_v23, %v1938_v11  ;;  %v10509_v23 = vrot.slane %v10508_v18, 2  ;;  %v10510_v8 = vrot.slane %v7359_v33, 2  ;;  %v10512_v11 = vstv %s10492_s1  ;;  %s10525_s1 = sld [smem:[#allocation9_spill]] }
 0x233   :  { %v2127_v58 = vsel %vm97_vm1, %v10501_v55, %v10500_v34  ;;  %v2306_v27 = vsel %vm55_vm0, %v10506_v43, %v10505_v28  ;;  %v2486_v61 = vmul.f32 %v10512_v11, %v5253_v16  ;;  %v3126_v14 = vmul.f32 %v3125_v39, %v2963_v15 }
 0x234   :  { %v2319_v37 = vsel %vm97_vm1, %v10510_v8, %v10509_v23  ;;  %v3129_v34 = vmul.f32 %v3128_v10, %v2963_v15  ;;  %v2853_v0 = vadd.f32 %v2850_v51, %v2840_v25  ;;  %v2117_v48 = vadd.f32 %v2114_v38, %v2104_v5  ;;  %v10515_v25 = vld [vmem:[#allocation169_spill] sm:$0xff]  ;;  %10599 = sst [smem:[#allocation22_spill]] %s8278_s15 }
 0x235   :  { %v3136_v55 = vmul.f32 %v3135_v49, %v2963_v15  ;;  %v3146_v43 = vmul.f32 %v3145_v19, %v2963_v15  ;;  %v3163_v29 = vmul.f32 %v3162_v32, %v2963_v15  ;;  %v3180_v33 = vmul.f32 %v3179_v13, %v2963_v15 }
 0x236   :  { %v3143_v28 = vmul.f32 %v3142_v36, %v2963_v15  ;;  %v2866_v18 = vadd.f32 %v2863_v47, %v2853_v0  ;;  %v2130_v23 = vadd.f32 %v2127_v58, %v2117_v48  ;;  %v10514_v8 = vstv %s10503_s6  ;;  %s10542_s6 = sld [smem:[#allocation91_spill]] }
 0x237   :  { %v1560_v39 = vmul.f32 %v10514_v8, %v4697_v54  ;;  %v3153_v10 = vmul.f32 %v3152_v46, %v2963_v15  ;;  %v3160_v51 = vmul.f32 %v3159_v56, %v2963_v15  ;;  %v2989_v38 = vmax.f32 %v2987_v63, %v2988_v50 }
 0x238   :  { %v10516_v49 = vrot.slane %v10515_v25, 1  ;;  %v10517_v19 = vrot.slane %v7458_v12, 1  ;;  %v3131_v13 = vrot.slane %v3129_v34, 1  ;;  %v10519_v5 = vstv %s10513_s30  ;;  %v10527_v34 = vld [vmem:[#allocation170_spill] sm:$0xff]  ;;  %s10543_s30 = sld [smem:[#allocation10_spill]] }
 0x239   :  { %v3030_v36 = vadd.f32 %v10519_v5, %v2866_v18  ;;  %v2296_v54 = vadd.f32 %v2294_v62, %v2130_v23  ;;  %v3138_v56 = vrot.slane %v3136_v55, 2  ;;  %v3148_v47 = vrot.slane %v3146_v43, 1 }
 0x23a   :  { %v1570_v32 = vsel %vm55_vm0, %v10517_v19, %v10516_v49  ;;  %v3165_v63 = vrot.slane %v3163_v29, 1  ;;  %v3182_v12 = vrot.slane %v3180_v33, 1  ;;  %v10528_v0 = vrot.slane %v10527_v34, 2  ;;  %v10537_v34 = vld [vmem:[#allocation173_spill] sm:$0xff] }
 0x23b   :  { %v1573_v46 = vadd.f32 %v1570_v32, %v1560_v39  ;;  %v3034_v58 = vrot.slane %v3030_v36, 1  ;;  %v3041_v50 = vrot.slane %v3030_v36, 2  ;;  %v2309_v11 = vadd.f32 %v2306_v27, %v2296_v54  ;;  %v10534_v27 = vld [vmem:[#allocation154_spill] sm:$0xff] }
 0x23c   :  { %v10529_v48 = vrot.slane %v7493_v7, 2  ;;  %v3170_v8 = vmul.f32 %v3169_v3, %v2963_v15  ;;  %v2992_v62 = vmul.f32 %v2991_v21, %v2989_v38  ;;  %v10531_v43 = vstv %s10522_s29  ;;  %s10546_s29 = sld [smem:[#allocation45_spill]] }
 0x23d   :  { %v1750_v29 = vmul.f32 %v10531_v43, %v4793_v60  ;;  %v10532_v33 = vstv %s10524_s16  ;;  %v10533_v39 = vstv %s10525_s1  ;;  %v10535_v49 = vrot.slane %v10534_v27, 1  ;;  %s10547_s16 = sld [smem:[#allocation83_spill]]  ;;  %s10548_s1 = sld [smem:[#allocation30_spill]] }
 0x23e   :  { %v1583_v18 = vsel %vm97_vm1, %v10529_v48, %v10528_v0  ;;  %v3177_v23 = vmul.f32 %v10532_v33, %v2963_v15  ;;  %v3187_v25 = vmul.f32 %v10533_v39, %v2963_v15  ;;  %v2322_v7 = vadd.f32 %v2319_v37, %v2309_v11  ;;  %v10553_v33 = vld [vmem:[#allocation168_spill] sm:$0xff] }
 0x23f   :  { %v1586_v55 = vadd.f32 %v1583_v18, %v1573_v46  ;;  %v3036_v19 = vsel %vm55_vm0, %v3034_v58, %v10535_v49  ;;  %v3133_v32 = vadd.f32 %v3131_v13, %v3126_v14  ;;  %v3150_v3 = vadd.f32 %v3148_v47, %v3143_v28 }
 0x240   :  { %v3039_v5 = vmax.f32 %v3030_v36, %v3036_v19  ;;  %v3167_v38 = vadd.f32 %v3165_v63, %v3160_v51  ;;  %v3184_v54 = vadd.f32 %v3182_v12, %v3177_v23  ;;  %v10536_v60 = vrot.slane %v10534_v27, 2  ;;  %v10559_v19 = vld [vmem:[#allocation171_spill] sm:$0xff] }
 0x241   :  { %v1752_v21 = vadd.f32 %v1750_v29, %v1586_v55  ;;  %v10538_v15 = vrot.slane %v10537_v34, 1  ;;  %v10539_v0 = vrot.slane %v7502_v40, 1  ;;  %v3155_v48 = vrot.slane %v3153_v10, 2  ;;  %v10549_v55 = vld [vmem:[#allocation167_spill] sm:$0xff] }
 0x242   :  { %v3043_v46 = vsel %vm97_vm1, %v3041_v50, %v10536_v60  ;;  %v10540_v37 = vstv %s10530_s22  ;;  %v3172_v13 = vrot.slane %v3170_v8, 2  ;;  %v3189_v51 = vrot.slane %v3187_v25, 2  ;;  %s10552_s22 = sld [smem:[#allocation164_spill]] }
 0x243   :  { %v1762_v58 = vsel %vm55_vm0, %v10539_v0, %v10538_v15  ;;  %v2995_v11 = vadd.f32 %v10540_v37, %v2992_v62  ;;  %v3046_v14 = vmax.f32 %v3039_v5, %v3043_v46  ;;  %v3384_v36 = vstv %s8162_s2  ;;  %v3019_v62 = vld [vmem:[#allocation2 + $0x1a0] ss:$3 sm:$0xf]  ;;  %s10556_s2 = sld [smem:[#allocation48_spill]] }
 0x244   :  { %v1765_v28 = vadd.f32 %v1762_v58, %v1752_v21  ;;  %v3391_v47 = vstv %s8164_s9  ;;  %v3140_v63 = vadd.f32 %v3138_v56, %v3133_v32  ;;  %v3157_v12 = vadd.f32 %v3155_v48, %v3150_v3  ;;  %v10563_v3 = vld [vmem:[#allocation172_spill] sm:$0xff]  ;;  %s8269_s9 = sld [smem:[#allocation3 + $0xf2]] }
 0x245   :  { %3048 = vst [vmem:[#allocation2 + $0x1b0] sm:$0xff] %v3046_v14  ;;  %v3395_v40 = vstv %s8166_s17  ;;  %v2488_v10 = vadd.f32 %v2486_v61, %v2322_v7  ;;  %v3174_v50 = vadd.f32 %v3172_v13, %v3167_v38  ;;  %v3191_v18 = vadd.f32 %v3189_v51, %v3184_v54  ;;  %s10562_s17 = sld [smem:[#allocation14_spill]]  ;;  %v10565_v21 = vld [vmem:[#allocation196_spill] sm:$0xff] }
 0x246   :  { %v10550_v43 = vrot.slane %v10549_v55, 1  ;;  %v10551_v8 = vrot.slane %v7380_v44, 1  ;;  %v10554_v56 = vrot.slane %v10553_v33, 2  ;;  %v10555_v23 = vrot.slane %v7385_v2, 2 }
 0x247   :  { %v10557_v25 = vstv %s10541_s25  ;;  %v10558_v61 = vstv %s10542_s6  ;;  %v10560_v7 = vrot.slane %v10559_v19, 1  ;;  %v10561_v32 = vrot.slane %v7399_v6, 1  ;;  %s10571_s25 = sld [smem:[#allocation81_spill]]  ;;  %s8241_s6 = sld [smem:[#allocation3 + $0x113]]  ;;  %v10578_v19 = vld [vmem:[#allocation12_spill] sm:$0xff] }
 0x248   :  { %v2498_v29 = vsel %vm55_vm0, %v10551_v8, %v10550_v43  ;;  %v2511_v39 = vsel %vm97_vm1, %v10555_v23, %v10554_v56  ;;  %v3194_v27 = vmul.f32 %v10557_v25, %v2995_v11  ;;  %v2678_v49 = vmul.f32 %v10558_v61, %v5360_v1  ;;  %v10576_v25 = vld [vmem:[#allocation174_spill] sm:$0xff] }
 0x249   :  { %v2690_v44 = vsel %vm55_vm0, %v10561_v32, %v10560_v7  ;;  %v10564_v5 = vrot.slane %v10563_v3, 2  ;;  %v10566_v38 = vrot.slane %v10565_v21, 2  ;;  %v10567_v54 = vstv %s10543_s30  ;;  %s8250_s30 = sld [smem:[#allocation3 + $0xca]] }
 0x24a   :  { %v3198_v60 = vmul.f32 %v10567_v54, %v2995_v11  ;;  %v10568_v46 = vstv %s10544_s21  ;;  %v10569_v15 = vstv %s10545_s11  ;;  %v10570_v58 = vstv %s10546_s29  ;;  %s8252_s21 = sld [smem:[#allocation3 + $0xd0]]  ;;  %s10585_s11 = sld [smem:[#allocation36_spill]] }
 0x24b   :  { %v2703_v2 = vsel %vm97_vm1, %v10566_v38, %v10564_v5  ;;  %v3205_v34 = vmul.f32 %v10568_v46, %v2995_v11  ;;  %v3212_v0 = vmul.f32 %v10569_v15, %v2995_v11  ;;  %v3216_v48 = vmul.f32 %v10570_v58, %v2995_v11  ;;  %s8257_s29 = sld [smem:[#allocation3 + $0xde]]  ;;  %10593 = sst [smem:[#allocation34_spill]] %s8269_s9 }
 0x24c   :  { %v10572_v37 = vstv %s10547_s16  ;;  %v10573_v14 = vstv %s10548_s1  ;;  %v3020_v51 = vmul.f32 0.1, %v3019_v62  ;;  %v2501_v55 = vadd.f32 %v2498_v29, %v2488_v10  ;;  %s8259_s16 = sld [smem:[#allocation3 + $0xdf]]  ;;  %s8263_s1 = sld [smem:[#allocation3 + $0xf0]] }
 0x24d   :  { %v3223_v6 = vmul.f32 %v10572_v37, %v2995_v11  ;;  %v3230_v13 = vmul.f32 %v10573_v14, %v2995_v11  ;;  %v3195_v43 = vadd.f32 %v3194_v27, %v3140_v63  ;;  %v10574_v8 = vstv %s10552_s22  ;;  %s8267_s22 = sld [smem:[#allocation3 + $0xf1]] }
 0x24e   :  { %v3234_v33 = vmul.f32 %v10574_v8, %v2995_v11  ;;  %v10575_v56 = vstv %s10556_s2  ;;  %v10577_v61 = vrot.slane %v10576_v25, 2  ;;  %v10579_v7 = vrot.slane %v10578_v19, 2  ;;  %s10584_s2 = sld [smem:[#allocation166_spill]]  ;;  %v10606_v25 = vld [vmem:[#allocation13_spill] sm:$0xff] }
 0x24f   :  { %v3248_v23 = vmul.f32 %v10575_v56, %v2995_v11  ;;  %v10580_v3 = vstv %s10562_s17  ;;  %v2514_v21 = vadd.f32 %v2511_v39, %v2501_v55  ;;  %10581 = sst [smem:[#allocation19_spill]] %s8250_s30  ;;  %v10583_v10 = vstv %s10571_s25  ;;  %s8261_s17 = sld [smem:[#allocation3 + $0xe0]]  ;;  %v10604_v56 = vld [vmem:[#allocation178_spill] sm:$0xff] }
 0x250   :  { %v1775_v32 = vsel %vm97_vm1, %v10579_v7, %v10577_v61  ;;  %v3252_v5 = vmul.f32 %v10580_v3, %v2995_v11  ;;  %10582 = sst [smem:[#allocation60_spill]] %s8252_s21  ;;  %v1942_v29 = vmul.f32 %v10583_v10, %v4900_v20  ;;  %v3200_v27 = vrot.slane %v3198_v60, 1  ;;  %s10592_s25 = sld [smem:[#allocation54_spill]] }
 0x251   :  { %v1778_v63 = vadd.f32 %v1775_v32, %v1765_v28  ;;  %v3213_v38 = vadd.f32 %v3212_v0, %v3157_v12  ;;  %v3218_v54 = vrot.slane %v3216_v48, 1  ;;  %v3231_v46 = vadd.f32 %v3230_v13, %v3174_v50  ;;  %10586 = sst [smem:[#allocation86_spill]] %s8257_s29  ;;  %v10594_v12 = vld [vmem:[#allocation176_spill] sm:$0xff]  ;;  %v10596_v0 = vld [vmem:[#allocation66_spill] sm:$0xff] }
 0x252   :  { %10587 = sst [smem:[#allocation37_spill]] %s8259_s16  ;;  %v3249_v15 = vadd.f32 %v3248_v23, %v3191_v18  ;;  %v3021_v39 = vmax.f32 %v3019_v62, %v3020_v51  ;;  %v2680_v58 = vadd.f32 %v2678_v49, %v2514_v21  ;;  %v3202_v37 = vadd.f32 %v3200_v27, %v3195_v43 }
 0x253   :  { %10589 = sst [smem:[#allocation42_spill]] %s8263_s1  ;;  %v1944_v28 = vadd.f32 %v1942_v29, %v1778_v63  ;;  %v3236_v14 = vrot.slane %v3234_v33, 1  ;;  %v10595_v50 = vrot.slane %v10594_v12, 1  ;;  %v10597_v18 = vrot.slane %v10596_v0, 1 }
 0x254   :  { %v10590_v20 = vstv %s10584_s2  ;;  %10591 = sst [smem:[#allocation92_spill]] %s8267_s22  ;;  %v3254_v49 = vrot.slane %v3252_v5, 1  ;;  %v10598_v48 = vstv %s10585_s11  ;;  %v2693_v51 = vadd.f32 %v2690_v44, %v2680_v58  ;;  %s10600_s2 = sld [smem:[#allocation75_spill]] }
 0x255   :  { %10588 = sst [smem:[#allocation25_spill]] %s8261_s17  ;;  %v3241_v60 = vmul.f32 %v10590_v20, %v2995_v11  ;;  %v1954_v62 = vsel %vm55_vm0, %v10597_v18, %v10595_v50  ;;  %v3259_v13 = vmul.f32 %v10598_v48, %v2995_v11  ;;  %v3207_v43 = vrot.slane %v3205_v34, 2  ;;  %s10610_s11 = sld [smem:[#allocation84_spill]] }
 0x256   :  { %v1957_v55 = vadd.f32 %v1954_v62, %v1944_v28  ;;  %v3220_v8 = vadd.f32 %v3218_v54, %v3213_v38  ;;  %v3238_v33 = vadd.f32 %v3236_v14, %v3231_v46  ;;  %v10605_v23 = vrot.slane %v10604_v56, 2  ;;  %v10611_v38 = vld [vmem:[#allocation175_spill] sm:$0xff]  ;;  %v10613_v46 = vld [vmem:[#allocation101_spill] sm:$0xff]  ;;  %v10617_v28 = vld [vmem:[#allocation197_spill] sm:$0xff] }
 0x257   :  { %v10607_v61 = vrot.slane %v10606_v25, 2  ;;  %v3256_v44 = vadd.f32 %v3254_v49, %v3249_v15  ;;  %v10608_v19 = vstv %s10592_s25  ;;  %v2706_v32 = vadd.f32 %v2703_v2, %v2693_v51  ;;  %s10621_s25 = sld [smem:[#allocation98_spill]] }
 0x258   :  { %v3024_v7 = vmul.f32 %v10608_v19, %v3021_v39  ;;  %v3225_v3 = vrot.slane %v3223_v6, 2  ;;  %v3243_v5 = vrot.slane %v3241_v60, 2  ;;  %v3402_v21 = vstv %s8241_s6  ;;  %v10615_v39 = vld [vmem:[#allocation177_spill] sm:$0xff]  ;;  %s8609_s6 = sld [smem:[#allocation3 + $0x15d]] }
 0x259   :  { %v1967_v11 = vsel %vm97_vm1, %v10607_v61, %v10605_v23  ;;  %v3209_v29 = vadd.f32 %v3207_v43, %v3202_v37  ;;  %v3261_v27 = vrot.slane %v3259_v13, 2  ;;  %v10612_v54 = vrot.slane %v10611_v38, 1 }
 0x25a   :  { %v1970_v34 = vadd.f32 %v1967_v11, %v1957_v55  ;;  %v10609_v63 = vstv %s10600_s2  ;;  %v10614_v15 = vrot.slane %v10613_v46, 1  ;;  %v10616_v58 = vrot.slane %v10615_v39, 2  ;;  %s8324_s2 = sld [smem:[#allocation3 + $0x166]]  ;;  %v10623_v11 = vld [vmem:[#allocation181_spill] sm:$0xff] }
 0x25b   :  { %v2870_v10 = vmul.f32 %v10609_v63, %v5530_v57  ;;  %v10618_v6 = vrot.slane %v10617_v28, 2  ;;  %v3227_v20 = vadd.f32 %v3225_v3, %v3220_v8  ;;  %v8307_v60 = vadd.f32 %v3243_v5, %v3238_v33  ;;  %v10627_v5 = vld [vmem:[#allocation182_spill] sm:$0xff]  ;;  %v8366_v28 = vld [vmem:[#allocation2 + $0x1b0] ss:$3 sm:$0xf] }
 0x25c   :  { %v2882_v2 = vsel %vm55_vm0, %v10614_v15, %v10612_v54  ;;  %v3087_v37 = vstv %s8250_s30  ;;  %v3090_v12 = vstv %s8252_s21  ;;  %v8311_v50 = vadd.f32 %v3261_v27, %v3256_v44  ;;  %s8326_s21 = sld [smem:[#allocation3 + $0x167]]  ;;  %s8572_s30 = sld [smem:[#allocation3 + $0x124]] }
 0x25d   :  { %v2895_v14 = vsel %vm97_vm1, %v10618_v6, %v10616_v58  ;;  %v10619_v0 = vstv %s7940_s12  ;;  %v3409_v62 = vstv %s8257_s29  ;;  %v3413_v49 = vstv %s8259_s16  ;;  %s8332_s12 = sld [smem:[#allocation3 + $0x168]]  ;;  %s10622_s29 = sld [smem:[#allocation27_spill]] }
 0x25e   :  { %v8315_v18 = vadd.f32 %v10619_v0, %v3024_v7  ;;  %v2872_v48 = vadd.f32 %v2870_v10, %v2706_v32  ;;  %v3420_v13 = vstv %s8261_s17  ;;  %v3427_v51 = vstv %s8263_s1  ;;  %s8334_s16 = sld [smem:[#allocation3 + $0x169]]  ;;  %s8491_s17 = sld [smem:[#allocation3 + $0x142]] }
 0x25f   :  { %v10620_v55 = vstv %s10610_s11  ;;  %v3431_v8 = vstv %s8267_s22  ;;  %v3438_v33 = vstv %s8269_s9  ;;  %v3445_v56 = vstv %s8278_s15  ;;  %s8343_s11 = sld [smem:[#allocation3 + $0x16a]]  ;;  %s10682_s9 = sld [smem:[#allocation6_spill]] }
 0x260   :  { %v2134_v43 = vmul.f32 %v10620_v55, %v4998_v53  ;;  %v3449_v23 = vstv %s8280_s7  ;;  %v3456_v25 = vstv %s8282_s10  ;;  %v3463_v61 = vstv %s8284_s4  ;;  %s8361_s10 = sld [smem:[#allocation3 + $0x16b]]  ;;  %s8487_s4 = sld [smem:[#allocation3 + $0x11e]] }
 0x261   :  { %v10624_v44 = vrot.slane %v10623_v11, 1  ;;  %v10625_v19 = vrot.slane %v7592_v42, 1  ;;  %v10626_v32 = vstv %s7951_s20  ;;  %v10628_v63 = vrot.slane %v10627_v5, 2  ;;  %v10631_v42 = vld [vmem:[#allocation184_spill] sm:$0xff]  ;;  %s10639_s20 = sld [smem:[#allocation88_spill]]  ;;  %s8503_s7 = sld [smem:[#allocation3 + $0x154]] }
 0x262   :  { %v2136_v53 = vadd.f32 %v2134_v43, %v1970_v34  ;;  %v3270_v3 = vmul.f32 %v10626_v32, %v8315_v18  ;;  %v10629_v10 = vrot.slane %v7597_v45, 2  ;;  %v10630_v27 = vstv %s10621_s25  ;;  %v10635_v45 = vld [vmem:[#allocation186_spill] sm:$0xff]  ;;  %s8448_s25 = sld [smem:[#allocation3 + $0x107]]  ;;  %s10697_s22 = sld [smem:[#allocation59_spill]] }
 0x263   :  { %v2146_v7 = vsel %vm55_vm0, %v10625_v19, %v10624_v44  ;;  %v2326_v38 = vmul.f32 %v10630_v27, %v5139_v4  ;;  %v10632_v54 = vrot.slane %v10631_v42, 1  ;;  %v10633_v46 = vrot.slane %v7615_v26, 1  ;;  %s8505_s15 = sld [smem:[#allocation3 + $0x11f]]  ;;  %s8517_s1 = sld [smem:[#allocation3 + $0x143]] }
 0x264   :  { %v2159_v34 = vsel %vm97_vm1, %v10629_v10, %v10628_v63  ;;  %v10634_v39 = vstv %s7949_s18  ;;  %v2885_v6 = vadd.f32 %v2882_v2, %v2872_v48  ;;  %v10636_v0 = vrot.slane %v10635_v45, 2  ;;  %s8401_s18 = sld [smem:[#allocation3 + $0x115]]  ;;  %10684 = sst [smem:[#allocation83_spill]] %s8491_s17 }
 0x265   :  { %v2338_v15 = vsel %vm55_vm0, %v10633_v46, %v10632_v54  ;;  %v3266_v58 = vmul.f32 %v10634_v39, %v8315_v18  ;;  %v10637_v55 = vrot.slane %v7674_v41, 2  ;;  %v10638_v43 = vstv %s10622_s29  ;;  %s10673_s29 = sld [smem:[#allocation31_spill]]  ;;  %s8540_s17 = sld [smem:[#allocation3 + $0x133]] }
 0x266   :  { %v8376_v26 = vmul.f32 %v10638_v43, %v5253_v16  ;;  %v10640_v11 = vstv %s7959_s24  ;;  %v10641_v19 = vstv %s7961_s14  ;;  %v10642_v2 = vstv %s7970_s13  ;;  %s8408_s13 = sld [smem:[#allocation3 + $0x116]]  ;;  %s8410_s14 = sld [smem:[#allocation3 + $0xcb]] }
 0x267   :  { %v2351_v4 = vsel %vm97_vm1, %v10637_v55, %v10636_v0  ;;  %v8381_v44 = vmul.f32 %v10640_v11, %v8315_v18  ;;  %v3284_v32 = vmul.f32 %v10641_v19, %v8315_v18  ;;  %v3288_v48 = vmul.f32 %v10642_v2, %v8315_v18  ;;  %s8416_s24 = sld [smem:[#allocation3 + $0xd1]]  ;;  %10681 = sst [smem:[#allocation11_spill]] %s8487_s4 }
 0x268   :  { %v10643_v41 = vstv %s7972_s5  ;;  %v10644_v63 = vstv %s7976_s28  ;;  %v10645_v10 = vstv %s7985_s23  ;;  %v2898_v42 = vadd.f32 %v2895_v14, %v2885_v6  ;;  %s8418_s23 = sld [smem:[#allocation3 + $0xe1]]  ;;  %s8423_s5 = sld [smem:[#allocation3 + $0xe2]] }
 0x269   :  { %v8392_v5 = vmul.f32 %v10643_v41, %v8315_v18  ;;  %v3302_v16 = vmul.f32 %v10644_v63, %v8315_v18  ;;  %v3306_v27 = vmul.f32 %v10645_v10, %v8315_v18  ;;  %v2149_v54 = vadd.f32 %v2146_v7, %v2136_v53  ;;  %s8425_s28 = sld [smem:[#allocation3 + $0xe3]]  ;;  %10665 = sst [smem:[#allocation141_spill]] %s8448_s25 }
 0x26a   :  { %v3267_v46 = vadd.f32 %v3266_v58, %v3209_v29  ;;  %v3272_v39 = vrot.slane %v3270_v3, 1  ;;  %v3285_v45 = vadd.f32 %v3284_v32, %v3227_v20  ;;  %v3052_v0 = vmul.f32 0.1, %v8366_v28  ;;  %10646 = sst [smem:[#allocation134_spill]] %s8401_s18  ;;  %s8542_s4 = sld [smem:[#allocation3 + $0x145]] }
 0x26b   :  { %v10647_v55 = vstv %s7996_s3  ;;  %v10648_v11 = vstv %s10639_s20  ;;  %v2162_v2 = vadd.f32 %v2159_v34, %v2149_v54  ;;  %v3565_v14 = vstv %s8324_s2  ;;  %s8430_s3 = sld [smem:[#allocation3 + $0xf3]]  ;;  %s8456_s2 = sld [smem:[#allocation3 + $0x117]] }
 0x26c   :  { %v3320_v43 = vmul.f32 %v10647_v55, %v8315_v18  ;;  %v3062_v19 = vadd.f32 %v10648_v11, %v2898_v42  ;;  %10649 = sst [smem:[#allocation145_spill]] %s8408_s13  ;;  %v10651_v29 = vstv %s7998_s19  ;;  %3567 = vst [vmem:[#allocation2 + $0x1e0] sm:$0x3f] %v3565_v14  ;;  %v3635_v20 = vstv %s8326_s21  ;;  %s8432_s19 = sld [smem:[#allocation3 + $0xf4]]  ;;  %v10658_v55 = vld [vmem:[#allocation183_spill] sm:$0xff] }
 0x26d   :  { %10650 = sst [smem:[#allocation152_spill]] %s8410_s14  ;;  %v3324_v53 = vmul.f32 %v10651_v29, %v8315_v18  ;;  %v3705_v7 = vstv %s8332_s12  ;;  %v3775_v3 = vstv %s8334_s16  ;;  %v2328_v32 = vadd.f32 %v2326_v38, %v2162_v2  ;;  %3637 = vst [vmem:[#allocation2 + $0x1e8] sm:$0x3f] %v3635_v20  ;;  %s8439_s21 = sld [smem:[#allocation3 + $0xf5]] }
 0x26e   :  { %10652 = sst [smem:[#allocation146_spill]] %s8416_s24  ;;  %v3066_v58 = vrot.slane %v3062_v19, 1  ;;  %v3073_v6 = vrot.slane %v3062_v19, 2  ;;  %3707 = vst [vmem:[#allocation2 + $0x1f0] sm:$0x3f] %v3705_v7  ;;  %v3845_v34 = vstv %s8343_s11  ;;  %v3290_v41 = vrot.slane %v3288_v48, 1 }
 0x26f   :  { %10653 = sst [smem:[#allocation132_spill]] %s8418_s23  ;;  %3777 = vst [vmem:[#allocation2 + $0x1f8] sm:$0x3f] %v3775_v3  ;;  %v3303_v63 = vadd.f32 %v3302_v16, %v8307_v60  ;;  %v3053_v10 = vmax.f32 %v8366_v28, %v3052_v0  ;;  %3847 = vst [vmem:[#allocation2 + $0x200] sm:$0x3f] %v3845_v34  ;;  %v3915_v38 = vstv %s8361_s10  ;;  %v3308_v42 = vrot.slane %v3306_v27, 1 }
 0x270   :  { %10654 = sst [smem:[#allocation69_spill]] %s8423_s5  ;;  %v3321_v54 = vadd.f32 %v3320_v43, %v8311_v50  ;;  %v10659_v11 = vrot.slane %v10658_v55, 1  ;;  %v2341_v48 = vadd.f32 %v2338_v15, %v2328_v32  ;;  %s8441_s16 = sld [smem:[#allocation3 + $0x105]]  ;;  %3917 = vst [vmem:[#allocation2 + $0x208] sm:$0x3f] %v3915_v38  ;;  %v3274_v60 = vadd.f32 %v3272_v39, %v3267_v46  ;;  %v10677_v34 = vld [vmem:[#allocation190_spill] sm:$0xff] }
 0x271   :  { %10655 = sst [smem:[#allocation8_spill]] %s8425_s28  ;;  %v3292_v28 = vadd.f32 %v3290_v41, %v3285_v45  ;;  %v10663_v16 = vstv %s7987_s8  ;;  %s8446_s10 = sld [smem:[#allocation3 + $0x106]]  ;;  %v3326_v50 = vrot.slane %v3324_v53, 1  ;;  %v10666_v15 = vstv %s8009_s26 }
 0x272   :  { %10656 = sst [smem:[#allocation135_spill]] %s8430_s3  ;;  %v3068_v2 = vsel %vm55_vm0, %v3066_v58, %v10659_v11  ;;  %v3313_v0 = vmul.f32 %v10663_v16, %v8315_v18  ;;  %v3331_v43 = vmul.f32 %v10666_v15, %v8315_v18  ;;  %v10667_v14 = vrot.slane %v10658_v55, 2  ;;  %s8458_s12 = sld [smem:[#allocation3 + $0x118]]  ;;  %v10674_v58 = vld [vmem:[#allocation189_spill] sm:$0xff]  ;;  %v10686_v11 = vld [vmem:[#allocation191_spill] sm:$0xff] }
 0x273   :  { %10657 = sst [smem:[#allocation136_spill]] %s8432_s19  ;;  %v3071_v27 = vmax.f32 %v3062_v19, %v3068_v2  ;;  %v2354_v20 = vadd.f32 %v2351_v4, %v2341_v48  ;;  %v3310_v46 = vadd.f32 %v3308_v42, %v3303_v63  ;;  %v3056_v39 = vmul.f32 %v3055_v31, %v3053_v10  ;;  %s8463_s8 = sld [smem:[#allocation3 + $0x119]]  ;;  %v10699_v15 = vld [vmem:[#allocation193_spill] sm:$0xff] }
 0x274   :  { %10660 = sst [smem:[#allocation15_spill]] %s8439_s21  ;;  %v3075_v29 = vsel %vm97_vm1, %v3073_v6, %v10667_v14  ;;  %v3467_v19 = vstv %s8401_s18  ;;  %s8465_s11 = sld [smem:[#allocation3 + $0x11a]]  ;;  %v3279_v18 = vrot.slane %v8381_v44, 2  ;;  %v3297_v53 = vrot.slane %v8392_v5, 2 }
 0x275   :  { %10668 = sst [smem:[#allocation9_spill]] %s8456_s2  ;;  %v3078_v45 = vmax.f32 %v3071_v27, %v3075_v29  ;;  %v3328_v7 = vadd.f32 %v3326_v50, %v3321_v54  ;;  %v2520_v4 = vadd.f32 %v8376_v26, %v2354_v20  ;;  %s8472_s20 = sld [smem:[#allocation3 + $0x11c]]  ;;  %v3315_v31 = vrot.slane %v3313_v0, 2  ;;  %v10691_v0 = vld [vmem:[#allocation192_spill] sm:$0xff] }
 0x276   :  { %10662 = sst [smem:[#allocation18_spill]] %s8441_s16  ;;  %s8470_s26 = sld [smem:[#allocation3 + $0x11b]]  ;;  %v3474_v3 = vstv %s8408_s13  ;;  %v10675_v6 = vrot.slane %v10674_v58, 1  ;;  %v10676_v32 = vrot.slane %v7725_v59, 1  ;;  %v10678_v5 = vrot.slane %v10677_v34, 2 }
 0x277   :  { %10664 = sst [smem:[#allocation165_spill]] %s8446_s10  ;;  %3080 = vst [vmem:[#allocation2 + $0x1c0] sm:$0xff] %v3078_v45  ;;  %v10679_v41 = vrot.slane %v7770_v52, 2  ;;  %s8485_s18 = sld [smem:[#allocation3 + $0x11d]]  ;;  %v3281_v63 = vadd.f32 %v3279_v18, %v3274_v60  ;;  %v3299_v10 = vadd.f32 %v3297_v53, %v3292_v28  ;;  %v3333_v38 = vrot.slane %v3331_v43, 2 }
 0x278   :  { %10669 = sst [smem:[#allocation150_spill]] %s8458_s12  ;;  %v2530_v44 = vsel %vm55_vm0, %v10676_v32, %v10675_v6  ;;  %s8489_s13 = sld [smem:[#allocation3 + $0x130]]  ;;  %v3317_v59 = vadd.f32 %v3315_v31, %v3310_v46  ;;  %v3059_v52 = vadd.f32 %v3058_v24, %v3056_v39  ;;  %v10685_v54 = vstv %s10673_s29 }
 0x279   :  { %10670 = sst [smem:[#allocation153_spill]] %s8463_s8  ;;  %v2543_v26 = vsel %vm97_vm1, %v10679_v41, %v10678_v5  ;;  %v2533_v42 = vadd.f32 %v2530_v44, %v2520_v4  ;;  %v2710_v55 = vmul.f32 %v10685_v54, %v5360_v1  ;;  %v10687_v2 = vrot.slane %v10686_v11, 1 }
 0x27a   :  { %10671 = sst [smem:[#allocation91_spill]] %s8465_s11  ;;  %v10688_v48 = vrot.slane %v7775_v17, 1  ;;  %v3335_v28 = vadd.f32 %v3333_v38, %v3328_v7  ;;  %v10692_v24 = vrot.slane %v10691_v0, 2  ;;  %v10693_v27 = vrot.slane %v7780_v30, 2  ;;  %s8515_s29 = sld [smem:[#allocation3 + $0x131]]  ;;  %v10702_v30 = vld [vmem:[#allocation194_spill] sm:$0xff] }
 0x27b   :  { %10689 = sst [smem:[#allocation30_spill]] %s8503_s7  ;;  %v2546_v16 = vadd.f32 %v2543_v26, %v2533_v42  ;;  %v10694_v50 = vstv %s10682_s9  ;;  %v10700_v43 = vrot.slane %v10699_v15, 1  ;;  %v10701_v14 = vrot.slane %v7820_v9, 1  ;;  %s10705_s9 = sld [smem:[#allocation47_spill]] }
 0x27c   :  { %10672 = sst [smem:[#allocation10_spill]] %s8470_s26  ;;  %v2722_v60 = vsel %vm55_vm0, %v10688_v48, %v10687_v2  ;;  %v2735_v1 = vsel %vm97_vm1, %v10693_v27, %v10692_v24  ;;  %v2902_v17 = vmul.f32 %v10694_v50, %v5530_v57  ;;  %v10703_v20 = vrot.slane %v10702_v30, 2  ;;  %s8583_s7 = sld [smem:[#allocation3 + $0x15a]] }
 0x27d   :  { %10680 = sst [smem:[#allocation24_spill]] %s8485_s18  ;;  %v2914_v29 = vsel %vm55_vm0, %v10701_v14, %v10700_v43  ;;  %v10704_v46 = vrot.slane %v7865_v22, 2  ;;  %v3119_v57 = vstv %s8410_s14  ;;  %v3122_v45 = vstv %s8416_s24  ;;  %s8551_s24 = sld [smem:[#allocation3 + $0x157]] }
 0x27e   :  { %10683 = sst [smem:[#allocation45_spill]] %s8489_s13  ;;  %v2712_v9 = vadd.f32 %v2710_v55, %v2546_v16  ;;  %v3481_v18 = vstv %s8418_s23  ;;  %v3485_v53 = vstv %s8423_s5  ;;  %v3492_v7 = vstv %s8425_s28  ;;  %s8553_s14 = sld [smem:[#allocation3 + $0x122]] }
 0x27f   :  { %10690 = sst [smem:[#allocation164_spill]] %s8505_s15  ;;  %v8529_v39 = vsel %vm97_vm1, %v10704_v46, %v10703_v20  ;;  %s8535_s15 = sld [smem:[#allocation3 + $0x121]]  ;;  %v10714_v22 = vstv %s8020_s0  ;;  %v10715_v31 = vstv %s10695_s27  ;;  %v10716_v6 = vstv %s10697_s22 }
 0x280   :  { %10696 = sst [smem:[#allocation48_spill]] %s8515_s29  ;;  %s8533_s29 = sld [smem:[#allocation3 + $0x155]]  ;;  %v3338_v4 = vmul.f32 %v10714_v22, %v3059_v52  ;;  %v3342_v58 = vmul.f32 %v10715_v31, %v3059_v52  ;;  %v3356_v32 = vmul.f32 %v10716_v6, %v3059_v52  ;;  %v3499_v44 = vstv %s8430_s3  ;;  %v8605_v22 = vld [vmem:[#allocation2 + $0x1c0] ss:$3 sm:$0xf] }
 0x281   :  { %10698 = sst [smem:[#allocation14_spill]] %s8517_s1  ;;  %s10708_s1 = sld [smem:[#allocation65_spill]]  ;;  %v10719_v34 = vstv %s10705_s9  ;;  %v3374_v41 = vmul.f32 %v3373_v35, %v3059_v52  ;;  %v2725_v42 = vadd.f32 %v2722_v60, %v2712_v9  ;;  %v3392_v55 = vmul.f32 %v3391_v47, %v3059_v52 }
 0x282   :  { %10711 = sst [smem:[#allocation36_spill]] %s8540_s17  ;;  %v3360_v5 = vmul.f32 %v10719_v34, %v3059_v52  ;;  %s10723_s27 = sld [smem:[#allocation28_spill]]  ;;  %v3339_v54 = vadd.f32 %v3338_v4, %v3281_v63  ;;  %v3396_v11 = vmul.f32 %v3395_v40, %v3059_v52  ;;  %v3503_v2 = vstv %s8432_s19 }
 0x283   :  { %10713 = sst [smem:[#allocation54_spill]] %s8542_s4  ;;  %s10721_s0 = sld [smem:[#allocation78_spill]]  ;;  %v3357_v35 = vadd.f32 %v3356_v32, %v3299_v10  ;;  %v3375_v48 = vadd.f32 %v3374_v41, %v3317_v59  ;;  %v2738_v60 = vadd.f32 %v2735_v1, %v2725_v42  ;;  %v3510_v16 = vstv %s8439_s21 }
 0x284   :  { %10717 = sst [smem:[#allocation75_spill]] %s8551_s24  ;;  %s8561_s28 = sld [smem:[#allocation3 + $0x134]]  ;;  %v3344_v63 = vrot.slane %v3342_v58, 1  ;;  %v3393_v27 = vadd.f32 %v3392_v55, %v3335_v28  ;;  %v3362_v10 = vrot.slane %v3360_v5, 1  ;;  %v3385_v1 = vmul.f32 %v3384_v36, %v3059_v52 }
 0x285   :  { %10709 = sst [smem:[#allocation166_spill]] %s8535_s15  ;;  %s8563_s5 = sld [smem:[#allocation3 + $0x146]]  ;;  %v2904_v50 = vadd.f32 %v2902_v17, %v2738_v60  ;;  %v3398_v43 = vrot.slane %v3396_v11, 1  ;;  %v3403_v28 = vmul.f32 %v3402_v21, %v3059_v52  ;;  %v3517_v14 = vstv %s8441_s16 }
 0x286   :  { %10707 = sst [smem:[#allocation81_spill]] %s8533_s29  ;;  %s8570_s22 = sld [smem:[#allocation3 + $0x158]]  ;;  %v3346_v15 = vadd.f32 %v3344_v63, %v3339_v54  ;;  %v3364_v30 = vadd.f32 %v3362_v10, %v3357_v35  ;;  %v3521_v17 = vstv %s8446_s10  ;;  %v3528_v21 = vstv %s8448_s25 }
 0x287   :  { %10718 = sst [smem:[#allocation84_spill]] %s8553_s14  ;;  %v10720_v26 = vstv %s10708_s1  ;;  %s8575_s1 = sld [smem:[#allocation3 + $0x136]]  ;;  %v2917_v36 = vadd.f32 %v2914_v29, %v2904_v50  ;;  %v3400_v9 = vadd.f32 %v3398_v43, %v3393_v27  ;;  %v3387_v31 = vrot.slane %v3385_v1, 2 }
 0x288   :  { %v3378_v38 = vmul.f32 %v10720_v26, %v3059_v52  ;;  %10727 = sst [smem:[#allocation21_spill]] %s8572_s30  ;;  %s8577_s3 = sld [smem:[#allocation3 + $0x148]]  ;;  %v10731_v40 = vstv %s10723_s27  ;;  %v3539_v58 = vstv %s8458_s12  ;;  %v3405_v32 = vrot.slane %v3403_v28, 2 }
 0x289   :  { %v10730_v47 = vstv %s10721_s0  ;;  %v3367_v24 = vmul.f32 %v10731_v40, %v3059_v52  ;;  %10732 = sst [smem:[#allocation43_spill]] %s8583_s7  ;;  %s8585_s13 = sld [smem:[#allocation3 + $0x125]]  ;;  %v2930_v29 = vadd.f32 %v8529_v39, %v2917_v36  ;;  %v3546_v34 = vstv %s8463_s8 }
 0x28a   :  { %10722 = sst [smem:[#allocation98_spill]] %s8561_s28  ;;  %v3349_v0 = vmul.f32 %v10730_v47, %v3059_v52  ;;  %v3380_v59 = vrot.slane %v3378_v38, 1  ;;  %s8589_s21 = sld [smem:[#allocation3 + $0x137]]  ;;  %v3535_v52 = vstv %s8456_s2  ;;  %v3553_v5 = vstv %s8465_s11 }
 0x28b   :  { %10724 = sst [smem:[#allocation27_spill]] %s8563_s5  ;;  %s8591_s19 = sld [smem:[#allocation3 + $0x149]]  ;;  %v3369_v4 = vrot.slane %v3367_v24, 2  ;;  %v3084_v26 = vmul.f32 0.1, %v8605_v22  ;;  %v3556_v38 = vstv %s8470_s26  ;;  %v8635_v42 = vadd.f32 %v3405_v32, %v3400_v9 }
 0x28c   :  { %10725 = sst [smem:[#allocation88_spill]] %s8570_s22  ;;  %s8596_s0 = sld [smem:[#allocation3 + $0x15b]]  ;;  %v3382_v20 = vadd.f32 %v3380_v59, %v3375_v48  ;;  %v3351_v46 = vrot.slane %v3349_v0, 2  ;;  %v3559_v54 = vstv %s8472_s20  ;;  %v3562_v55 = vstv %s8485_s18 }
 0x28d   :  { %10728 = sst [smem:[#allocation31_spill]] %s8575_s1  ;;  %s8598_s27 = sld [smem:[#allocation3 + $0x127]]  ;;  %v8625_v39 = vadd.f32 %v3369_v4, %v3364_v30  ;;  %v3599_v40 = vstv %s8533_s29  ;;  %v3639_v24 = vstv %s8535_s15  ;;  %v3085_v27 = vmax.f32 %v8605_v22, %v3084_v26  ;;  %v10768_v26 = vld [vmem:[#allocation195_spill] sm:$0xff] }
 0x28e   :  { %10729 = sst [smem:[#allocation6_spill]] %s8577_s3  ;;  %s8601_s9 = sld [smem:[#allocation3 + $0x139]]  ;;  %v8617_v6 = vadd.f32 %v3351_v46, %v3346_v15  ;;  %v8627_v41 = vadd.f32 %v3387_v31, %v3382_v20  ;;  %v3642_v1 = vstv %s8540_s17  ;;  %v3646_v50 = vstv %s8542_s4 }
 0x28f   :  { %10733 = sst [smem:[#allocation59_spill]] %s8585_s13  ;;  %s8603_s23 = sld [smem:[#allocation3 + $0x14b]]  ;;  %v3650_v15 = vstv %s8551_s24  ;;  %v3658_v43 = vstv %s8553_s14  ;;  %v3661_v28 = vstv %s8561_s28  ;;  %v3088_v32 = vmul.f32 %v3087_v37, %v3085_v27 }
 0x290   :  { %10734 = sst [smem:[#allocation47_spill]] %s8589_s21  ;;  %s8613_s10 = sld [smem:[#allocation3 + $0x128]]  ;;  %v3731_v9 = vstv %s8589_s21  ;;  %v10775_v37 = vrot.slane %v10768_v26, 2 }
 0x291   :  { %10735 = sst [smem:[#allocation87_spill]] %s8591_s19  ;;  %s8615_s16 = sld [smem:[#allocation3 + $0x13a]] }
 0x292   :  { %10736 = sst [smem:[#allocation65_spill]] %s8596_s0  ;;  %s10744_s2 = sld [smem:[#allocation45_spill]] }
 0x293   :  { %10737 = sst [smem:[#allocation16_spill]] %s8598_s27  ;;  %s10745_s25 = sld [smem:[#allocation83_spill]] }
 0x294   :  { %10738 = sst [smem:[#allocation71_spill]] %s8601_s9  ;;  %s10747_s9 = sld [smem:[#allocation30_spill]] }
 0x295   :  { %10739 = sst [smem:[#allocation78_spill]] %s8603_s23  ;;  %s10743_s23 = sld [smem:[#allocation11_spill]] }
 0x296   :  { %10740 = sst [smem:[#allocation28_spill]] %s8609_s6  ;;  %s8621_s6 = sld [smem:[#allocation3 + $0x14c]] }
 0x297   :  { %10741 = sst [smem:[#allocation51_spill]] %s8613_s10  ;;  %s8623_s27 = sld [smem:[#allocation3 + $0x15e]] }
 0x298   :  { %10742 = sst [smem:[#allocation198_spill]] %s8615_s16  ;;  %s10749_s12 = sld [smem:[#allocation164_spill]]  ;;  %v3572_v35 = vstv %s10744_s2 }
 0x299   :  { %s10750_s16 = sld [smem:[#allocation48_spill]]  ;;  %s10751_s10 = sld [smem:[#allocation14_spill]]  ;;  %v3576_v48 = vstv %s10745_s25 }
 0x29a   :  { %s8631_s0 = sld [smem:[#allocation3 + $0x12a]]  ;;  %s8633_s11 = sld [smem:[#allocation3 + $0x13c]]  ;;  %v3580_v60 = vstv %s10747_s9 }
 0x29b   :  { %v3569_v11 = vstv %s10743_s23  ;;  %s10754_s8 = sld [smem:[#allocation7_spill]]  ;;  %s8648_s26 = sld [smem:[#allocation3 + $0x160]] }
 0x29c   :  { %10746 = sst [smem:[#allocation199_spill]] %s8621_s6  ;;  %s8642_s6 = sld [smem:[#allocation3 + $0x18a]] }
 0x29d   :  { %10748 = sst [smem:[#allocation200_spill]] %s8623_s27  ;;  %s8640_s27 = sld [smem:[#allocation3 + $0x14e]] }
 0x29e   :  { %v3588_v63 = vstv %s10749_s12  ;;  %s8656_s18 = sld [smem:[#allocation3 + $0x13d]]  ;;  %s8658_s23 = sld [smem:[#allocation3 + $0x14f]] }
 0x29f   :  { %v3591_v47 = vstv %s10750_s16  ;;  %v3595_v0 = vstv %s10751_s10  ;;  %s8665_s9 = sld [smem:[#allocation3 + $0x161]]  ;;  %s8667_s10 = sld [smem:[#allocation3 + $0x12d]] }
 0x2a0   :  { %10752 = sst [smem:[#allocation201_spill]] %s8631_s0  ;;  %s8673_s25 = sld [smem:[#allocation3 + $0x13f]] }
 0x2a1   :  { %10753 = sst [smem:[#allocation202_spill]] %s8633_s11  ;;  %s8650_s11 = sld [smem:[#allocation3 + $0x12b]]  ;;  %v10756_v10 = vstv %s10754_s8 }
 0x2a2   :  { %v3094_v59 = vadd.f32 %v10756_v10, %v2930_v29  ;;  %s8675_s8 = sld [smem:[#allocation3 + $0x151]]  ;;  %s10760_s4 = sld [smem:[#allocation65_spill]]  ;;  %v10769_v10 = vrot.slane %v10768_v26, 1  ;;  %v3985_v22 = vstv %s8642_s6 }
 0x2a3   :  { %10755 = sst [smem:[#allocation7_spill]] %s8640_s27  ;;  %s8679_s17 = sld [smem:[#allocation3 + $0x163]]  ;;  %3987 = vst [vmem:[#allocation2 + $0x210] sm:$0xff] %v3985_v22  ;;  %3988 = vst [vmem:[#allocation2 + $0x218] sm:$0xff] %v3985_v22 }
 0x2a4   :  { %v3098_v20 = vrot.slane %v3094_v59, 1  ;;  %v3105_v36 = vrot.slane %v3094_v59, 2  ;;  %s10762_s15 = sld [smem:[#allocation16_spill]]  ;;  %s8681_s16 = sld [smem:[#allocation3 + $0x12e]]  ;;  %3989 = vst [vmem:[#allocation2 + $0x220] sm:$0x7] %v3985_v22 }
 0x2a5   :  { %10757 = sst [smem:[#allocation203_spill]] %s8665_s9  ;;  %s8687_s28 = sld [smem:[#allocation3 + $0x140]] }
 0x2a6   :  { %10759 = sst [smem:[#allocation19_spill]] %s8673_s25  ;;  %v3100_v46 = vsel %vm55_vm0, %v3098_v20, %v10769_v10  ;;  %s8698_s22 = sld [smem:[#allocation3 + $0x164]]  ;;  %v3107_v27 = vsel %vm97_vm1, %v3105_v36, %v10775_v37  ;;  %v3091_v37 = vadd.f32 %v3090_v12, %v3088_v32 }
 0x2a7   :  { %s10764_s5 = sld [smem:[#allocation71_spill]]  ;;  %s8700_s3 = sld [smem:[#allocation3 + $0x120]]  ;;  %v3103_v31 = vmax.f32 %v3094_v59, %v3100_v46 }
 0x2a8   :  { %s8689_s2 = sld [smem:[#allocation3 + $0x152]]  ;;  %s10772_s7 = sld [smem:[#allocation51_spill]]  ;;  %v3739_v29 = vstv %s10760_s4  ;;  %v3414_v36 = vmul.f32 %v3413_v49, %v3091_v37  ;;  %v3410_v32 = vmul.f32 %v3409_v62, %v3091_v37  ;;  %v3446_v49 = vmul.f32 %v3445_v56, %v3091_v37 }
 0x2a9   :  { %10761 = sst [smem:[#allocation204_spill]] %s8679_s17  ;;  %s8704_s30 = sld [smem:[#allocation3 + $0x132]]  ;;  %v3110_v59 = vmax.f32 %v3103_v31, %v3107_v27  ;;  %v3432_v31 = vmul.f32 %v3431_v8, %v3091_v37  ;;  %v3450_v26 = vmul.f32 %v3449_v23, %v3091_v37  ;;  %v3421_v23 = vmul.f32 %v3420_v13, %v3091_v37 }
 0x2aa   :  { %10763 = sst [smem:[#allocation16_spill]] %s8681_s16  ;;  %v3779_v4 = vstv %s10762_s15  ;;  %s8713_s12 = sld [smem:[#allocation3 + $0x144]]  ;;  %v3411_v62 = vadd.f32 %v3410_v32, %v8617_v6  ;;  %v3416_v56 = vrot.slane %v3414_v36, 1  ;;  %v3439_v20 = vmul.f32 %v3438_v33, %v3091_v37 }
 0x2ab   :  { %s8715_s4 = sld [smem:[#allocation3 + $0x156]]  ;;  %s8720_s6 = sld [smem:[#allocation3 + $0x123]]  ;;  %3112 = vst [vmem:[#allocation2 + $0x1d0] sm:$0xff] %v3110_v59  ;;  %v3428_v59 = vmul.f32 %v3427_v51, %v3091_v37  ;;  %v3447_v12 = vadd.f32 %v3446_v49, %v8627_v41  ;;  %v3434_v6 = vrot.slane %v3432_v31, 1  ;;  %v3468_v32 = vmul.f32 %v3467_v19, %v3091_v37 }
 0x2ac   :  { %10770 = sst [smem:[#allocation205_spill]] %s8698_s22  ;;  %s8722_s14 = sld [smem:[#allocation3 + $0x135]]  ;;  %v3452_v36 = vrot.slane %v3450_v26, 1  ;;  %v3457_v13 = vmul.f32 %v3456_v25, %v3091_v37  ;;  %v3418_v49 = vadd.f32 %v3416_v56, %v3411_v62  ;;  %v3423_v26 = vrot.slane %v3421_v23, 2 }
 0x2ad   :  { %10771 = sst [smem:[#allocation206_spill]] %s8700_s3  ;;  %s8737_s21 = sld [smem:[#allocation3 + $0x147]]  ;;  %v3429_v51 = vadd.f32 %v3428_v59, %v8625_v39  ;;  %v3464_v39 = vmul.f32 %v3463_v61, %v3091_v37  ;;  %v3475_v61 = vmul.f32 %v3474_v3, %v3091_v37  ;;  %v3441_v25 = vrot.slane %v3439_v20, 2 }
 0x2ae   :  { %10767 = sst [smem:[#allocation71_spill]] %s8689_s2  ;;  %s8739_s19 = sld [smem:[#allocation3 + $0x159]]  ;;  %v3454_v31 = vadd.f32 %v3452_v36, %v3447_v12  ;;  %v3470_v10 = vrot.slane %v3468_v32, 1  ;;  %v3459_v41 = vrot.slane %v3457_v13, 2  ;;  %v3425_v12 = vadd.f32 %v3423_v26, %v3418_v49 }
 0x2af   :  { %s8750_s25 = sld [smem:[#allocation3 + $0x126]]  ;;  %s8752_s9 = sld [smem:[#allocation3 + $0x138]]  ;;  %v3436_v46 = vadd.f32 %v3434_v6, %v3429_v51  ;;  %v3465_v8 = vadd.f32 %v3464_v39, %v8635_v42 }
 0x2b0   :  { %10779 = sst [smem:[#allocation51_spill]] %s8713_s12  ;;  %s8761_s24 = sld [smem:[#allocation3 + $0x14a]] }
 0x2b1   :  { %10780 = sst [smem:[#allocation60_spill]] %s8715_s4  ;;  %s8769_s2 = sld [smem:[#allocation3 + $0x15c]]  ;;  %v3443_v3 = vadd.f32 %v3441_v25, %v3436_v46  ;;  %v3472_v37 = vadd.f32 %v3470_v10, %v3465_v8 }
 0x2b2   :  { %10781 = sst [smem:[#allocation207_spill]] %s8720_s6  ;;  %s8771_s1 = sld [smem:[#allocation3 + $0x129]]  ;;  %v3115_v27 = vld [vmem:[#allocation2 + $0x1d0] ss:$3 sm:$0xf] }
 0x2b3   :  { %10782 = sst [smem:[#allocation208_spill]] %s8722_s14  ;;  %s8777_s0 = sld [smem:[#allocation3 + $0x13b]]  ;;  %v3116_v59 = vmul.f32 0.1, %v3115_v27 }
 0x2b4   :  { %10787 = sst [smem:[#allocation37_spill]] %s8737_s21  ;;  %s8806_s21 = sld [smem:[#allocation3 + $0x15f]] }
 0x2b5   :  { %10788 = sst [smem:[#allocation86_spill]] %s8739_s19  ;;  %s8784_s29 = sld [smem:[#allocation3 + $0x14d]]  ;;  %v3117_v30 = vmax.f32 %v3115_v27, %v3116_v59  ;;  %v3747_v19 = vstv %s8750_s25  ;;  %v3750_v22 = vstv %s8752_s9 }
 0x2b6   :  { %10791 = sst [smem:[#allocation42_spill]] %s8750_s25  ;;  %v3754_v62 = vstv %s8761_s24  ;;  %s8810_s4 = sld [smem:[#allocation3 + $0x12c]] }
 0x2b7   :  { %10792 = sst [smem:[#allocation92_spill]] %s8752_s9  ;;  %v3120_v33 = vmul.f32 %v3119_v57, %v3117_v30  ;;  %v3758_v42 = vstv %s8769_s2  ;;  %v3461_v57 = vadd.f32 %v3459_v41, %v3454_v31  ;;  %v3477_v30 = vrot.slane %v3475_v61, 2  ;;  %s8822_s17 = sld [smem:[#allocation3 + $0x150]] }
 0x2b8   :  { %10795 = sst [smem:[#allocation22_spill]] %s8761_s24  ;;  %v3817_v27 = vstv %s8771_s1  ;;  %s8832_s3 = sld [smem:[#allocation3 + $0x162]] }
 0x2b9   :  { %10798 = sst [smem:[#allocation128_spill]] %s8769_s2  ;;  %v3123_v51 = vadd.f32 %v3122_v45, %v3120_v33  ;;  %v3820_v20 = vstv %s8777_s0  ;;  %s8812_s2 = sld [smem:[#allocation3 + $0x13e]] }
 0x2ba   :  { %10799 = sst [smem:[#allocation25_spill]] %s8771_s1  ;;  %s8834_s16 = sld [smem:[#allocation3 + $0x12f]] }
 0x2bb   :  { %10801 = sst [smem:[#allocation34_spill]] %s8777_s0  ;;  %v3824_v56 = vstv %s8784_s29  ;;  %v3482_v23 = vmul.f32 %v3481_v18, %v3123_v51  ;;  %v3486_v46 = vmul.f32 %v3485_v53, %v3123_v51  ;;  %v3493_v10 = vmul.f32 %v3492_v7, %v3123_v51  ;;  %s8844_s1 = sld [smem:[#allocation3 + $0x141]] }
 0x2bc   :  { %10803 = sst [smem:[#allocation125_spill]] %s8784_s29  ;;  %v3500_v8 = vmul.f32 %v3499_v44, %v3123_v51  ;;  %v3504_v45 = vmul.f32 %v3503_v2, %v3123_v51  ;;  %v3511_v6 = vmul.f32 %v3510_v16, %v3123_v51  ;;  %v3518_v39 = vmul.f32 %v3517_v14, %v3123_v51  ;;  %s10838_s25 = sld [smem:[#allocation27_spill]] }
 0x2bd   :  { %10814 = sst [smem:[#allocation134_spill]] %s8806_s21  ;;  %v3522_v32 = vmul.f32 %v3521_v17, %v3123_v51  ;;  %v3479_v18 = vadd.f32 %v3477_v30, %v3472_v37  ;;  %v3483_v53 = vadd.f32 %v3482_v23, %v3425_v12  ;;  %v3488_v7 = vrot.slane %v3486_v46, 1  ;;  %s10839_s9 = sld [smem:[#allocation21_spill]] }
 0x2be   :  { %10815 = sst [smem:[#allocation40_spill]] %s8810_s4  ;;  %v3501_v44 = vadd.f32 %v3500_v8, %v3443_v3  ;;  %v3495_v59 = vrot.slane %v3493_v10, 2  ;;  %v3506_v36 = vrot.slane %v3504_v45, 1  ;;  %v3519_v2 = vadd.f32 %v3518_v39, %v3461_v57  ;;  %s10840_s24 = sld [smem:[#allocation31_spill]] }
 0x2bf   :  { %10816 = sst [smem:[#allocation145_spill]] %s8812_s2  ;;  %v3524_v13 = vrot.slane %v3522_v32, 1  ;;  %v3490_v16 = vadd.f32 %v3488_v7, %v3483_v53  ;;  %v3529_v14 = vmul.f32 %v3528_v21, %v3123_v51  ;;  %v3536_v17 = vmul.f32 %v3535_v52, %v3123_v51  ;;  %s10841_s14 = sld [smem:[#allocation88_spill]] }
 0x2c0   :  { %v3540_v33 = vmul.f32 %v3539_v58, %v3123_v51  ;;  %v3508_v41 = vadd.f32 %v3506_v36, %v3501_v44  ;;  %v3513_v49 = vrot.slane %v3511_v6, 2  ;;  %v3547_v61 = vmul.f32 %v3546_v34, %v3123_v51  ;;  %s10842_s12 = sld [smem:[#allocation6_spill]]  ;;  %s10843_s6 = sld [smem:[#allocation59_spill]] }
 0x2c1   :  { %v3526_v31 = vadd.f32 %v3524_v13, %v3519_v2  ;;  %v3497_v26 = vadd.f32 %v3495_v59, %v3490_v16  ;;  %v3531_v25 = vrot.slane %v3529_v14, 2  ;;  %v3537_v12 = vadd.f32 %v3536_v17, %v3479_v18  ;;  %v3584_v59 = vld [vmem:[#allocation2 + $0x1e0] ss:$2 sm:$0x3]  ;;  %s10854_s29 = sld [smem:[#allocation78_spill]]  ;;  %s10857_s13 = sld [smem:[#allocation28_spill]] }
 0x2c2   :  { %v3542_v3 = vrot.slane %v3540_v33, 1  ;;  %v3515_v21 = vadd.f32 %v3513_v49, %v3508_v41  ;;  %v3828_v52 = vstv %s8806_s21  ;;  %v3887_v58 = vstv %s8810_s4  ;;  %v3603_v13 = vld [vmem:[#allocation2 + $0x1e1] ss:$2 sm:$0x3]  ;;  %s10849_s4 = sld [smem:[#allocation87_spill]]  ;;  %s10858_s27 = sld [smem:[#allocation198_spill]] }
 0x2c3   :  { %v3890_v37 = vstv %s8812_s2  ;;  %v3533_v34 = vadd.f32 %v3531_v25, %v3526_v31  ;;  %v3549_v57 = vrot.slane %v3547_v61, 2  ;;  %v8851_v30 = vadd.f32 %v3553_v5, %v3497_v26  ;;  %v3654_v16 = vld [vmem:[#allocation2 + $0x1e8] ss:$2 sm:$0x3]  ;;  %s10848_s2 = sld [smem:[#allocation43_spill]]  ;;  %s10859_s22 = sld [smem:[#allocation199_spill]] }
 0x2c4   :  { %v3544_v51 = vadd.f32 %v3542_v3, %v3537_v12  ;;  %v8855_v23 = vadd.f32 %v3556_v38, %v3515_v21  ;;  %v3894_v46 = vstv %s8822_s17  ;;  %v3898_v10 = vstv %s8832_s3  ;;  %s10860_s19 = sld [smem:[#allocation201_spill]]  ;;  %s10861_s20 = sld [smem:[#allocation202_spill]] }
 0x2c5   :  { %v3957_v8 = vstv %s8834_s16  ;;  %v8862_v6 = vadd.f32 %v3559_v54, %v3533_v34  ;;  %v3570_v39 = vmul.f32 %v3569_v11, %v8851_v30  ;;  %v3589_v5 = vmul.f32 %v3588_v63, %v8851_v30  ;;  %s10875_s15 = sld [smem:[#allocation203_spill]]  ;;  %s10900_s21 = sld [smem:[#allocation37_spill]] }
 0x2c6   :  { %v3551_v45 = vadd.f32 %v3549_v57, %v3544_v51  ;;  %v3573_v38 = vmul.f32 %v3572_v35, %v8855_v23  ;;  %v3592_v32 = vmul.f32 %v3591_v47, %v8855_v23  ;;  %v3640_v18 = vmul.f32 %v3639_v24, %v8851_v30  ;;  %s10906_s0 = sld [smem:[#allocation86_spill]]  ;;  %s9117_s16 = sld [smem:[#allocation3 + $0x184]] }
 0x2c7   :  { %v3643_v54 = vmul.f32 %v3642_v1, %v8855_v23  ;;  %v3577_v11 = vmul.f32 %v3576_v48, %v8862_v6  ;;  %v3596_v63 = vmul.f32 %v3595_v0, %v8862_v6  ;;  %v3647_v35 = vmul.f32 %v3646_v50, %v8862_v6  ;;  %s9120_s17 = sld [smem:[#allocation3 + $0x187]]  ;;  %s9124_s3 = sld [smem:[#allocation3 + $0x17c]] }
 0x2c8   :  { %v8884_v53 = vadd.f32 %v3562_v55, %v3551_v45  ;;  %v3574_v47 = vadd.f32 %v3573_v38, %v3570_v39  ;;  %v3593_v7 = vadd.f32 %v3592_v32, %v3589_v5  ;;  %v3659_v55 = vmul.f32 %v3658_v43, %v8851_v30  ;;  %v3673_v5 = vld [vmem:[#allocation2 + $0x1e9] ss:$2 sm:$0x3] }
 0x2c9   :  { %v3644_v24 = vadd.f32 %v3643_v54, %v3640_v18  ;;  %v3662_v0 = vmul.f32 %v3661_v28, %v8855_v23  ;;  %v3960_v50 = vstv %s8844_s1  ;;  %v10844_v14 = vstv %s10838_s25  ;;  %s10864_s25 = sld [smem:[#allocation200_spill]]  ;;  %s9122_s1 = sld [smem:[#allocation3 + $0x179]] }
 0x2ca   :  { %v3581_v1 = vmul.f32 %v3580_v60, %v8884_v53  ;;  %v3600_v48 = vmul.f32 %v3599_v40, %v8884_v53  ;;  %v3578_v44 = vadd.f32 %v3577_v11, %v3574_v47  ;;  %v3597_v36 = vadd.f32 %v3596_v63, %v3593_v7  ;;  %v3724_v47 = vld [vmem:[#allocation2 + $0x1f0] ss:$2 sm:$0x3] }
 0x2cb   :  { %v3648_v2 = vadd.f32 %v3647_v35, %v3644_v24  ;;  %v3651_v43 = vmul.f32 %v3650_v15, %v8884_v53  ;;  %v3663_v60 = vadd.f32 %v3662_v0, %v3659_v55  ;;  %v3666_v40 = vmul.f32 %v10844_v14, %v8862_v6 }
 0x2cc   :  { %v10846_v28 = vstv %s10839_s9  ;;  %v10847_v33 = vstv %s10840_s24  ;;  %v3582_v49 = vadd.f32 %v3581_v1, %v3578_v44  ;;  %v3601_v31 = vadd.f32 %v3600_v48, %v3597_v36  ;;  %s10867_s9 = sld [smem:[#allocation7_spill]]  ;;  %s9007_s24 = sld [smem:[#allocation3 + $0x153]] }
 0x2cd   :  { %v3710_v17 = vmul.f32 %v10846_v28, %v8851_v30  ;;  %v3713_v41 = vmul.f32 %v10847_v33, %v8855_v23  ;;  %v3652_v61 = vadd.f32 %v3651_v43, %v3648_v2  ;;  %v10850_v15 = vstv %s10841_s14  ;;  %s10894_s14 = sld [smem:[#allocation208_spill]] }
 0x2ce   :  { %v3670_v26 = vmul.f32 %v10850_v15, %v8884_v53  ;;  %v3667_v25 = vadd.f32 %v3666_v40, %v3663_v60  ;;  %v10851_v3 = vstv %s10842_s12  ;;  %v10852_v34 = vstv %s10843_s6  ;;  %v3743_v40 = vld [vmem:[#allocation2 + $0x1f1] ss:$2 sm:$0x3]  ;;  %s10897_s12 = sld [smem:[#allocation60_spill]]  ;;  %s9023_s6 = sld [smem:[#allocation3 + $0x16c]] }
 0x2cf   :  { %v3714_v12 = vadd.f32 %v3713_v41, %v3710_v17  ;;  %v3717_v21 = vmul.f32 %v10851_v3, %v8862_v6  ;;  %v3729_v51 = vmul.f32 %v10852_v34, %v8851_v30  ;;  %v3585_v57 = vadd.f32 %v3584_v59, %v3582_v49  ;;  %v3794_v3 = vld [vmem:[#allocation2 + $0x1f8] ss:$2 sm:$0x3] }
 0x2d0   :  { %v3604_v45 = vadd.f32 %v3603_v13, %v3601_v31  ;;  %v3655_v39 = vadd.f32 %v3654_v16, %v3652_v61  ;;  %v3732_v38 = vmul.f32 %v3731_v9, %v8855_v23  ;;  %v3671_v32 = vadd.f32 %v3670_v26, %v3667_v25 }
 0x2d1   :  { %v3718_v18 = vadd.f32 %v3717_v21, %v3714_v12  ;;  %v10855_v54 = vstv %s10848_s2  ;;  %v10856_v63 = vstv %s10849_s4  ;;  %3586 = vst [vmem:[#allocation2 + $0x1e0] ss:$2 sm:$0x3] %v3585_v57  ;;  %v3740_v9 = vmul.f32 %v3739_v29, %v8884_v53  ;;  %s9111_s2 = sld [smem:[#allocation3 + $0x181]]  ;;  %s9129_s4 = sld [smem:[#allocation3 + $0x182]] }
 0x2d2   :  { %v3721_v11 = vmul.f32 %v10855_v54, %v8884_v53  ;;  %v3736_v35 = vmul.f32 %v10856_v63, %v8862_v6  ;;  %3605 = vst [vmem:[#allocation2 + $0x1e1] ss:$2 sm:$0x3] %v3604_v45  ;;  %3656 = vst [vmem:[#allocation2 + $0x1e8] ss:$2 sm:$0x3] %v3655_v39  ;;  %v3733_v7 = vadd.f32 %v3732_v38, %v3729_v51  ;;  %v10862_v55 = vstv %s10764_s5 }
 0x2d3   :  { %v3780_v24 = vmul.f32 %v3779_v4, %v8851_v30  ;;  %v3783_v1 = vmul.f32 %v10862_v55, %v8855_v23  ;;  %v3674_v48 = vadd.f32 %v3673_v5, %v3671_v32  ;;  %v10863_v44 = vstv %s10854_s29  ;;  %s10877_s5 = sld [smem:[#allocation19_spill]]  ;;  %v3813_v63 = vld [vmem:[#allocation2 + $0x1f9] ss:$2 sm:$0x3]  ;;  %s9039_s29 = sld [smem:[#allocation3 + $0x16d]] }
 0x2d4   :  { %v3722_v0 = vadd.f32 %v3721_v11, %v3718_v18  ;;  %v3787_v59 = vmul.f32 %v10863_v44, %v8862_v6  ;;  %v10865_v36 = vstv %s10772_s7  ;;  %v3737_v43 = vadd.f32 %v3736_v35, %v3733_v7  ;;  %s10879_s7 = sld [smem:[#allocation16_spill]] }
 0x2d5   :  { %v3799_v2 = vmul.f32 %v10865_v36, %v8851_v30  ;;  %v3784_v13 = vadd.f32 %v3783_v1, %v3780_v24  ;;  %v10866_v29 = vstv %s10857_s13  ;;  %v10868_v4 = vstv %s10858_s27  ;;  %3675 = vst [vmem:[#allocation2 + $0x1e9] ss:$2 sm:$0x3] %v3674_v48  ;;  %s9041_s13 = sld [smem:[#allocation3 + $0x173]]  ;;  %s9137_s27 = sld [smem:[#allocation3 + $0x17a]] }
 0x2d6   :  { %v3791_v16 = vmul.f32 %v10866_v29, %v8884_v53  ;;  %v3802_v60 = vmul.f32 %v10868_v4, %v8855_v23  ;;  %v3725_v14 = vadd.f32 %v3724_v47, %v3722_v0  ;;  %v10869_v28 = vstv %s10859_s22  ;;  %v3864_v0 = vld [vmem:[#allocation2 + $0x200] ss:$2 sm:$0x3]  ;;  %s9139_s22 = sld [smem:[#allocation3 + $0x17d]] }
 0x2d7   :  { %v3806_v17 = vmul.f32 %v10869_v28, %v8862_v6  ;;  %v10870_v33 = vstv %s10860_s19  ;;  %v10871_v49 = vstv %s10861_s20  ;;  %v3741_v61 = vadd.f32 %v3740_v9, %v3737_v43  ;;  %s9052_s19 = sld [smem:[#allocation3 + $0x16e]] }
 0x2d8   :  { %v3850_v41 = vmul.f32 %v10870_v33, %v8851_v30  ;;  %v3853_v31 = vmul.f32 %v10871_v49, %v8855_v23  ;;  %v3788_v15 = vadd.f32 %v3787_v59, %v3784_v13  ;;  %v3803_v26 = vadd.f32 %v3802_v60, %v3799_v2  ;;  %3726 = vst [vmem:[#allocation2 + $0x1f0] ss:$2 sm:$0x3] %v3725_v14 }
 0x2d9   :  { %v10872_v25 = vstv %s10864_s25  ;;  %v10873_v34 = vstv %s10867_s9  ;;  %v10874_v57 = vstv %s8650_s11  ;;  %v10876_v39 = vstv %s8656_s18  ;;  %s10882_s11 = sld [smem:[#allocation204_spill]]  ;;  %s10884_s18 = sld [smem:[#allocation71_spill]] }
 0x2da   :  { %v3810_v12 = vmul.f32 %v10872_v25, %v8884_v53  ;;  %v3854_v21 = vadd.f32 %v3853_v31, %v3850_v41  ;;  %v3857_v51 = vmul.f32 %v10873_v34, %v8862_v6  ;;  %v3869_v45 = vmul.f32 %v10874_v57, %v8851_v30  ;;  %s9057_s25 = sld [smem:[#allocation3 + $0x174]]  ;;  %s9059_s9 = sld [smem:[#allocation3 + $0x16f]] }
 0x2db   :  { %v3872_v5 = vmul.f32 %v10876_v39, %v8855_v23  ;;  %v3744_v38 = vadd.f32 %v3743_v40, %v3741_v61  ;;  %v3792_v32 = vadd.f32 %v3791_v16, %v3788_v15  ;;  %v3807_v18 = vadd.f32 %v3806_v17, %v3803_v26  ;;  %v3883_v40 = vld [vmem:[#allocation2 + $0x201] ss:$2 sm:$0x3] }
 0x2dc   :  { %v10878_v54 = vstv %s8648_s26  ;;  %v3858_v35 = vadd.f32 %v3857_v51, %v3854_v21  ;;  %v10880_v7 = vstv %s8658_s23  ;;  %v10881_v24 = vstv %s8667_s10  ;;  %s10886_s26 = sld [smem:[#allocation206_spill]]  ;;  %s10889_s23 = sld [smem:[#allocation205_spill]] }
 0x2dd   :  { %v3861_v11 = vmul.f32 %v10878_v54, %v8884_v53  ;;  %v3873_v47 = vadd.f32 %v3872_v5, %v3869_v45  ;;  %v3876_v9 = vmul.f32 %v10880_v7, %v8862_v6  ;;  %v3920_v55 = vmul.f32 %v10881_v24, %v8851_v30  ;;  %3745 = vst [vmem:[#allocation2 + $0x1f1] ss:$2 sm:$0x3] %v3744_v38  ;;  %s10892_s10 = sld [smem:[#allocation51_spill]] }
 0x2de   :  { %v3795_v1 = vadd.f32 %v3794_v3, %v3792_v32  ;;  %v3811_v48 = vadd.f32 %v3810_v12, %v3807_v18  ;;  %v10883_v44 = vstv %s10875_s15  ;;  %v10885_v36 = vstv %s10877_s5  ;;  %v3934_v5 = vld [vmem:[#allocation2 + $0x208] ss:$2 sm:$0x3] }
 0x2df   :  { %v3880_v59 = vmul.f32 %v10883_v44, %v8884_v53  ;;  %v3923_v2 = vmul.f32 %v10885_v36, %v8855_v23  ;;  %v3862_v43 = vadd.f32 %v3861_v11, %v3858_v35  ;;  %v3877_v13 = vadd.f32 %v3876_v9, %v3873_v47 }
 0x2e0   :  { %v10887_v29 = vstv %s8675_s8  ;;  %v10888_v4 = vstv %s10879_s7  ;;  %3796 = vst [vmem:[#allocation2 + $0x1f8] ss:$2 sm:$0x3] %v3795_v1  ;;  %v3814_v14 = vadd.f32 %v3813_v63, %v3811_v48  ;;  %v10890_v17 = vstv %s10882_s11  ;;  %s10893_s8 = sld [smem:[#allocation207_spill]]  ;;  %s9067_s7 = sld [smem:[#allocation3 + $0x175]] }
 0x2e1   :  { %v3927_v16 = vmul.f32 %v10887_v29, %v8862_v6  ;;  %v3939_v60 = vmul.f32 %v10888_v4, %v8851_v30  ;;  %v3924_v28 = vadd.f32 %v3923_v2, %v3920_v55  ;;  %v3931_v33 = vmul.f32 %v10890_v17, %v8884_v53  ;;  %v3953_v55 = vld [vmem:[#allocation2 + $0x209] ss:$2 sm:$0x3] }
 0x2e2   :  { %v10891_v41 = vstv %s8687_s28  ;;  %v3865_v31 = vadd.f32 %v3864_v0, %v3862_v43  ;;  %v3881_v61 = vadd.f32 %v3880_v59, %v3877_v13  ;;  %v10895_v15 = vstv %s10884_s18  ;;  %3815 = vst [vmem:[#allocation2 + $0x1f9] ss:$2 sm:$0x3] %v3814_v14  ;;  %s9021_s28 = sld [smem:[#allocation3 + $0x165]] }
 0x2e3   :  { %v3942_v49 = vmul.f32 %v10891_v41, %v8855_v23  ;;  %v3946_v26 = vmul.f32 %v10895_v15, %v8862_v6  ;;  %v10896_v25 = vstv %s10886_s26  ;;  %v3928_v3 = vadd.f32 %v3927_v16, %v3924_v28  ;;  %v3622_v16 = vld [vmem:[#allocation2 + $0x1e2] ss:$2 sm:$0x3]  ;;  %v3692_v28 = vld [vmem:[#allocation2 + $0x1ea] ss:$2 sm:$0x3] }
 0x2e4   :  { %v3608_v12 = vmul.f32 %v10896_v25, %v8851_v30  ;;  %v10898_v34 = vstv %s10889_s23  ;;  %v10899_v57 = vstv %s8704_s30  ;;  %3866 = vst [vmem:[#allocation2 + $0x200] ss:$2 sm:$0x3] %v3865_v31  ;;  %v3884_v39 = vadd.f32 %v3883_v40, %v3881_v61  ;;  %s9034_s30 = sld [smem:[#allocation3 + $0x172]]  ;;  %s9073_s26 = sld [smem:[#allocation3 + $0x170]] }
 0x2e5   :  { %v3943_v21 = vadd.f32 %v3942_v49, %v3939_v60  ;;  %v3950_v51 = vmul.f32 %v10898_v34, %v8884_v53  ;;  %v3611_v45 = vmul.f32 %v10899_v57, %v8855_v23  ;;  %v10902_v38 = vstv %s10892_s10  ;;  %s9081_s10 = sld [smem:[#allocation3 + $0x176]]  ;;  %v3762_v31 = vld [vmem:[#allocation2 + $0x1f2] ss:$2 sm:$0x3] }
 0x2e6   :  { %v3615_v32 = vmul.f32 %v10902_v38, %v8862_v6  ;;  %v10904_v18 = vstv %s10893_s8  ;;  %v10905_v11 = vstv %s10894_s14  ;;  %v3932_v35 = vadd.f32 %v3931_v33, %v3928_v3  ;;  %3885 = vst [vmem:[#allocation2 + $0x201] ss:$2 sm:$0x3] %v3884_v39  ;;  %s9083_s8 = sld [smem:[#allocation3 + $0x171]]  ;;  %s9099_s14 = sld [smem:[#allocation3 + $0x178]] }
 0x2e7   :  { %v3678_v54 = vmul.f32 %v10904_v18, %v8851_v30  ;;  %v3681_v63 = vmul.f32 %v10905_v11, %v8855_v23  ;;  %v3947_v47 = vadd.f32 %v3946_v26, %v3943_v21  ;;  %v3612_v7 = vadd.f32 %v3611_v45, %v3608_v12 }
 0x2e8   :  { %v10907_v9 = vstv %s10897_s12  ;;  %v10910_v48 = vstv %s10900_s21  ;;  %v3748_v44 = vmul.f32 %v3747_v19, %v8851_v30  ;;  %v3751_v59 = vmul.f32 %v3750_v22, %v8855_v23  ;;  %s9101_s12 = sld [smem:[#allocation3 + $0x17b]]  ;;  %s9109_s21 = sld [smem:[#allocation3 + $0x17e]] }
 0x2e9   :  { %v3619_v24 = vmul.f32 %v10907_v9, %v8884_v53  ;;  %v3682_v1 = vadd.f32 %v3681_v63, %v3678_v54  ;;  %v3685_v0 = vmul.f32 %v10910_v48, %v8862_v6  ;;  %v3935_v36 = vadd.f32 %v3934_v5, %v3932_v35 }
 0x2ea   :  { %v3951_v2 = vadd.f32 %v3950_v51, %v3947_v47  ;;  %v3616_v43 = vadd.f32 %v3615_v32, %v3612_v7  ;;  %v10912_v13 = vstv %s10906_s0  ;;  %v3752_v4 = vadd.f32 %v3751_v59, %v3748_v44  ;;  %s9133_s0 = sld [smem:[#allocation3 + $0x185]] }
 0x2eb   :  { %v3689_v29 = vmul.f32 %v10912_v13, %v8884_v53  ;;  %v3686_v19 = vadd.f32 %v3685_v0, %v3682_v1  ;;  %v3755_v22 = vmul.f32 %v3754_v62, %v8862_v6  ;;  %v3818_v60 = vmul.f32 %v3817_v27, %v8851_v30  ;;  %3936 = vst [vmem:[#allocation2 + $0x208] ss:$2 sm:$0x3] %v3935_v36 }
 0x2ec   :  { %v3954_v14 = vadd.f32 %v3953_v55, %v3951_v2  ;;  %v3620_v40 = vadd.f32 %v3619_v24, %v3616_v43  ;;  %v3821_v17 = vmul.f32 %v3820_v20, %v8855_v23  ;;  %v3964_v33 = vstv %s9007_s24  ;;  %s9091_s24 = sld [smem:[#allocation3 + $0x177]] }
 0x2ed   :  { %v3690_v41 = vadd.f32 %v3689_v29, %v3686_v19  ;;  %v3756_v62 = vadd.f32 %v3755_v22, %v3752_v4  ;;  %v3759_v27 = vmul.f32 %v3758_v42, %v8884_v53  ;;  %v3888_v49 = vmul.f32 %v3887_v58, %v8851_v30 }
 0x2ee   :  { %3955 = vst [vmem:[#allocation2 + $0x209] ss:$2 sm:$0x3] %v3954_v14  ;;  %v3623_v20 = vadd.f32 %v3622_v16, %v3620_v40  ;;  %v3822_v61 = vadd.f32 %v3821_v17, %v3818_v60  ;;  %v3825_v15 = vmul.f32 %v3824_v56, %v8862_v6  ;;  %v3891_v26 = vmul.f32 %v3890_v37, %v8855_v23 }
 0x2ef   :  { %v3693_v42 = vadd.f32 %v3692_v28, %v3690_v41  ;;  %v3760_v58 = vadd.f32 %v3759_v27, %v3756_v62  ;;  %v3829_v25 = vmul.f32 %v3828_v52, %v8884_v53  ;;  %v3958_v12 = vmul.f32 %v3957_v8, %v8851_v30  ;;  %v3832_v30 = vld [vmem:[#allocation2 + $0x1fa] ss:$2 sm:$0x3] }
 0x2f0   :  { %3624 = vst [vmem:[#allocation2 + $0x1e2] ss:$2 sm:$0x3] %v3623_v20  ;;  %v3826_v56 = vadd.f32 %v3825_v15, %v3822_v61  ;;  %v3892_v3 = vadd.f32 %v3891_v26, %v3888_v49  ;;  %v3895_v37 = vmul.f32 %v3894_v46, %v8862_v6  ;;  %v3961_v21 = vmul.f32 %v3960_v50, %v8855_v23  ;;  %v3902_v50 = vld [vmem:[#allocation2 + $0x202] ss:$2 sm:$0x3] }
 0x2f1   :  { %3694 = vst [vmem:[#allocation2 + $0x1ea] ss:$2 sm:$0x3] %v3693_v42  ;;  %v3763_v52 = vadd.f32 %v3762_v31, %v3760_v58  ;;  %v3899_v8 = vmul.f32 %v3898_v10, %v8884_v53  ;;  %v3968_v34 = vstv %s9021_s28  ;;  %v3965_v23 = vmul.f32 %v3964_v33, %v8862_v6  ;;  %s9127_s28 = sld [smem:[#allocation3 + $0x17f]] }
 0x2f2   :  { %v3830_v51 = vadd.f32 %v3829_v25, %v3826_v56  ;;  %v3896_v57 = vadd.f32 %v3895_v37, %v3892_v3  ;;  %v3962_v46 = vadd.f32 %v3961_v21, %v3958_v12  ;;  %v3969_v5 = vmul.f32 %v3968_v34, %v8884_v53  ;;  %v3972_v6 = vld [vmem:[#allocation2 + $0x20a] ss:$2 sm:$0x3] }
 0x2f3   :  { %3764 = vst [vmem:[#allocation2 + $0x1f2] ss:$2 sm:$0x3] %v3763_v52  ;;  %v3629_v38 = vstv %s9023_s6  ;;  %v3632_v32 = vstv %s9034_s30  ;;  %v3699_v11 = vstv %s9039_s29  ;;  %v3702_v63 = vstv %s9041_s13  ;;  %s9145_s6 = sld [smem:[#allocation3 + $0x180]]  ;;  %s9147_s30 = sld [smem:[#allocation3 + $0x183]] }
 0x2f4   :  { %v3833_v10 = vadd.f32 %v3832_v30, %v3830_v51  ;;  %v3900_v45 = vadd.f32 %v3899_v8, %v3896_v57  ;;  %v3966_v39 = vadd.f32 %v3965_v23, %v3962_v46  ;;  %v3769_v35 = vstv %s9052_s19  ;;  %s9164_s29 = sld [smem:[#allocation3 + $0x186]]  ;;  %s9168_s13 = sld [smem:[#allocation3 + $0x188]] }
 0x2f5   :  { %v3772_v47 = vstv %s9057_s25  ;;  %v3839_v7 = vstv %s9059_s9  ;;  %v3842_v9 = vstv %s9067_s7  ;;  %v3909_v48 = vstv %s9073_s26  ;;  %s9172_s19 = sld [smem:[#allocation3 + $0x189]]  ;;  %s10918_s9 = sld [smem:[#allocation209_spill]] }
 0x2f6   :  { %3834 = vst [vmem:[#allocation2 + $0x1fa] ss:$2 sm:$0x3] %v3833_v10  ;;  %v3903_v18 = vadd.f32 %v3902_v50, %v3900_v45  ;;  %v3970_v54 = vadd.f32 %v3969_v5, %v3966_v39  ;;  %v3912_v0 = vstv %s9081_s10  ;;  %v3979_v59 = vstv %s9083_s8 }
 0x2f7   :  { %v3625_v53 = vld [vmem:[#allocation2 + $0x1e0] sm:$0x3f]  ;;  %v3982_v36 = vstv %s9091_s24  ;;  %v3991_v2 = vstv %s9099_s14  ;;  %v3994_v29 = vstv %s9101_s12  ;;  %v3998_v16 = vstv %s9109_s21 }
 0x2f8   :  { %3904 = vst [vmem:[#allocation2 + $0x202] ss:$2 sm:$0x3] %v3903_v18  ;;  %v3973_v24 = vadd.f32 %v3972_v6, %v3970_v54  ;;  %v3626_v55 = vmul.f32 0.1, %v3625_v53  ;;  %v4002_v19 = vstv %s9111_s2  ;;  %v4006_v60 = vstv %s9117_s16 }
 0x2f9   :  { %v3695_v1 = vld [vmem:[#allocation2 + $0x1e8] sm:$0x3f]  ;;  %v4010_v14 = vstv %s9120_s17  ;;  %v4018_v28 = vstv %s9122_s1  ;;  %v4021_v17 = vstv %s9124_s3  ;;  %v4025_v33 = vstv %s9127_s28 }
 0x2fa   :  { %v3696_v44 = vmul.f32 0.1, %v3695_v1  ;;  %3974 = vst [vmem:[#allocation2 + $0x20a] ss:$2 sm:$0x3] %v3973_v24  ;;  %v3627_v43 = vmax.f32 %v3625_v53, %v3626_v55  ;;  %v4029_v49 = vstv %s9129_s4  ;;  %v4033_v20 = vstv %s9133_s0 }
 0x2fb   :  { %v3765_v13 = vld [vmem:[#allocation2 + $0x1f0] sm:$0x3f]  ;;  %v4045_v15 = vstv %s9137_s27  ;;  %v4048_v26 = vstv %s9139_s22  ;;  %v4052_v12 = vstv %s9145_s6  ;;  %v4056_v56 = vstv %s9147_s30 }
 0x2fc   :  { %v3697_v4 = vmax.f32 %v3695_v1, %v3696_v44  ;;  %v3766_v22 = vmul.f32 0.1, %v3765_v13  ;;  %v3630_v40 = vmul.f32 %v3629_v38, %v3627_v43  ;;  %v4037_v1 = vstv %s9168_s13 }
 0x2fd   :  { %v3835_v27 = vld [vmem:[#allocation2 + $0x1f8] sm:$0x3f]  ;;  %v4064_v43 = vstv %s9172_s19 }
 0x2fe   :  { %v3700_v41 = vmul.f32 %v3699_v11, %v3697_v4  ;;  %v3767_v62 = vmax.f32 %v3765_v13, %v3766_v22  ;;  %v3633_v31 = vadd.f32 %v3632_v32, %v3630_v40  ;;  %v3836_v61 = vmul.f32 0.1, %v3835_v27 }
 0x2ff   :  { %v3905_v25 = vld [vmem:[#allocation2 + $0x200] sm:$0x3f] }
 0x300   :  { %v3703_v42 = vadd.f32 %v3702_v63, %v3700_v41  ;;  %v3770_v58 = vmul.f32 %v3769_v35, %v3767_v62  ;;  %v3837_v3 = vmax.f32 %v3835_v27, %v3836_v61  ;;  %v3906_v37 = vmul.f32 0.1, %v3905_v25  ;;  %v4041_v62 = vld [vmem:[#allocation2 + $0x211] ss:$3 sm:$0x3f] }
 0x301   :  { %v3992_v21 = vmul.f32 %v3991_v2, %v3633_v31  ;;  %v4019_v52 = vmul.f32 %v4018_v28, %v3633_v31  ;;  %v3975_v8 = vld [vmem:[#allocation2 + $0x208] sm:$0x3f]  ;;  %v4046_v57 = vmul.f32 %v4045_v15, %v3633_v31  ;;  %v4060_v35 = vstv %s9164_s29  ;;  %v4068_v27 = vld [vmem:[#allocation2 + $0x212] ss:$3 sm:$0x3f] }
 0x302   :  { %v3773_v30 = vadd.f32 %v3772_v47, %v3770_v58  ;;  %v3995_v34 = vmul.f32 %v3994_v29, %v3703_v42  ;;  %v4022_v51 = vmul.f32 %v4021_v17, %v3703_v42  ;;  %v3840_v46 = vmul.f32 %v3839_v7, %v3837_v3 }
 0x303   :  { %v3907_v23 = vmax.f32 %v3905_v25, %v3906_v37  ;;  %v3976_v50 = vmul.f32 0.1, %v3975_v8  ;;  %v4049_v10 = vmul.f32 %v4048_v26, %v3703_v42 }
 0x304   :  { %v3996_v45 = vadd.f32 %v3995_v34, %v3992_v21  ;;  %v3999_v39 = vmul.f32 %v3998_v16, %v3773_v30  ;;  %v4023_v5 = vadd.f32 %v4022_v51, %v4019_v52  ;;  %v4026_v6 = vmul.f32 %v4025_v33, %v3773_v30 }
 0x305   :  { %v3843_v38 = vadd.f32 %v3842_v9, %v3840_v46  ;;  %v3910_v32 = vmul.f32 %v3909_v48, %v3907_v23  ;;  %v3977_v18 = vmax.f32 %v3975_v8, %v3976_v50  ;;  %v4050_v54 = vadd.f32 %v4049_v10, %v4046_v57 }
 0x306   :  { %v4000_v11 = vadd.f32 %v3999_v39, %v3996_v45  ;;  %v4027_v63 = vadd.f32 %v4026_v6, %v4023_v5  ;;  %v4053_v53 = vmul.f32 %v4052_v12, %v3773_v30 }
 0x307   :  { %v3913_v47 = vadd.f32 %v3912_v0, %v3910_v32  ;;  %v3980_v7 = vmul.f32 %v3979_v59, %v3977_v18  ;;  %v4003_v24 = vmul.f32 %v4002_v19, %v3843_v38  ;;  %v4030_v55 = vmul.f32 %v4029_v49, %v3843_v38  ;;  %v4014_v0 = vld [vmem:[#allocation2 + $0x210] ss:$3 sm:$0x3f] }
 0x308   :  { %v4054_v44 = vadd.f32 %v4053_v53, %v4050_v54  ;;  %v4057_v2 = vmul.f32 %v4056_v56, %v3843_v38 }
 0x309   :  { %v3983_v13 = vadd.f32 %v3982_v36, %v3980_v7  ;;  %v4004_v9 = vadd.f32 %v4003_v24, %v4000_v11  ;;  %v4007_v29 = vmul.f32 %v4006_v60, %v3913_v47  ;;  %v4031_v48 = vadd.f32 %v4030_v55, %v4027_v63 }
 0x30a   :  { %v4034_v16 = vmul.f32 %v4033_v20, %v3913_v47  ;;  %v4058_v4 = vadd.f32 %v4057_v2, %v4054_v44  ;;  %v4061_v22 = vmul.f32 %v4060_v35, %v3913_v47 }
 0x30b   :  { %v4008_v40 = vadd.f32 %v4007_v29, %v4004_v9  ;;  %v4011_v28 = vmul.f32 %v4010_v14, %v3983_v13  ;;  %v4038_v59 = vmul.f32 %v4037_v1, %v3983_v13  ;;  %v4065_v33 = vmul.f32 %v4064_v43, %v3983_v13 }
 0x30c   :  { %v4035_v17 = vadd.f32 %v4034_v16, %v4031_v48  ;;  %v4062_v19 = vadd.f32 %v4061_v22, %v4058_v4 }
 0x30d   :  { %v4012_v41 = vadd.f32 %v4011_v28, %v4008_v40 }
 0x30e   :  { %v4039_v49 = vadd.f32 %v4038_v59, %v4035_v17  ;;  %v4066_v31 = vadd.f32 %v4065_v33, %v4062_v19 }
 0x30f   :  { %v4015_v36 = vadd.f32 %v4014_v0, %v4012_v41 }
 0x310   :  { %v4042_v61 = vadd.f32 %v4041_v62, %v4039_v49  ;;  %v4069_v60 = vadd.f32 %v4068_v27, %v4066_v31 }
 0x311   :  { %4016 = vst [vmem:[#allocation2 + $0x210] ss:$3 sm:$0x3f] %v4015_v36 }
 0x312   :  { %4043 = vst [vmem:[#allocation2 + $0x211] ss:$3 sm:$0x3f] %v4042_v61  ;;  %4070 = vst [vmem:[#allocation2 + $0x212] ss:$3 sm:$0x3f] %v4069_v60 }
 0x319   :  { %v4071_v20 = vld [vmem:[#allocation2 + $0x210] sm:$0xff]  ;;  %v4072_v15 = vld [vmem:[#allocation2 + $0x218] sm:$0xff]  ;;  %v4073_v26 = vld [vmem:[#allocation2 + $0x220] sm:$0x7] }
 0x31a   :  { %4074 = vst [vmem:[%s10918_s9] sm:$0xff] %v4071_v20  ;;  %4075 = vst [vmem:[%s10918_s9 + $0x8] sm:$0xff] %v4072_v15 }
 0x31b   :  { %4076 = vst [vmem:[%s10918_s9 + $0x10] sm:$0x7] %v4073_v26 }
 0x31c   :  { %4081 = vsyncpa [#allocation4], 1 }

</bundles_post_ra>
